<compile_context>
chip_gen: v7x
topology: tpu7x:2x2x1
jax: 0.10.0
libtpu: 0.0.40
codegen_flags: <defaults>
</compile_context>

<pallas_src>
import numpy as np
import jax
import jax.numpy as jnp
from jax.experimental import pallas as pl
from jax.experimental.pallas import tpu as pltpu

PAD = 16  # live activation rows start at a bf16-tile-aligned sublane offset


# --------------------------------------------------------------------------
# Trace-time weight preparation (numpy, runs once, outside the kernel)
# --------------------------------------------------------------------------

def conv3x3_bands(w, width, channel_major_k=False):
    """HWIO (3,3,Cin,Cout) -> (3, width*Cin, width*Cout) bf16 banded matrices.

    SAME column padding is baked in (out-of-range kx taps are dropped), so
        conv(x)[h] == sum_ky  x_rowpad[h+ky-1, :] @ band[ky]
    in the flat per-row layout.  K-axis layout is wi*Cin+ci (channel-minor) by
    default, or ci*width+wi (channel-major) for the NCHW first conv.
    """
    w = np.asarray(w, np.float32)
    _, _, cin, cout = w.shape
    bands = np.zeros((3, width * cin, width * cout), np.float32)
    co = np.arange(cout)
    for ky in range(3):
        for kx in range(3):
            wo = np.arange(width)
            wi = wo + kx - 1
            ok = (wi >= 0) & (wi < width)
            wo, wi = wo[ok], wi[ok]
            for ci in range(cin):
                rows = (ci * width + wi) if channel_major_k else (wi * cin + ci)
                bands[ky, rows[:, None], (wo * cout)[:, None] + co[None, :]] = \
                    w[ky, kx, ci][None, :]
    return jnp.asarray(bands, dtype=jnp.bfloat16)


def bias_row(b, width):
    """Per-channel bias -> (1, width*Cout) f32 broadcast row (w*Cout+co layout)."""
    b = np.asarray(b, np.float32).reshape(-1)
    return jnp.asarray(np.tile(b, width).reshape(1, -1), jnp.float32)


def pool_row_select(h):
    """(h/2, h) 0/1 even/odd row selectors, bf16 (exact)."""
    e = np.zeros((h // 2, h), np.float32)
    o = np.zeros_like(e)
    e[np.arange(h // 2), 2 * np.arange(h // 2)] = 1.0
    o[np.arange(h // 2), 2 * np.arange(h // 2) + 1] = 1.0
    return jnp.asarray(e, jnp.bfloat16), jnp.asarray(o, jnp.bfloat16)


def pool_col_select(width, c):
    """(width*c, (width/2)*c) 0/1 even/odd column-group selectors, bf16."""
    e = np.zeros((width * c, (width // 2) * c), np.float32)
    o = np.zeros_like(e)
    w2 = np.repeat(np.arange(width // 2), c)
    cc = np.tile(np.arange(c), width // 2)
    cols = w2 * c + cc
    e[(2 * w2) * c + cc, cols] = 1.0
    o[(2 * w2 + 1) * c + cc, cols] = 1.0
    return jnp.asarray(e, jnp.bfloat16), jnp.asarray(o, jnp.bfloat16)


def prepare_fc(wfc, c_hidden, h4, w4):
    """PyTorch CHW-flatten FC weight (c*h4*w4, ncls) -> (ncls, h4, w4*c) f32.

    Matches the kernel's pooled feature layout p[h, w*c_hidden + ch], so the
    classifier is a plain elementwise-multiply + reduce per class.
    """
    wfc = np.asarray(wfc, np.float32)
    ncls = wfc.shape[1]
    w3 = wfc.reshape(c_hidden, h4, w4, ncls).transpose(3, 1, 2, 0)
    return jnp.asarray(w3.reshape(ncls, h4, w4 * c_hidden), jnp.float32)


def prepare_pallas_params(params, h, w):
    hid = params["w1"].shape[-1]
    h2, w2 = h // 2, w // 2
    sre1, sro1 = pool_row_select(h)
    sce1, sco1 = pool_col_select(w, hid)
    sre2, sro2 = pool_row_select(h2)
    sce2, sco2 = pool_col_select(w2, hid)
    return dict(
        w11=conv3x3_bands(params["w1"], w, channel_major_k=True),
        b11=bias_row(params["b1"], w),
        w12=conv3x3_bands(params["w2"], w),
        b12=bias_row(params["b2"], w),
        sre1=sre1, sro1=sro1, sce1=sce1, sco1=sco1,
        w21=conv3x3_bands(params["w3"], w2),
        b21=bias_row(params["b3"], w2),
        w22=conv3x3_bands(params["w4"], w2),
        b22=bias_row(params["b4"], w2),
        sre2=sre2, sro2=sro2, sce2=sce2, sco2=sco2,
        wfc=prepare_fc(params["wfc"], hid, h // 4, w // 4),
        bfc=jnp.asarray(params["bfc"], jnp.float32),
    )


ARG_ORDER = ("w11", "b11", "w12", "b12", "sre1", "sro1", "sce1", "sco1",
             "w21", "b21", "w22", "b22", "sre2", "sro2", "sce2", "sco2",
             "wfc", "bfc")


# --------------------------------------------------------------------------
# Pallas kernel
# --------------------------------------------------------------------------

def _conv3x3(src_ref, h, band_ref, bias_ref):
    """3x3 SAME conv + bias + ReLU via three banded MXU matmuls.

    src_ref rows [PAD-1 .. PAD+h] hold [0, x_0..x_{h-1}, 0] in bf16; bands are
    bf16, accumulation is f32.  (Kept as 3 accumulated dots rather than one
    K-concatenated matmul: the concat relayout costs about what the two extra
    MXU fill/drains do, and v7x's MRB accumulates in place anyway.)
    """
    acc = jnp.dot(src_ref[PAD - 1:PAD - 1 + h, :], band_ref[0],
                  preferred_element_type=jnp.float32)
    acc = acc + jnp.dot(src_ref[PAD:PAD + h, :], band_ref[1],
                        preferred_element_type=jnp.float32)
    acc = acc + jnp.dot(src_ref[PAD + 1:PAD + 1 + h, :], band_ref[2],
                        preferred_element_type=jnp.float32)
    return jnp.maximum(acc + bias_ref[...], 0.0)


def _pad_store(dst_ref, h, width, val_bf16):
    """Write activation rows into a bf16 scratch with a zeroed 1-row halo."""
    dst_ref[PAD - 1:PAD, :] = jnp.zeros((1, width), jnp.bfloat16)
    dst_ref[PAD + h:PAD + h + 1, :] = jnp.zeros((1, width), jnp.bfloat16)
    dst_ref[PAD:PAD + h, :] = val_bf16


def _maxpool2x2(y, sre_ref, sro_ref, sce_ref, sco_ref):
    """2x2/2 max-pool via exact 0/1 bf16 selection matmuls (lane-dense)."""
    yb = y.astype(jnp.bfloat16)
    rows = jnp.maximum(
        jnp.dot(sre_ref[...], yb, preferred_element_type=jnp.float32),
        jnp.dot(sro_ref[...], yb, preferred_element_type=jnp.float32))
    rb = rows.astype(jnp.bfloat16)   # exact: values already on the bf16 grid
    return jnp.maximum(
        jnp.dot(rb, sce_ref[...], preferred_element_type=jnp.float32),
        jnp.dot(rb, sco_ref[...], preferred_element_type=jnp.float32))


def tiny_vgg_kernel(x_ref,
                    w11_ref, b11_ref, w12_ref, b12_ref,
                    sre1_ref, sro1_ref, sce1_ref, sco1_ref,
                    w21_ref, b21_ref, w22_ref, b22_ref,
                    sre2_ref, sro2_ref, sce2_ref, sco2_ref,
                    wfc_ref, bfc_ref,
                    out_ref,
                    sx1_ref, sy1_ref, sx2_ref, sy2_ref):
    cin, h, w = x_ref.shape

    # --- in-kernel NCHW -> flat (H, Cin*W) bf16 with zeroed row halo
    #     (replaces the old wrapper-side transpose/reshape/pad HLOs).
    k1 = cin * w
    sx1_ref[PAD - 1:PAD, :] = jnp.zeros((1, k1), jnp.bfloat16)
    sx1_ref[PAD + h:PAD + h + 1, :] = jnp.zeros((1, k1), jnp.bfloat16)
    for c in range(cin):
        sx1_ref[PAD:PAD + h, c * w:(c + 1) * w] = x_ref[c].astype(jnp.bfloat16)

    # --- block 1: conv3x3+ReLU -> conv3x3+ReLU -> maxpool2x2
    y = _conv3x3(sx1_ref, h, w11_ref, b11_ref)                 # (H, W*hid) f32
    _pad_store(sy1_ref, h, y.shape[1], y.astype(jnp.bfloat16))
    y = _conv3x3(sy1_ref, h, w12_ref, b12_ref)
    p = _maxpool2x2(y, sre1_ref, sro1_ref, sce1_ref, sco1_ref)  # (H/2, W/2*hid)

    # --- block 2
    h2 = h // 2
    _pad_store(sx2_ref, h2, p.shape[1], p.astype(jnp.bfloat16))
    y = _conv3x3(sx2_ref, h2, w21_ref, b21_ref)
    _pad_store(sy2_ref, h2, y.shape[1], y.astype(jnp.bfloat16))
    y = _conv3x3(sy2_ref, h2, w22_ref, b22_ref)
    p = _maxpool2x2(y, sre2_ref, sro2_ref, sce2_ref, sco2_ref)  # (H/4, W/4*hid)

    # --- classifier: out[c] = <p, Wfc[c]> + b[c]; tiny, so done with VPU
    #     multiplies + single-axis reductions (no flatten relayout, no matmul).
    ncls = wfc_ref.shape[0]
    cols = []
    for c in range(ncls):
        t = jnp.sum(p * wfc_ref[c], axis=0, keepdims=True)      # (1, W/4*hid)
        cols.append(jnp.sum(t, axis=1, keepdims=True))          # (1, 1)
    out_ref[...] = jnp.concatenate(cols, axis=1) + bfc_ref[...]


# --------------------------------------------------------------------------
# Wrapper
# --------------------------------------------------------------------------

def tiny_vgg_forward(x_nchw, prep):
    n, cin, h, w = x_nchw.shape
    hid = prep["b12"].shape[1] // w
    ncls = prep["bfc"].shape[1]
    args = [prep[k] for k in ARG_ORDER]

    in_specs = [pl.BlockSpec((None, cin, h, w), lambda i: (i, 0, 0, 0))]
    for a in args:
        if a.ndim == 3:
            in_specs.append(pl.BlockSpec(a.shape, lambda i: (0, 0, 0)))
        else:
            in_specs.append(pl.BlockSpec(a.shape, lambda i: (0, 0)))

    scratch = [
        pltpu.VMEM((h + 2 * PAD, cin * w), jnp.bfloat16),            # padded input
        pltpu.VMEM((h + 2 * PAD, w * hid), jnp.bfloat16),            # padded conv1 act
        pltpu.VMEM((h // 2 + 2 * PAD, (w // 2) * hid), jnp.bfloat16),  # padded pool1
        pltpu.VMEM((h // 2 + 2 * PAD, (w // 2) * hid), jnp.bfloat16),  # padded conv3 act
    ]

    out = pl.pallas_call(
        tiny_vgg_kernel,
        out_shape=jax.ShapeDtypeStruct((n, 1, ncls), jnp.float32),
        grid=(n,),
        in_specs=in_specs,
        out_specs=pl.BlockSpec((None, 1, ncls), lambda i: (i, 0, 0)),
        scratch_shapes=scratch,
        compiler_params=pltpu.CompilerParams(
            dimension_semantics=("parallel",),
            vmem_limit_bytes=32 * 1024 * 1024),
    )(x_nchw, *args)
    return out.reshape(n, ncls)


# --------------------------------------------------------------------------
# Init + pure-JAX reference (same bf16-at-matmul-boundary semantics)
# --------------------------------------------------------------------------

def init_params(key, in_ch, hidden, n_classes, feat_hw):
    ks = jax.random.split(key, 10)
    s = 0.1
    return {
        "w1": s * jax.random.normal(ks[0], (3, 3, in_ch, hidden), jnp.float32),
        "b1": s * jax.random.normal(ks[1], (1, hidden), jnp.float32),
        "w2": s * jax.random.normal(ks[2], (3, 3, hidden, hidden), jnp.float32),
        "b2": s * jax.random.normal(ks[3], (1, hidden), jnp.float32),
        "w3": s * jax.random.normal(ks[4], (3, 3, hidden, hidden), jnp.float32),
        "b3": s * jax.random.normal(ks[5], (1, hidden), jnp.float32),
        "w4": s * jax.random.normal(ks[6], (3, 3, hidden, hidden), jnp.float32),
        "b4": s * jax.random.normal(ks[7], (1, hidden), jnp.float32),
        "wfc": s * jax.random.normal(ks[8], (hidden * feat_hw * feat_hw, n_classes),
                                     jnp.float32),
        "bfc": s * jax.random.normal(ks[9], (1, n_classes), jnp.float32),
    }


def reference_forward(x_nchw, params):
    x = jnp.transpose(x_nchw, (0, 2, 3, 1))

    def conv(x, w, b):
        y = jax.lax.conv_general_dilated(
            x.astype(jnp.bfloat16), w.astype(jnp.bfloat16),
            window_strides=(1, 1), padding="SAME",
            dimension_numbers=("NHWC", "HWIO", "NHWC"),
            preferred_element_type=jnp.float32)
        return jax.nn.relu(y + b.reshape(1, 1, 1, -1))

    def pool(x):
        n, h, w, c = x.shape
        return jnp.max(x.reshape(n, h // 2, 2, w // 2, 2, c), axis=(2, 4))

    x = pool(conv(conv(x, params["w1"], params["b1"]), params["w2"], params["b2"]))
    x = pool(conv(conv(x, params["w3"], params["b3"]), params["w4"], params["b4"]))
    xf = jnp.transpose(x, (0, 3, 1, 2)).reshape(x.shape[0], -1)   # NCHW Flatten order
    xf = xf.astype(jnp.bfloat16).astype(jnp.float32)              # kernel pools in bf16
    return xf @ params["wfc"] + params["bfc"]


if __name__ == "__main__":
    # TinyVGG(input_shape=3, hidden_units=8, output_shape=3) on 64x64 images:
    # 64 -> pool -> 32 -> pool -> 16, so Flatten yields hidden*16*16 features,
    # matching nn.Linear(hidden_units * 16 * 16, output_shape).
    N, C_IN, H, W = 2, 3, 64, 64
    HIDDEN, N_CLASSES = 8, 3

    key = jax.random.PRNGKey(0)
    kx, kp = jax.random.split(key)
    x = jax.random.normal(kx, (N, C_IN, H, W), jnp.float32)
    params = init_params(kp, C_IN, HIDDEN, N_CLASSES, H // 4)
    prep = prepare_pallas_params(params, H, W)

    forward = jax.jit(tiny_vgg_forward)
    out = jax.block_until_ready(forward(x, prep))
    ref = reference_forward(x, params)

    assert out.shape == (N, N_CLASSES)
    err = float(jnp.max(jnp.abs(out - ref)))
    assert jnp.allclose(out, ref, rtol=1e-2, atol=1e-2), err
    print("KERNEL_OK")
</pallas_src>

<mosaic_0001>
module attributes {stable_mosaic.version = 11 : i64} {
  func.func @tiny_vgg_kernel(%arg0: i32, %arg1: memref<1x3x64x64xf32, #tpu.memory_space<vmem>>, %arg2: memref<3x192x512xbf16, #tpu.memory_space<vmem>>, %arg3: memref<1x512xf32, #tpu.memory_space<vmem>>, %arg4: memref<3x512x512xbf16, #tpu.memory_space<vmem>>, %arg5: memref<1x512xf32, #tpu.memory_space<vmem>>, %arg6: memref<32x64xbf16, #tpu.memory_space<vmem>>, %arg7: memref<32x64xbf16, #tpu.memory_space<vmem>>, %arg8: memref<512x256xbf16, #tpu.memory_space<vmem>>, %arg9: memref<512x256xbf16, #tpu.memory_space<vmem>>, %arg10: memref<3x256x256xbf16, #tpu.memory_space<vmem>>, %arg11: memref<1x256xf32, #tpu.memory_space<vmem>>, %arg12: memref<3x256x256xbf16, #tpu.memory_space<vmem>>, %arg13: memref<1x256xf32, #tpu.memory_space<vmem>>, %arg14: memref<16x32xbf16, #tpu.memory_space<vmem>>, %arg15: memref<16x32xbf16, #tpu.memory_space<vmem>>, %arg16: memref<256x128xbf16, #tpu.memory_space<vmem>>, %arg17: memref<256x128xbf16, #tpu.memory_space<vmem>>, %arg18: memref<3x16x128xf32, #tpu.memory_space<vmem>>, %arg19: memref<1x3xf32, #tpu.memory_space<vmem>>, %arg20: memref<1x1x3xf32, #tpu.memory_space<vmem>>, %arg21: memref<96x192xbf16, #tpu.memory_space<vmem>>, %arg22: memref<96x512xbf16, #tpu.memory_space<vmem>>, %arg23: memref<64x256xbf16, #tpu.memory_space<vmem>>, %arg24: memref<64x256xbf16, #tpu.memory_space<vmem>>) attributes {dimension_semantics = [#tpu.dimension_semantics<parallel>], iteration_bounds = array<i64: 2>, scalar_prefetch = 0 : i64, scratch_operands = 4 : i64, tpu.core_type = #tpu.core_type<tc>, window_params = [{transform_indices = @transform_0, window_bounds = array<i64: 1, 3, 64, 64>}, {pipeline_mode = #tpu.pipeline_mode<synchronous>, transform_indices = @transform_1, window_bounds = array<i64: 3, 192, 512>}, {pipeline_mode = #tpu.pipeline_mode<synchronous>, transform_indices = @transform_2, window_bounds = array<i64: 1, 512>}, {pipeline_mode = #tpu.pipeline_mode<synchronous>, transform_indices = @transform_3, window_bounds = array<i64: 3, 512, 512>}, {pipeline_mode = #tpu.pipeline_mode<synchronous>, transform_indices = @transform_4, window_bounds = array<i64: 1, 512>}, {pipeline_mode = #tpu.pipeline_mode<synchronous>, transform_indices = @transform_5, window_bounds = array<i64: 32, 64>}, {pipeline_mode = #tpu.pipeline_mode<synchronous>, transform_indices = @transform_6, window_bounds = array<i64: 32, 64>}, {pipeline_mode = #tpu.pipeline_mode<synchronous>, transform_indices = @transform_7, window_bounds = array<i64: 512, 256>}, {pipeline_mode = #tpu.pipeline_mode<synchronous>, transform_indices = @transform_8, window_bounds = array<i64: 512, 256>}, {pipeline_mode = #tpu.pipeline_mode<synchronous>, transform_indices = @transform_9, window_bounds = array<i64: 3, 256, 256>}, {pipeline_mode = #tpu.pipeline_mode<synchronous>, transform_indices = @transform_10, window_bounds = array<i64: 1, 256>}, {pipeline_mode = #tpu.pipeline_mode<synchronous>, transform_indices = @transform_11, window_bounds = array<i64: 3, 256, 256>}, {pipeline_mode = #tpu.pipeline_mode<synchronous>, transform_indices = @transform_12, window_bounds = array<i64: 1, 256>}, {pipeline_mode = #tpu.pipeline_mode<synchronous>, transform_indices = @transform_13, window_bounds = array<i64: 16, 32>}, {pipeline_mode = #tpu.pipeline_mode<synchronous>, transform_indices = @transform_14, window_bounds = array<i64: 16, 32>}, {pipeline_mode = #tpu.pipeline_mode<synchronous>, transform_indices = @transform_15, window_bounds = array<i64: 256, 128>}, {pipeline_mode = #tpu.pipeline_mode<synchronous>, transform_indices = @transform_16, window_bounds = array<i64: 256, 128>}, {pipeline_mode = #tpu.pipeline_mode<synchronous>, transform_indices = @transform_17, window_bounds = array<i64: 3, 16, 128>}, {pipeline_mode = #tpu.pipeline_mode<synchronous>, transform_indices = @transform_18, window_bounds = array<i64: 1, 3>}, {transform_indices = @transform_19, window_bounds = array<i64: 1, 1, 3>}]} {
    %cst = arith.constant 0.000000e+00 : bf16
    %0 = vector.broadcast %cst : bf16 to vector<1x192xbf16>
    %c15 = arith.constant 15 : index
    %c0 = arith.constant 0 : index
    %1 = vector.load %arg21[%c15, %c0] : memref<96x192xbf16, #tpu.memory_space<vmem>>, vector<1x192xbf16>
    tpu.vector_store %arg21[%c15, %c0], %0 {strides = array<i32>} : memref<96x192xbf16, #tpu.memory_space<vmem>>, vector<1x192xbf16>,
    %cst_0 = arith.constant 0.000000e+00 : bf16
    %2 = vector.broadcast %cst_0 : bf16 to vector<1x192xbf16>
    %c80 = arith.constant 80 : index
    %c0_1 = arith.constant 0 : index
    %3 = vector.load %arg21[%c80, %c0_1] : memref<96x192xbf16, #tpu.memory_space<vmem>>, vector<1x192xbf16>
    tpu.vector_store %arg21[%c80, %c0_1], %2 {strides = array<i32>} : memref<96x192xbf16, #tpu.memory_space<vmem>>, vector<1x192xbf16>,
    %c0_2 = arith.constant 0 : index
    %c0_3 = arith.constant 0 : index
    %c0_4 = arith.constant 0 : index
    %c0_5 = arith.constant 0 : index
    %4 = vector.load %arg1[%c0_2, %c0_3, %c0_4, %c0_5] : memref<1x3x64x64xf32, #tpu.memory_space<vmem>>, vector<1x1x64x64xf32>
    %5 = vector.shape_cast %4 : vector<1x1x64x64xf32> to vector<64x64xf32>
    %6 = arith.truncf %5 : vector<64x64xf32> to vector<64x64xbf16>
    %c16 = arith.constant 16 : index
    %c0_6 = arith.constant 0 : index
    %7 = vector.load %arg21[%c16, %c0_6] : memref<96x192xbf16, #tpu.memory_space<vmem>>, vector<64x64xbf16>
    tpu.vector_store %arg21[%c16, %c0_6], %6 {strides = array<i32>} : memref<96x192xbf16, #tpu.memory_space<vmem>>, vector<64x64xbf16>,
    %c0_7 = arith.constant 0 : index
    %c1 = arith.constant 1 : index
    %c0_8 = arith.constant 0 : index
    %c0_9 = arith.constant 0 : index
    %8 = vector.load %arg1[%c0_7, %c1, %c0_8, %c0_9] : memref<1x3x64x64xf32, #tpu.memory_space<vmem>>, vector<1x1x64x64xf32>
    %9 = vector.shape_cast %8 : vector<1x1x64x64xf32> to vector<64x64xf32>
    %10 = arith.truncf %9 : vector<64x64xf32> to vector<64x64xbf16>
    %c16_10 = arith.constant 16 : index
    %c64 = arith.constant 64 : index
    %11 = vector.load %arg21[%c16_10, %c64] : memref<96x192xbf16, #tpu.memory_space<vmem>>, vector<64x64xbf16>
    tpu.vector_store %arg21[%c16_10, %c64], %10 {strides = array<i32>} : memref<96x192xbf16, #tpu.memory_space<vmem>>, vector<64x64xbf16>,
    %c0_11 = arith.constant 0 : index
    %c2 = arith.constant 2 : index
    %c0_12 = arith.constant 0 : index
    %c0_13 = arith.constant 0 : index
    %12 = vector.load %arg1[%c0_11, %c2, %c0_12, %c0_13] : memref<1x3x64x64xf32, #tpu.memory_space<vmem>>, vector<1x1x64x64xf32>
    %13 = vector.shape_cast %12 : vector<1x1x64x64xf32> to vector<64x64xf32>
    %14 = arith.truncf %13 : vector<64x64xf32> to vector<64x64xbf16>
    %c16_14 = arith.constant 16 : index
    %c128 = arith.constant 128 : index
    %15 = vector.load %arg21[%c16_14, %c128] : memref<96x192xbf16, #tpu.memory_space<vmem>>, vector<64x64xbf16>
    tpu.vector_store %arg21[%c16_14, %c128], %14 {strides = array<i32>} : memref<96x192xbf16, #tpu.memory_space<vmem>>, vector<64x64xbf16>,
    %c15_15 = arith.constant 15 : index
    %c0_16 = arith.constant 0 : index
    %16 = vector.load %arg21[%c15_15, %c0_16] : memref<96x192xbf16, #tpu.memory_space<vmem>>, vector<64x192xbf16>
    %c0_17 = arith.constant 0 : index
    %c0_18 = arith.constant 0 : index
    %c0_19 = arith.constant 0 : index
    %17 = vector.load %arg2[%c0_17, %c0_18, %c0_19] : memref<3x192x512xbf16, #tpu.memory_space<vmem>>, vector<1x192x512xbf16>
    %18 = vector.shape_cast %17 : vector<1x192x512xbf16> to vector<192x512xbf16>
    %cst_20 = arith.constant dense<0.000000e+00> : vector<64x512xf32>
    %19 = tpu.matmul %16, %18, %cst_20 {dimension_numbers = #tpu.dot_dimension_numbers<[1], [0], [0], [1], [0, 0, 1, 1], [], []>} : vector<64x192xbf16>, vector<192x512xbf16>, vector<64x512xf32> -> vector<64x512xf32>
    %c16_21 = arith.constant 16 : index
    %c0_22 = arith.constant 0 : index
    %20 = vector.load %arg21[%c16_21, %c0_22] : memref<96x192xbf16, #tpu.memory_space<vmem>>, vector<64x192xbf16>
    %c1_23 = arith.constant 1 : index
    %c0_24 = arith.constant 0 : index
    %c0_25 = arith.constant 0 : index
    %21 = vector.load %arg2[%c1_23, %c0_24, %c0_25] : memref<3x192x512xbf16, #tpu.memory_space<vmem>>, vector<1x192x512xbf16>
    %22 = vector.shape_cast %21 : vector<1x192x512xbf16> to vector<192x512xbf16>
    %cst_26 = arith.constant dense<0.000000e+00> : vector<64x512xf32>
    %23 = tpu.matmul %20, %22, %cst_26 {dimension_numbers = #tpu.dot_dimension_numbers<[1], [0], [0], [1], [0, 0, 1, 1], [], []>} : vector<64x192xbf16>, vector<192x512xbf16>, vector<64x512xf32> -> vector<64x512xf32>
    %24 = arith.addf %19, %23 : vector<64x512xf32>
    %c17 = arith.constant 17 : index
    %c0_27 = arith.constant 0 : index
    %25 = vector.load %arg21[%c17, %c0_27] : memref<96x192xbf16, #tpu.memory_space<vmem>>, vector<64x192xbf16>
    %c2_28 = arith.constant 2 : index
    %c0_29 = arith.constant 0 : index
    %c0_30 = arith.constant 0 : index
    %26 = vector.load %arg2[%c2_28, %c0_29, %c0_30] : memref<3x192x512xbf16, #tpu.memory_space<vmem>>, vector<1x192x512xbf16>
    %27 = vector.shape_cast %26 : vector<1x192x512xbf16> to vector<192x512xbf16>
    %cst_31 = arith.constant dense<0.000000e+00> : vector<64x512xf32>
    %28 = tpu.matmul %25, %27, %cst_31 {dimension_numbers = #tpu.dot_dimension_numbers<[1], [0], [0], [1], [0, 0, 1, 1], [], []>} : vector<64x192xbf16>, vector<192x512xbf16>, vector<64x512xf32> -> vector<64x512xf32>
    %29 = arith.addf %24, %28 : vector<64x512xf32>
    %c0_32 = arith.constant 0 : index
    %c0_33 = arith.constant 0 : index
    %30 = vector.load %arg3[%c0_32, %c0_33] : memref<1x512xf32, #tpu.memory_space<vmem>>, vector<1x512xf32>
    %31 = vector.broadcast %30 : vector<1x512xf32> to vector<64x512xf32>
    %32 = arith.addf %29, %31 : vector<64x512xf32>
    %cst_34 = arith.constant 0.000000e+00 : f32
    %33 = vector.broadcast %cst_34 : f32 to vector<64x512xf32>
    %34 = arith.maximumf %32, %33 : vector<64x512xf32>
    %35 = arith.truncf %34 : vector<64x512xf32> to vector<64x512xbf16>
    %cst_35 = arith.constant 0.000000e+00 : bf16
    %36 = vector.broadcast %cst_35 : bf16 to vector<1x512xbf16>
    %c15_36 = arith.constant 15 : index
    %c0_37 = arith.constant 0 : index
    %37 = vector.load %arg22[%c15_36, %c0_37] : memref<96x512xbf16, #tpu.memory_space<vmem>>, vector<1x512xbf16>
    tpu.vector_store %arg22[%c15_36, %c0_37], %36 {strides = array<i32>} : memref<96x512xbf16, #tpu.memory_space<vmem>>, vector<1x512xbf16>,
    %cst_38 = arith.constant 0.000000e+00 : bf16
    %38 = vector.broadcast %cst_38 : bf16 to vector<1x512xbf16>
    %c80_39 = arith.constant 80 : index
    %c0_40 = arith.constant 0 : index
    %39 = vector.load %arg22[%c80_39, %c0_40] : memref<96x512xbf16, #tpu.memory_space<vmem>>, vector<1x512xbf16>
    tpu.vector_store %arg22[%c80_39, %c0_40], %38 {strides = array<i32>} : memref<96x512xbf16, #tpu.memory_space<vmem>>, vector<1x512xbf16>,
    %c16_41 = arith.constant 16 : index
    %c0_42 = arith.constant 0 : index
    %40 = vector.load %arg22[%c16_41, %c0_42] : memref<96x512xbf16, #tpu.memory_space<vmem>>, vector<64x512xbf16>
    tpu.vector_store %arg22[%c16_41, %c0_42], %35 {strides = array<i32>} : memref<96x512xbf16, #tpu.memory_space<vmem>>, vector<64x512xbf16>,
    %c15_43 = arith.constant 15 : index
    %c0_44 = arith.constant 0 : index
    %41 = vector.load %arg22[%c15_43, %c0_44] : memref<96x512xbf16, #tpu.memory_space<vmem>>, vector<64x512xbf16>
    %c0_45 = arith.constant 0 : index
    %c0_46 = arith.constant 0 : index
    %c0_47 = arith.constant 0 : index
    %42 = vector.load %arg4[%c0_45, %c0_46, %c0_47] : memref<3x512x512xbf16, #tpu.memory_space<vmem>>, vector<1x512x512xbf16>
    %43 = vector.shape_cast %42 : vector<1x512x512xbf16> to vector<512x512xbf16>
    %cst_48 = arith.constant dense<0.000000e+00> : vector<64x512xf32>
    %44 = tpu.matmul %41, %43, %cst_48 {dimension_numbers = #tpu.dot_dimension_numbers<[1], [0], [0], [1], [0, 0, 1, 1], [], []>} : vector<64x512xbf16>, vector<512x512xbf16>, vector<64x512xf32> -> vector<64x512xf32>
    %c16_49 = arith.constant 16 : index
    %c0_50 = arith.constant 0 : index
    %45 = vector.load %arg22[%c16_49, %c0_50] : memref<96x512xbf16, #tpu.memory_space<vmem>>, vector<64x512xbf16>
    %c1_51 = arith.constant 1 : index
    %c0_52 = arith.constant 0 : index
    %c0_53 = arith.constant 0 : index
    %46 = vector.load %arg4[%c1_51, %c0_52, %c0_53] : memref<3x512x512xbf16, #tpu.memory_space<vmem>>, vector<1x512x512xbf16>
    %47 = vector.shape_cast %46 : vector<1x512x512xbf16> to vector<512x512xbf16>
    %cst_54 = arith.constant dense<0.000000e+00> : vector<64x512xf32>
    %48 = tpu.matmul %45, %47, %cst_54 {dimension_numbers = #tpu.dot_dimension_numbers<[1], [0], [0], [1], [0, 0, 1, 1], [], []>} : vector<64x512xbf16>, vector<512x512xbf16>, vector<64x512xf32> -> vector<64x512xf32>
    %49 = arith.addf %44, %48 : vector<64x512xf32>
    %c17_55 = arith.constant 17 : index
    %c0_56 = arith.constant 0 : index
    %50 = vector.load %arg22[%c17_55, %c0_56] : memref<96x512xbf16, #tpu.memory_space<vmem>>, vector<64x512xbf16>
    %c2_57 = arith.constant 2 : index
    %c0_58 = arith.constant 0 : index
    %c0_59 = arith.constant 0 : index
    %51 = vector.load %arg4[%c2_57, %c0_58, %c0_59] : memref<3x512x512xbf16, #tpu.memory_space<vmem>>, vector<1x512x512xbf16>
    %52 = vector.shape_cast %51 : vector<1x512x512xbf16> to vector<512x512xbf16>
    %cst_60 = arith.constant dense<0.000000e+00> : vector<64x512xf32>
    %53 = tpu.matmul %50, %52, %cst_60 {dimension_numbers = #tpu.dot_dimension_numbers<[1], [0], [0], [1], [0, 0, 1, 1], [], []>} : vector<64x512xbf16>, vector<512x512xbf16>, vector<64x512xf32> -> vector<64x512xf32>
    %54 = arith.addf %49, %53 : vector<64x512xf32>
    %c0_61 = arith.constant 0 : index
    %c0_62 = arith.constant 0 : index
    %55 = vector.load %arg5[%c0_61, %c0_62] : memref<1x512xf32, #tpu.memory_space<vmem>>, vector<1x512xf32>
    %56 = vector.broadcast %55 : vector<1x512xf32> to vector<64x512xf32>
    %57 = arith.addf %54, %56 : vector<64x512xf32>
    %cst_63 = arith.constant 0.000000e+00 : f32
    %58 = vector.broadcast %cst_63 : f32 to vector<64x512xf32>
    %59 = arith.maximumf %57, %58 : vector<64x512xf32>
    %60 = arith.truncf %59 : vector<64x512xf32> to vector<64x512xbf16>
    %c0_64 = arith.constant 0 : index
    %c0_65 = arith.constant 0 : index
    %61 = vector.load %arg6[%c0_64, %c0_65] : memref<32x64xbf16, #tpu.memory_space<vmem>>, vector<32x64xbf16>
    %cst_66 = arith.constant dense<0.000000e+00> : vector<32x512xf32>
    %62 = tpu.matmul %61, %60, %cst_66 {dimension_numbers = #tpu.dot_dimension_numbers<[1], [0], [0], [1], [0, 0, 1, 1], [], []>} : vector<32x64xbf16>, vector<64x512xbf16>, vector<32x512xf32> -> vector<32x512xf32>
    %c0_67 = arith.constant 0 : index
    %c0_68 = arith.constant 0 : index
    %63 = vector.load %arg7[%c0_67, %c0_68] : memref<32x64xbf16, #tpu.memory_space<vmem>>, vector<32x64xbf16>
    %cst_69 = arith.constant dense<0.000000e+00> : vector<32x512xf32>
    %64 = tpu.matmul %63, %60, %cst_69 {dimension_numbers = #tpu.dot_dimension_numbers<[1], [0], [0], [1], [0, 0, 1, 1], [], []>} : vector<32x64xbf16>, vector<64x512xbf16>, vector<32x512xf32> -> vector<32x512xf32>
    %65 = arith.maximumf %62, %64 : vector<32x512xf32>
    %66 = arith.truncf %65 : vector<32x512xf32> to vector<32x512xbf16>
    %c0_70 = arith.constant 0 : index
    %c0_71 = arith.constant 0 : index
    %67 = vector.load %arg8[%c0_70, %c0_71] : memref<512x256xbf16, #tpu.memory_space<vmem>>, vector<512x256xbf16>
    %cst_72 = arith.constant dense<0.000000e+00> : vector<32x256xf32>
    %68 = tpu.matmul %66, %67, %cst_72 {dimension_numbers = #tpu.dot_dimension_numbers<[1], [0], [0], [1], [0, 0, 1, 1], [], []>} : vector<32x512xbf16>, vector<512x256xbf16>, vector<32x256xf32> -> vector<32x256xf32>
    %c0_73 = arith.constant 0 : index
    %c0_74 = arith.constant 0 : index
    %69 = vector.load %arg9[%c0_73, %c0_74] : memref<512x256xbf16, #tpu.memory_space<vmem>>, vector<512x256xbf16>
    %cst_75 = arith.constant dense<0.000000e+00> : vector<32x256xf32>
    %70 = tpu.matmul %66, %69, %cst_75 {dimension_numbers = #tpu.dot_dimension_numbers<[1], [0], [0], [1], [0, 0, 1, 1], [], []>} : vector<32x512xbf16>, vector<512x256xbf16>, vector<32x256xf32> -> vector<32x256xf32>
    %71 = arith.maximumf %68, %70 : vector<32x256xf32>
    %72 = arith.truncf %71 : vector<32x256xf32> to vector<32x256xbf16>
    %cst_76 = arith.constant 0.000000e+00 : bf16
    %73 = vector.broadcast %cst_76 : bf16 to vector<1x256xbf16>
    %c15_77 = arith.constant 15 : index
    %c0_78 = arith.constant 0 : index
    %74 = vector.load %arg23[%c15_77, %c0_78] : memref<64x256xbf16, #tpu.memory_space<vmem>>, vector<1x256xbf16>
    tpu.vector_store %arg23[%c15_77, %c0_78], %73 {strides = array<i32>} : memref<64x256xbf16, #tpu.memory_space<vmem>>, vector<1x256xbf16>,
    %cst_79 = arith.constant 0.000000e+00 : bf16
    %75 = vector.broadcast %cst_79 : bf16 to vector<1x256xbf16>
    %c48 = arith.constant 48 : index
    %c0_80 = arith.constant 0 : index
    %76 = vector.load %arg23[%c48, %c0_80] : memref<64x256xbf16, #tpu.memory_space<vmem>>, vector<1x256xbf16>
    tpu.vector_store %arg23[%c48, %c0_80], %75 {strides = array<i32>} : memref<64x256xbf16, #tpu.memory_space<vmem>>, vector<1x256xbf16>,
    %c16_81 = arith.constant 16 : index
    %c0_82 = arith.constant 0 : index
    %77 = vector.load %arg23[%c16_81, %c0_82] : memref<64x256xbf16, #tpu.memory_space<vmem>>, vector<32x256xbf16>
    tpu.vector_store %arg23[%c16_81, %c0_82], %72 {strides = array<i32>} : memref<64x256xbf16, #tpu.memory_space<vmem>>, vector<32x256xbf16>,
    %c15_83 = arith.constant 15 : index
    %c0_84 = arith.constant 0 : index
    %78 = vector.load %arg23[%c15_83, %c0_84] : memref<64x256xbf16, #tpu.memory_space<vmem>>, vector<32x256xbf16>
    %c0_85 = arith.constant 0 : index
    %c0_86 = arith.constant 0 : index
    %c0_87 = arith.constant 0 : index
    %79 = vector.load %arg10[%c0_85, %c0_86, %c0_87] : memref<3x256x256xbf16, #tpu.memory_space<vmem>>, vector<1x256x256xbf16>
    %80 = vector.shape_cast %79 : vector<1x256x256xbf16> to vector<256x256xbf16>
    %cst_88 = arith.constant dense<0.000000e+00> : vector<32x256xf32>
    %81 = tpu.matmul %78, %80, %cst_88 {dimension_numbers = #tpu.dot_dimension_numbers<[1], [0], [0], [1], [0, 0, 1, 1], [], []>} : vector<32x256xbf16>, vector<256x256xbf16>, vector<32x256xf32> -> vector<32x256xf32>
    %c16_89 = arith.constant 16 : index
    %c0_90 = arith.constant 0 : index
    %82 = vector.load %arg23[%c16_89, %c0_90] : memref<64x256xbf16, #tpu.memory_space<vmem>>, vector<32x256xbf16>
    %c1_91 = arith.constant 1 : index
    %c0_92 = arith.constant 0 : index
    %c0_93 = arith.constant 0 : index
    %83 = vector.load %arg10[%c1_91, %c0_92, %c0_93] : memref<3x256x256xbf16, #tpu.memory_space<vmem>>, vector<1x256x256xbf16>
    %84 = vector.shape_cast %83 : vector<1x256x256xbf16> to vector<256x256xbf16>
    %cst_94 = arith.constant dense<0.000000e+00> : vector<32x256xf32>
    %85 = tpu.matmul %82, %84, %cst_94 {dimension_numbers = #tpu.dot_dimension_numbers<[1], [0], [0], [1], [0, 0, 1, 1], [], []>} : vector<32x256xbf16>, vector<256x256xbf16>, vector<32x256xf32> -> vector<32x256xf32>
    %86 = arith.addf %81, %85 : vector<32x256xf32>
    %c17_95 = arith.constant 17 : index
    %c0_96 = arith.constant 0 : index
    %87 = vector.load %arg23[%c17_95, %c0_96] : memref<64x256xbf16, #tpu.memory_space<vmem>>, vector<32x256xbf16>
    %c2_97 = arith.constant 2 : index
    %c0_98 = arith.constant 0 : index
    %c0_99 = arith.constant 0 : index
    %88 = vector.load %arg10[%c2_97, %c0_98, %c0_99] : memref<3x256x256xbf16, #tpu.memory_space<vmem>>, vector<1x256x256xbf16>
    %89 = vector.shape_cast %88 : vector<1x256x256xbf16> to vector<256x256xbf16>
    %cst_100 = arith.constant dense<0.000000e+00> : vector<32x256xf32>
    %90 = tpu.matmul %87, %89, %cst_100 {dimension_numbers = #tpu.dot_dimension_numbers<[1], [0], [0], [1], [0, 0, 1, 1], [], []>} : vector<32x256xbf16>, vector<256x256xbf16>, vector<32x256xf32> -> vector<32x256xf32>
    %91 = arith.addf %86, %90 : vector<32x256xf32>
    %c0_101 = arith.constant 0 : index
    %c0_102 = arith.constant 0 : index
    %92 = vector.load %arg11[%c0_101, %c0_102] : memref<1x256xf32, #tpu.memory_space<vmem>>, vector<1x256xf32>
    %93 = vector.broadcast %92 : vector<1x256xf32> to vector<32x256xf32>
    %94 = arith.addf %91, %93 : vector<32x256xf32>
    %cst_103 = arith.constant 0.000000e+00 : f32
    %95 = vector.broadcast %cst_103 : f32 to vector<32x256xf32>
    %96 = arith.maximumf %94, %95 : vector<32x256xf32>
    %97 = arith.truncf %96 : vector<32x256xf32> to vector<32x256xbf16>
    %cst_104 = arith.constant 0.000000e+00 : bf16
    %98 = vector.broadcast %cst_104 : bf16 to vector<1x256xbf16>
    %c15_105 = arith.constant 15 : index
    %c0_106 = arith.constant 0 : index
    %99 = vector.load %arg24[%c15_105, %c0_106] : memref<64x256xbf16, #tpu.memory_space<vmem>>, vector<1x256xbf16>
    tpu.vector_store %arg24[%c15_105, %c0_106], %98 {strides = array<i32>} : memref<64x256xbf16, #tpu.memory_space<vmem>>, vector<1x256xbf16>,
    %cst_107 = arith.constant 0.000000e+00 : bf16
    %100 = vector.broadcast %cst_107 : bf16 to vector<1x256xbf16>
    %c48_108 = arith.constant 48 : index
    %c0_109 = arith.constant 0 : index
    %101 = vector.load %arg24[%c48_108, %c0_109] : memref<64x256xbf16, #tpu.memory_space<vmem>>, vector<1x256xbf16>
    tpu.vector_store %arg24[%c48_108, %c0_109], %100 {strides = array<i32>} : memref<64x256xbf16, #tpu.memory_space<vmem>>, vector<1x256xbf16>,
    %c16_110 = arith.constant 16 : index
    %c0_111 = arith.constant 0 : index
    %102 = vector.load %arg24[%c16_110, %c0_111] : memref<64x256xbf16, #tpu.memory_space<vmem>>, vector<32x256xbf16>
    tpu.vector_store %arg24[%c16_110, %c0_111], %97 {strides = array<i32>} : memref<64x256xbf16, #tpu.memory_space<vmem>>, vector<32x256xbf16>,
    %c15_112 = arith.constant 15 : index
    %c0_113 = arith.constant 0 : index
    %103 = vector.load %arg24[%c15_112, %c0_113] : memref<64x256xbf16, #tpu.memory_space<vmem>>, vector<32x256xbf16>
    %c0_114 = arith.constant 0 : index
    %c0_115 = arith.constant 0 : index
    %c0_116 = arith.constant 0 : index
    %104 = vector.load %arg12[%c0_114, %c0_115, %c0_116] : memref<3x256x256xbf16, #tpu.memory_space<vmem>>, vector<1x256x256xbf16>
    %105 = vector.shape_cast %104 : vector<1x256x256xbf16> to vector<256x256xbf16>
    %cst_117 = arith.constant dense<0.000000e+00> : vector<32x256xf32>
    %106 = tpu.matmul %103, %105, %cst_117 {dimension_numbers = #tpu.dot_dimension_numbers<[1], [0], [0], [1], [0, 0, 1, 1], [], []>} : vector<32x256xbf16>, vector<256x256xbf16>, vector<32x256xf32> -> vector<32x256xf32>
    %c16_118 = arith.constant 16 : index
    %c0_119 = arith.constant 0 : index
    %107 = vector.load %arg24[%c16_118, %c0_119] : memref<64x256xbf16, #tpu.memory_space<vmem>>, vector<32x256xbf16>
    %c1_120 = arith.constant 1 : index
    %c0_121 = arith.constant 0 : index
    %c0_122 = arith.constant 0 : index
    %108 = vector.load %arg12[%c1_120, %c0_121, %c0_122] : memref<3x256x256xbf16, #tpu.memory_space<vmem>>, vector<1x256x256xbf16>
    %109 = vector.shape_cast %108 : vector<1x256x256xbf16> to vector<256x256xbf16>
    %cst_123 = arith.constant dense<0.000000e+00> : vector<32x256xf32>
    %110 = tpu.matmul %107, %109, %cst_123 {dimension_numbers = #tpu.dot_dimension_numbers<[1], [0], [0], [1], [0, 0, 1, 1], [], []>} : vector<32x256xbf16>, vector<256x256xbf16>, vector<32x256xf32> -> vector<32x256xf32>
    %111 = arith.addf %106, %110 : vector<32x256xf32>
    %c17_124 = arith.constant 17 : index
    %c0_125 = arith.constant 0 : index
    %112 = vector.load %arg24[%c17_124, %c0_125] : memref<64x256xbf16, #tpu.memory_space<vmem>>, vector<32x256xbf16>
    %c2_126 = arith.constant 2 : index
    %c0_127 = arith.constant 0 : index
    %c0_128 = arith.constant 0 : index
    %113 = vector.load %arg12[%c2_126, %c0_127, %c0_128] : memref<3x256x256xbf16, #tpu.memory_space<vmem>>, vector<1x256x256xbf16>
    %114 = vector.shape_cast %113 : vector<1x256x256xbf16> to vector<256x256xbf16>
    %cst_129 = arith.constant dense<0.000000e+00> : vector<32x256xf32>
    %115 = tpu.matmul %112, %114, %cst_129 {dimension_numbers = #tpu.dot_dimension_numbers<[1], [0], [0], [1], [0, 0, 1, 1], [], []>} : vector<32x256xbf16>, vector<256x256xbf16>, vector<32x256xf32> -> vector<32x256xf32>
    %116 = arith.addf %111, %115 : vector<32x256xf32>
    %c0_130 = arith.constant 0 : index
    %c0_131 = arith.constant 0 : index
    %117 = vector.load %arg13[%c0_130, %c0_131] : memref<1x256xf32, #tpu.memory_space<vmem>>, vector<1x256xf32>
    %118 = vector.broadcast %117 : vector<1x256xf32> to vector<32x256xf32>
    %119 = arith.addf %116, %118 : vector<32x256xf32>
    %cst_132 = arith.constant 0.000000e+00 : f32
    %120 = vector.broadcast %cst_132 : f32 to vector<32x256xf32>
    %121 = arith.maximumf %119, %120 : vector<32x256xf32>
    %122 = arith.truncf %121 : vector<32x256xf32> to vector<32x256xbf16>
    %c0_133 = arith.constant 0 : index
    %c0_134 = arith.constant 0 : index
    %123 = vector.load %arg14[%c0_133, %c0_134] : memref<16x32xbf16, #tpu.memory_space<vmem>>, vector<16x32xbf16>
    %cst_135 = arith.constant dense<0.000000e+00> : vector<16x256xf32>
    %124 = tpu.matmul %123, %122, %cst_135 {dimension_numbers = #tpu.dot_dimension_numbers<[1], [0], [0], [1], [0, 0, 1, 1], [], []>} : vector<16x32xbf16>, vector<32x256xbf16>, vector<16x256xf32> -> vector<16x256xf32>
    %c0_136 = arith.constant 0 : index
    %c0_137 = arith.constant 0 : index
    %125 = vector.load %arg15[%c0_136, %c0_137] : memref<16x32xbf16, #tpu.memory_space<vmem>>, vector<16x32xbf16>
    %cst_138 = arith.constant dense<0.000000e+00> : vector<16x256xf32>
    %126 = tpu.matmul %125, %122, %cst_138 {dimension_numbers = #tpu.dot_dimension_numbers<[1], [0], [0], [1], [0, 0, 1, 1], [], []>} : vector<16x32xbf16>, vector<32x256xbf16>, vector<16x256xf32> -> vector<16x256xf32>
    %127 = arith.maximumf %124, %126 : vector<16x256xf32>
    %128 = arith.truncf %127 : vector<16x256xf32> to vector<16x256xbf16>
    %c0_139 = arith.constant 0 : index
    %c0_140 = arith.constant 0 : index
    %129 = vector.load %arg16[%c0_139, %c0_140] : memref<256x128xbf16, #tpu.memory_space<vmem>>, vector<256x128xbf16>
    %cst_141 = arith.constant dense<0.000000e+00> : vector<16x128xf32>
    %130 = tpu.matmul %128, %129, %cst_141 {dimension_numbers = #tpu.dot_dimension_numbers<[1], [0], [0], [1], [0, 0, 1, 1], [], []>} : vector<16x256xbf16>, vector<256x128xbf16>, vector<16x128xf32> -> vector<16x128xf32>
    %c0_142 = arith.constant 0 : index
    %c0_143 = arith.constant 0 : index
    %131 = vector.load %arg17[%c0_142, %c0_143] : memref<256x128xbf16, #tpu.memory_space<vmem>>, vector<256x128xbf16>
    %cst_144 = arith.constant dense<0.000000e+00> : vector<16x128xf32>
    %132 = tpu.matmul %128, %131, %cst_144 {dimension_numbers = #tpu.dot_dimension_numbers<[1], [0], [0], [1], [0, 0, 1, 1], [], []>} : vector<16x256xbf16>, vector<256x128xbf16>, vector<16x128xf32> -> vector<16x128xf32>
    %133 = arith.maximumf %130, %132 : vector<16x128xf32>
    %c0_145 = arith.constant 0 : index
    %c0_146 = arith.constant 0 : index
    %c0_147 = arith.constant 0 : index
    %134 = vector.load %arg18[%c0_145, %c0_146, %c0_147] : memref<3x16x128xf32, #tpu.memory_space<vmem>>, vector<1x16x128xf32>
    %135 = vector.shape_cast %134 : vector<1x16x128xf32> to vector<16x128xf32>
    %136 = arith.mulf %133, %135 : vector<16x128xf32>
    %cst_148 = arith.constant dense<0.000000e+00> : vector<128xf32>
    %137 = vector.multi_reduction <add>, %136, %cst_148 [0] : vector<16x128xf32> to vector<128xf32>
    %138 = vector.shape_cast %137 : vector<128xf32> to vector<1x128xf32>
    %cst_149 = arith.constant dense<0.000000e+00> : vector<1xf32>
    %139 = vector.multi_reduction <add>, %138, %cst_149 [1] : vector<1x128xf32> to vector<1xf32>
    %140 = vector.shape_cast %139 : vector<1xf32> to vector<1x1xf32>
    %c1_150 = arith.constant 1 : index
    %c0_151 = arith.constant 0 : index
    %c0_152 = arith.constant 0 : index
    %141 = vector.load %arg18[%c1_150, %c0_151, %c0_152] : memref<3x16x128xf32, #tpu.memory_space<vmem>>, vector<1x16x128xf32>
    %142 = vector.shape_cast %141 : vector<1x16x128xf32> to vector<16x128xf32>
    %143 = arith.mulf %133, %142 : vector<16x128xf32>
    %cst_153 = arith.constant dense<0.000000e+00> : vector<128xf32>
    %144 = vector.multi_reduction <add>, %143, %cst_153 [0] : vector<16x128xf32> to vector<128xf32>
    %145 = vector.shape_cast %144 : vector<128xf32> to vector<1x128xf32>
    %cst_154 = arith.constant dense<0.000000e+00> : vector<1xf32>
    %146 = vector.multi_reduction <add>, %145, %cst_154 [1] : vector<1x128xf32> to vector<1xf32>
    %147 = vector.shape_cast %146 : vector<1xf32> to vector<1x1xf32>
    %c2_155 = arith.constant 2 : index
    %c0_156 = arith.constant 0 : index
    %c0_157 = arith.constant 0 : index
    %148 = vector.load %arg18[%c2_155, %c0_156, %c0_157] : memref<3x16x128xf32, #tpu.memory_space<vmem>>, vector<1x16x128xf32>
    %149 = vector.shape_cast %148 : vector<1x16x128xf32> to vector<16x128xf32>
    %150 = arith.mulf %133, %149 : vector<16x128xf32>
    %cst_158 = arith.constant dense<0.000000e+00> : vector<128xf32>
    %151 = vector.multi_reduction <add>, %150, %cst_158 [0] : vector<16x128xf32> to vector<128xf32>
    %152 = vector.shape_cast %151 : vector<128xf32> to vector<1x128xf32>
    %cst_159 = arith.constant dense<0.000000e+00> : vector<1xf32>
    %153 = vector.multi_reduction <add>, %152, %cst_159 [1] : vector<1x128xf32> to vector<1xf32>
    %154 = vector.shape_cast %153 : vector<1xf32> to vector<1x1xf32>
    %155 = tpu.concatenate %140, %147, %154 in 1 : vector<1x1xf32>, vector<1x1xf32>, vector<1x1xf32> -> vector<1x3xf32>
    %c0_160 = arith.constant 0 : index
    %c0_161 = arith.constant 0 : index
    %156 = vector.load %arg19[%c0_160, %c0_161] : memref<1x3xf32, #tpu.memory_space<vmem>>, vector<1x3xf32>
    %157 = arith.addf %155, %156 : vector<1x3xf32>
    %c0_162 = arith.constant 0 : index
    %c0_163 = arith.constant 0 : index
    %c0_164 = arith.constant 0 : index
    %158 = vector.load %arg20[%c0_162, %c0_163, %c0_164] : memref<1x1x3xf32, #tpu.memory_space<vmem>>, vector<1x1x3xf32>
    %159 = vector.shape_cast %158 : vector<1x1x3xf32> to vector<1x3xf32>
    %160 = vector.shape_cast %157 : vector<1x3xf32> to vector<1x1x3xf32>
    tpu.vector_store %arg20[%c0_162, %c0_163, %c0_164], %160 {strides = array<i32>} : memref<1x1x3xf32, #tpu.memory_space<vmem>>, vector<1x1x3xf32>,
    return
  }
  func.func @transform_0(%arg0: i32) -> (i32, i32, i32, i32) {
    %c0_i32 = arith.constant 0 : i32
    %c0_i32_0 = arith.constant 0 : i32
    %c0_i32_1 = arith.constant 0 : i32
    %c0_i32_2 = arith.constant 0 : i32
    return %arg0, %c0_i32, %c0_i32_0, %c0_i32_1 : i32, i32, i32, i32
  }
  func.func @transform_1(%arg0: i32) -> (i32, i32, i32) {
    %c0_i32 = arith.constant 0 : i32
    %c0_i32_0 = arith.constant 0 : i32
    %c0_i32_1 = arith.constant 0 : i32
    %c0_i32_2 = arith.constant 0 : i32
    return %c0_i32, %c0_i32_0, %c0_i32_1 : i32, i32, i32
  }
  func.func @transform_2(%arg0: i32) -> (i32, i32) {
    %c0_i32 = arith.constant 0 : i32
    %c0_i32_0 = arith.constant 0 : i32
    %c0_i32_1 = arith.constant 0 : i32
    return %c0_i32, %c0_i32_0 : i32, i32
  }
  func.func @transform_3(%arg0: i32) -> (i32, i32, i32) {
    %c0_i32 = arith.constant 0 : i32
    %c0_i32_0 = arith.constant 0 : i32
    %c0_i32_1 = arith.constant 0 : i32
    %c0_i32_2 = arith.constant 0 : i32
    return %c0_i32, %c0_i32_0, %c0_i32_1 : i32, i32, i32
  }
  func.func @transform_4(%arg0: i32) -> (i32, i32) {
    %c0_i32 = arith.constant 0 : i32
    %c0_i32_0 = arith.constant 0 : i32
    %c0_i32_1 = arith.constant 0 : i32
    return %c0_i32, %c0_i32_0 : i32, i32
  }
  func.func @transform_5(%arg0: i32) -> (i32, i32) {
    %c0_i32 = arith.constant 0 : i32
    %c0_i32_0 = arith.constant 0 : i32
    %c0_i32_1 = arith.constant 0 : i32
    return %c0_i32, %c0_i32_0 : i32, i32
  }
  func.func @transform_6(%arg0: i32) -> (i32, i32) {
    %c0_i32 = arith.constant 0 : i32
    %c0_i32_0 = arith.constant 0 : i32
    %c0_i32_1 = arith.constant 0 : i32
    return %c0_i32, %c0_i32_0 : i32, i32
  }
  func.func @transform_7(%arg0: i32) -> (i32, i32) {
    %c0_i32 = arith.constant 0 : i32
    %c0_i32_0 = arith.constant 0 : i32
    %c0_i32_1 = arith.constant 0 : i32
    return %c0_i32, %c0_i32_0 : i32, i32
  }
  func.func @transform_8(%arg0: i32) -> (i32, i32) {
    %c0_i32 = arith.constant 0 : i32
    %c0_i32_0 = arith.constant 0 : i32
    %c0_i32_1 = arith.constant 0 : i32
    return %c0_i32, %c0_i32_0 : i32, i32
  }
  func.func @transform_9(%arg0: i32) -> (i32, i32, i32) {
    %c0_i32 = arith.constant 0 : i32
    %c0_i32_0 = arith.constant 0 : i32
    %c0_i32_1 = arith.constant 0 : i32
    %c0_i32_2 = arith.constant 0 : i32
    return %c0_i32, %c0_i32_0, %c0_i32_1 : i32, i32, i32
  }
  func.func @transform_10(%arg0: i32) -> (i32, i32) {
    %c0_i32 = arith.constant 0 : i32
    %c0_i32_0 = arith.constant 0 : i32
    %c0_i32_1 = arith.constant 0 : i32
    return %c0_i32, %c0_i32_0 : i32, i32
  }
  func.func @transform_11(%arg0: i32) -> (i32, i32, i32) {
    %c0_i32 = arith.constant 0 : i32
    %c0_i32_0 = arith.constant 0 : i32
    %c0_i32_1 = arith.constant 0 : i32
    %c0_i32_2 = arith.constant 0 : i32
    return %c0_i32, %c0_i32_0, %c0_i32_1 : i32, i32, i32
  }
  func.func @transform_12(%arg0: i32) -> (i32, i32) {
    %c0_i32 = arith.constant 0 : i32
    %c0_i32_0 = arith.constant 0 : i32
    %c0_i32_1 = arith.constant 0 : i32
    return %c0_i32, %c0_i32_0 : i32, i32
  }
  func.func @transform_13(%arg0: i32) -> (i32, i32) {
    %c0_i32 = arith.constant 0 : i32
    %c0_i32_0 = arith.constant 0 : i32
    %c0_i32_1 = arith.constant 0 : i32
    return %c0_i32, %c0_i32_0 : i32, i32
  }
  func.func @transform_14(%arg0: i32) -> (i32, i32) {
    %c0_i32 = arith.constant 0 : i32
    %c0_i32_0 = arith.constant 0 : i32
    %c0_i32_1 = arith.constant 0 : i32
    return %c0_i32, %c0_i32_0 : i32, i32
  }
  func.func @transform_15(%arg0: i32) -> (i32, i32) {
    %c0_i32 = arith.constant 0 : i32
    %c0_i32_0 = arith.constant 0 : i32
    %c0_i32_1 = arith.constant 0 : i32
    return %c0_i32, %c0_i32_0 : i32, i32
  }
  func.func @transform_16(%arg0: i32) -> (i32, i32) {
    %c0_i32 = arith.constant 0 : i32
    %c0_i32_0 = arith.constant 0 : i32
    %c0_i32_1 = arith.constant 0 : i32
    return %c0_i32, %c0_i32_0 : i32, i32
  }
  func.func @transform_17(%arg0: i32) -> (i32, i32, i32) {
    %c0_i32 = arith.constant 0 : i32
    %c0_i32_0 = arith.constant 0 : i32
    %c0_i32_1 = arith.constant 0 : i32
    %c0_i32_2 = arith.constant 0 : i32
    return %c0_i32, %c0_i32_0, %c0_i32_1 : i32, i32, i32
  }
  func.func @transform_18(%arg0: i32) -> (i32, i32) {
    %c0_i32 = arith.constant 0 : i32
    %c0_i32_0 = arith.constant 0 : i32
    %c0_i32_1 = arith.constant 0 : i32
    return %c0_i32, %c0_i32_0 : i32, i32
  }
  func.func @transform_19(%arg0: i32) -> (i32, i32, i32) {
    %c0_i32 = arith.constant 0 : i32
    %c0_i32_0 = arith.constant 0 : i32
    %c0_i32_1 = arith.constant 0 : i32
    return %arg0, %c0_i32, %c0_i32_0 : i32, i32, i32
  }
}

</mosaic_0001>

<bundles_post_ra>
// kernel: tiny_vgg_forward.1
= control target key start
LH: loop header
LB: loop body
LE: loop exit
PB: predicated region body
PF: predicated region fallthrough
CT: control target
= control target key end

     0   :  { %s15072_s0 = inlined_call_operand.hbm [shape: f32[2,3,64,64], index: 0, kind: input, shape index: {}]   ;;  %s15073_s1 = inlined_call_operand.hbm [shape: bf16[3,192,512], index: 1, kind: input, shape index: {}]   ;;  %s15074_s2 = inlined_call_operand.hbm [shape: f32[1,512], index: 2, kind: input, shape index: {}]   ;;  %s15075_s3 = inlined_call_operand.hbm [shape: bf16[3,512,512], index: 3, kind: input, shape index: {}]   ;;  %s15076_s4 = inlined_call_operand.hbm [shape: f32[1,512], index: 4, kind: input, shape index: {}]   ;;  %s15077_s5 = inlined_call_operand.hbm [shape: bf16[32,64], index: 5, kind: input, shape index: {}]   ;;  %s15078_s6 = inlined_call_operand.hbm [shape: bf16[32,64], index: 6, kind: input, shape index: {}]   ;;  %s15079_s7 = inlined_call_operand.hbm [shape: bf16[512,256], index: 7, kind: input, shape index: {}]   ;;  %s15080_s8 = inlined_call_operand.hbm [shape: bf16[512,256], index: 8, kind: input, shape index: {}]   ;;  %s15081_s9 = inlined_call_operand.hbm [shape: bf16[3,256,256], index: 9, kind: input, shape index: {}]   ;;  %s15082_s10 = inlined_call_operand.hbm [shape: f32[1,256], index: 10, kind: input, shape index: {}]   ;;  %s15083_s11 = inlined_call_operand.hbm [shape: bf16[3,256,256], index: 11, kind: input, shape index: {}]   ;;  %s15084_s12 = inlined_call_operand.hbm [shape: f32[1,256], index: 12, kind: input, shape index: {}]   ;;  %s15085_s13 = inlined_call_operand.hbm [shape: bf16[16,32], index: 13, kind: input, shape index: {}]   ;;  %s15086_s14 = inlined_call_operand.hbm [shape: bf16[16,32], index: 14, kind: input, shape index: {}]   ;;  %s15087_s15 = inlined_call_operand.hbm [shape: bf16[256,128], index: 15, kind: input, shape index: {}]   ;;  %s15088_s16 = inlined_call_operand.hbm [shape: bf16[256,128], index: 16, kind: input, shape index: {}]   ;;  %s15089_s17 = inlined_call_operand.hbm [shape: f32[3,16,128], index: 17, kind: input, shape index: {}]   ;;  %s15090_s18 = inlined_call_operand.hbm [shape: f32[1,3], index: 18, kind: input, shape index: {}]   ;;  %s15091_s19 = inlined_call_operand.hbm [shape: f32[2,1,3], index: 19, kind: output, shape index: {}]  }
   0x1   :  { %15121 = sst [smem:[#allocation54_spill]] %s15072_s0 }
   0x2   :  { %15122 = sst [smem:[#allocation55_spill]] %s15073_s1 }
   0x3   :  { %15123 = sst [smem:[#allocation56_spill]] %s15074_s2 }
   0x4   :  { %15124 = sst [smem:[#allocation57_spill]] %s15075_s3 }
   0x5   :  { %15125 = sst [smem:[#allocation58_spill]] %s15076_s4 }
   0x6   :  { %15126 = sst [smem:[#allocation59_spill]] %s15077_s5 }
   0x7   :  { %15127 = sst [smem:[#allocation60_spill]] %s15078_s6 }
   0x8   :  { %15128 = sst [smem:[#allocation61_spill]] %s15079_s7 }
   0x9   :  { %15129 = sst [smem:[#allocation62_spill]] %s15080_s8 }
   0xa   :  { %15130 = sst [smem:[#allocation63_spill]] %s15081_s9 }
   0xb   :  { %15131 = sst [smem:[#allocation64_spill]] %s15086_s14 }
   0xc   :  { %15132 = sst [smem:[#allocation65_spill]] %s15088_s16 }
   0xd   :  { %15133 = sst [smem:[#allocation66_spill]] %s15090_s18 }
   0xe   :  { %15134 = sst [smem:[#allocation67_spill]] %s15091_s19 }
   0xf   :  { %24 = vsyncpa [#allocation7], 0 }
  0x10   :  { %26 = vsyncpa [#allocation7 + $0x1], 0 }
  0x11   :  { %27 = vsyncpa [#allocation10], 0 }
  0x12   :  { %28 = vsyncpa [#allocation13], 0 }
  0x13   :  { %29 = vsyncpa [#allocation16], 0 }
  0x14   :  { %30 = vsyncpa [#allocation19], 0 }
  0x15   :  { %31 = vsyncpa [#allocation22], 0 }
  0x16   :  { %32 = vsyncpa [#allocation25], 0 }
  0x17   :  { %33 = vsyncpa [#allocation28], 0 }
  0x18   :  { %34 = vsyncpa [#allocation31], 0 }
  0x19   :  { %35 = vsyncpa [#allocation34], 0 }
  0x1a   :  { %36 = vsyncpa [#allocation8], 0 }
  0x1b   :  { %38 = vsyncpa [#allocation8 + $0x1], 0  ;;  %s13736_s0 = smov 0   ;;  %s13738_s30 = smov 0  }
  0x1c   :  { %s13740_s20 = smov 0   ;;  %s13742_s21 = smov 0  }
  0x1d LB: > { %15135 = sst [smem:[#allocation48_spill]] %s13594_s0  ;;  %s13608_s1 = smov [#allocation9]   ;;  %s13606_s21 = sphi %s13742_s21, %s14211_s21   ;;  %s13602_s20 = sphi %s13740_s20, %s15207_s20   ;;  %s13598_s30 = sphi %s13738_s30, %s15206_s30   ;;  %s13594_s0 = sphi %s13736_s0, %s15205_s0  }
  0x1e   : > { %15136 = sst [smem:[#allocation49_spill]] %s13598_s30  ;;  %s491_s22 = sshll.u32 %s13608_s1, 4  ;;  %s13762_s22 = int_to_ptr.vmem [resolvable:$true] %s491_s22 }
  0x1f   : > { %15137 = sst [smem:[#allocation50_spill]] %s13602_s20  ;;  %s13757_s2 = sadd.s32 4294967295, %s13606_s21  }
  0x20   : > { %15138 = sst [smem:[#allocation51_spill]] %s13606_s21  ;;  %p10128_p0 = scmp.ge.s32.totalorder %s13606_s21, 1 }
  0x21   : > { %15139 = sst [smem:[#allocation52_spill]] %s13757_s2  ;;  %p15108_p1 = scmp.eq.s32.totalorder %s13757_s2, 0 }
  0x22   : > { %p479_p2 = scmp.lt.s32.totalorder %s13606_s21, 3  ;;  %s13609_s24 = smov [#allocation12]  }
  0x23   : > { %s515_s25 = sshll.u32 %s13609_s24, 4  ;;  %s13610_s26 = smov [#allocation15]   ;;  %s13777_s25 = int_to_ptr.vmem [resolvable:$true] %s515_s25 }
  0x24   : > { %p13764_p3 = pnand %p10128_p0, %p479_p2  ;;  %s539_s27 = sshll.u32 %s13610_s26, 4  ;;  %s13779_s27 = int_to_ptr.vmem [resolvable:$true] %s539_s27 }
  0x25   : > { %s15143_s1 = sld [smem:[#allocation55_spill]] }
  0x26   : > { %s15140_s23 = scalar_select %p13764_p3, 1, 0 }
  0x27   : > { %p11502_p5 = pneg %p13764_p3 }
  0x28   : > { %15141 = sst [smem:[#allocation53_spill]] %s15140_s23 }
  0x29   : > { %p13773_p6 = pnand %p11502_p5, %p15108_p1 }
  0x2b   : > { %s12970_s19 = scalar_lea.hbm %s15143_s1, 18432  ;;  %p13789_p8 = pneg %p13773_p6 }
  0x2c   : > { %p12971_p7 = scmp.ne.s32.totalorder %s15143_s1, %s12970_s19  ;;  %p12977_p11 = scmp.lt.u32.totalorder %s12970_s19, %s15143_s1 }
  0x2e   : > { %p12973_p9 = pnand %p13789_p8, %p12971_p7 }
  0x30   : > { %p12974_p10 = pneg %p12973_p9 }
  0x32   : > { %p12979_p12 = pnand %p12977_p11, %p12974_p10 }
  0x34   : > { %12982 = shalt.err (!%p12979_p12)
}
  0x35   : > { %s12983_s0 = scalar_lea.vmem %s13762_s22, 18432  ;;  %p12991_p5 = scmp.lt.s32.totalorder %s13762_s22, %s13762_s22 }
  0x36   : > { %p12984_p13 = scmp.ne.s32.totalorder %s13762_s22, %s12983_s0  ;;  %p12992_p4 = scmp.lt.s32.totalorder %s12983_s0, %s12983_s0 }
  0x38   : > { %p12986_p0 = pnand %p12984_p13, %p13789_p8  ;;  %p12993_p7 = por %p12992_p4, %p12991_p5 }
  0x3a   : > { %p12987_p2 = pneg %p12986_p0 }
  0x3c   : > { %p12994_p9 = pnand %p12993_p7, %p12987_p2 }
  0x3e   : > { %12997 = shalt.err (!%p12994_p9)
}
  0x3f   : > { %s13611_s23 = smov 256   ;;  %s13612_s19 = smov 16  }
  0x40   : > { %11505 = dma.hbm_to_vmem [thread:$0]  (!%p13773_p6), %s15143_s1, 18432, %s13762_s22, [#allocation10], %s13611_s23, %s13611_s23, %s13612_s19  }
  0x41   : > { %s15145_s30 = sld [smem:[#allocation57_spill]] }
  0x47   : > { %s15146_s18 = smov %s15145_s30  ;;  %s12998_s20 = scalar_lea.hbm %s15145_s30, 49152 }
  0x48   : > { %p12999_p4 = scmp.ne.s32.totalorder %s15146_s18, %s12998_s20  ;;  %p13005_p12 = scmp.lt.u32.totalorder %s12998_s20, %s15146_s18 }
  0x4a   : > { %p13001_p10 = pnand %p12999_p4, %p13789_p8 }
  0x4c   : > { %p13002_p11 = pneg %p13001_p10 }
  0x4e   : > { %p13007_p13 = pnand %p13005_p12, %p13002_p11 }
  0x50   : > { %13010 = shalt.err (!%p13007_p13)
}
  0x51   : > { %s13011_s22 = scalar_lea.vmem %s13777_s25, 49152  ;;  %p13019_p7 = scmp.lt.s32.totalorder %s13777_s25, %s13777_s25 }
  0x52   : > { %p13012_p0 = scmp.ne.s32.totalorder %s13777_s25, %s13011_s22  ;;  %p13020_p9 = scmp.lt.s32.totalorder %s13011_s22, %s13011_s22 }
  0x54   : > { %p13014_p2 = pnand %p13012_p0, %p13789_p8  ;;  %p13021_p4 = por %p13020_p9, %p13019_p7 }
  0x56   : > { %p13015_p5 = pneg %p13014_p2 }
  0x58   : > { %p13022_p10 = pnand %p13021_p4, %p13015_p5 }
  0x5a   : > { %13025 = shalt.err (!%p13022_p10)
}
  0x5b   : > { %11511 = dma.hbm_to_vmem [thread:$0]  (!%p13773_p6), %s15146_s18, 49152, %s13777_s25, [#allocation13], %s13611_s23, %s13611_s23, %s13612_s19  }
  0x5c   : > { %s15147_s5 = sld [smem:[#allocation59_spill]] }
  0x62   : > { %s13026_s21 = scalar_lea.hbm %s15147_s5, 256 }
  0x63   : > { %p13027_p11 = scmp.ne.s32.totalorder %s15147_s5, %s13026_s21  ;;  %p13033_p0 = scmp.lt.u32.totalorder %s13026_s21, %s15147_s5 }
  0x65   : > { %p13029_p12 = pnand %p13027_p11, %p13789_p8 }
  0x67   : > { %p13030_p13 = pneg %p13029_p12 }
  0x69   : > { %p13035_p2 = pnand %p13033_p0, %p13030_p13 }
  0x6b   : > { %13038 = shalt.err (!%p13035_p2)
}
  0x6c   : > { %s13039_s25 = scalar_lea.vmem %s13779_s27, 256  ;;  %p13047_p4 = scmp.lt.s32.totalorder %s13779_s27, %s13779_s27 }
  0x6d   : > { %p13040_p5 = scmp.ne.s32.totalorder %s13779_s27, %s13039_s25  ;;  %p13048_p10 = scmp.lt.s32.totalorder %s13039_s25, %s13039_s25 }
  0x6f   : > { %p13042_p7 = pnand %p13040_p5, %p13789_p8  ;;  %p13049_p11 = por %p13048_p10, %p13047_p4 }
  0x71   : > { %p13043_p9 = pneg %p13042_p7 }
  0x73   : > { %p13050_p12 = pnand %p13049_p11, %p13043_p9 }
  0x75   : > { %13053 = shalt.err (!%p13050_p12)
}
  0x76   : > { %s15110_s23 = smov 64   ;;  %s15114_s19 = smov 4  }
  0x77   : > { %11517 = dma.hbm_to_vmem [thread:$0]  (!%p13773_p6), %s15147_s5, 256, %s13779_s27, [#allocation16], %s15110_s23, %s15110_s23, %s15114_s19  }
  0x78   : > { %s13615_s14 = smov [#allocation18]   ;;  %s15148_s7 = sld [smem:[#allocation61_spill]] }
  0x79   : > { %s565_s16 = sshll.u32 %s13615_s14, 4  ;;  %s566_s16 = int_to_ptr.vmem [resolvable:$true] %s565_s16 }
  0x7e   : > { %s13054_s21 = scalar_lea.hbm %s15148_s7, 8192 }
  0x7f   : > { %p13055_p13 = scmp.ne.s32.totalorder %s15148_s7, %s13054_s21  ;;  %p13061_p5 = scmp.lt.u32.totalorder %s13054_s21, %s15148_s7 }
  0x81   : > { %p13057_p0 = pnand %p13055_p13, %p13789_p8 }
  0x83   : > { %p13058_p2 = pneg %p13057_p0 }
  0x85   : > { %p13063_p7 = pnand %p13061_p5, %p13058_p2 }
  0x87   : > { %13066 = shalt.err (!%p13063_p7)
}
  0x88   : > { %s13067_s27 = scalar_lea.vmem %s566_s16, 8192  ;;  %p13075_p11 = scmp.lt.s32.totalorder %s566_s16, %s566_s16 }
  0x89   : > { %p13068_p9 = scmp.ne.s32.totalorder %s566_s16, %s13067_s27  ;;  %p13076_p12 = scmp.lt.s32.totalorder %s13067_s27, %s13067_s27 }
  0x8b   : > { %p13070_p4 = pnand %p13068_p9, %p13789_p8  ;;  %p13077_p1 = por %p13076_p12, %p13075_p11 }
  0x8d   : > { %p13071_p10 = pneg %p13070_p4 }
  0x8f   : > { %p13078_p3 = pnand %p13077_p1, %p13071_p10 }
  0x91   : > { %13081 = shalt.err (!%p13078_p3)
}
  0x92   : > { %s15112_s25 = smov 128   ;;  %s15116_s0 = smov 8  }
  0x93   : > { %11523 = dma.hbm_to_vmem [thread:$0]  (!%p13773_p6), %s15148_s7, 8192, %s566_s16, [#allocation19], %s15112_s25, %s15112_s25, %s15116_s0  }
  0x94   : > { %s13618_s30 = smov [#allocation21]   ;;  %s13619_s21 = smov [#allocation24]  }
  0x95   : > { %s591_s20 = sshll.u32 %s13618_s30, 4  ;;  %s615_s2 = sshll.u32 %s13619_s21, 4  ;;  %s592_s20 = int_to_ptr.vmem [resolvable:$true] %s591_s20  ;;  %s13880_s2 = int_to_ptr.vmem [resolvable:$true] %s615_s2 }
  0x96   : > { %s15149_s9 = sld [smem:[#allocation63_spill]] }
  0x9c   : > { %s13082_s26 = scalar_lea.hbm %s15149_s9, 12288 }
  0x9d   : > { %p13083_p1 = scmp.ne.s32.totalorder %s15149_s9, %s13082_s26  ;;  %p13089_p0 = scmp.lt.u32.totalorder %s13082_s26, %s15149_s9 }
  0x9f   : > { %p13085_p3 = pnand %p13083_p1, %p13789_p8 }
  0xa1   : > { %p13086_p13 = pneg %p13085_p3 }
  0xa3   : > { %p13091_p2 = pnand %p13089_p0, %p13086_p13 }
  0xa5   : > { %13094 = shalt.err (!%p13091_p2)
}
  0xa6   : > { %s13095_s14 = scalar_lea.vmem %s592_s20, 12288  ;;  %p13103_p4 = scmp.lt.s32.totalorder %s592_s20, %s592_s20 }
  0xa7   : > { %p13096_p5 = scmp.ne.s32.totalorder %s592_s20, %s13095_s14  ;;  %p13104_p10 = scmp.lt.s32.totalorder %s13095_s14, %s13095_s14 }
  0xa9   : > { %p13098_p7 = pnand %p13096_p5, %p13789_p8  ;;  %p13105_p11 = por %p13104_p10, %p13103_p4 }
  0xab   : > { %p13099_p9 = pneg %p13098_p7 }
  0xad   : > { %p13106_p12 = pnand %p13105_p11, %p13099_p9 }
  0xaf   : > { %13109 = shalt.err (!%p13106_p12)
}
  0xb0   : > { %11529 = dma.hbm_to_vmem [thread:$0]  (!%p13773_p6), %s15149_s9, 12288, %s592_s20, [#allocation22], %s15112_s25, %s15112_s25, %s15116_s0  }
  0xb1   : > { %s13110_s29 = scalar_lea.hbm %s15083_s11, 12288 }
  0xb2   : > { %p13111_p1 = scmp.ne.s32.totalorder %s15083_s11, %s13110_s29  ;;  %p13117_p0 = scmp.lt.u32.totalorder %s13110_s29, %s15083_s11 }
  0xb4   : > { %p13113_p3 = pnand %p13111_p1, %p13789_p8 }
  0xb6   : > { %p13114_p13 = pneg %p13113_p3 }
  0xb8   : > { %p13119_p2 = pnand %p13117_p0, %p13114_p13 }
  0xba   : > { %13122 = shalt.err (!%p13119_p2)
}
  0xbb   : > { %s13123_s20 = scalar_lea.vmem %s13880_s2, 12288  ;;  %p13131_p4 = scmp.lt.s32.totalorder %s13880_s2, %s13880_s2 }
  0xbc   : > { %p13124_p5 = scmp.ne.s32.totalorder %s13880_s2, %s13123_s20  ;;  %p13132_p10 = scmp.lt.s32.totalorder %s13123_s20, %s13123_s20 }
  0xbe   : > { %p13126_p7 = pnand %p13124_p5, %p13789_p8  ;;  %p13133_p11 = por %p13132_p10, %p13131_p4 }
  0xc0   : > { %p13127_p9 = pneg %p13126_p7 }
  0xc2   : > { %p13134_p12 = pnand %p13133_p11, %p13127_p9 }
  0xc4   : > { %13137 = shalt.err (!%p13134_p12)
}
  0xc5   : > { %11535 = dma.hbm_to_vmem [thread:$0]  (!%p13773_p6), %s15083_s11, 12288, %s13880_s2, [#allocation25], %s15112_s25, %s15112_s25, %s15116_s0  }
  0xc6   : > { %s13620_s30 = smov [#allocation27]   ;;  %s13621_s28 = smov [#allocation30]  }
  0xc7   : > { %s639_s21 = sshll.u32 %s13620_s30, 4  ;;  %s665_s29 = sshll.u32 %s13621_s28, 4  ;;  %s640_s21 = int_to_ptr.vmem [resolvable:$true] %s639_s21  ;;  %s13929_s29 = int_to_ptr.vmem [resolvable:$true] %s665_s29 }
  0xc8   : > { %s13138_s22 = scalar_lea.hbm %s15085_s13, 128 }
  0xc9   : > { %p13139_p1 = scmp.ne.s32.totalorder %s15085_s13, %s13138_s22  ;;  %p13145_p0 = scmp.lt.u32.totalorder %s13138_s22, %s15085_s13 }
  0xcb   : > { %p13141_p3 = pnand %p13139_p1, %p13789_p8 }
  0xcd   : > { %p13142_p13 = pneg %p13141_p3 }
  0xcf   : > { %p13147_p2 = pnand %p13145_p0, %p13142_p13 }
  0xd1   : > { %13150 = shalt.err (!%p13147_p2)
}
  0xd2   : > { %s13151_s23 = scalar_lea.vmem %s640_s21, 128  ;;  %p13159_p4 = scmp.lt.s32.totalorder %s640_s21, %s640_s21 }
  0xd3   : > { %p13152_p5 = scmp.ne.s32.totalorder %s640_s21, %s13151_s23  ;;  %p13160_p10 = scmp.lt.s32.totalorder %s13151_s23, %s13151_s23 }
  0xd5   : > { %p13154_p7 = pnand %p13152_p5, %p13789_p8  ;;  %p13161_p11 = por %p13160_p10, %p13159_p4 }
  0xd7   : > { %p13155_p9 = pneg %p13154_p7 }
  0xd9   : > { %p13162_p12 = pnand %p13161_p11, %p13155_p9 }
  0xdb   : > { %13165 = shalt.err (!%p13162_p12)
}
  0xdc   : > { %s15150_s30 = smov 64   ;;  %s13166_s16 = scalar_lea.hbm %s15087_s15, 2048 }
  0xdd   : > { %11541 = dma.hbm_to_vmem [thread:$0]  (!%p13773_p6), %s15085_s13, 128, %s640_s21, [#allocation28], %s15150_s30, %s15150_s30, %s15114_s19  }
  0xde   : > { %p13167_p1 = scmp.ne.s32.totalorder %s15087_s15, %s13166_s16  ;;  %p13173_p0 = scmp.lt.u32.totalorder %s13166_s16, %s15087_s15 }
  0xe0   : > { %p13169_p3 = pnand %p13167_p1, %p13789_p8 }
  0xe2   : > { %p13170_p13 = pneg %p13169_p3 }
  0xe4   : > { %p13175_p2 = pnand %p13173_p0, %p13170_p13 }
  0xe6   : > { %13178 = shalt.err (!%p13175_p2)
}
  0xe7   : > { %s13179_s21 = scalar_lea.vmem %s13929_s29, 2048  ;;  %p13187_p4 = scmp.lt.s32.totalorder %s13929_s29, %s13929_s29 }
  0xe8   : > { %p13180_p5 = scmp.ne.s32.totalorder %s13929_s29, %s13179_s21  ;;  %p13188_p10 = scmp.lt.s32.totalorder %s13179_s21, %s13179_s21 }
  0xea   : > { %p13182_p7 = pnand %p13180_p5, %p13789_p8  ;;  %p13189_p11 = por %p13188_p10, %p13187_p4 }
  0xec   : > { %p13183_p9 = pneg %p13182_p7 }
  0xee   : > { %p13190_p12 = pnand %p13189_p11, %p13183_p9 }
  0xf0   : > { %13193 = shalt.err (!%p13190_p12)
}
  0xf1   : > { %11547 = dma.hbm_to_vmem [thread:$0]  (!%p13773_p6), %s15087_s15, 2048, %s13929_s29, [#allocation31], %s15150_s30, %s15150_s30, %s15114_s19  }
  0xf2   : > { %s13622_s27 = smov [#allocation33]   ;;  %s13623_s16 = smov [#allocation11]  }
  0xf3   : > { %s691_s22 = sshll.u32 %s13622_s27, 4  ;;  %s505_s20 = sshll.u32 %s13623_s16, 4  ;;  %s692_s22 = int_to_ptr.vmem [resolvable:$true] %s691_s22  ;;  %s13978_s20 = int_to_ptr.vmem [resolvable:$true] %s505_s20 }
  0xf4   : > { %s13194_s23 = scalar_lea.hbm %s15089_s17, 768 }
  0xf5   : > { %p13195_p1 = scmp.ne.s32.totalorder %s15089_s17, %s13194_s23  ;;  %p13201_p0 = scmp.lt.u32.totalorder %s13194_s23, %s15089_s17 }
  0xf7   : > { %p13197_p3 = pnand %p13195_p1, %p13789_p8 }
  0xf9   : > { %p13198_p13 = pneg %p13197_p3 }
  0xfb   : > { %p13203_p2 = pnand %p13201_p0, %p13198_p13 }
  0xfd   : > { %13206 = shalt.err (!%p13203_p2)
}
  0xfe   : > { %s13207_s26 = scalar_lea.vmem %s692_s22, 768  ;;  %p13215_p4 = scmp.lt.s32.totalorder %s692_s22, %s692_s22 }
  0xff   : > { %p13208_p5 = scmp.ne.s32.totalorder %s692_s22, %s13207_s26  ;;  %p13216_p10 = scmp.lt.s32.totalorder %s13207_s26, %s13207_s26 }
 0x101   : > { %p13210_p7 = pnand %p13208_p5, %p13789_p8  ;;  %p13217_p11 = por %p13216_p10, %p13215_p4 }
 0x103   : > { %p13211_p9 = pneg %p13210_p7 }
 0x105   : > { %p13218_p12 = pnand %p13217_p11, %p13211_p9 }
 0x107   : > { %13221 = shalt.err (!%p13218_p12)
}
 0x108   : > { %s15151_s25 = smov 128   ;;  %s15152_s23 = sld [smem:[#allocation56_spill]] }
 0x109   : > { %11553 = dma.hbm_to_vmem [thread:$0]  (!%p13773_p6), %s15089_s17, 768, %s692_s22, [#allocation34], %s15151_s25, %s15151_s25, %s15116_s0  }
 0x10e   : > { %s13222_s21 = scalar_lea.hbm %s15152_s23, 64 }
 0x10f   : > { %p13223_p1 = scmp.ne.s32.totalorder %s15152_s23, %s13222_s21  ;;  %p13229_p0 = scmp.lt.u32.totalorder %s13222_s21, %s15152_s23 }
 0x111   : > { %p13225_p3 = pnand %p13223_p1, %p13789_p8 }
 0x113   : > { %p13226_p13 = pneg %p13225_p3 }
 0x115   : > { %p13231_p2 = pnand %p13229_p0, %p13226_p13 }
 0x117   : > { %13234 = shalt.err (!%p13231_p2)
}
 0x118   : > { %s13235_s22 = scalar_lea.vmem %s13978_s20, 64  ;;  %p13243_p4 = scmp.lt.s32.totalorder %s13978_s20, %s13978_s20 }
 0x119   : > { %p13236_p5 = scmp.ne.s32.totalorder %s13978_s20, %s13235_s22  ;;  %p13244_p10 = scmp.lt.s32.totalorder %s13235_s22, %s13235_s22 }
 0x11b   : > { %p13238_p7 = pnand %p13236_p5, %p13789_p8  ;;  %p13245_p11 = por %p13244_p10, %p13243_p4 }
 0x11d   : > { %p13239_p9 = pneg %p13238_p7 }
 0x11f   : > { %p13246_p12 = pnand %p13245_p11, %p13239_p9 }
 0x121   : > { %13249 = shalt.err (!%p13246_p12)
}
 0x122   : > { %11508 = dma.hbm_to_vmem [thread:$0]  (!%p13773_p6), %s15152_s23, 64, %s13978_s20, [#allocation10]  }
 0x123   : > { %s13624_s16 = smov [#allocation14]   ;;  %s13625_s2 = smov [#allocation17]  }
 0x124   : > { %s529_s14 = sshll.u32 %s13624_s16, 4  ;;  %s552_s21 = sshll.u32 %s13625_s2, 4  ;;  %s530_s14 = int_to_ptr.vmem [resolvable:$true] %s529_s14  ;;  %s14024_s21 = int_to_ptr.vmem [resolvable:$true] %s552_s21 }
 0x125   : > { %s15153_s4 = sld [smem:[#allocation58_spill]] }
 0x12b   : > { %s13250_s26 = scalar_lea.hbm %s15153_s4, 64 }
 0x12c   : > { %p13251_p1 = scmp.ne.s32.totalorder %s15153_s4, %s13250_s26  ;;  %p13257_p0 = scmp.lt.u32.totalorder %s13250_s26, %s15153_s4 }
 0x12e   : > { %p13253_p3 = pnand %p13251_p1, %p13789_p8 }
 0x130   : > { %p13254_p13 = pneg %p13253_p3 }
 0x132   : > { %p13259_p2 = pnand %p13257_p0, %p13254_p13 }
 0x134   : > { %13262 = shalt.err (!%p13259_p2)
}
 0x135   : > { %s13263_s27 = scalar_lea.vmem %s530_s14, 64  ;;  %p13271_p4 = scmp.lt.s32.totalorder %s530_s14, %s530_s14 }
 0x136   : > { %p13264_p5 = scmp.ne.s32.totalorder %s530_s14, %s13263_s27  ;;  %p13272_p10 = scmp.lt.s32.totalorder %s13263_s27, %s13263_s27 }
 0x138   : > { %p13266_p7 = pnand %p13264_p5, %p13789_p8  ;;  %p13273_p11 = por %p13272_p10, %p13271_p4 }
 0x13a   : > { %p13267_p9 = pneg %p13266_p7 }
 0x13c   : > { %p13274_p12 = pnand %p13273_p11, %p13267_p9 }
 0x13e   : > { %13277 = shalt.err (!%p13274_p12)
}
 0x13f   : > { %11514 = dma.hbm_to_vmem [thread:$0]  (!%p13773_p6), %s15153_s4, 64, %s530_s14, [#allocation13]  }
 0x140   : > { %s15154_s6 = sld [smem:[#allocation60_spill]] }
 0x146   : > { %s13278_s29 = scalar_lea.hbm %s15154_s6, 256 }
 0x147   : > { %p13279_p1 = scmp.ne.s32.totalorder %s15154_s6, %s13278_s29  ;;  %p13285_p0 = scmp.lt.u32.totalorder %s13278_s29, %s15154_s6 }
 0x149   : > { %p13281_p3 = pnand %p13279_p1, %p13789_p8 }
 0x14b   : > { %p13282_p13 = pneg %p13281_p3 }
 0x14d   : > { %p13287_p2 = pnand %p13285_p0, %p13282_p13 }
 0x14f   : > { %13290 = shalt.err (!%p13287_p2)
}
 0x150   : > { %s13291_s14 = scalar_lea.vmem %s14024_s21, 256  ;;  %p13299_p4 = scmp.lt.s32.totalorder %s14024_s21, %s14024_s21 }
 0x151   : > { %p13292_p5 = scmp.ne.s32.totalorder %s14024_s21, %s13291_s14  ;;  %p13300_p10 = scmp.lt.s32.totalorder %s13291_s14, %s13291_s14 }
 0x153   : > { %p13294_p7 = pnand %p13292_p5, %p13789_p8  ;;  %p13301_p11 = por %p13300_p10, %p13299_p4 }
 0x155   : > { %p13295_p9 = pneg %p13294_p7 }
 0x157   : > { %p13302_p12 = pnand %p13301_p11, %p13295_p9 }
 0x159   : > { %13305 = shalt.err (!%p13302_p12)
}
 0x15a   : > { %s15155_s27 = smov 4   ;;  %s13626_s2 = smov [#allocation20]  }
 0x15b   : > { %11520 = dma.hbm_to_vmem [thread:$0]  (!%p13773_p6), %s15154_s6, 256, %s14024_s21, [#allocation16], %s15150_s30, %s15150_s30, %s15155_s27  }
 0x15c   : > { %s578_s28 = sshll.u32 %s13626_s2, 4  ;;  %s13627_s29 = smov [#allocation23]   ;;  %s579_s28 = int_to_ptr.vmem [resolvable:$true] %s578_s28 }
 0x15d   : > { %s605_s26 = sshll.u32 %s13627_s29, 4  ;;  %s15156_s8 = sld [smem:[#allocation62_spill]]  ;;  %s14070_s26 = int_to_ptr.vmem [resolvable:$true] %s605_s26 }
 0x163   : > { %s13306_s20 = scalar_lea.hbm %s15156_s8, 8192 }
 0x164   : > { %p13307_p1 = scmp.ne.s32.totalorder %s15156_s8, %s13306_s20  ;;  %p13313_p0 = scmp.lt.u32.totalorder %s13306_s20, %s15156_s8 }
 0x166   : > { %p13309_p3 = pnand %p13307_p1, %p13789_p8 }
 0x168   : > { %p13310_p13 = pneg %p13309_p3 }
 0x16a   : > { %p13315_p2 = pnand %p13313_p0, %p13310_p13 }
 0x16c   : > { %13318 = shalt.err (!%p13315_p2)
}
 0x16d   : > { %s13319_s16 = scalar_lea.vmem %s579_s28, 8192  ;;  %p13327_p4 = scmp.lt.s32.totalorder %s579_s28, %s579_s28 }
 0x16e   : > { %p13320_p5 = scmp.ne.s32.totalorder %s579_s28, %s13319_s16  ;;  %p13328_p10 = scmp.lt.s32.totalorder %s13319_s16, %s13319_s16 }
 0x170   : > { %p13322_p7 = pnand %p13320_p5, %p13789_p8  ;;  %p13329_p11 = por %p13328_p10, %p13327_p4 }
 0x172   : > { %p13323_p9 = pneg %p13322_p7 }
 0x174   : > { %p13330_p12 = pnand %p13329_p11, %p13323_p9 }
 0x176   : > { %13333 = shalt.err (!%p13330_p12)
}
 0x177   : > { %s15157_s1 = smov 8   ;;  %s13334_s20 = scalar_lea.hbm %s15082_s10, 32 }
 0x178   : > { %11526 = dma.hbm_to_vmem [thread:$0]  (!%p13773_p6), %s15156_s8, 8192, %s579_s28, [#allocation19], %s15151_s25, %s15151_s25, %s15157_s1  }
 0x179   : > { %p13335_p1 = scmp.ne.s32.totalorder %s15082_s10, %s13334_s20  ;;  %p13341_p0 = scmp.lt.u32.totalorder %s13334_s20, %s15082_s10 }
 0x17b   : > { %p13337_p3 = pnand %p13335_p1, %p13789_p8 }
 0x17d   : > { %p13338_p13 = pneg %p13337_p3 }
 0x17f   : > { %p13343_p2 = pnand %p13341_p0, %p13338_p13 }
 0x181   : > { %13346 = shalt.err (!%p13343_p2)
}
 0x182   : > { %s13347_s28 = scalar_lea.vmem %s14070_s26, 32  ;;  %p13355_p4 = scmp.lt.s32.totalorder %s14070_s26, %s14070_s26 }
 0x183   : > { %p13348_p5 = scmp.ne.s32.totalorder %s14070_s26, %s13347_s28  ;;  %p13356_p10 = scmp.lt.s32.totalorder %s13347_s28, %s13347_s28 }
 0x185   : > { %p13350_p7 = pnand %p13348_p5, %p13789_p8  ;;  %p13357_p11 = por %p13356_p10, %p13355_p4 }
 0x187   : > { %p13351_p9 = pneg %p13350_p7 }
 0x189   : > { %p13358_p12 = pnand %p13357_p11, %p13351_p9 }
 0x18b   : > { %13361 = shalt.err (!%p13358_p12)
}
 0x18c   : > { %11532 = dma.hbm_to_vmem [thread:$0]  (!%p13773_p6), %s15082_s10, 32, %s14070_s26, [#allocation22]  }
 0x18d   : > { %s13628_s22 = smov [#allocation26]   ;;  %s13629_s20 = smov [#allocation29]  }
 0x18e   : > { %s629_s19 = sshll.u32 %s13628_s22, 4  ;;  %s652_s14 = sshll.u32 %s13629_s20, 4  ;;  %s630_s19 = int_to_ptr.vmem [resolvable:$true] %s629_s19  ;;  %s14116_s14 = int_to_ptr.vmem [resolvable:$true] %s652_s14 }
 0x18f   : > { %s13362_s16 = scalar_lea.hbm %s15084_s12, 32 }
 0x190   : > { %p13363_p1 = scmp.ne.s32.totalorder %s15084_s12, %s13362_s16  ;;  %p13369_p0 = scmp.lt.u32.totalorder %s13362_s16, %s15084_s12 }
 0x192   : > { %p13365_p3 = pnand %p13363_p1, %p13789_p8 }
 0x194   : > { %p13366_p13 = pneg %p13365_p3 }
 0x196   : > { %p13371_p2 = pnand %p13369_p0, %p13366_p13 }
 0x198   : > { %13374 = shalt.err (!%p13371_p2)
}
 0x199   : > { %s13375_s29 = scalar_lea.vmem %s630_s19, 32  ;;  %p13383_p4 = scmp.lt.s32.totalorder %s630_s19, %s630_s19 }
 0x19a   : > { %p13376_p5 = scmp.ne.s32.totalorder %s630_s19, %s13375_s29  ;;  %p13384_p10 = scmp.lt.s32.totalorder %s13375_s29, %s13375_s29 }
 0x19c   : > { %p13378_p7 = pnand %p13376_p5, %p13789_p8  ;;  %p13385_p11 = por %p13384_p10, %p13383_p4 }
 0x19e   : > { %p13379_p9 = pneg %p13378_p7 }
 0x1a0   : > { %p13386_p12 = pnand %p13385_p11, %p13379_p9 }
 0x1a2   : > { %13389 = shalt.err (!%p13386_p12)
}
 0x1a3   : > { %11538 = dma.hbm_to_vmem [thread:$0]  (!%p13773_p6), %s15084_s12, 32, %s630_s19, [#allocation25]  }
 0x1a4   : > { %s15158_s21 = sld [smem:[#allocation64_spill]] }
 0x1aa   : > { %s15159_s16 = smov %s15158_s21  ;;  %s13390_s28 = scalar_lea.hbm %s15158_s21, 128 }
 0x1ab   : > { %p13391_p1 = scmp.ne.s32.totalorder %s15159_s16, %s13390_s28  ;;  %p13397_p0 = scmp.lt.u32.totalorder %s13390_s28, %s15159_s16 }
 0x1ad   : > { %p13393_p3 = pnand %p13391_p1, %p13789_p8 }
 0x1af   : > { %p13394_p13 = pneg %p13393_p3 }
 0x1b1   : > { %p13399_p2 = pnand %p13397_p0, %p13394_p13 }
 0x1b3   : > { %13402 = shalt.err (!%p13399_p2)
}
 0x1b4   : > { %s13403_s19 = scalar_lea.vmem %s14116_s14, 128  ;;  %p13411_p4 = scmp.lt.s32.totalorder %s14116_s14, %s14116_s14 }
 0x1b5   : > { %p13404_p5 = scmp.ne.s32.totalorder %s14116_s14, %s13403_s19  ;;  %p13412_p10 = scmp.lt.s32.totalorder %s13403_s19, %s13403_s19 }
 0x1b7   : > { %p13406_p7 = pnand %p13404_p5, %p13789_p8  ;;  %p13413_p11 = por %p13412_p10, %p13411_p4 }
 0x1b9   : > { %p13407_p9 = pneg %p13406_p7 }
 0x1bb   : > { %p13414_p12 = pnand %p13413_p11, %p13407_p9 }
 0x1bd   : > { %13417 = shalt.err (!%p13414_p12)
}
 0x1be   : > { %11544 = dma.hbm_to_vmem [thread:$0]  (!%p13773_p6), %s15159_s16, 128, %s14116_s14, [#allocation28], %s15150_s30, %s15150_s30, %s15155_s27  }
 0x1bf   : > { %s13630_s22 = smov [#allocation32]   ;;  %s13631_s0 = smov [#allocation35]  }
 0x1c0   : > { %s678_s20 = sshll.u32 %s13630_s22, 4  ;;  %s705_s21 = sshll.u32 %s13631_s0, 4  ;;  %s679_s20 = int_to_ptr.vmem [resolvable:$true] %s678_s20  ;;  %s14162_s21 = int_to_ptr.vmem [resolvable:$true] %s705_s21 }
 0x1c1   : > { %s15160_s26 = sld [smem:[#allocation65_spill]] }
 0x1c7   : > { %s13418_s29 = scalar_lea.hbm %s15160_s26, 2048 }
 0x1c8   : > { %p13419_p1 = scmp.ne.s32.totalorder %s15160_s26, %s13418_s29  ;;  %p13425_p0 = scmp.lt.u32.totalorder %s13418_s29, %s15160_s26 }
 0x1ca   : > { %p13421_p3 = pnand %p13419_p1, %p13789_p8 }
 0x1cc   : > { %p13422_p13 = pneg %p13421_p3 }
 0x1ce   : > { %p13427_p2 = pnand %p13425_p0, %p13422_p13 }
 0x1d0   : > { %13430 = shalt.err (!%p13427_p2)
}
 0x1d1   : > { %s13431_s4 = scalar_lea.vmem %s679_s20, 2048  ;;  %p13439_p4 = scmp.lt.s32.totalorder %s679_s20, %s679_s20 }
 0x1d2   : > { %p13432_p5 = scmp.ne.s32.totalorder %s679_s20, %s13431_s4  ;;  %p13440_p10 = scmp.lt.s32.totalorder %s13431_s4, %s13431_s4 }
 0x1d4   : > { %p13434_p7 = pnand %p13432_p5, %p13789_p8  ;;  %p13441_p11 = por %p13440_p10, %p13439_p4 }
 0x1d6   : > { %p13435_p9 = pneg %p13434_p7 }
 0x1d8   : > { %p13442_p12 = pnand %p13441_p11, %p13435_p9 }
 0x1da   : > { %13445 = shalt.err (!%p13442_p12)
}
 0x1db   : > { %11550 = dma.hbm_to_vmem [thread:$0]  (!%p13773_p6), %s15160_s26, 2048, %s679_s20, [#allocation31], %s15150_s30, %s15150_s30, %s15155_s27  }
 0x1dc   : > { %s15161_s2 = sld [smem:[#allocation66_spill]] }
 0x1e2   : > { %s13446_s29 = scalar_lea.hbm %s15161_s2, 16 }
 0x1e3   : > { %p13447_p1 = scmp.ne.s32.totalorder %s15161_s2, %s13446_s29  ;;  %p13453_p0 = scmp.lt.u32.totalorder %s13446_s29, %s15161_s2 }
 0x1e5   : > { %p13449_p3 = pnand %p13447_p1, %p13789_p8 }
 0x1e7   : > { %p13450_p13 = pneg %p13449_p3 }
 0x1e9   : > { %p13455_p2 = pnand %p13453_p0, %p13450_p13 }
 0x1eb   : > { %13458 = shalt.err (!%p13455_p2)
}
 0x1ec   : > { %s13459_s30 = scalar_lea.vmem %s14162_s21, 16  ;;  %s13466_s27 = scalar_lea.vmem %s14162_s21, 32 }
 0x1ed   : > { %p13460_p5 = scmp.ne.s32.totalorder %s14162_s21, %s13459_s30  ;;  %p13467_p4 = scmp.lt.s32.totalorder %s14162_s21, %s14162_s21 }
 0x1ee   : > { %p13468_p10 = scmp.lt.s32.totalorder %s13466_s27, %s13459_s30 }
 0x1ef   : > { %p13462_p7 = pnand %p13460_p5, %p13789_p8 }
 0x1f0   : > { %p13469_p11 = por %p13468_p10, %p13467_p4 }
 0x1f1   : > { %p13463_p9 = pneg %p13462_p7 }
 0x1f3   : > { %p13470_p12 = pnand %p13469_p11, %p13463_p9 }
 0x1f5   : > { %13473 = shalt.err (!%p13470_p12)
}
 0x1f6   : > { %s15162_s22 = sld [smem:[#allocation51_spill]]  ;;  %s15163_s0 = sld [smem:[#allocation50_spill]] }
 0x1f7   : > { %s15164_s24 = sld [smem:[#allocation49_spill]]  ;;  %s15165_s28 = sld [smem:[#allocation48_spill]] }
 0x1f8   : > { %s15166_s29 = sld [smem:[#allocation52_spill]] }
 0x1f9   : > { %11556 = dma.hbm_to_vmem [thread:$0]  (!%p13773_p6), %s15161_s2, 16, %s14162_s21, [#allocation34]  }
 0x1fc   : > { %s10127_s3 = sadd.s32 4294967294, %s15162_s22   ;;  %s14211_s21 = sadd.s32 1, %s15162_s22  }
 0x1fd   : > { %s48_s19 = ssub.s32 %s15162_s22, %s14211_s21  ;;  %s51_s5 = sadd.s32 1, %s15163_s0 }
 0x1fe   : > { %p49_p8 = scmp.eq.s32.totalorder %s48_s19, 0  ;;  %p58_p1 = scmp.ne.s32.totalorder %s15163_s0, %s15164_s24 }
 0x1ff   : > { %p59_p3 = scmp.eq.s32.totalorder %s15162_s22, 0  ;;  %p64_p13 = scmp.ne.s32.totalorder %s15164_s24, %s15165_s28 }
 0x200   : > { %s14222_s14 = scalar_select %p49_p8, %s15163_s0, %s51_s5  }
 0x201   : > { %p60_p0 = por %p59_p3, %p58_p1  ;;  %p15167_p2 = scmp.eq.s32.totalorder %s15166_s29, 0 }
 0x202   : > { %p466_p6 = scmp.eq.s32.totalorder %s15166_s29, 1  ;;  %p472_p7 = scmp.eq.s32.totalorder %s10127_s3, 1 }
 0x203   : > { %p14226_p5 = por %p15167_p2, %p64_p13  ;;  %p11583_p9 = scmp.lt.s32.totalorder %s15162_s22, 2 }
 0x204   : > { %s716_s30 = sand.u32 1, %s15163_s0   ;;  %p14233_p4 = por %p466_p6, %p58_p1 }
 0x205   : > { %p14237_p10 = por %p472_p7, %p64_p13  ;;  %s11423_s6 = smul.u32 192, %s716_s30 }
 0x206   : > { %s15169_s27 = scalar_select %p14233_p4, 1, 0 }
 0x207   : > { %s15170_s20 = scalar_select %p14237_p10, 1, 0 }
 0x208   : > { %s11424_s24 = smul.u32 3072, %s15162_s22  ;;  %p14242_p11 = pnand %p11583_p9, %p60_p0 }
 0x209   : > { %s15172_s29 = sld [smem:[#allocation54_spill]]  ;;  %s720_s3 = scalar_lea.vmem [#allocation6], %s11423_s6 }
 0x20a   : > { %s727_s2 = sshll.u32 %s720_s3, 4  ;;  %s14253_s22 = scalar_lea.sflag [#allocation7], %s716_s30  ;;  %s14251_s2 = int_to_ptr.vmem [resolvable:$true] %s727_s2 }
 0x20b   : > { %p13476_p8 = pneg %p14242_p11 }
 0x20f   : > { %s14249_s0 = scalar_lea.hbm %s15172_s29, %s11424_s24  ;;  %s13479_s5 = scalar_lea.hbm %s15172_s29, 6144 }
 0x210   : > { %s13474_s7 = scalar_lea.hbm %s14249_s0, 3072  ;;  %p13480_p13 = scmp.lt.u32.totalorder %s14249_s0, %s15172_s29 }
 0x211   : > { %p13475_p12 = scmp.ne.s32.totalorder %s14249_s0, %s13474_s7  ;;  %p13481_p0 = scmp.lt.u32.totalorder %s13479_s5, %s13474_s7 }
 0x212   : > { %p13483_p6 = scmp.lt.u32.totalorder %s13474_s7, %s14249_s0 }
 0x213   : > { %p13477_p1 = pnand %p13476_p8, %p13475_p12  ;;  %p13482_p2 = por %p13481_p0, %p13480_p13 }
 0x215   : > { %p13478_p3 = pneg %p13477_p1  ;;  %p13484_p7 = por %p13483_p6, %p13482_p2 }
 0x217   : > { %p13485_p9 = pnand %p13484_p7, %p13478_p3 }
 0x219   : > { %13488 = shalt.err (!%p13485_p9)
}
 0x21a   : > { %s13489_s30 = scalar_lea.vmem %s14251_s2, 3072  ;;  %s13632_s6 = smov [#allocation6]  }
 0x21b   : > { %p13490_p12 = scmp.ne.s32.totalorder %s14251_s2, %s13489_s30  ;;  %s13494_s3 = sshll.u32 %s13632_s6, 4  ;;  %s13495_s3 = int_to_ptr.vmem [resolvable:$false] %s13494_s3 }
 0x21c   : > { %s13496_s8 = scalar_lea.vmem %s13495_s3, 6144  ;;  %p13497_p4 = scmp.lt.s32.totalorder %s14251_s2, %s13495_s3 }
 0x21d   : > { %p13492_p1 = pnand %p13490_p12, %p13476_p8  ;;  %p13498_p13 = scmp.lt.s32.totalorder %s13496_s8, %s13489_s30 }
 0x21f   : > { %p13493_p10 = pneg %p13492_p1  ;;  %p13499_p0 = por %p13498_p13, %p13497_p4 }
 0x221   : > { %p13500_p2 = pnand %p13499_p0, %p13493_p10 }
 0x223   : > { %13503 = shalt.err (!%p13500_p2)
}
 0x224   : > { %11560 = dma.hbm_to_vmem [thread:$0]  (!%p14242_p11), %s14249_s0, 3072, %s14251_s2, %s14253_s22, %s15151_s25, %s15151_s25, %s15157_s1  }
 0x225   : > { %s15173_s7 = sld [smem:[#allocation53_spill]] }
 0x22b   : > { %p15174_p8 = scmp.ne.s32.totalorder %s15173_s7, 0 }
 0x22c   : > { %s15175_s9 = sld [smem:[#allocation49_spill]] (!%p15174_p8) }
 0x22d   : > { %739 = sbr.rel (%p15174_p8) target bundleno = 3466 (0xd8a), region = 96 }
 0x232   : > { %s14287_s24 = sand.u32 (!%p15174_p8), 1, %s15175_s9  }
 0x233   : > { %s11425_s19 = smul.u32 (!%p15174_p8), 192, %s14287_s24  ;;  %s742_s5 = scalar_lea.sflag (!%p15174_p8), [#allocation7], %s14287_s24 }
 0x235   : > { %s14291_s30 = scalar_lea.vmem [#allocation6], %s11425_s19 }
 0x236   : > { %13549 = dma.done.wait (%p14226_p5), %s742_s5, 3072  }
 0x237   : > { %13551 = vsyncadd (%p14226_p5), %s742_s5, 4294964224  ;;  %s15176_s28 = sld [smem:[#allocation52_spill]] }
 0x23d   : > { %p15177_p4 = scmp.eq.s32.totalorder %s15176_s28, 0 }
 0x23f   : > { %13553 = dma.done.wait (%p15177_p4), [#allocation10], 18496   ;;  %p15178_p10 = pmov %p15177_p4 }
 0x240   : > { %p15179_p11 = pmov %p15177_p4 }
 0x241   : > { %13555 = vsyncadd (%p15178_p10), [#allocation10], 4294948800 }
 0x242   : > { %13557 = dma.done.wait (%p15179_p11), [#allocation13], 49216   ;;  %p15180_p3 = pmov %p15177_p4 }
 0x244   : > { %13559 = vsyncadd (%p15180_p3), [#allocation13], 4294918080  ;;  %p15181_p6 = pmov %p15180_p3 }
 0x245   : > { %p15182_p7 = pmov %p15180_p3 }
 0x246   : > { %13561 = dma.done.wait (%p15181_p6), [#allocation16], 512  }
 0x247   : > { %13563 = vsyncadd (%p15182_p7), [#allocation16], 4294966784  ;;  %p15183_p5 = pmov %p15180_p3 }
 0x248   : > { %p15184_p9 = pmov %p15180_p3 }
 0x249   : > { %13565 = dma.done.wait (%p15183_p5), [#allocation19], 16384  }
 0x24a   : > { %13567 = vsyncadd (%p15184_p9), [#allocation19], 4294950912  ;;  %p15185_p12 = pmov %p15180_p3 }
 0x24b   : > { %p15186_p1 = pmov %p15180_p3 }
 0x24c   : > { %13569 = dma.done.wait (%p15185_p12), [#allocation22], 12320  }
 0x24d   : > { %13571 = vsyncadd (%p15186_p1), [#allocation22], 4294954976  ;;  %p15187_p13 = pmov %p15186_p1 }
 0x24e   : > { %p15188_p0 = pmov %p15186_p1 }
 0x24f   : > { %13573 = dma.done.wait (%p15187_p13), [#allocation25], 12320  }
 0x250   : > { %13575 = vsyncadd (%p15188_p0), [#allocation25], 4294954976  ;;  %p15189_p2 = pmov %p15188_p0 }
 0x251   : > { %p15190_p8 = pmov %p15188_p0 }
 0x252   : > { %13577 = dma.done.wait (%p15189_p2), [#allocation28], 256  }
 0x253   : > { %13579 = vsyncadd (%p15190_p8), [#allocation28], 4294967040  ;;  %p15191_p4 = pmov %p15188_p0 }
 0x254   : > { %p15192_p10 = pmov %p15188_p0 }
 0x255   : > { %13581 = dma.done.wait (%p15191_p4), [#allocation31], 4096  }
 0x256   : > { %13583 = vsyncadd (%p15192_p10), [#allocation31], 4294963200  ;;  %p15193_p11 = pmov %p15188_p0 }
 0x257   : > { %p15194_p3 = pmov %p15188_p0 }
 0x258   : > { %13585 = dma.done.wait (%p15193_p11), [#allocation34], 784  }
 0x259   : > { %13587 = vsyncadd (%p15194_p3), [#allocation34], 4294966512  ;;  %v10168_v0 = vld [vmem:[%s14291_s30 + $0x40] sm:$0xff]  ;;  %v10169_v1 = vld [vmem:[%s14291_s30 + $0x48] sm:$0xff]  ;;  %s13633_s25 = smov 64   ;;  %vm906_vm0 = vcmask 523264  }
 0x25a   : > { %v10170_v2 = vld [vmem:[%s14291_s30 + $0x50] sm:$0xff]  ;;  %v920_v3 = vpack.c.bf16 %v10169_v1, %v10168_v0  ;;  %v10171_v4 = vld [vmem:[%s14291_s30 + $0x58] sm:$0xff]  ;;  %v10172_v5 = vld [vmem:[%s14291_s30 + $0x60] sm:$0xff]  ;;  %vm872_vm1 = vcmask 1047559   ;;  %vm873_vm2 = vsmask.f32 7966 }
 0x25b   : > { %v10173_v6 = vld [vmem:[%s14291_s30 + $0x68] sm:$0xff]  ;;  %v10174_v8 = vld [vmem:[%s14291_s30 + $0x70] sm:$0xff]  ;;  %v10175_v9 = vld [vmem:[%s14291_s30 + $0x78] sm:$0xff]  ;;  %v921_v10 = vpack.c.bf16 %v10171_v4, %v10170_v2  ;;  %vm878_vm3 = vcmask 523271   ;;  %vm889_vm6 = vcmask 516096   ;;  %vm883_vm7 = vcmask 1040384  }
 0x25c   : > { %v922_v7 = vpack.c.bf16 %v10173_v6, %v10172_v5  ;;  %928 = vrot.lane.b32.xlu0 %v920_v3, %s13633_s25  ;;  %v11661_v11 = vld [vmem:[#allocation9 + $0x184] ss:$16 sps:$4 sm:$0xff]   ;;  %v923_v12 = vpack.c.bf16 %v10175_v9, %v10174_v8  ;;  %v11663_v13 = vld [vmem:[#allocation9 + $0x18c] ss:$16 sps:$4 sm:$0xff]   ;;  %v11665_v14 = vld [vmem:[#allocation9 + $0x180] ss:$16 sps:$4 sm:$0xff]  }
 0x25d   : > { %1321 = vmatprep.subr.bf16.mxu0 %v11661_v11  ;;  %v11666_v15 = vld [vmem:[#allocation9 + $0x188] ss:$16 sps:$4 sm:$0xff]   ;;  %1394 = vmatprep.subr.bf16.mxu1 %v11663_v13  ;;  %v11667_v16 = vld [vmem:[#allocation9 + $0x1a4] ss:$16 sps:$4 sm:$0xff]   ;;  %v11669_v17 = vld [vmem:[#allocation9 + $0x1ac] ss:$16 sps:$4 sm:$0xff]  }
 0x25e   : > { %932 = vrot.lane.b32.xlu1 %v922_v7, %s13633_s25  ;;  %1322 = vmatpush1.bf16.msra.mxu0 %v11665_v14  ;;  %v11671_v18 = vld [vmem:[#allocation9 + $0x1a0] ss:$16 sps:$4 sm:$0xff]   ;;  %v11672_v19 = vld [vmem:[#allocation9 + $0x1a8] ss:$16 sps:$4 sm:$0xff]   ;;  %v11673_v20 = vld [vmem:[#allocation9 + $0x1c4] ss:$16 sps:$4 sm:$0xff]  }
 0x25f   : > { %1395 = vmatpush1.bf16.msra.mxu1 %v11666_v15  ;;  %1323 = vmatprep.subr.bf16.mxu0 %v11667_v16  ;;  %v11675_v21 = vld [vmem:[#allocation9 + $0x1cc] ss:$16 sps:$4 sm:$0xff]   ;;  %v11677_v22 = vld [vmem:[#allocation9 + $0x1c0] ss:$16 sps:$4 sm:$0xff]   ;;  %v11678_v23 = vld [vmem:[#allocation9 + $0x1c8] ss:$16 sps:$4 sm:$0xff]  }
 0x260   : > { %930 = vrot.lane.b32.xlu0 %v921_v10, %s13633_s25  ;;  %1396 = vmatprep.subr.bf16.mxu1 %v11669_v17  ;;  %v11679_v24 = vld [vmem:[#allocation9 + $0x1e4] ss:$16 sps:$4 sm:$0xff]   ;;  %v11681_v25 = vld [vmem:[#allocation9 + $0x1ec] ss:$16 sps:$4 sm:$0xff]   ;;  %v11683_v26 = vld [vmem:[#allocation9 + $0x1e0] ss:$16 sps:$4 sm:$0xff]  }
 0x261   : > { %v11684_v27 = vld [vmem:[#allocation9 + $0x1e8] ss:$16 sps:$4 sm:$0xff]   ;;  %v11685_v28 = vld [vmem:[#allocation9 + $0x204] ss:$16 sps:$4 sm:$0xff]   ;;  %v11687_v29 = vld [vmem:[#allocation9 + $0x20c] ss:$16 sps:$4 sm:$0xff]  }
 0x262   : > { %934 = vrot.lane.b32.xlu1 %v923_v12, %s13633_s25  ;;  %1324 = vmatpush1.bf16.msra.mxu0 %v11671_v18  ;;  %v11689_v30 = vld [vmem:[#allocation9 + $0x200] ss:$16 sps:$4 sm:$0xff]   ;;  %v11690_v31 = vld [vmem:[#allocation9 + $0x208] ss:$16 sps:$4 sm:$0xff]   ;;  %v11691_v32 = vld [vmem:[#allocation9 + $0x224] ss:$16 sps:$4 sm:$0xff]  }
 0x263   : > { %1397 = vmatpush1.bf16.msra.mxu1 %v11672_v19  ;;  %1325 = vmatprep.subr.bf16.mxu0 %v11673_v20  ;;  %v11693_v33 = vld [vmem:[#allocation9 + $0x22c] ss:$16 sps:$4 sm:$0xff]   ;;  %v11695_v34 = vld [vmem:[#allocation9 + $0x220] ss:$16 sps:$4 sm:$0xff]   ;;  %v11696_v35 = vld [vmem:[#allocation9 + $0x228] ss:$16 sps:$4 sm:$0xff]  }
 0x264   : > { %1398 = vmatprep.subr.bf16.mxu1 %v11675_v21  ;;  %v11697_v36 = vld [vmem:[#allocation9 + $0x244] ss:$16 sps:$4 sm:$0xff]   ;;  %v11699_v37 = vld [vmem:[#allocation9 + $0x24c] ss:$16 sps:$4 sm:$0xff]   ;;  %v11701_v38 = vld [vmem:[#allocation9 + $0x240] ss:$16 sps:$4 sm:$0xff]  }
 0x265   : > { %v11702_v39 = vld [vmem:[#allocation9 + $0x248] ss:$16 sps:$4 sm:$0xff]   ;;  %v11703_v40 = vld [vmem:[#allocation9 + $0x264] ss:$16 sps:$4 sm:$0xff]   ;;  %v11705_v41 = vld [vmem:[#allocation9 + $0x26c] ss:$16 sps:$4 sm:$0xff]  }
 0x266   : > { %1326 = vmatpush1.bf16.msra.mxu0 %v11677_v22  ;;  %v11707_v42 = vld [vmem:[#allocation9 + $0x260] ss:$16 sps:$4 sm:$0xff]   ;;  %v11708_v43 = vld [vmem:[#allocation9 + $0x268] ss:$16 sps:$4 sm:$0xff]   ;;  %v11709_v44 = vld [vmem:[#allocation9 + $0x284] ss:$16 sps:$4 sm:$0xff]  }
 0x267   : > { %1399 = vmatpush1.bf16.msra.mxu1 %v11678_v23  ;;  %1327 = vmatprep.subr.bf16.mxu0 %v11679_v24  ;;  %v894_v45 = vld [vmem:[%s14291_s30] sm:$0xff]  ;;  %v895_v46 = vld [vmem:[%s14291_s30 + $0x8] sm:$0xff]  ;;  %v896_v52 = vld [vmem:[%s14291_s30 + $0x10] sm:$0xff]  ;;  %vm884_vm8 = vsmask.f32 256  ;;  %vm940_vm11 = vcmask 1048064  }
 0x268   : > { %1400 = vmatprep.subr.bf16.mxu1 %v11681_v25  ;;  %v11711_v47 = vld [vmem:[#allocation9 + $0x28c] ss:$16 sps:$4 sm:$0xff]   ;;  %v902_v48 = vpack.c.bf16 %v895_v46, %v894_v45  ;;  %v11713_v49 = vld [vmem:[#allocation9 + $0x280] ss:$16 sps:$4 sm:$0xff]   ;;  %v11714_v50 = vld [vmem:[#allocation9 + $0x288] ss:$16 sps:$4 sm:$0xff]  }
 0x269   : > { %v11715_v51 = vld [vmem:[#allocation9 + $0x2a4] ss:$16 sps:$4 sm:$0xff]   ;;  %v897_v53 = vld [vmem:[%s14291_s30 + $0x18] sm:$0xff]  ;;  %v10177_v56 = vld [vmem:[%s14291_s30 + $0x88] sm:$0xff]  ;;  %vm1996_vm12 = vsmask.f32 7424 }
 0x26a   : > { %1328 = vmatpush1.bf16.msra.mxu0 %v11683_v26  ;;  %907 = vst.msk [vmem:[#allocation2 + $0x10] sm:$0xff] %vm906_vm0, %v902_v48  ;;  %v10176_v54 = vld [vmem:[%s14291_s30 + $0x80] sm:$0xff]  ;;  %v903_v55 = vpack.c.bf16 %v897_v53, %v896_v52  ;;  %v11717_v57 = vld [vmem:[#allocation9 + $0x2ac] ss:$16 sps:$4 sm:$0xff]   ;;  %v11720_v60 = vld [vmem:[#allocation9 + $0x2a8] ss:$16 sps:$4 sm:$0xff]  }
 0x26b   : > { %1401 = vmatpush1.bf16.msra.mxu1 %v11684_v27  ;;  %1329 = vmatprep.subr.bf16.mxu0 %v11685_v28  ;;  %v11719_v58 = vld [vmem:[#allocation9 + $0x2a0] ss:$16 sps:$4 sm:$0xff]   ;;  %v954_v59 = vpack.c.bf16 %v10177_v56, %v10176_v54  ;;  %v11721_v63 = vld [vmem:[#allocation9 + $0x2c4] ss:$16 sps:$4 sm:$0xff]   ;;  %v1062_v0 = vld [vmem:[#allocation9 + $0x2c8] sm:$0xff]  ;;  %vm9382_vm13 = vcmask 261120  }
 0x26c   : > { %1402 = vmatprep.subr.bf16.mxu1 %v11687_v29  ;;  %v1061_v61 = vld [vmem:[#allocation9 + $0x2c0] sm:$0xff]  ;;  %v1063_v62 = vld [vmem:[#allocation9 + $0x2d0] sm:$0xff]  ;;  %908 = vst.msk [vmem:[#allocation2 + $0x20] sm:$0xff] %vm906_vm0, %v903_v55  ;;  %v1064_v1 = vld [vmem:[#allocation9 + $0x2d8] sm:$0xff]  ;;  %vm9869_vm14 = vcmask 7168   ;;  %vm9871_vm15 = vcmask 15360  }
 0x26d   : > { %958 = vst.msk [vmem:[#allocation2 + $0x18] sm:$0xff] %vm906_vm0, %v954_v59  ;;  %v11723_v2 = vld [vmem:[#allocation9 + $0x2cc] ss:$16 sps:$4 sm:$0xff]   ;;  %v1065_v3 = vld [vmem:[#allocation9 + $0x2e0] sm:$0xff]  ;;  %v1067_v4 = vld [vmem:[#allocation9 + $0x2f0] sm:$0xff]  ;;  %v10224_v5 = vcombine.low %v1061_v61, %v1063_v62  ;;  %v10226_v7 = vcombine.low %v1062_v0, %v1064_v1  ;;  %s11104_s1 = sshll.u32 %s15176_s28, 4 }
 0x26e   : > { %1330 = vmatpush1.bf16.msra.mxu0 %v11689_v30  ;;  %v11725_v6 = vld [vmem:[#allocation9 + $0x2e4] ss:$16 sps:$4 sm:$0xff]   ;;  %v1066_v8 = vld [vmem:[#allocation9 + $0x2e8] sm:$0xff]  ;;  %v1068_v9 = vld [vmem:[#allocation9 + $0x2f8] sm:$0xff]  ;;  %v10228_v12 = vcombine.low %v1065_v3, %v1067_v4  ;;  %s870_s2 = scalar_lea.vmem [#allocation36], %s14287_s24  ;;  %s15199_s6 = sld [smem:[#allocation67_spill]] }
 0x26f   : > { %1403 = vmatpush1.bf16.msra.mxu1 %v11690_v31  ;;  %1331 = vmatprep.subr.bf16.mxu0 %v11691_v32  ;;  %v11727_v10 = vld [vmem:[#allocation9 + $0x2ec] ss:$16 sps:$4 sm:$0xff]   ;;  %v898_v13 = vld [vmem:[%s14291_s30 + $0x20] sm:$0xff]  ;;  %v10230_v15 = vcombine.low %v1066_v8, %v1068_v9  ;;  %v900_v19 = vld [vmem:[%s14291_s30 + $0x30] sm:$0xff]  ;;  %s9890_s4 = sshll.u32 %s870_s2, 4  ;;  %s9878_s8 = scalar_lea.sflag [#allocation8], %s14287_s24  ;;  %s15030_s4 = int_to_ptr.vmem [resolvable:$true] %s9890_s4 }
 0x270   : > { %1404 = vmatprep.subr.bf16.mxu1 %v11693_v33  ;;  %v899_v14 = vld [vmem:[%s14291_s30 + $0x28] sm:$0xff]  ;;  %v11731_v16 = vld [vmem:[#allocation9 + $0x4] ss:$16 sps:$4 sm:$0xff]   ;;  %v901_v20 = vld [vmem:[%s14291_s30 + $0x38] sm:$0xff]  ;;  %s13504_s7 = scalar_lea.vmem %s15030_s4, 16  ;;  %p15200_p7 = scmp.ne.s32.totalorder %s15169_s27, 0 }
 0x271   : > { %v904_v17 = vpack.c.bf16 %v899_v14, %v898_v13  ;;  %v11734_v18 = vld [vmem:[#allocation9 + $0xc] ss:$16 sps:$4 sm:$0xff]   ;;  %v905_v21 = vpack.c.bf16 %v901_v20, %v900_v19  ;;  %v10178_v22 = vld [vmem:[%s14291_s30 + $0x90] sm:$0xff]  ;;  %v10180_v25 = vld [vmem:[%s14291_s30 + $0xa0] sm:$0xff]  ;;  %p13505_p6 = scmp.ne.s32.totalorder %s15030_s4, %s13504_s7  ;;  %s13635_s9 = smov [#allocation36]  }
 0x272   : > { %1332 = vmatpush1.bf16.msra.mxu0 %v11695_v34  ;;  %v10179_v23 = vld [vmem:[%s14291_s30 + $0x98] sm:$0xff]  ;;  %v10181_v26 = vld [vmem:[%s14291_s30 + $0xa8] sm:$0xff]  ;;  %v10182_v28 = vld [vmem:[%s14291_s30 + $0xb0] sm:$0xff]  ;;  %s13508_s19 = sshll.u32 %s13635_s9, 4  ;;  %s13509_s19 = int_to_ptr.vmem [resolvable:$false] %s13508_s19 }
 0x273   : > { %1405 = vmatpush1.bf16.msra.mxu1 %v11696_v35  ;;  %1333 = vmatprep.subr.bf16.mxu0 %v11697_v36  ;;  %909 = vst.msk [vmem:[#allocation2 + $0x30] sm:$0xff] %vm906_vm0, %v904_v17  ;;  %v955_v24 = vpack.c.bf16 %v10179_v23, %v10178_v22  ;;  %910 = vst.msk [vmem:[#allocation2 + $0x40] sm:$0xff] %vm906_vm0, %v905_v21  ;;  %v956_v27 = vpack.c.bf16 %v10181_v26, %v10180_v25  ;;  %v10183_v29 = vld [vmem:[%s14291_s30 + $0xb8] sm:$0xff]  ;;  %v880_v32 = vld [vmem:[#allocation2 + $0x8] sm:$0x80]  ;;  %p13506_p5 = pnand %p13505_p6, %p15200_p7  ;;  %s13510_s5 = scalar_lea.vmem %s13509_s19, 32 }
 0x274   : > { %1406 = vmatprep.subr.bf16.mxu1 %v11699_v37  ;;  %v14350_v11 = vld [vmem:[#allocation2 + $0x18] sm:$0xff]  ;;  %v957_v30 = vpack.c.bf16 %v10183_v29, %v10182_v28  ;;  %vm14371_vm4 = vmand %vm872_vm1, %vm873_vm2  ;;  %v875_v33 = vld [vmem:[#allocation2] sm:$0x80]  ;;  %s15028_s3 = scalar_lea.hbm %s15199_s6, %s11104_s1  ;;  %p13511_p12 = scmp.lt.s32.totalorder %s15030_s4, %s13509_s19 }
 0x275   : > { %10232 = vmatprep.mubr.msk.bf16.mxu0 %vm906_vm0, %v14350_v11  ;;  %10236 = vmatprep.mubr.msk.bf16.mxu1 %vm906_vm0, %v14350_v11  ;;  %959 = vst.msk [vmem:[#allocation2 + $0x28] sm:$0xff] %vm906_vm0, %v955_v24  ;;  %960 = vst.msk [vmem:[#allocation2 + $0x38] sm:$0xff] %vm906_vm0, %v956_v27  ;;  %v876_v35 = vsel %vm14371_vm4, 0, %v875_v33  ;;  %v891_v36 = vld [vmem:[#allocation2 + $0x58] sm:$0x1]  ;;  %v1483_v1 = vshrl.u32 %v14350_v11, 16  ;;  %p13507_p9 = pneg %p13506_p5  ;;  %p13512_p1 = scmp.lt.s32.totalorder %s13510_s5, %s13504_s7 }
 0x276   : > { %1334 = vmatpush1.bf16.msra.mxu0 %v11701_v38  ;;  %961 = vst.msk [vmem:[#allocation2 + $0x48] sm:$0xff] %vm906_vm0, %v957_v30  ;;  %vm879_vm5 = vmand %vm878_vm3, %vm873_vm2  ;;  %v886_v38 = vld [vmem:[#allocation2 + $0x50] sm:$0x1]  ;;  %v11732_v46 = vld [vmem:[#allocation9 + $0x8] ss:$16 sps:$4 sm:$0xff]  }
 0x277   : > { %1407 = vmatpush1.bf16.msra.mxu1 %v11702_v39  ;;  %1335 = vmatprep.subr.bf16.mxu0 %v11703_v40  ;;  %v881_v34 = vsel %vm879_vm5, 0, %v880_v32  ;;  %877 = vst [vmem:[#allocation2] sm:$0x80] %v876_v35  ;;  %vm890_vm9 = vmand %vm889_vm6, %vm884_vm8  ;;  %v11729_v45 = vld [vmem:[#allocation9] ss:$16 sps:$4 sm:$0xff]   ;;  %p13513_p13 = por %p13512_p1, %p13511_p12 }
 0x278   : > { %1408 = vmatprep.subr.bf16.mxu1 %v11705_v41  ;;  %882 = vst [vmem:[#allocation2 + $0x8] sm:$0x80] %v881_v34  ;;  %vm14379_vm10 = vmand %vm883_vm7, %vm884_vm8  ;;  %v892_v39 = vsel %vm890_vm9, 0, %v891_v36  ;;  %v11740_v48 = vld [vmem:[#allocation9 + $0x2c] ss:$16 sps:$4 sm:$0xff]  }
 0x279   : > { %v887_v40 = vsel %vm14379_vm10, 0, %v886_v38  ;;  %893 = vst [vmem:[#allocation2 + $0x58] sm:$0x1] %v892_v39  ;;  %v11738_v52 = vld [vmem:[#allocation9 + $0x28] ss:$16 sps:$4 sm:$0xff]   ;;  %p13514_p0 = pnand %p13513_p13, %p13507_p9 }
 0x27a   : > { %1336 = vmatpush1.bf16.msra.mxu0 %v11707_v42  ;;  %888 = vst [vmem:[#allocation2 + $0x50] sm:$0x1] %v887_v40  ;;  %v11743_v53 = vld [vmem:[#allocation9 + $0x44] ss:$16 sps:$4 sm:$0xff]   ;;  %v11746_v54 = vld [vmem:[#allocation9 + $0x4c] ss:$16 sps:$4 sm:$0xff]  }
 0x27b   : > { %1409 = vmatpush1.bf16.msra.mxu1 %v11708_v43  ;;  %1337 = vmatprep.subr.bf16.mxu0 %v11709_v44  ;;  %v11741_v55 = vld [vmem:[#allocation9 + $0x40] ss:$16 sps:$4 sm:$0xff]   ;;  %v11744_v56 = vld [vmem:[#allocation9 + $0x48] ss:$16 sps:$4 sm:$0xff]   ;;  %v11758_v0 = vld [vmem:[#allocation9 + $0x8c] ss:$16 sps:$4 sm:$0xff]  }
 0x27c   : > { %1410 = vmatprep.subr.bf16.mxu1 %v11711_v47  ;;  %v11737_v47 = vld [vmem:[#allocation9 + $0x24] ss:$16 sps:$4 sm:$0xff]   ;;  %v14399_v61 = vld [vmem:[#allocation2 + $0x38] sm:$0xff]  ;;  %v11759_v8 = vld [vmem:[#allocation9 + $0xa0] ss:$16 sps:$4 sm:$0xff]  }
 0x27d   : > { %v11750_v62 = vld [vmem:[#allocation9 + $0x68] ss:$16 sps:$4 sm:$0xff]   ;;  %v11761_v4 = vld [vmem:[#allocation9 + $0xa4] ss:$16 sps:$4 sm:$0xff]   ;;  %v11770_v14 = vld [vmem:[#allocation9 + $0xcc] ss:$16 sps:$4 sm:$0xff]  }
 0x27e   : > { %1338 = vmatpush1.bf16.msra.mxu0 %v11713_v49  ;;  %v11756_v3 = vld [vmem:[#allocation9 + $0x88] ss:$16 sps:$4 sm:$0xff]   ;;  %v11767_v13 = vld [vmem:[#allocation9 + $0xc4] ss:$16 sps:$4 sm:$0xff]   ;;  %v11765_v17 = vld [vmem:[#allocation9 + $0xc0] ss:$16 sps:$4 sm:$0xff]  }
 0x27f   : > { %1411 = vmatpush1.bf16.msra.mxu1 %v11714_v50  ;;  %1339 = vmatprep.subr.bf16.mxu0 %v11715_v51  ;;  %v14389_v50 = vld [vmem:[#allocation2 + $0x28] sm:$0xff]  ;;  %v11735_v51 = vld [vmem:[#allocation9 + $0x20] ss:$16 sps:$4 sm:$0xff]   ;;  %v11773_v19 = vld [vmem:[#allocation9 + $0xe4] ss:$16 sps:$4 sm:$0xff]  }
 0x280   : > { %1412 = vmatprep.subr.bf16.mxu1 %v11717_v57  ;;  %v11749_v57 = vld [vmem:[#allocation9 + $0x64] ss:$16 sps:$4 sm:$0xff]   ;;  %v11762_v9 = vld [vmem:[#allocation9 + $0xa8] ss:$16 sps:$4 sm:$0xff]   ;;  %v11776_v20 = vld [vmem:[#allocation9 + $0xec] ss:$16 sps:$4 sm:$0xff]  }
 0x281   : > { %v11771_v24 = vld [vmem:[#allocation9 + $0xe0] ss:$16 sps:$4 sm:$0xff]   ;;  %v11774_v25 = vld [vmem:[#allocation9 + $0xe8] ss:$16 sps:$4 sm:$0xff]   ;;  %v11779_v26 = vld [vmem:[#allocation9 + $0x104] ss:$16 sps:$4 sm:$0xff]  }
 0x282   : > { %1340 = vmatpush1.bf16.msra.mxu0 %v11719_v58  ;;  %v11752_v58 = vld [vmem:[#allocation9 + $0x6c] ss:$16 sps:$4 sm:$0xff]   ;;  %v11777_v29 = vld [vmem:[#allocation9 + $0x100] ss:$16 sps:$4 sm:$0xff]   ;;  %v11780_v30 = vld [vmem:[#allocation9 + $0x108] ss:$16 sps:$4 sm:$0xff]  }
 0x283   : > { %1413 = vmatpush1.bf16.msra.mxu1 %v11720_v60  ;;  %1341 = vmatprep.subr.bf16.mxu0 %v11721_v63  ;;  %v11747_v60 = vld [vmem:[#allocation9 + $0x60] ss:$16 sps:$4 sm:$0xff]   ;;  %v11755_v63 = vld [vmem:[#allocation9 + $0x84] ss:$16 sps:$4 sm:$0xff]   ;;  %v11782_v27 = vld [vmem:[#allocation9 + $0x10c] ss:$16 sps:$4 sm:$0xff]  }
 0x284   : > { %1414 = vmatprep.subr.bf16.mxu1 %v11723_v2  ;;  %v11753_v2 = vld [vmem:[#allocation9 + $0x80] ss:$16 sps:$4 sm:$0xff]   ;;  %v11785_v32 = vld [vmem:[#allocation9 + $0x124] ss:$16 sps:$4 sm:$0xff]   ;;  %v11788_v33 = vld [vmem:[#allocation9 + $0x12c] ss:$16 sps:$4 sm:$0xff]  }
 0x285   : > { %v11783_v34 = vld [vmem:[#allocation9 + $0x120] ss:$16 sps:$4 sm:$0xff]   ;;  %v11786_v35 = vld [vmem:[#allocation9 + $0x128] ss:$16 sps:$4 sm:$0xff]   ;;  %v11791_v36 = vld [vmem:[#allocation9 + $0x144] ss:$16 sps:$4 sm:$0xff]  }
 0x286   : > { %1342 = vmatpush1.bf16.msra.mxu0 %v10224_v5  ;;  %v963_v5 = vld [vmem:[#allocation2 + $0x8] sm:$0x80]  ;;  %v962_v39 = vld [vmem:[#allocation2] sm:$0x80] }
 0x287   : > { %1415 = vmatpush1.bf16.msra.mxu1 %v10226_v7  ;;  %1343 = vmatprep.subr.bf16.mxu0 %v11725_v6  ;;  %v11764_v6 = vld [vmem:[#allocation9 + $0xac] ss:$16 sps:$4 sm:$0xff]   ;;  %v1486_v7 = vshll.u32 %v14350_v11, 16  ;;  %v11849_v11 = vld [vmem:[#allocation9 + $0x400] ss:$16 sps:$4 sm:$0xff]  }
 0x288   : > { %1416 = vmatprep.subr.bf16.mxu1 %v11727_v10  ;;  %v11794_v38 = vld [vmem:[#allocation9 + $0x14c] ss:$16 sps:$4 sm:$0xff]  }
 0x28a   : > { %1344 = vmatpush1.bf16.msra.mxu0 %v10228_v12  ;;  %v14411_v12 = vrot.slane %v1483_v1, 7 }
 0x28b   : > { %1417 = vmatpush1.bf16.msra.mxu1 %v10230_v15  ;;  %1791 = vmatprep.subr.bf16.mxu0 %v11731_v16  ;;  %v14415_v15 = vld [vmem:[#allocation2 + $0x48] sm:$0xff]  ;;  %v1480_v16 = vshrl.u32 %v963_v5, 16 }
 0x28c   : > { %1864 = vmatprep.subr.bf16.mxu1 %v11734_v18  ;;  %v11768_v18 = vld [vmem:[#allocation9 + $0xc8] ss:$16 sps:$4 sm:$0xff]   ;;  %v1488_v22 = vor.u32 %v1486_v7, %v14411_v12 }
 0x28d   : > { %v1482_v21 = vrot.slane %v1480_v16, 7 }
 0x28f   : > { %v1489_v28 = vsel %vm884_vm8, %v1482_v21, %v1488_v22  ;;  %v11813_v22 = vld [vmem:[#allocation9 + $0x340] ss:$16 sps:$4 sm:$0xff]  }
 0x2ce   : > { %v929_v41 = vpop.permute.xlu0 %928 }
 0x2cf   : > { %941 = vst.msk [vmem:[#allocation2 + $0x10] sm:$0xff] %vm940_vm11, %v929_v41  ;;  %v11789_v41 = vld [vmem:[#allocation9 + $0x140] ss:$16 sps:$4 sm:$0xff]  }
 0x2d0   : > { %v933_v42 = vpop.permute.xlu1 %932 }
 0x2d1   : > { %943 = vst.msk [vmem:[#allocation2 + $0x30] sm:$0xff] %vm940_vm11, %v933_v42  ;;  %v11792_v42 = vld [vmem:[#allocation9 + $0x148] ss:$16 sps:$4 sm:$0xff]  }
 0x2d2   : > { %v931_v43 = vpop.permute.xlu0 %930 }
 0x2d3   : > { %942 = vst.msk [vmem:[#allocation2 + $0x20] sm:$0xff] %vm940_vm11, %v931_v43  ;;  %v1498_v43 = vshrl.u32 %v14389_v50, 16 }
 0x2d4   : > { %v935_v44 = vpop.permute.xlu1 %934 }
 0x2d5   : > { %944 = vst.msk [vmem:[#allocation2 + $0x40] sm:$0xff] %vm940_vm11, %v935_v44  ;;  %v11797_v44 = vld [vmem:[#allocation9 + $0x164] ss:$16 sps:$4 sm:$0xff]  }
 0x2d6   : > { %v14385_v49 = vld [vmem:[#allocation2 + $0x10] sm:$0xff] }
 0x2d7   : > { %1354 = vmatmul.mubr.bf16.vlgmr.msra.gmra.mrb[0].mxu0 %v14385_v49  ;;  %1427 = vmatmul.mubr.bf16.vlgmr.msra.gmra.mrb[0].mxu1 %v14385_v49  ;;  %v1472_v40 = vshrl.u32 %v14385_v49, 16 }
 0x2d8   : > { %1792 = vmatpush1.bf16.msra.mxu0 %v11729_v45  ;;  %1865 = vmatpush1.bf16.msra.mxu1 %v11732_v46  ;;  %v14407_v10 = vld [vmem:[#allocation2 + $0x30] sm:$0xff]  ;;  %v11800_v45 = vld [vmem:[#allocation9 + $0x16c] ss:$16 sps:$4 sm:$0xff]  }
 0x2d9   : > { %1793 = vmatprep.subr.bf16.mxu0 %v11737_v47  ;;  %1866 = vmatprep.subr.bf16.mxu1 %v11740_v48  ;;  %v1474_v46 = vrot.slane %v1472_v40, 7  ;;  %v11795_v47 = vld [vmem:[#allocation9 + $0x160] ss:$16 sps:$4 sm:$0xff]   ;;  %v11798_v48 = vld [vmem:[#allocation9 + $0x168] ss:$16 sps:$4 sm:$0xff]  }
 0x2da   : > { %10233 = vmatprep.mubr.msk.bf16.mxu0 %vm906_vm0, %v14389_v50  ;;  %10237 = vmatprep.mubr.msk.bf16.mxu1 %vm906_vm0, %v14389_v50  ;;  %v14395_v59 = vld [vmem:[#allocation2 + $0x20] sm:$0xff] }
 0x2dc   : > { %1794 = vmatpush1.bf16.msra.mxu0 %v11735_v51  ;;  %1867 = vmatpush1.bf16.msra.mxu1 %v11738_v52  ;;  %v14424_v23 = vld [vmem:[#allocation2 + $0x40] sm:$0xff]  ;;  %v1468_v51 = vshrl.u32 %v962_v39, 16  ;;  %v1500_v52 = vrot.slane %v1498_v43, 7  ;;  %v11830_v39 = vld [vmem:[#allocation9 + $0x38c] ss:$16 sps:$4 sm:$0xff]  }
 0x2dd   : > { %1795 = vmatprep.subr.bf16.mxu0 %v11743_v53  ;;  %1868 = vmatprep.subr.bf16.mxu1 %v11746_v54  ;;  %v1501_v53 = vshll.u32 %v14389_v50, 16  ;;  %v11803_v54 = vld [vmem:[#allocation9 + $0x304] ss:$16 sps:$4 sm:$0xff]  }
 0x2df   : > { %1364 = vmatmul.mubr.bf16.gmra.mrb[4].mxu0 %v14395_v59  ;;  %1437 = vmatmul.mubr.bf16.gmra.mrb[4].mxu1 %v14395_v59 }
 0x2e0   : > { %1796 = vmatpush1.bf16.msra.mxu0 %v11741_v55  ;;  %1869 = vmatpush1.bf16.msra.mxu1 %v11744_v56  ;;  %v11806_v55 = vld [vmem:[#allocation9 + $0x30c] ss:$16 sps:$4 sm:$0xff]   ;;  %v1475_v56 = vshll.u32 %v14385_v49, 16  ;;  %v11890_v49 = vld [vmem:[#allocation12 + $0x44c] ss:$16 sps:$4 sm:$0xff]  }
 0x2e1   : > { %1797 = vmatprep.subr.bf16.mxu0 %v11749_v57  ;;  %1870 = vmatprep.subr.bf16.mxu1 %v11752_v58  ;;  %v1491_v58 = vshrl.u32 %v14395_v59, 16 }
 0x2e2   : > { %10234 = vmatprep.mubr.msk.bf16.mxu0 %vm906_vm0, %v14399_v61  ;;  %10238 = vmatprep.mubr.msk.bf16.mxu1 %vm906_vm0, %v14399_v61  ;;  %v1477_v57 = vor.u32 %v1475_v56, %v1474_v46 }
 0x2e3   : > { %v1493_v5 = vrot.slane %v1491_v58, 7 }
 0x2e4   : > { %1798 = vmatpush1.bf16.msra.mxu0 %v11747_v60  ;;  %1871 = vmatpush1.bf16.msra.mxu1 %v11750_v62  ;;  %v1470_v60 = vrot.slane %v1468_v51, 7  ;;  %v11801_v62 = vld [vmem:[#allocation9 + $0x300] ss:$16 sps:$4 sm:$0xff]  }
 0x2e5   : > { %1799 = vmatprep.subr.bf16.mxu0 %v11755_v63  ;;  %1872 = vmatprep.subr.bf16.mxu1 %v11758_v0  ;;  %v11804_v63 = vld [vmem:[#allocation9 + $0x308] ss:$16 sps:$4 sm:$0xff]   ;;  %v1513_v0 = vshrl.u32 %v14399_v61, 16 }
 0x2e7   : > { %1374 = vmatmul.mubr.bf16.gmra.mrb[8].mxu0 %v14407_v10  ;;  %1447 = vmatmul.mubr.bf16.gmra.mrb[8].mxu1 %v14407_v10 }
 0x2e8   : > { %1800 = vmatpush1.bf16.msra.mxu0 %v11753_v2  ;;  %1873 = vmatpush1.bf16.msra.mxu1 %v11756_v3  ;;  %v11809_v2 = vld [vmem:[#allocation9 + $0x324] ss:$16 sps:$4 sm:$0xff]   ;;  %v11812_v3 = vld [vmem:[#allocation9 + $0x32c] ss:$16 sps:$4 sm:$0xff]  }
 0x2e9   : > { %1801 = vmatprep.subr.bf16.mxu0 %v11761_v4  ;;  %1874 = vmatprep.subr.bf16.mxu1 %v11764_v6  ;;  %v1503_v4 = vor.u32 %v1501_v53, %v1500_v52  ;;  %v1478_v6 = vsel %vm884_vm8, %v1470_v60, %v1477_v57  ;;  %v11834_v57 = vld [vmem:[#allocation9 + $0x3a8] ss:$16 sps:$4 sm:$0xff]  }
 0x2ea   : > { %10235 = vmatprep.mubr.msk.bf16.mxu0 %vm906_vm0, %v14415_v15  ;;  %10239 = vmatprep.mubr.msk.bf16.mxu1 %vm906_vm0, %v14415_v15 }
 0x2eb   : > { %v1504_v16 = vsel %vm884_vm8, %v14411_v12, %v1503_v4  ;;  %v1528_v12 = vshrl.u32 %v14415_v15, 16  ;;  %v11837_v4 = vld [vmem:[#allocation9 + $0x3c0] ss:$16 sps:$4 sm:$0xff]  }
 0x2ec   : > { %1802 = vmatpush1.bf16.msra.mxu0 %v11759_v8  ;;  %1875 = vmatpush1.bf16.msra.mxu1 %v11762_v9  ;;  %v11807_v8 = vld [vmem:[#allocation9 + $0x320] ss:$16 sps:$4 sm:$0xff]   ;;  %v11810_v9 = vld [vmem:[#allocation9 + $0x328] ss:$16 sps:$4 sm:$0xff]  }
 0x2ed   : > { %1803 = vmatprep.subr.bf16.mxu0 %v11767_v13  ;;  %1876 = vmatprep.subr.bf16.mxu1 %v11770_v14  ;;  %v14450_v13 = vrot.slane %v1513_v0, 7  ;;  %v1516_v14 = vshll.u32 %v14399_v61, 16 }
 0x2ef   : > { %1384 = vmatmul.mubr.bf16.gmra.mrb[12].mxu0 %v14424_v23  ;;  %1457 = vmatmul.mubr.bf16.gmra.mrb[12].mxu1 %v14424_v23 }
 0x2f0   : > { %1804 = vmatpush1.bf16.msra.mxu0 %v11765_v17  ;;  %1877 = vmatpush1.bf16.msra.mxu1 %v11768_v18  ;;  %v11815_v17 = vld [vmem:[#allocation9 + $0x344] ss:$16 sps:$4 sm:$0xff]   ;;  %v11818_v18 = vld [vmem:[#allocation9 + $0x34c] ss:$16 sps:$4 sm:$0xff]  }
 0x2f1   : > { %1805 = vmatprep.subr.bf16.mxu0 %v11773_v19  ;;  %1878 = vmatprep.subr.bf16.mxu1 %v11776_v20  ;;  %v1494_v19 = vshll.u32 %v14395_v59, 16  ;;  %v1506_v20 = vshrl.u32 %v14407_v10, 16  ;;  %v11891_v59 = vld [vmem:[#allocation12 + $0x460] ss:$16 sps:$4 sm:$0xff]  }
 0x2f2   : > { %10288 = vmatprep.mubr.msk.bf16.mxu0 %vm906_vm0, %v1489_v28  ;;  %10292 = vmatprep.mubr.msk.bf16.mxu1 %vm906_vm0, %v1489_v28 }
 0x2f3   : > { %v1496_v21 = vor.u32 %v1494_v19, %v1493_v5  ;;  %v1508_v28 = vrot.slane %v1506_v20, 7 }
 0x2f4   : > { %1806 = vmatpush1.bf16.msra.mxu0 %v11771_v24  ;;  %1879 = vmatpush1.bf16.msra.mxu1 %v11774_v25  ;;  %v11816_v24 = vld [vmem:[#allocation9 + $0x348] ss:$16 sps:$4 sm:$0xff]   ;;  %v11821_v25 = vld [vmem:[#allocation9 + $0x364] ss:$16 sps:$4 sm:$0xff]  }
 0x2f5   : > { %1807 = vmatprep.subr.bf16.mxu0 %v11779_v26  ;;  %1880 = vmatprep.subr.bf16.mxu1 %v11782_v27  ;;  %v11824_v26 = vld [vmem:[#allocation9 + $0x36c] ss:$16 sps:$4 sm:$0xff]   ;;  %v1518_v27 = vor.u32 %v1516_v14, %v14450_v13 }
 0x2f8   : > { %1808 = vmatpush1.bf16.msra.mxu0 %v11777_v29  ;;  %1881 = vmatpush1.bf16.msra.mxu1 %v11780_v30  ;;  %v1509_v29 = vshll.u32 %v14407_v10, 16  ;;  %v1497_v30 = vsel %vm884_vm8, %v1474_v46, %v1496_v21  ;;  %v11833_v46 = vld [vmem:[#allocation9 + $0x3a4] ss:$16 sps:$4 sm:$0xff]   ;;  %v11854_v21 = vld [vmem:[#allocation9 + $0x40c] ss:$16 sps:$4 sm:$0xff]  }
 0x2f9   : > { %1809 = vmatprep.subr.bf16.mxu0 %v11785_v32  ;;  %1882 = vmatprep.subr.bf16.mxu1 %v11788_v33  ;;  %v11819_v32 = vld [vmem:[#allocation9 + $0x360] ss:$16 sps:$4 sm:$0xff]   ;;  %v11822_v33 = vld [vmem:[#allocation9 + $0x368] ss:$16 sps:$4 sm:$0xff]   ;;  %v11903_v10 = vld [vmem:[#allocation12 + $0x4a0] ss:$16 sps:$4 sm:$0xff]  }
 0x2fc   : > { %1810 = vmatpush1.bf16.msra.mxu0 %v11783_v34  ;;  %1883 = vmatpush1.bf16.msra.mxu1 %v11786_v35  ;;  %v1530_v34 = vrot.slane %v1528_v12, 7  ;;  %v1531_v35 = vshll.u32 %v14415_v15, 16 }
 0x2fd   : > { %1811 = vmatprep.subr.bf16.mxu0 %v11791_v36  ;;  %1884 = vmatprep.subr.bf16.mxu1 %v11794_v38  ;;  %v1519_v36 = vsel %vm884_vm8, %v1500_v52, %v1518_v27  ;;  %v11827_v38 = vld [vmem:[#allocation9 + $0x384] ss:$16 sps:$4 sm:$0xff]   ;;  %v1524_v52 = vshll.u32 %v14424_v23, 16 }
 0x2fe   : > { %v11863_v27 = vld [vmem:[#allocation9 + $0x444] ss:$16 sps:$4 sm:$0xff]  }
 0x300   : > { %1812 = vmatpush1.bf16.msra.mxu0 %v11789_v41  ;;  %1885 = vmatpush1.bf16.msra.mxu1 %v11792_v42  ;;  %v1521_v41 = vshrl.u32 %v14424_v23, 16  ;;  %v1511_v42 = vor.u32 %v1509_v29, %v1508_v28  ;;  %v11926_v23 = vld [vmem:[#allocation12 + $0x50c] ss:$16 sps:$4 sm:$0xff]  }
 0x301   : > { %1813 = vmatprep.subr.bf16.mxu0 %v11797_v44  ;;  %1886 = vmatprep.subr.bf16.mxu1 %v11800_v45  ;;  %v11825_v44 = vld [vmem:[#allocation9 + $0x380] ss:$16 sps:$4 sm:$0xff]   ;;  %v11828_v45 = vld [vmem:[#allocation9 + $0x388] ss:$16 sps:$4 sm:$0xff]  }
 0x302   : > { %v1523_v51 = vrot.slane %v1521_v41, 7 }
 0x304   : > { %1814 = vmatpush1.bf16.msra.mxu0 %v11795_v47  ;;  %1887 = vmatpush1.bf16.msra.mxu1 %v11798_v48  ;;  %v11836_v47 = vld [vmem:[#allocation9 + $0x3ac] ss:$16 sps:$4 sm:$0xff]   ;;  %v1533_v48 = vor.u32 %v1531_v35, %v1530_v34 }
 0x305   : > { %2325 = vmatprep.subr.bf16.mxu0 %v11803_v54  ;;  %2398 = vmatprep.subr.bf16.mxu1 %v11806_v55  ;;  %v1512_v54 = vsel %vm884_vm8, %v1493_v5, %v1511_v42  ;;  %v11831_v55 = vld [vmem:[#allocation9 + $0x3a0] ss:$16 sps:$4 sm:$0xff]   ;;  %v11840_v5 = vld [vmem:[#allocation9 + $0x3c8] ss:$16 sps:$4 sm:$0xff]   ;;  %v11872_v34 = vld [vmem:[#allocation9 + $0x46c] ss:$16 sps:$4 sm:$0xff]  }
 0x306   : > { %v1534_v60 = vsel %vm884_vm8, %v14450_v13, %v1533_v48  ;;  %v11878_v42 = vld [vmem:[#allocation12 + $0x40c] ss:$16 sps:$4 sm:$0xff]   ;;  %v11873_v48 = vld [vmem:[#allocation12 + $0x400] ss:$16 sps:$4 sm:$0xff]  }
 0x307   : > { %1824 = vmatmul.mubr.bf16.vlgmr.msra.gmra.mrb[0].mxu0 %v1478_v6  ;;  %1897 = vmatmul.mubr.bf16.vlgmr.msra.gmra.mrb[0].mxu1 %v1478_v6  ;;  %v11845_v6 = vld [vmem:[#allocation9 + $0x3e4] ss:$16 sps:$4 sm:$0xff]  }
 0x308   : > { %2326 = vmatpush1.bf16.msra.mxu0 %v11801_v62  ;;  %2399 = vmatpush1.bf16.msra.mxu1 %v11804_v63  ;;  %v11839_v62 = vld [vmem:[#allocation9 + $0x3c4] ss:$16 sps:$4 sm:$0xff]   ;;  %v11842_v63 = vld [vmem:[#allocation9 + $0x3cc] ss:$16 sps:$4 sm:$0xff]  }
 0x309   : > { %2327 = vmatprep.subr.bf16.mxu0 %v11809_v2  ;;  %2400 = vmatprep.subr.bf16.mxu1 %v11812_v3  ;;  %v2014_v2 = vrot.slane %v1486_v7, 1  ;;  %v1526_v3 = vor.u32 %v1524_v52, %v1523_v51  ;;  %v2019_v7 = vrot.slane %v1501_v53, 1  ;;  %v11857_v53 = vld [vmem:[#allocation9 + $0x424] ss:$16 sps:$4 sm:$0xff]   ;;  %v11876_v51 = vld [vmem:[#allocation12 + $0x408] ss:$16 sps:$4 sm:$0xff]  }
 0x30a   : > { %10289 = vmatprep.mubr.msk.bf16.mxu0 %vm906_vm0, %v1504_v16  ;;  %10293 = vmatprep.mubr.msk.bf16.mxu1 %vm906_vm0, %v1504_v16  ;;  %v11843_v16 = vld [vmem:[#allocation9 + $0x3e0] ss:$16 sps:$4 sm:$0xff]  }
 0x30b   : > { %v1527_v13 = vsel %vm884_vm8, %v1508_v28, %v1526_v3  ;;  %v11866_v28 = vld [vmem:[#allocation9 + $0x44c] ss:$16 sps:$4 sm:$0xff]   ;;  %v11885_v3 = vld [vmem:[#allocation12 + $0x440] ss:$16 sps:$4 sm:$0xff]  }
 0x30c   : > { %2328 = vmatpush1.bf16.msra.mxu0 %v11807_v8  ;;  %2401 = vmatpush1.bf16.msra.mxu1 %v11810_v9  ;;  %v11848_v8 = vld [vmem:[#allocation9 + $0x3ec] ss:$16 sps:$4 sm:$0xff]   ;;  %v2015_v9 = vor.u32 %v2014_v2, %v1483_v1  ;;  %v11852_v1 = vld [vmem:[#allocation9 + $0x408] ss:$16 sps:$4 sm:$0xff]   ;;  %v2027_v2 = vrot.slane %v1509_v29, 1 }
 0x30d   : > { %2329 = vmatprep.subr.bf16.mxu0 %v11815_v17  ;;  %2402 = vmatprep.subr.bf16.mxu1 %v11818_v18  ;;  %v11846_v17 = vld [vmem:[#allocation9 + $0x3e8] ss:$16 sps:$4 sm:$0xff]   ;;  %v11851_v18 = vld [vmem:[#allocation9 + $0x404] ss:$16 sps:$4 sm:$0xff]  }
 0x30e   : > { %v11899_v29 = vld [vmem:[#allocation12 + $0x484] ss:$16 sps:$4 sm:$0xff]  }
 0x30f   : > { %1834 = vmatmul.mubr.bf16.gmra.mrb[4].mxu0 %v1497_v30  ;;  %1907 = vmatmul.mubr.bf16.gmra.mrb[4].mxu1 %v1497_v30  ;;  %v11861_v30 = vld [vmem:[#allocation9 + $0x440] ss:$16 sps:$4 sm:$0xff]  }
 0x310   : > { %2330 = vmatpush1.bf16.msra.mxu0 %v11813_v22  ;;  %2403 = vmatpush1.bf16.msra.mxu1 %v11816_v24  ;;  %v2020_v22 = vsel %vm1996_vm12, %v2015_v9, %v2019_v7  ;;  %v11860_v24 = vld [vmem:[#allocation9 + $0x42c] ss:$16 sps:$4 sm:$0xff]  }
 0x311   : > { %2331 = vmatprep.subr.bf16.mxu0 %v11821_v25  ;;  %2404 = vmatprep.subr.bf16.mxu1 %v11824_v26  ;;  %v11855_v25 = vld [vmem:[#allocation9 + $0x420] ss:$16 sps:$4 sm:$0xff]   ;;  %v11858_v26 = vld [vmem:[#allocation9 + $0x428] ss:$16 sps:$4 sm:$0xff]  }
 0x312   : > { %10290 = vmatprep.mubr.msk.bf16.mxu0 %vm906_vm0, %v1519_v36  ;;  %10294 = vmatprep.mubr.msk.bf16.mxu1 %vm906_vm0, %v1519_v36  ;;  %v11867_v36 = vld [vmem:[#allocation9 + $0x460] ss:$16 sps:$4 sm:$0xff]  }
 0x314   : > { %2332 = vmatpush1.bf16.msra.mxu0 %v11819_v32  ;;  %2405 = vmatpush1.bf16.msra.mxu1 %v11822_v33  ;;  %v11864_v32 = vld [vmem:[#allocation9 + $0x448] ss:$16 sps:$4 sm:$0xff]   ;;  %v11869_v33 = vld [vmem:[#allocation9 + $0x464] ss:$16 sps:$4 sm:$0xff]  }
 0x315   : > { %2333 = vmatprep.subr.bf16.mxu0 %v11827_v38  ;;  %2406 = vmatprep.subr.bf16.mxu1 %v11830_v39  ;;  %v11870_v38 = vld [vmem:[#allocation9 + $0x468] ss:$16 sps:$4 sm:$0xff]  }
 0x316   : > { %v11875_v39 = vld [vmem:[#allocation12 + $0x404] ss:$16 sps:$4 sm:$0xff]  }
 0x317   : > { %1844 = vmatmul.mubr.bf16.gmra.mrb[8].mxu0 %v1512_v54  ;;  %1917 = vmatmul.mubr.bf16.gmra.mrb[8].mxu1 %v1512_v54 }
 0x318   : > { %2334 = vmatpush1.bf16.msra.mxu0 %v11825_v44  ;;  %2407 = vmatpush1.bf16.msra.mxu1 %v11828_v45  ;;  %v2002_v44 = vrot.slane %v1475_v56, 1  ;;  %v2031_v45 = vor.u32 %v2019_v7, %v1498_v43  ;;  %v11884_v56 = vld [vmem:[#allocation12 + $0x42c] ss:$16 sps:$4 sm:$0xff]   ;;  %v11879_v43 = vld [vmem:[#allocation12 + $0x420] ss:$16 sps:$4 sm:$0xff]  }
 0x319   : > { %2335 = vmatprep.subr.bf16.mxu0 %v11833_v46  ;;  %2408 = vmatprep.subr.bf16.mxu1 %v11836_v47  ;;  %v2035_v46 = vrot.slane %v1516_v14, 1  ;;  %v2007_v47 = vrot.slane %v1494_v19, 1  ;;  %v11882_v14 = vld [vmem:[#allocation12 + $0x428] ss:$16 sps:$4 sm:$0xff]   ;;  %v1946_v19 = vld [vmem:[#allocation2 + $0x58] sm:$0x1] }
 0x31a   : > { %10291 = vmatprep.mubr.msk.bf16.mxu0 %vm906_vm0, %v1534_v60  ;;  %10295 = vmatprep.mubr.msk.bf16.mxu1 %vm906_vm0, %v1534_v60  ;;  %v2003_v54 = vor.u32 %v2002_v44, %v1472_v40  ;;  %v11887_v60 = vld [vmem:[#allocation12 + $0x444] ss:$16 sps:$4 sm:$0xff]   ;;  %v11927_v44 = vld [vmem:[#allocation12 + $0x520] ss:$16 sps:$4 sm:$0xff]  }
 0x31b   : > { %v2047_v40 = vor.u32 %v2035_v46, %v1513_v0  ;;  %v2065_v0 = vshll.u32 %v1946_v19, 16  ;;  %v11948_v19 = vld [vmem:[#allocation12 + $0x588] ss:$16 sps:$4 sm:$0xff]  }
 0x31c   : > { %2336 = vmatpush1.bf16.msra.mxu0 %v11831_v55  ;;  %2409 = vmatpush1.bf16.msra.mxu1 %v11834_v57  ;;  %v11881_v55 = vld [vmem:[#allocation12 + $0x424] ss:$16 sps:$4 sm:$0xff]   ;;  %v2036_v57 = vsel %vm1996_vm12, %v2031_v45, %v2035_v46  ;;  %v2008_v50 = vsel %vm1996_vm12, %v2003_v54, %v2007_v47  ;;  %v11930_v45 = vld [vmem:[#allocation12 + $0x528] ss:$16 sps:$4 sm:$0xff]  }
 0x31d   : > { %2337 = vmatprep.subr.bf16.mxu0 %v11839_v62  ;;  %2410 = vmatprep.subr.bf16.mxu1 %v11842_v63  ;;  %v2051_v62 = vrot.slane %v1531_v35, 1  ;;  %v2023_v63 = vor.u32 %v2007_v47, %v1491_v58  ;;  %v11894_v58 = vld [vmem:[#allocation12 + $0x468] ss:$16 sps:$4 sm:$0xff]   ;;  %v2067_v7 = vrot.slane %v2065_v0, 1  ;;  %v11935_v46 = vld [vmem:[#allocation12 + $0x544] ss:$16 sps:$4 sm:$0xff]  }
 0x31e   : > { %v11938_v47 = vld [vmem:[#allocation12 + $0x54c] ss:$16 sps:$4 sm:$0xff]   ;;  %v11941_v54 = vld [vmem:[#allocation12 + $0x564] ss:$16 sps:$4 sm:$0xff]   ;;  %v11966_v0 = vld [vmem:[#allocation12 + $0x5e8] ss:$16 sps:$4 sm:$0xff]  }
 0x31f   : > { %1854 = vmatmul.mubr.bf16.gmra.mrb[12].mxu0 %v1527_v13  ;;  %1927 = vmatmul.mubr.bf16.gmra.mrb[12].mxu1 %v1527_v13  ;;  %v2052_v61 = vsel %vm1996_vm12, %v2047_v40, %v2051_v62  ;;  %v2028_v35 = vsel %vm1996_vm12, %v2023_v63, %v2027_v2  ;;  %v2063_v9 = vor.u32 %v2051_v62, %v1528_v12  ;;  %v1945_v13 = vld [vmem:[#allocation2 + $0x50] sm:$0x1]  ;;  %v11951_v40 = vld [vmem:[#allocation12 + $0x5a0] ss:$16 sps:$4 sm:$0xff]   ;;  %v11954_v62 = vld [vmem:[#allocation12 + $0x5a8] ss:$16 sps:$4 sm:$0xff]  }
 0x320   : > { %2338 = vmatpush1.bf16.msra.mxu0 %v11837_v4  ;;  %2411 = vmatpush1.bf16.msra.mxu1 %v11840_v5  ;;  %v11888_v4 = vld [vmem:[#allocation12 + $0x448] ss:$16 sps:$4 sm:$0xff]   ;;  %v11893_v5 = vld [vmem:[#allocation12 + $0x464] ss:$16 sps:$4 sm:$0xff]   ;;  %v2057_v12 = vshll.u32 %v1945_v13, 16 }
 0x321   : > { %2339 = vmatprep.subr.bf16.mxu0 %v11845_v6  ;;  %2412 = vmatprep.subr.bf16.mxu1 %v11848_v8  ;;  %v11896_v6 = vld [vmem:[#allocation12 + $0x46c] ss:$16 sps:$4 sm:$0xff]   ;;  %v11959_v63 = vld [vmem:[#allocation12 + $0x5c4] ss:$16 sps:$4 sm:$0xff]  }
 0x322   : > { %10344 = vmatprep.mubr.msk.bf16.mxu0 %vm906_vm0, %v2020_v22  ;;  %10348 = vmatprep.mubr.msk.bf16.mxu1 %vm906_vm0, %v2020_v22  ;;  %v11902_v8 = vld [vmem:[#allocation12 + $0x48c] ss:$16 sps:$4 sm:$0xff]   ;;  %v11905_v22 = vld [vmem:[#allocation12 + $0x4a4] ss:$16 sps:$4 sm:$0xff]  }
 0x324   : > { %2340 = vmatpush1.bf16.msra.mxu0 %v11843_v16  ;;  %2413 = vmatpush1.bf16.msra.mxu1 %v11846_v17  ;;  %v2039_v16 = vor.u32 %v2027_v2, %v1506_v20  ;;  %v2043_v17 = vrot.slane %v1524_v52, 1  ;;  %v11906_v20 = vld [vmem:[#allocation12 + $0x4a8] ss:$16 sps:$4 sm:$0xff]   ;;  %v11911_v52 = vld [vmem:[#allocation12 + $0x4c4] ss:$16 sps:$4 sm:$0xff]  }
 0x325   : > { %2341 = vmatprep.subr.bf16.mxu0 %v11851_v18  ;;  %2414 = vmatprep.subr.bf16.mxu1 %v11854_v21  ;;  %v11897_v18 = vld [vmem:[#allocation12 + $0x480] ss:$16 sps:$4 sm:$0xff]   ;;  %v11900_v21 = vld [vmem:[#allocation12 + $0x488] ss:$16 sps:$4 sm:$0xff]   ;;  %v11962_v2 = vld [vmem:[#allocation12 + $0x5cc] ss:$16 sps:$4 sm:$0xff]  }
 0x326   : > { %v2044_v15 = vsel %vm1996_vm12, %v2039_v16, %v2043_v17  ;;  %v2611_v16 = vld [vmem:[#allocation3 + $0x10] sm:$0x80] }
 0x328   : > { %2342 = vmatpush1.bf16.msra.mxu0 %v11849_v11  ;;  %2415 = vmatpush1.bf16.msra.mxu1 %v11852_v1  ;;  %v11908_v11 = vld [vmem:[#allocation12 + $0x4ac] ss:$16 sps:$4 sm:$0xff]   ;;  %v2068_v1 = vsel %vm1996_vm12, %v2063_v9, %v2067_v7  ;;  %v2614_v7 = vld [vmem:[#allocation3 + $0x18] sm:$0x80] }
 0x329   : > { %2343 = vmatprep.subr.bf16.mxu0 %v11857_v53  ;;  %2416 = vmatprep.subr.bf16.mxu1 %v11860_v24  ;;  %v11914_v53 = vld [vmem:[#allocation12 + $0x4cc] ss:$16 sps:$4 sm:$0xff]   ;;  %v2055_v24 = vor.u32 %v2043_v17, %v1521_v41  ;;  %v11921_v41 = vld [vmem:[#allocation12 + $0x500] ss:$16 sps:$4 sm:$0xff]   ;;  %v2615_v13 = vsel %vm14371_vm4, 0, %v2614_v7  ;;  %v2612_v17 = vsel %vm14371_vm4, 0, %v2611_v16 }
 0x32a   : > { %2616 = vst [vmem:[#allocation3 + $0x18] sm:$0x80] %v2615_v13  ;;  %2613 = vst [vmem:[#allocation3 + $0x10] sm:$0x80] %v2612_v17 }
 0x32c   : > { %2344 = vmatpush1.bf16.msra.mxu0 %v11855_v25  ;;  %2417 = vmatpush1.bf16.msra.mxu1 %v11858_v26  ;;  %v2059_v25 = vrot.slane %v2057_v12, 1  ;;  %v11909_v26 = vld [vmem:[#allocation12 + $0x4c0] ss:$16 sps:$4 sm:$0xff]  }
 0x32d   : > { %2345 = vmatprep.subr.bf16.mxu0 %v11863_v27  ;;  %2418 = vmatprep.subr.bf16.mxu1 %v11866_v28  ;;  %v11912_v27 = vld [vmem:[#allocation12 + $0x4c8] ss:$16 sps:$4 sm:$0xff]   ;;  %v11917_v28 = vld [vmem:[#allocation12 + $0x4e4] ss:$16 sps:$4 sm:$0xff]  }
 0x330   : > { %2346 = vmatpush1.bf16.msra.mxu0 %v11861_v30  ;;  %2419 = vmatpush1.bf16.msra.mxu1 %v11864_v32  ;;  %v11920_v30 = vld [vmem:[#allocation12 + $0x4ec] ss:$16 sps:$4 sm:$0xff]   ;;  %v2060_v32 = vsel %vm1996_vm12, %v2055_v24, %v2059_v25 }
 0x331   : > { %2347 = vmatprep.subr.bf16.mxu0 %v11869_v33  ;;  %2420 = vmatprep.subr.bf16.mxu1 %v11872_v34  ;;  %v11915_v33 = vld [vmem:[#allocation12 + $0x4e0] ss:$16 sps:$4 sm:$0xff]   ;;  %v11918_v34 = vld [vmem:[#allocation12 + $0x4e8] ss:$16 sps:$4 sm:$0xff]   ;;  %v2503_v25 = vld [vmem:[#allocation11] sm:$0xf] }
 0x334   : > { %2348 = vmatpush1.bf16.msra.mxu0 %v11867_v36  ;;  %2421 = vmatpush1.bf16.msra.mxu1 %v11870_v38  ;;  %v11923_v36 = vld [vmem:[#allocation12 + $0x504] ss:$16 sps:$4 sm:$0xff]   ;;  %v11924_v38 = vld [vmem:[#allocation12 + $0x508] ss:$16 sps:$4 sm:$0xff]  }
 0x335   : > { %3562 = vmatprep.subr.bf16.mxu0 %v11875_v39  ;;  %3708 = vmatprep.subr.bf16.mxu1 %v11878_v42  ;;  %v11929_v39 = vld [vmem:[#allocation12 + $0x524] ss:$16 sps:$4 sm:$0xff]   ;;  %v11932_v42 = vld [vmem:[#allocation12 + $0x52c] ss:$16 sps:$4 sm:$0xff]  }
 0x337   : > { %2358 = vmatmul.mubr.bf16.vlgmr.msra.gmra.mrb[0].mxu0 %v2008_v50  ;;  %2431 = vmatmul.mubr.bf16.vlgmr.msra.gmra.mrb[0].mxu1 %v2008_v50  ;;  %v11947_v50 = vld [vmem:[#allocation12 + $0x584] ss:$16 sps:$4 sm:$0xff]  }
 0x338   : > { %10345 = vmatprep.mubr.msk.bf16.mxu0 %vm906_vm0, %v2036_v57  ;;  %10349 = vmatprep.mubr.msk.bf16.mxu1 %vm906_vm0, %v2036_v57  ;;  %v11942_v57 = vld [vmem:[#allocation12 + $0x568] ss:$16 sps:$4 sm:$0xff]  }
 0x339   : > { %3563 = vmatpush1.bf16.msra.mxu0 %v11873_v48  ;;  %3709 = vmatpush1.bf16.msra.mxu1 %v11876_v51  ;;  %v11933_v48 = vld [vmem:[#allocation12 + $0x540] ss:$16 sps:$4 sm:$0xff]   ;;  %v11936_v51 = vld [vmem:[#allocation12 + $0x548] ss:$16 sps:$4 sm:$0xff]  }
 0x33a   : > { %3564 = vmatprep.subr.bf16.mxu0 %v11881_v55  ;;  %3710 = vmatprep.subr.bf16.mxu1 %v11884_v56  ;;  %v11944_v55 = vld [vmem:[#allocation12 + $0x56c] ss:$16 sps:$4 sm:$0xff]   ;;  %v11939_v56 = vld [vmem:[#allocation12 + $0x560] ss:$16 sps:$4 sm:$0xff]  }
 0x33d   : > { %3565 = vmatpush1.bf16.msra.mxu0 %v11879_v43  ;;  %3711 = vmatpush1.bf16.msra.mxu1 %v11882_v14  ;;  %v11950_v43 = vld [vmem:[#allocation12 + $0x58c] ss:$16 sps:$4 sm:$0xff]   ;;  %v11945_v14 = vld [vmem:[#allocation12 + $0x580] ss:$16 sps:$4 sm:$0xff]  }
 0x33e   : > { %3566 = vmatprep.subr.bf16.mxu0 %v11887_v60  ;;  %3712 = vmatprep.subr.bf16.mxu1 %v11890_v49  ;;  %v11953_v60 = vld [vmem:[#allocation12 + $0x5a4] ss:$16 sps:$4 sm:$0xff]   ;;  %v11956_v49 = vld [vmem:[#allocation12 + $0x5ac] ss:$16 sps:$4 sm:$0xff]  }
 0x33f   : > { %2368 = vmatmul.mubr.bf16.gmra.mrb[4].mxu0 %v2028_v35  ;;  %2441 = vmatmul.mubr.bf16.gmra.mrb[4].mxu1 %v2028_v35  ;;  %v11971_v35 = vld [vmem:[#allocation12 + $0x604] ss:$16 sps:$4 sm:$0xff]  }
 0x340   : > { %10346 = vmatprep.mubr.msk.bf16.mxu0 %vm906_vm0, %v2052_v61  ;;  %10350 = vmatprep.mubr.msk.bf16.mxu1 %vm906_vm0, %v2052_v61  ;;  %v11963_v61 = vld [vmem:[#allocation12 + $0x5e0] ss:$16 sps:$4 sm:$0xff]  }
 0x341   : > { %3567 = vmatpush1.bf16.msra.mxu0 %v11885_v3  ;;  %3713 = vmatpush1.bf16.msra.mxu1 %v11888_v4  ;;  %v11957_v3 = vld [vmem:[#allocation12 + $0x5c0] ss:$16 sps:$4 sm:$0xff]   ;;  %v11960_v4 = vld [vmem:[#allocation12 + $0x5c8] ss:$16 sps:$4 sm:$0xff]  }
 0x342   : > { %3568 = vmatprep.subr.bf16.mxu0 %v11893_v5  ;;  %3714 = vmatprep.subr.bf16.mxu1 %v11896_v6  ;;  %v11965_v5 = vld [vmem:[#allocation12 + $0x5e4] ss:$16 sps:$4 sm:$0xff]   ;;  %v11968_v6 = vld [vmem:[#allocation12 + $0x5ec] ss:$16 sps:$4 sm:$0xff]  }
 0x345   : > { %3569 = vmatpush1.bf16.msra.mxu0 %v11891_v59  ;;  %3715 = vmatpush1.bf16.msra.mxu1 %v11894_v58  ;;  %v11974_v59 = vld [vmem:[#allocation12 + $0x60c] ss:$16 sps:$4 sm:$0xff]   ;;  %v2608_v58 = vld [vmem:[#allocation3 + $0x8] sm:$0x80] }
 0x346   : > { %3570 = vmatprep.subr.bf16.mxu0 %v11899_v29  ;;  %3716 = vmatprep.subr.bf16.mxu1 %v11902_v8  ;;  %v2609_v29 = vsel %vm14371_vm4, 0, %v2608_v58  ;;  %v2605_v8 = vld [vmem:[#allocation3] sm:$0x80] }
 0x347   : > { %2378 = vmatmul.mubr.bf16.gmra.mrb[8].mxu0 %v2044_v15  ;;  %2451 = vmatmul.mubr.bf16.gmra.mrb[8].mxu1 %v2044_v15  ;;  %2610 = vst [vmem:[#allocation3 + $0x8] sm:$0x80] %v2609_v29  ;;  %v2606_v9 = vsel %vm14371_vm4, 0, %v2605_v8  ;;  %v2626_v15 = vld [vmem:[#allocation3 + $0xb8] sm:$0x1] }
 0x348   : > { %10347 = vmatprep.mubr.msk.bf16.mxu0 %vm906_vm0, %v2068_v1  ;;  %10351 = vmatprep.mubr.msk.bf16.mxu1 %vm906_vm0, %v2068_v1  ;;  %2607 = vst [vmem:[#allocation3] sm:$0x80] %v2606_v9  ;;  %v2623_v1 = vld [vmem:[#allocation3 + $0xb0] sm:$0x1] }
 0x349   : > { %3571 = vmatpush1.bf16.msra.mxu0 %v11897_v18  ;;  %3717 = vmatpush1.bf16.msra.mxu1 %v11900_v21  ;;  %v2617_v18 = vld [vmem:[#allocation3 + $0xa0] sm:$0x1]  ;;  %v2620_v21 = vld [vmem:[#allocation3 + $0xa8] sm:$0x1]  ;;  %v2624_v12 = vsel %vm14379_vm10, 0, %v2623_v1 }
 0x34a   : > { %3572 = vmatprep.subr.bf16.mxu0 %v11905_v22  ;;  %3718 = vmatprep.subr.bf16.mxu1 %v11908_v11  ;;  %v2618_v22 = vsel %vm14379_vm10, 0, %v2617_v18  ;;  %v2621_v11 = vsel %vm14379_vm10, 0, %v2620_v21  ;;  %2625 = vst [vmem:[#allocation3 + $0xb0] sm:$0x1] %v2624_v12  ;;  %v11980_v8 = vld [vmem:[#allocation12 + $0x62c] ss:$16 sps:$4 sm:$0xff]  }
 0x34b   : > { %2619 = vst [vmem:[#allocation3 + $0xa0] sm:$0x1] %v2618_v22  ;;  %2622 = vst [vmem:[#allocation3 + $0xa8] sm:$0x1] %v2621_v11  ;;  %v11978_v12 = vld [vmem:[#allocation12 + $0x628] ss:$16 sps:$4 sm:$0xff]  }
 0x34d   : > { %3573 = vmatpush1.bf16.msra.mxu0 %v11903_v10  ;;  %3719 = vmatpush1.bf16.msra.mxu1 %v11906_v20  ;;  %v2627_v10 = vsel %vm14379_vm10, 0, %v2626_v15  ;;  %v2505_v20 = vlaneseq  ;;  %v11975_v15 = vld [vmem:[#allocation12 + $0x620] ss:$16 sps:$4 sm:$0xff]  }
 0x34e   : > { %3574 = vmatprep.subr.bf16.mxu0 %v11911_v52  ;;  %3720 = vmatprep.subr.bf16.mxu1 %v11914_v53  ;;  %2628 = vst [vmem:[#allocation3 + $0xb8] sm:$0x1] %v2627_v10  ;;  %v11983_v10 = vld [vmem:[#allocation12 + $0x644] ss:$16 sps:$4 sm:$0xff]  }
 0x34f   : > { %2388 = vmatmul.mubr.bf16.gmra.mrb[12].mxu0 %v2060_v32  ;;  %2461 = vmatmul.mubr.bf16.gmra.mrb[12].mxu1 %v2060_v32  ;;  %v14555_v52 = vshrl.u32 %v2505_v20, 7 }
 0x351   : > { %3575 = vmatpush1.bf16.msra.mxu0 %v11909_v26  ;;  %3721 = vmatpush1.bf16.msra.mxu1 %v11912_v27  ;;  %v14558_v53 = vsub.s32 0, %v14555_v52  ;;  %v2515_v24 = vsub.s32 2, %v14555_v52  ;;  %v14562_v26 = vsub.s32 1, %v14555_v52  ;;  %v2519_v27 = vsub.s32 3, %v14555_v52 }
 0x352   : > { %3576 = vmatprep.subr.bf16.mxu0 %v11917_v28  ;;  %3722 = vmatprep.subr.bf16.mxu1 %v11920_v30 }
 0x353   : > { %v14566_v28 = vrot.slane %v2503_v25, %v14558_v53  ;;  %v14570_v30 = vrot.slane %v2503_v25, %v2515_v24  ;;  %v14573_v32 = vrot.slane %v2503_v25, %v14562_v26 }
 0x355   : > { %3577 = vmatpush1.bf16.msra.mxu0 %v11915_v33  ;;  %3723 = vmatpush1.bf16.msra.mxu1 %v11918_v34  ;;  %v14577_v33 = vrot.slane %v2503_v25, %v2519_v27 }
 0x356   : > { %3578 = vmatprep.subr.bf16.mxu0 %v11923_v36  ;;  %3724 = vmatprep.subr.bf16.mxu1 %v11926_v23 }
 0x359   : > { %3579 = vmatpush1.bf16.msra.mxu0 %v11921_v41  ;;  %3725 = vmatpush1.bf16.msra.mxu1 %v11924_v38 }
 0x35a   : > { %3580 = vmatprep.subr.bf16.mxu0 %v11929_v39  ;;  %3726 = vmatprep.subr.bf16.mxu1 %v11932_v42 }
 0x35d   : > { %3581 = vmatpush1.bf16.msra.mxu0 %v11927_v44  ;;  %3727 = vmatpush1.bf16.msra.mxu1 %v11930_v45 }
 0x35e   : > { %3582 = vmatprep.subr.bf16.mxu0 %v11935_v46  ;;  %3728 = vmatprep.subr.bf16.mxu1 %v11938_v47 }
 0x361   : > { %3583 = vmatpush1.bf16.msra.mxu0 %v11933_v48  ;;  %3729 = vmatpush1.bf16.msra.mxu1 %v11936_v51 }
 0x362   : > { %3584 = vmatprep.subr.bf16.mxu0 %v11941_v54  ;;  %3730 = vmatprep.subr.bf16.mxu1 %v11944_v55 }
 0x365   : > { %3585 = vmatpush1.bf16.msra.mxu0 %v11939_v56  ;;  %3731 = vmatpush1.bf16.msra.mxu1 %v11942_v57 }
 0x366   : > { %3586 = vmatprep.subr.bf16.mxu0 %v11947_v50  ;;  %3732 = vmatprep.subr.bf16.mxu1 %v11950_v43 }
 0x369   : > { %3587 = vmatpush1.bf16.msra.mxu0 %v11945_v14  ;;  %3733 = vmatpush1.bf16.msra.mxu1 %v11948_v19 }
 0x36a   : > { %3588 = vmatprep.subr.bf16.mxu0 %v11953_v60  ;;  %3734 = vmatprep.subr.bf16.mxu1 %v11956_v49 }
 0x36d   : > { %3589 = vmatpush1.bf16.msra.mxu0 %v11951_v40  ;;  %3735 = vmatpush1.bf16.msra.mxu1 %v11954_v62  ;;  %v11969_v62 = vld [vmem:[#allocation12 + $0x600] ss:$16 sps:$4 sm:$0xff]  }
 0x36e   : > { %3590 = vmatprep.subr.bf16.mxu0 %v11959_v63  ;;  %3736 = vmatprep.subr.bf16.mxu1 %v11962_v2  ;;  %v11972_v63 = vld [vmem:[#allocation12 + $0x608] ss:$16 sps:$4 sm:$0xff]  }
 0x371   : > { %3591 = vmatpush1.bf16.msra.mxu0 %v11957_v3  ;;  %3737 = vmatpush1.bf16.msra.mxu1 %v11960_v4  ;;  %v11977_v4 = vld [vmem:[#allocation12 + $0x624] ss:$16 sps:$4 sm:$0xff]  }
 0x372   : > { %3592 = vmatprep.subr.bf16.mxu0 %v11965_v5  ;;  %3738 = vmatprep.subr.bf16.mxu1 %v11968_v6 }
 0x375   : > { %3593 = vmatpush1.bf16.msra.mxu0 %v11963_v61  ;;  %3739 = vmatpush1.bf16.msra.mxu1 %v11966_v0 }
 0x376   : > { %3635 = vmatprep.subr.bf16.mxu0 %v11971_v35  ;;  %3781 = vmatprep.subr.bf16.mxu1 %v11974_v59 }
 0x40a   : > { %v2359_v34 = vpop.f32.mrb[0].mxu0  ;;  %v2432_v36 = vpop.f32.mrb[0].mxu1 }
 0x40b   : > { %v2525_v23 = vadd.f32 %v14566_v28, %v2359_v34  ;;  %v2527_v41 = vadd.f32 %v14570_v30, %v2432_v36  ;;  %v2361_v38 = vpop.f32.mrb[1].mxu0  ;;  %v2434_v39 = vpop.f32.mrb[1].mxu1 }
 0x40c   : > { %v2526_v42 = vadd.f32 %v14573_v32, %v2361_v38  ;;  %v2528_v44 = vadd.f32 %v14577_v33, %v2434_v39  ;;  %v2363_v45 = vpop.f32.mrb[2].mxu0  ;;  %v2436_v46 = vpop.f32.mrb[2].mxu1 }
 0x40d   : > { %v2529_v47 = vadd.f32 %v14566_v28, %v2363_v45  ;;  %v2531_v48 = vadd.f32 %v14570_v30, %v2436_v46  ;;  %v2365_v51 = vpop.f32.mrb[3].mxu0  ;;  %v2438_v54 = vpop.f32.mrb[3].mxu1  ;;  %v2557_v57 = vmax.f32 %v2525_v23, 0.0  ;;  %v2559_v50 = vmax.f32 %v2527_v41, 0.0  ;;  %v11986_v23 = vld [vmem:[#allocation12 + $0x64c] ss:$16 sps:$4 sm:$0xff]  }
 0x40e   : > { %v2530_v55 = vadd.f32 %v14573_v32, %v2365_v51  ;;  %v2532_v56 = vadd.f32 %v14577_v33, %v2438_v54  ;;  %v2558_v19 = vmax.f32 %v2526_v42, 0.0  ;;  %v2560_v60 = vmax.f32 %v2528_v44, 0.0  ;;  %v11981_v54 = vld [vmem:[#allocation12 + $0x640] ss:$16 sps:$4 sm:$0xff]  }
 0x40f   : > { %v2561_v43 = vmax.f32 %v2529_v47, 0.0  ;;  %v2563_v14 = vmax.f32 %v2531_v48, 0.0 }
 0x410   : > { %v2562_v49 = vmax.f32 %v2530_v55, 0.0  ;;  %v2564_v40 = vmax.f32 %v2532_v56, 0.0  ;;  %v11984_v55 = vld [vmem:[#allocation12 + $0x648] ss:$16 sps:$4 sm:$0xff]  }
 0x411   : > { %v14587_v2 = vpack.c.bf16 %v2561_v43, %v2557_v57  ;;  %v14589_v3 = vpack.c.bf16 %v2563_v14, %v2559_v50  ;;  %v11989_v14 = vld [vmem:[#allocation12 + $0x664] ss:$16 sps:$4 sm:$0xff]  }
 0x412   : > { %v14591_v5 = vpack.c.bf16 %v2562_v49, %v2558_v19  ;;  %v14593_v6 = vpack.c.bf16 %v2564_v40, %v2560_v60  ;;  %v2369_v61 = vpop.f32.mrb[4].mxu0  ;;  %v2442_v0 = vpop.f32.mrb[4].mxu1  ;;  %v11992_v19 = vld [vmem:[#allocation12 + $0x66c] ss:$16 sps:$4 sm:$0xff]  }
 0x413   : > { %2629 = vst [vmem:[#allocation3 + $0x20] sm:$0xff] %v14587_v2  ;;  %2631 = vst [vmem:[#allocation3 + $0x30] sm:$0xff] %v14589_v3  ;;  %v2533_v35 = vadd.f32 %v14566_v28, %v2369_v61  ;;  %v2535_v59 = vadd.f32 %v14570_v30, %v2442_v0  ;;  %v2371_v58 = vpop.f32.mrb[5].mxu0  ;;  %v2444_v29 = vpop.f32.mrb[5].mxu1 }
 0x414   : > { %2630 = vst [vmem:[#allocation3 + $0x28] sm:$0xff] %v14591_v5  ;;  %2632 = vst [vmem:[#allocation3 + $0x38] sm:$0xff] %v14593_v6  ;;  %v2534_v9 = vadd.f32 %v14573_v32, %v2371_v58  ;;  %v2536_v7 = vadd.f32 %v14577_v33, %v2444_v29  ;;  %v2373_v13 = vpop.f32.mrb[6].mxu0  ;;  %v2446_v16 = vpop.f32.mrb[6].mxu1  ;;  %3594 = vmatprep.mubr.bf16.mxu0 %v14591_v5  ;;  %3740 = vmatprep.mubr.bf16.mxu1 %v14591_v5 }
 0x415   : > { %v2537_v17 = vadd.f32 %v14566_v28, %v2373_v13  ;;  %v2539_v18 = vadd.f32 %v14570_v30, %v2446_v16  ;;  %v2375_v21 = vpop.f32.mrb[7].mxu0  ;;  %v2448_v22 = vpop.f32.mrb[7].mxu1  ;;  %3595 = vmatmul.mubr.bf16.vlgmr.msra.gmra.mrb[16].mxu0 %v14587_v2  ;;  %3741 = vmatmul.mubr.bf16.vlgmr.msra.gmra.mrb[16].mxu1 %v14587_v2  ;;  %v2565_v20 = vmax.f32 %v2533_v35, 0.0  ;;  %v2567_v25 = vmax.f32 %v2535_v59, 0.0  ;;  %v11987_v35 = vld [vmem:[#allocation12 + $0x660] ss:$16 sps:$4 sm:$0xff]  }
 0x416   : > { %v2538_v11 = vadd.f32 %v14573_v32, %v2375_v21  ;;  %v2540_v1 = vadd.f32 %v14577_v33, %v2448_v22  ;;  %3636 = vmatpush1.bf16.msra.mxu0 %v11969_v62  ;;  %3782 = vmatpush1.bf16.msra.mxu1 %v11972_v63  ;;  %v2566_v41 = vmax.f32 %v2534_v9, 0.0  ;;  %v2568_v38 = vmax.f32 %v2536_v7, 0.0  ;;  %v11990_v9 = vld [vmem:[#allocation12 + $0x668] ss:$16 sps:$4 sm:$0xff]   ;;  %v11995_v7 = vld [vmem:[#allocation12 + $0x684] ss:$16 sps:$4 sm:$0xff]  }
 0x417   : > { %v2569_v34 = vmax.f32 %v2537_v17, 0.0  ;;  %v2571_v36 = vmax.f32 %v2539_v18, 0.0  ;;  %3637 = vmatprep.subr.bf16.mxu0 %v11977_v4  ;;  %3783 = vmatprep.subr.bf16.mxu1 %v11980_v8  ;;  %v3871_v59 = vshrl.u32 %v14591_v5, 16  ;;  %v3859_v8 = vshrl.u32 %v14587_v2, 16  ;;  %v11998_v21 = vld [vmem:[#allocation12 + $0x68c] ss:$16 sps:$4 sm:$0xff]  }
 0x418   : > { %v2570_v39 = vmax.f32 %v2538_v11, 0.0  ;;  %v2572_v42 = vmax.f32 %v2540_v1, 0.0 }
 0x419   : > { %v14611_v44 = vpack.c.bf16 %v2569_v34, %v2565_v20  ;;  %v14613_v45 = vpack.c.bf16 %v2571_v36, %v2567_v25 }
 0x41a   : > { %v14615_v46 = vpack.c.bf16 %v2570_v39, %v2566_v41  ;;  %v14617_v47 = vpack.c.bf16 %v2572_v42, %v2568_v38  ;;  %v2379_v48 = vpop.f32.mrb[8].mxu0  ;;  %v2452_v51 = vpop.f32.mrb[8].mxu1  ;;  %3638 = vmatpush1.bf16.msra.mxu0 %v11975_v15  ;;  %3784 = vmatpush1.bf16.msra.mxu1 %v11978_v12  ;;  %v11996_v41 = vld [vmem:[#allocation12 + $0x688] ss:$16 sps:$4 sm:$0xff]  }
 0x41b   : > { %2633 = vst [vmem:[#allocation3 + $0x40] sm:$0xff] %v14611_v44  ;;  %2635 = vst [vmem:[#allocation3 + $0x50] sm:$0xff] %v14613_v45  ;;  %v2541_v56 = vadd.f32 %v14566_v28, %v2379_v48  ;;  %v2543_v57 = vadd.f32 %v14570_v30, %v2452_v51  ;;  %v2381_v50 = vpop.f32.mrb[9].mxu0  ;;  %v2454_v43 = vpop.f32.mrb[9].mxu1  ;;  %3639 = vmatprep.subr.bf16.mxu0 %v11983_v10  ;;  %3785 = vmatprep.subr.bf16.mxu1 %v11986_v23  ;;  %v11993_v23 = vld [vmem:[#allocation12 + $0x680] ss:$16 sps:$4 sm:$0xff]  }
 0x41c   : > { %2634 = vst [vmem:[#allocation3 + $0x48] sm:$0xff] %v14615_v46  ;;  %2636 = vst [vmem:[#allocation3 + $0x58] sm:$0xff] %v14617_v47  ;;  %v2542_v60 = vadd.f32 %v14573_v32, %v2381_v50  ;;  %v2544_v49 = vadd.f32 %v14577_v33, %v2454_v43  ;;  %v2383_v40 = vpop.f32.mrb[10].mxu0  ;;  %v2456_v62 = vpop.f32.mrb[10].mxu1  ;;  %3604 = vmatprep.mubr.bf16.mxu0 %v14615_v46  ;;  %3750 = vmatprep.mubr.bf16.mxu1 %v14615_v46  ;;  %v12001_v51 = vld [vmem:[#allocation12 + $0x6a4] ss:$16 sps:$4 sm:$0xff]  }
 0x41d   : > { %v2545_v63 = vadd.f32 %v14566_v28, %v2383_v40  ;;  %v2547_v4 = vadd.f32 %v14570_v30, %v2456_v62  ;;  %v2385_v61 = vpop.f32.mrb[11].mxu0  ;;  %v2458_v0 = vpop.f32.mrb[11].mxu1  ;;  %3605 = vmatmul.mubr.bf16.gmra.mrb[20].mxu0 %v14611_v44  ;;  %3751 = vmatmul.mubr.bf16.gmra.mrb[20].mxu1 %v14611_v44  ;;  %v2573_v13 = vmax.f32 %v2541_v56, 0.0  ;;  %v2575_v16 = vmax.f32 %v2543_v57, 0.0 }
 0x41e   : > { %v2546_v58 = vadd.f32 %v14573_v32, %v2385_v61  ;;  %v2548_v29 = vadd.f32 %v14577_v33, %v2458_v0  ;;  %3640 = vmatpush1.bf16.msra.mxu0 %v11981_v54  ;;  %3786 = vmatpush1.bf16.msra.mxu1 %v11984_v55  ;;  %v2574_v22 = vmax.f32 %v2542_v60, 0.0  ;;  %v2576_v11 = vmax.f32 %v2544_v49, 0.0  ;;  %v12004_v54 = vld [vmem:[#allocation12 + $0x6ac] ss:$16 sps:$4 sm:$0xff]  }
 0x41f   : > { %v2577_v17 = vmax.f32 %v2545_v63, 0.0  ;;  %v2579_v18 = vmax.f32 %v2547_v4, 0.0  ;;  %3641 = vmatprep.subr.bf16.mxu0 %v11989_v14  ;;  %3787 = vmatprep.subr.bf16.mxu1 %v11992_v19  ;;  %v14649_v55 = vrot.slane %v3871_v59, 7  ;;  %v14653_v56 = vrot.slane %v3859_v8, 7  ;;  %v11999_v4 = vld [vmem:[#allocation12 + $0x6a0] ss:$16 sps:$4 sm:$0xff]  }
 0x420   : > { %v2578_v1 = vmax.f32 %v2546_v58, 0.0  ;;  %v2580_v15 = vmax.f32 %v2548_v29, 0.0  ;;  %v3911_v49 = vshrl.u32 %v14615_v46, 16  ;;  %v3903_v63 = vshrl.u32 %v14611_v44, 16  ;;  %v12007_v59 = vld [vmem:[#allocation12 + $0x6c4] ss:$16 sps:$4 sm:$0xff]  }
 0x421   : > { %v14637_v12 = vpack.c.bf16 %v2577_v17, %v2573_v13  ;;  %v14639_v10 = vpack.c.bf16 %v2579_v18, %v2575_v16 }
 0x422   : > { %v14641_v20 = vpack.c.bf16 %v2578_v1, %v2574_v22  ;;  %v14643_v25 = vpack.c.bf16 %v2580_v15, %v2576_v11  ;;  %v2389_v34 = vpop.f32.mrb[12].mxu0  ;;  %v2462_v36 = vpop.f32.mrb[12].mxu1  ;;  %3642 = vmatpush1.bf16.msra.mxu0 %v11987_v35  ;;  %3788 = vmatpush1.bf16.msra.mxu1 %v11990_v9  ;;  %v3895_v22 = vshrl.u32 %v14593_v6, 16  ;;  %v3913_v11 = vrot.slane %v3911_v49, 7 }
 0x423   : > { %2637 = vst [vmem:[#allocation3 + $0x60] sm:$0xff] %v14637_v12  ;;  %2639 = vst [vmem:[#allocation3 + $0x70] sm:$0xff] %v14639_v10  ;;  %v2549_v38 = vadd.f32 %v14566_v28, %v2389_v34  ;;  %v2551_v39 = vadd.f32 %v14570_v30, %v2462_v36  ;;  %v2391_v42 = vpop.f32.mrb[13].mxu0  ;;  %v2464_v48 = vpop.f32.mrb[13].mxu1  ;;  %3643 = vmatprep.subr.bf16.mxu0 %v11995_v7  ;;  %3789 = vmatprep.subr.bf16.mxu1 %v11998_v21  ;;  %v12010_v7 = vld [vmem:[#allocation12 + $0x6cc] ss:$16 sps:$4 sm:$0xff]  }
 0x424   : > { %2638 = vst [vmem:[#allocation3 + $0x68] sm:$0xff] %v14641_v20  ;;  %2640 = vst [vmem:[#allocation3 + $0x78] sm:$0xff] %v14643_v25  ;;  %v2550_v57 = vadd.f32 %v14573_v32, %v2391_v42  ;;  %v2552_v50 = vadd.f32 %v14577_v33, %v2464_v48  ;;  %v2393_v43 = vpop.f32.mrb[14].mxu0  ;;  %v2466_v14 = vpop.f32.mrb[14].mxu1  ;;  %3614 = vmatprep.mubr.bf16.mxu0 %v14641_v20  ;;  %3760 = vmatprep.mubr.bf16.mxu1 %v14641_v20  ;;  %v3943_v35 = vshrl.u32 %v14641_v20, 16 }
 0x425   : > { %v2553_v19 = vadd.f32 %v14566_v28, %v2393_v43  ;;  %v2555_v60 = vadd.f32 %v14570_v30, %v2466_v14  ;;  %v2395_v40 = vpop.f32.mrb[15].mxu0  ;;  %v2468_v62 = vpop.f32.mrb[15].mxu1  ;;  %3615 = vmatmul.mubr.bf16.gmra.mrb[24].mxu0 %v14637_v12  ;;  %3761 = vmatmul.mubr.bf16.gmra.mrb[24].mxu1 %v14637_v12  ;;  %v3935_v28 = vshrl.u32 %v14637_v12, 16  ;;  %v12002_v30 = vld [vmem:[#allocation12 + $0x6a8] ss:$16 sps:$4 sm:$0xff]   ;;  %v2581_v58 = vmax.f32 %v2549_v38, 0.0 }
 0x426   : > { %v2554_v61 = vadd.f32 %v14573_v32, %v2395_v40  ;;  %v2556_v0 = vadd.f32 %v14577_v33, %v2468_v62  ;;  %3644 = vmatpush1.bf16.msra.mxu0 %v11993_v23  ;;  %3790 = vmatpush1.bf16.msra.mxu1 %v11996_v41  ;;  %v2583_v29 = vmax.f32 %v2551_v39, 0.0  ;;  %v2582_v13 = vmax.f32 %v2550_v57, 0.0  ;;  %v12005_v34 = vld [vmem:[#allocation12 + $0x6c0] ss:$16 sps:$4 sm:$0xff]   ;;  %v12008_v36 = vld [vmem:[#allocation12 + $0x6c8] ss:$16 sps:$4 sm:$0xff]  }
 0x427   : > { %v2585_v8 = vmax.f32 %v2553_v19, 0.0  ;;  %v2587_v9 = vmax.f32 %v2555_v60, 0.0  ;;  %3645 = vmatprep.subr.bf16.mxu0 %v12001_v51  ;;  %3791 = vmatprep.subr.bf16.mxu1 %v12004_v54  ;;  %v2584_v16 = vmax.f32 %v2552_v50, 0.0  ;;  %v3906_v21 = vshll.u32 %v14611_v44, 16  ;;  %v12013_v42 = vld [vmem:[#allocation12 + $0x6e4] ss:$16 sps:$4 sm:$0xff]  }
 0x428   : > { %v2586_v32 = vmax.f32 %v2554_v61, 0.0  ;;  %v2588_v17 = vmax.f32 %v2556_v0, 0.0  ;;  %v3927_v23 = vshrl.u32 %v14617_v47, 16  ;;  %v3905_v41 = vrot.slane %v3903_v63, 7  ;;  %v12011_v54 = vld [vmem:[#allocation12 + $0x6e0] ss:$16 sps:$4 sm:$0xff]  }
 0x429   : > { %v14669_v33 = vpack.c.bf16 %v2585_v8, %v2581_v58  ;;  %v14671_v18 = vpack.c.bf16 %v2587_v9, %v2583_v29  ;;  %v3945_v38 = vrot.slane %v3943_v35, 7  ;;  %v3937_v39 = vrot.slane %v3935_v28, 7  ;;  %v12016_v57 = vld [vmem:[#allocation12 + $0x6ec] ss:$16 sps:$4 sm:$0xff]   ;;  %v12014_v62 = vld [vmem:[#allocation12 + $0x6e8] ss:$16 sps:$4 sm:$0xff]  }
 0x42a   : > { %v2602_v1 = vpack.c.bf16 %v2586_v32, %v2582_v13  ;;  %v14675_v15 = vpack.c.bf16 %v2588_v17, %v2584_v16  ;;  %3646 = vmatpush1.bf16.msra.mxu0 %v11999_v4  ;;  %3792 = vmatpush1.bf16.msra.mxu1 %v12002_v30  ;;  %v3914_v48 = vshll.u32 %v14615_v46, 16  ;;  %v3959_v50 = vshrl.u32 %v14643_v25, 16  ;;  %v12017_v8 = vld [vmem:[#allocation12 + $0x700] ss:$16 sps:$4 sm:$0xff]   ;;  %v12020_v32 = vld [vmem:[#allocation12 + $0x708] ss:$16 sps:$4 sm:$0xff]  }
 0x42b   : > { %2641 = vst [vmem:[#allocation3 + $0x80] sm:$0xff] %v14669_v33  ;;  %2643 = vst [vmem:[#allocation3 + $0x90] sm:$0xff] %v14671_v18  ;;  %3647 = vmatprep.subr.bf16.mxu0 %v12007_v59  ;;  %3793 = vmatprep.subr.bf16.mxu1 %v12010_v7  ;;  %v3967_v44 = vshrl.u32 %v14669_v33, 16  ;;  %v3946_v14 = vshll.u32 %v14641_v20, 16  ;;  %v3938_v19 = vshll.u32 %v14637_v12, 16  ;;  %v3930_v46 = vshll.u32 %v14617_v47, 16 }
 0x42c   : > { %2642 = vst [vmem:[#allocation3 + $0x88] sm:$0xff] %v2602_v1  ;;  %2644 = vst [vmem:[#allocation3 + $0x98] sm:$0xff] %v14675_v15  ;;  %3624 = vmatprep.mubr.bf16.mxu0 %v2602_v1  ;;  %v3975_v51 = vshrl.u32 %v2602_v1, 16  ;;  %3770 = vmatprep.mubr.bf16.mxu1 %v2602_v1  ;;  %v3991_v43 = vshrl.u32 %v14675_v15, 16  ;;  %v3978_v40 = vshll.u32 %v2602_v1, 16  ;;  %v3929_v63 = vrot.slane %v3927_v23, 7 }
 0x42d   : > { %3625 = vmatmul.mubr.bf16.gmra.mrb[28].mxu0 %v14669_v33  ;;  %v3969_v60 = vrot.slane %v3967_v44, 7  ;;  %3771 = vmatmul.mubr.bf16.gmra.mrb[28].mxu1 %v14669_v33  ;;  %v3916_v4 = vor.u32 %v3914_v48, %v3913_v11  ;;  %v3970_v61 = vshll.u32 %v14669_v33, 16  ;;  %v12019_v12 = vld [vmem:[#allocation12 + $0x704] ss:$16 sps:$4 sm:$0xff]   ;;  %v12022_v20 = vld [vmem:[#allocation12 + $0x70c] ss:$16 sps:$4 sm:$0xff]   ;;  %v3908_v0 = vor.u32 %v3906_v21, %v3905_v41 }
 0x42e   : > { %v3977_v49 = vrot.slane %v3975_v51, 7  ;;  %3648 = vmatpush1.bf16.msra.mxu0 %v12005_v34  ;;  %3794 = vmatpush1.bf16.msra.mxu1 %v12008_v36  ;;  %v3948_v35 = vor.u32 %v3946_v14, %v3945_v38  ;;  %v3940_v28 = vor.u32 %v3938_v19, %v3937_v39  ;;  %v3961_v30 = vrot.slane %v3959_v50, 7  ;;  %v12028_v1 = vld [vmem:[#allocation12 + $0x72c] ss:$16 sps:$4 sm:$0xff]   ;;  %v12031_v51 = vld [vmem:[#allocation12 + $0x744] ss:$16 sps:$4 sm:$0xff]  }
 0x42f   : > { %3667 = vmatprep.mubr.bf16.mxu0 %v14593_v6  ;;  %3813 = vmatprep.mubr.bf16.mxu1 %v14593_v6  ;;  %v3993_v59 = vrot.slane %v3991_v43, 7  ;;  %v14695_v58 = vsel %vm884_vm8, %v14649_v55, %v3916_v4  ;;  %v14699_v9 = vsel %vm884_vm8, %v14653_v56, %v3908_v0  ;;  %v3972_v16 = vor.u32 %v3970_v61, %v3969_v60  ;;  %v12032_v50 = vld [vmem:[#allocation12 + $0x748] ss:$16 sps:$4 sm:$0xff]   ;;  %v12037_v43 = vld [vmem:[#allocation12 + $0x764] ss:$16 sps:$4 sm:$0xff]  }
 0x430   : > { %3649 = vmatprep.subr.bf16.mxu0 %v12013_v42  ;;  %3795 = vmatprep.subr.bf16.mxu1 %v12016_v57  ;;  %v3980_v29 = vor.u32 %v3978_v40, %v3977_v49  ;;  %v14702_v7 = vsel %vm884_vm8, %v3913_v11, %v3948_v35  ;;  %v14705_v13 = vsel %vm884_vm8, %v3905_v41, %v3940_v28  ;;  %v3962_v17 = vshll.u32 %v14643_v25, 16  ;;  %v12025_v11 = vld [vmem:[#allocation12 + $0x724] ss:$16 sps:$4 sm:$0xff]   ;;  %v12026_v42 = vld [vmem:[#allocation12 + $0x728] ss:$16 sps:$4 sm:$0xff]  }
 0x431   : > { %v14713_v21 = vrot.slane %v3895_v22, 7  ;;  %v3994_v34 = vshll.u32 %v14675_v15, 16  ;;  %v14717_v36 = vsel %vm884_vm8, %v3937_v39, %v3972_v16  ;;  %v3932_v23 = vor.u32 %v3930_v46, %v3929_v63  ;;  %v12023_v22 = vld [vmem:[#allocation12 + $0x720] ss:$16 sps:$4 sm:$0xff]   ;;  %v12040_v14 = vld [vmem:[#allocation12 + $0x76c] ss:$16 sps:$4 sm:$0xff]  }
 0x432   : > { %3650 = vmatpush1.bf16.msra.mxu0 %v12011_v54  ;;  %3796 = vmatpush1.bf16.msra.mxu1 %v12014_v62  ;;  %v14709_v33 = vsel %vm884_vm8, %v3945_v38, %v3980_v29  ;;  %v3964_v41 = vor.u32 %v3962_v17, %v3961_v30  ;;  %v12034_v54 = vld [vmem:[#allocation12 + $0x74c] ss:$16 sps:$4 sm:$0xff]   ;;  %v12029_v57 = vld [vmem:[#allocation12 + $0x740] ss:$16 sps:$4 sm:$0xff]   ;;  %v12038_v60 = vld [vmem:[#allocation12 + $0x768] ss:$16 sps:$4 sm:$0xff]  }
 0x433   : > { %3651 = vmatprep.subr.bf16.mxu0 %v12019_v12  ;;  %3797 = vmatprep.subr.bf16.mxu1 %v12022_v20  ;;  %v14721_v44 = vsel %vm884_vm8, %v14713_v21, %v3932_v23  ;;  %v3996_v38 = vor.u32 %v3994_v34, %v3993_v59  ;;  %v12035_v19 = vld [vmem:[#allocation12 + $0x760] ss:$16 sps:$4 sm:$0xff]   ;;  %v12043_v46 = vld [vmem:[#allocation12 + $0x784] ss:$16 sps:$4 sm:$0xff]   ;;  %v12046_v49 = vld [vmem:[#allocation12 + $0x78c] ss:$16 sps:$4 sm:$0xff]  }
 0x434   : > { %v14724_v48 = vsel %vm884_vm8, %v3929_v63, %v3964_v41  ;;  %v12041_v40 = vld [vmem:[#allocation12 + $0x780] ss:$16 sps:$4 sm:$0xff]   ;;  %v12044_v62 = vld [vmem:[#allocation12 + $0x788] ss:$16 sps:$4 sm:$0xff]   ;;  %v12049_v63 = vld [vmem:[#allocation12 + $0x7a4] ss:$16 sps:$4 sm:$0xff]  }
 0x435   : > { %v14727_v39 = vsel %vm884_vm8, %v3961_v30, %v3996_v38  ;;  %v12052_v4 = vld [vmem:[#allocation12 + $0x7ac] ss:$16 sps:$4 sm:$0xff]   ;;  %v12047_v61 = vld [vmem:[#allocation12 + $0x7a0] ss:$16 sps:$4 sm:$0xff]   ;;  %v12050_v12 = vld [vmem:[#allocation12 + $0x7a8] ss:$16 sps:$4 sm:$0xff]  }
 0x436   : > { %3652 = vmatpush1.bf16.msra.mxu0 %v12017_v8  ;;  %3798 = vmatpush1.bf16.msra.mxu1 %v12020_v32  ;;  %v12055_v20 = vld [vmem:[#allocation12 + $0x7c4] ss:$16 sps:$4 sm:$0xff]   ;;  %v12058_v0 = vld [vmem:[#allocation12 + $0x7cc] ss:$16 sps:$4 sm:$0xff]   ;;  %v12053_v35 = vld [vmem:[#allocation12 + $0x7c0] ss:$16 sps:$4 sm:$0xff]  }
 0x437   : > { %3653 = vmatprep.subr.bf16.mxu0 %v12025_v11  ;;  %3799 = vmatprep.subr.bf16.mxu1 %v12028_v1  ;;  %v12056_v28 = vld [vmem:[#allocation12 + $0x7c8] ss:$16 sps:$4 sm:$0xff]   ;;  %v12061_v30 = vld [vmem:[#allocation12 + $0x7e4] ss:$16 sps:$4 sm:$0xff]   ;;  %v12064_v59 = vld [vmem:[#allocation12 + $0x7ec] ss:$16 sps:$4 sm:$0xff]  }
 0x438   : > { %v12059_v29 = vld [vmem:[#allocation12 + $0x7e0] ss:$16 sps:$4 sm:$0xff]   ;;  %v12062_v8 = vld [vmem:[#allocation12 + $0x7e8] ss:$16 sps:$4 sm:$0xff]   ;;  %v12067_v16 = vld [vmem:[#allocation12 + $0x4] ss:$16 sps:$4 sm:$0xff]  }
 0x439   : > { %v12070_v32 = vld [vmem:[#allocation12 + $0xc] ss:$16 sps:$4 sm:$0xff]   ;;  %v12065_v17 = vld [vmem:[#allocation12] ss:$16 sps:$4 sm:$0xff]   ;;  %v12068_v11 = vld [vmem:[#allocation12 + $0x8] ss:$16 sps:$4 sm:$0xff]  }
 0x43a   : > { %3654 = vmatpush1.bf16.msra.mxu0 %v12023_v22  ;;  %3800 = vmatpush1.bf16.msra.mxu1 %v12026_v42  ;;  %v12073_v1 = vld [vmem:[#allocation12 + $0x24] ss:$16 sps:$4 sm:$0xff]   ;;  %v12076_v34 = vld [vmem:[#allocation12 + $0x2c] ss:$16 sps:$4 sm:$0xff]   ;;  %v12071_v23 = vld [vmem:[#allocation12 + $0x20] ss:$16 sps:$4 sm:$0xff]  }
 0x43b   : > { %3655 = vmatprep.subr.bf16.mxu0 %v12031_v51  ;;  %3801 = vmatprep.subr.bf16.mxu1 %v12034_v54  ;;  %v12074_v41 = vld [vmem:[#allocation12 + $0x28] ss:$16 sps:$4 sm:$0xff]   ;;  %v12079_v38 = vld [vmem:[#allocation12 + $0x44] ss:$16 sps:$4 sm:$0xff]   ;;  %v12082_v22 = vld [vmem:[#allocation12 + $0x4c] ss:$16 sps:$4 sm:$0xff]  }
 0x43c   : > { %v12077_v42 = vld [vmem:[#allocation12 + $0x40] ss:$16 sps:$4 sm:$0xff]   ;;  %v12080_v51 = vld [vmem:[#allocation12 + $0x48] ss:$16 sps:$4 sm:$0xff]   ;;  %v12085_v54 = vld [vmem:[#allocation12 + $0x64] ss:$16 sps:$4 sm:$0xff]  }
 0x43e   : > { %3656 = vmatpush1.bf16.msra.mxu0 %v12029_v57  ;;  %3802 = vmatpush1.bf16.msra.mxu1 %v12032_v50  ;;  %v12086_v57 = vld [vmem:[#allocation12 + $0x68] ss:$16 sps:$4 sm:$0xff]   ;;  %v12091_v50 = vld [vmem:[#allocation12 + $0x84] ss:$16 sps:$4 sm:$0xff]  }
 0x43f   : > { %3657 = vmatprep.subr.bf16.mxu0 %v12037_v43  ;;  %3803 = vmatprep.subr.bf16.mxu1 %v12040_v14  ;;  %v12094_v43 = vld [vmem:[#allocation12 + $0x8c] ss:$16 sps:$4 sm:$0xff]   ;;  %v2646_v14 = vld [vmem:[#allocation3 + $0x8] sm:$0x80] }
 0x442   : > { %3658 = vmatpush1.bf16.msra.mxu0 %v12035_v19  ;;  %3804 = vmatpush1.bf16.msra.mxu1 %v12038_v60  ;;  %v12089_v19 = vld [vmem:[#allocation12 + $0x80] ss:$16 sps:$4 sm:$0xff]   ;;  %v12092_v60 = vld [vmem:[#allocation12 + $0x88] ss:$16 sps:$4 sm:$0xff]  }
 0x443   : > { %3659 = vmatprep.subr.bf16.mxu0 %v12043_v46  ;;  %3805 = vmatprep.subr.bf16.mxu1 %v12046_v49  ;;  %v12100_v46 = vld [vmem:[#allocation12 + $0xac] ss:$16 sps:$4 sm:$0xff]   ;;  %v3874_v49 = vshll.u32 %v14591_v5, 16 }
 0x446   : > { %3660 = vmatpush1.bf16.msra.mxu0 %v12041_v40  ;;  %3806 = vmatpush1.bf16.msra.mxu1 %v12044_v62  ;;  %v12095_v40 = vld [vmem:[#allocation12 + $0xa0] ss:$16 sps:$4 sm:$0xff]   ;;  %v12098_v62 = vld [vmem:[#allocation12 + $0xa8] ss:$16 sps:$4 sm:$0xff]  }
 0x447   : > { %3661 = vmatprep.subr.bf16.mxu0 %v12049_v63  ;;  %3807 = vmatprep.subr.bf16.mxu1 %v12052_v4  ;;  %v12103_v63 = vld [vmem:[#allocation12 + $0xc4] ss:$16 sps:$4 sm:$0xff]   ;;  %v12106_v4 = vld [vmem:[#allocation12 + $0xcc] ss:$16 sps:$4 sm:$0xff]  }
 0x44a   : > { %3662 = vmatpush1.bf16.msra.mxu0 %v12047_v61  ;;  %3808 = vmatpush1.bf16.msra.mxu1 %v12050_v12  ;;  %v3876_v12 = vor.u32 %v3874_v49, %v14649_v55  ;;  %v12110_v55 = vld [vmem:[#allocation12 + $0xe8] ss:$16 sps:$4 sm:$0xff]   ;;  %v12157_v49 = vld [vmem:[#allocation12 + $0x1e4] ss:$16 sps:$4 sm:$0xff]  }
 0x44b   : > { %3663 = vmatprep.subr.bf16.mxu0 %v12055_v20  ;;  %3809 = vmatprep.subr.bf16.mxu1 %v12058_v0  ;;  %v12104_v20 = vld [vmem:[#allocation12 + $0xc8] ss:$16 sps:$4 sm:$0xff]   ;;  %v12112_v0 = vld [vmem:[#allocation12 + $0xec] ss:$16 sps:$4 sm:$0xff]  }
 0x44e   : > { %3664 = vmatpush1.bf16.msra.mxu0 %v12053_v35  ;;  %3810 = vmatpush1.bf16.msra.mxu1 %v12056_v28  ;;  %v12107_v35 = vld [vmem:[#allocation12 + $0xe0] ss:$16 sps:$4 sm:$0xff]   ;;  %v12115_v28 = vld [vmem:[#allocation12 + $0x104] ss:$16 sps:$4 sm:$0xff]  }
 0x44f   : > { %3665 = vmatprep.subr.bf16.mxu0 %v12061_v30  ;;  %3811 = vmatprep.subr.bf16.mxu1 %v12064_v59  ;;  %v12118_v30 = vld [vmem:[#allocation12 + $0x10c] ss:$16 sps:$4 sm:$0xff]   ;;  %v12113_v59 = vld [vmem:[#allocation12 + $0x100] ss:$16 sps:$4 sm:$0xff]  }
 0x452   : > { %3666 = vmatpush1.bf16.msra.mxu0 %v12059_v29  ;;  %3812 = vmatpush1.bf16.msra.mxu1 %v12062_v8  ;;  %v12116_v29 = vld [vmem:[#allocation12 + $0x108] ss:$16 sps:$4 sm:$0xff]   ;;  %v12121_v8 = vld [vmem:[#allocation12 + $0x124] ss:$16 sps:$4 sm:$0xff]  }
 0x453   : > { %4654 = vmatprep.subr.bf16.mxu0 %v12067_v16  ;;  %4800 = vmatprep.subr.bf16.mxu1 %v12070_v32  ;;  %v12124_v16 = vld [vmem:[#allocation12 + $0x12c] ss:$16 sps:$4 sm:$0xff]   ;;  %v12119_v32 = vld [vmem:[#allocation12 + $0x120] ss:$16 sps:$4 sm:$0xff]  }
 0x455   : > { %3668 = vmatmul.mubr.bf16.vlgmr.msra.gmra.mrb[16].mxu0 %v14589_v3  ;;  %3814 = vmatmul.mubr.bf16.vlgmr.msra.gmra.mrb[16].mxu1 %v14589_v3  ;;  %v12088_v3 = vld [vmem:[#allocation12 + $0x6c] ss:$16 sps:$4 sm:$0xff]  }
 0x456   : > { %3677 = vmatprep.mubr.bf16.mxu0 %v14617_v47  ;;  %3823 = vmatprep.mubr.bf16.mxu1 %v14617_v47  ;;  %v12083_v47 = vld [vmem:[#allocation12 + $0x60] ss:$16 sps:$4 sm:$0xff]  }
 0x457   : > { %4655 = vmatpush1.bf16.msra.mxu0 %v12065_v17  ;;  %4801 = vmatpush1.bf16.msra.mxu1 %v12068_v11  ;;  %v12122_v17 = vld [vmem:[#allocation12 + $0x128] ss:$16 sps:$4 sm:$0xff]   ;;  %v12127_v11 = vld [vmem:[#allocation12 + $0x144] ss:$16 sps:$4 sm:$0xff]  }
 0x458   : > { %4656 = vmatprep.subr.bf16.mxu0 %v12073_v1  ;;  %4802 = vmatprep.subr.bf16.mxu1 %v12076_v34  ;;  %v12130_v1 = vld [vmem:[#allocation12 + $0x14c] ss:$16 sps:$4 sm:$0xff]   ;;  %v12125_v34 = vld [vmem:[#allocation12 + $0x140] ss:$16 sps:$4 sm:$0xff]  }
 0x45b   : > { %4657 = vmatpush1.bf16.msra.mxu0 %v12071_v23  ;;  %4803 = vmatpush1.bf16.msra.mxu1 %v12074_v41  ;;  %v12128_v23 = vld [vmem:[#allocation12 + $0x148] ss:$16 sps:$4 sm:$0xff]   ;;  %v12133_v41 = vld [vmem:[#allocation12 + $0x164] ss:$16 sps:$4 sm:$0xff]  }
 0x45c   : > { %4658 = vmatprep.subr.bf16.mxu0 %v12079_v38  ;;  %4804 = vmatprep.subr.bf16.mxu1 %v12082_v22  ;;  %v12136_v38 = vld [vmem:[#allocation12 + $0x16c] ss:$16 sps:$4 sm:$0xff]   ;;  %v12131_v22 = vld [vmem:[#allocation12 + $0x160] ss:$16 sps:$4 sm:$0xff]  }
 0x45d   : > { %3678 = vmatmul.mubr.bf16.gmra.mrb[20].mxu0 %v14613_v45  ;;  %3824 = vmatmul.mubr.bf16.gmra.mrb[20].mxu1 %v14613_v45  ;;  %v12097_v45 = vld [vmem:[#allocation12 + $0xa4] ss:$16 sps:$4 sm:$0xff]  }
 0x45e   : > { %3687 = vmatprep.mubr.bf16.mxu0 %v14643_v25  ;;  %3833 = vmatprep.mubr.bf16.mxu1 %v14643_v25  ;;  %v3867_v25 = vshrl.u32 %v2646_v14, 16  ;;  %v12146_v14 = vld [vmem:[#allocation12 + $0x1a8] ss:$16 sps:$4 sm:$0xff]  }
 0x45f   : > { %4659 = vmatpush1.bf16.msra.mxu0 %v12077_v42  ;;  %4805 = vmatpush1.bf16.msra.mxu1 %v12080_v51  ;;  %v12134_v42 = vld [vmem:[#allocation12 + $0x168] ss:$16 sps:$4 sm:$0xff]   ;;  %v12139_v51 = vld [vmem:[#allocation12 + $0x184] ss:$16 sps:$4 sm:$0xff]  }
 0x460   : > { %4660 = vmatprep.subr.bf16.mxu0 %v12085_v54  ;;  %4806 = vmatprep.subr.bf16.mxu1 %v12088_v3  ;;  %v3869_v61 = vrot.slane %v3867_v25, 7  ;;  %v12142_v54 = vld [vmem:[#allocation12 + $0x18c] ss:$16 sps:$4 sm:$0xff]   ;;  %v12137_v3 = vld [vmem:[#allocation12 + $0x180] ss:$16 sps:$4 sm:$0xff]  }
 0x461   : > { %v12152_v25 = vld [vmem:[#allocation12 + $0x1c8] ss:$16 sps:$4 sm:$0xff]  }
 0x462   : > { %v3877_v5 = vsel %vm884_vm8, %v3869_v61, %v3876_v12  ;;  %v12158_v61 = vld [vmem:[#allocation12 + $0x1e8] ss:$16 sps:$4 sm:$0xff]   ;;  %v12163_v12 = vld [vmem:[#allocation12 + $0x204] ss:$16 sps:$4 sm:$0xff]  }
 0x463   : > { %4661 = vmatpush1.bf16.msra.mxu0 %v12083_v47  ;;  %4807 = vmatpush1.bf16.msra.mxu1 %v12086_v57  ;;  %v12140_v47 = vld [vmem:[#allocation12 + $0x188] ss:$16 sps:$4 sm:$0xff]   ;;  %v12145_v57 = vld [vmem:[#allocation12 + $0x1a4] ss:$16 sps:$4 sm:$0xff]  }
 0x464   : > { %4662 = vmatprep.subr.bf16.mxu0 %v12091_v50  ;;  %4808 = vmatprep.subr.bf16.mxu1 %v12094_v43  ;;  %v12148_v50 = vld [vmem:[#allocation12 + $0x1ac] ss:$16 sps:$4 sm:$0xff]   ;;  %v12143_v43 = vld [vmem:[#allocation12 + $0x1a0] ss:$16 sps:$4 sm:$0xff]  }
 0x465   : > { %3688 = vmatmul.mubr.bf16.gmra.mrb[24].mxu0 %v14639_v10  ;;  %3834 = vmatmul.mubr.bf16.gmra.mrb[24].mxu1 %v14639_v10  ;;  %v12101_v10 = vld [vmem:[#allocation12 + $0xc0] ss:$16 sps:$4 sm:$0xff]  }
 0x466   : > { %3697 = vmatprep.mubr.bf16.mxu0 %v14675_v15  ;;  %3843 = vmatprep.mubr.bf16.mxu1 %v14675_v15  ;;  %v12109_v15 = vld [vmem:[#allocation12 + $0xe4] ss:$16 sps:$4 sm:$0xff]  }
 0x467   : > { %4663 = vmatpush1.bf16.msra.mxu0 %v12089_v19  ;;  %4809 = vmatpush1.bf16.msra.mxu1 %v12092_v60  ;;  %v12151_v19 = vld [vmem:[#allocation12 + $0x1c4] ss:$16 sps:$4 sm:$0xff]   ;;  %v12154_v60 = vld [vmem:[#allocation12 + $0x1cc] ss:$16 sps:$4 sm:$0xff]  }
 0x468   : > { %4664 = vmatprep.subr.bf16.mxu0 %v12097_v45  ;;  %4810 = vmatprep.subr.bf16.mxu1 %v12100_v46  ;;  %v2645_v45 = vld [vmem:[#allocation3] sm:$0x80] }
 0x469   : > { %v12149_v46 = vld [vmem:[#allocation12 + $0x1c0] ss:$16 sps:$4 sm:$0xff]  }
 0x46b   : > { %4665 = vmatpush1.bf16.msra.mxu0 %v12095_v40  ;;  %4811 = vmatpush1.bf16.msra.mxu1 %v12098_v62  ;;  %v12160_v40 = vld [vmem:[#allocation12 + $0x1ec] ss:$16 sps:$4 sm:$0xff]   ;;  %v3855_v62 = vshrl.u32 %v2645_v45, 16  ;;  %v12209_v45 = vld [vmem:[#allocation12 + $0x300] ss:$16 sps:$4 sm:$0xff]  }
 0x46c   : > { %4666 = vmatprep.subr.bf16.mxu0 %v12103_v63  ;;  %4812 = vmatprep.subr.bf16.mxu1 %v12106_v4  ;;  %v3862_v63 = vshll.u32 %v14587_v2, 16  ;;  %v12155_v4 = vld [vmem:[#allocation12 + $0x1e0] ss:$16 sps:$4 sm:$0xff]   ;;  %v12169_v2 = vld [vmem:[#allocation12 + $0x224] ss:$16 sps:$4 sm:$0xff]  }
 0x46d   : > { %3698 = vmatmul.mubr.bf16.gmra.mrb[28].mxu0 %v14671_v18  ;;  %3844 = vmatmul.mubr.bf16.gmra.mrb[28].mxu1 %v14671_v18 }
 0x46e   : > { %4686 = vmatprep.mubr.bf16.mxu0 %v3877_v5  ;;  %4832 = vmatprep.mubr.bf16.mxu1 %v3877_v5  ;;  %v12164_v5 = vld [vmem:[#allocation12 + $0x208] ss:$16 sps:$4 sm:$0xff]  }
 0x46f   : > { %4667 = vmatpush1.bf16.msra.mxu0 %v12101_v10  ;;  %4813 = vmatpush1.bf16.msra.mxu1 %v12104_v20  ;;  %v12166_v10 = vld [vmem:[#allocation12 + $0x20c] ss:$16 sps:$4 sm:$0xff]   ;;  %v3857_v20 = vrot.slane %v3855_v62, 7  ;;  %v12223_v62 = vld [vmem:[#allocation12 + $0x344] ss:$16 sps:$4 sm:$0xff]  }
 0x470   : > { %4668 = vmatprep.subr.bf16.mxu0 %v12109_v15  ;;  %4814 = vmatprep.subr.bf16.mxu1 %v12112_v0  ;;  %v3864_v15 = vor.u32 %v3862_v63, %v14653_v56  ;;  %v12161_v0 = vld [vmem:[#allocation12 + $0x200] ss:$16 sps:$4 sm:$0xff]   ;;  %v12170_v56 = vld [vmem:[#allocation12 + $0x228] ss:$16 sps:$4 sm:$0xff]   ;;  %v12226_v63 = vld [vmem:[#allocation12 + $0x34c] ss:$16 sps:$4 sm:$0xff]  }
 0x473   : > { %4669 = vmatpush1.bf16.msra.mxu0 %v12107_v35  ;;  %4815 = vmatpush1.bf16.msra.mxu1 %v12110_v55  ;;  %v3865_v35 = vsel %vm884_vm8, %v3857_v20, %v3864_v15  ;;  %v12172_v55 = vld [vmem:[#allocation12 + $0x22c] ss:$16 sps:$4 sm:$0xff]   ;;  %v12227_v20 = vld [vmem:[#allocation12 + $0x360] ss:$16 sps:$4 sm:$0xff]   ;;  %v12230_v15 = vld [vmem:[#allocation12 + $0x368] ss:$16 sps:$4 sm:$0xff]  }
 0x474   : > { %4670 = vmatprep.subr.bf16.mxu0 %v12115_v28  ;;  %4816 = vmatprep.subr.bf16.mxu1 %v12118_v30  ;;  %v12167_v28 = vld [vmem:[#allocation12 + $0x220] ss:$16 sps:$4 sm:$0xff]   ;;  %v12175_v30 = vld [vmem:[#allocation12 + $0x244] ss:$16 sps:$4 sm:$0xff]  }
 0x477   : > { %4671 = vmatpush1.bf16.msra.mxu0 %v12113_v59  ;;  %4817 = vmatpush1.bf16.msra.mxu1 %v12116_v29  ;;  %v12178_v59 = vld [vmem:[#allocation12 + $0x24c] ss:$16 sps:$4 sm:$0xff]   ;;  %v12173_v29 = vld [vmem:[#allocation12 + $0x240] ss:$16 sps:$4 sm:$0xff]  }
 0x478   : > { %4672 = vmatprep.subr.bf16.mxu0 %v12121_v8  ;;  %4818 = vmatprep.subr.bf16.mxu1 %v12124_v16  ;;  %v12176_v8 = vld [vmem:[#allocation12 + $0x248] ss:$16 sps:$4 sm:$0xff]   ;;  %v12181_v16 = vld [vmem:[#allocation12 + $0x264] ss:$16 sps:$4 sm:$0xff]  }
 0x47b   : > { %4673 = vmatpush1.bf16.msra.mxu0 %v12119_v32  ;;  %4819 = vmatpush1.bf16.msra.mxu1 %v12122_v17  ;;  %v12184_v32 = vld [vmem:[#allocation12 + $0x26c] ss:$16 sps:$4 sm:$0xff]   ;;  %v12182_v17 = vld [vmem:[#allocation12 + $0x268] ss:$16 sps:$4 sm:$0xff]  }
 0x47c   : > { %4674 = vmatprep.subr.bf16.mxu0 %v12127_v11  ;;  %4820 = vmatprep.subr.bf16.mxu1 %v12130_v1  ;;  %v12187_v11 = vld [vmem:[#allocation12 + $0x284] ss:$16 sps:$4 sm:$0xff]   ;;  %v12190_v1 = vld [vmem:[#allocation12 + $0x28c] ss:$16 sps:$4 sm:$0xff]  }
 0x47f   : > { %4675 = vmatpush1.bf16.msra.mxu0 %v12125_v34  ;;  %4821 = vmatpush1.bf16.msra.mxu1 %v12128_v23  ;;  %v12185_v34 = vld [vmem:[#allocation12 + $0x280] ss:$16 sps:$4 sm:$0xff]   ;;  %v2648_v23 = vld [vmem:[#allocation3 + $0x18] sm:$0x80] }
 0x480   : > { %4676 = vmatprep.subr.bf16.mxu0 %v12133_v41  ;;  %4822 = vmatprep.subr.bf16.mxu1 %v12136_v38  ;;  %v12188_v41 = vld [vmem:[#allocation12 + $0x288] ss:$16 sps:$4 sm:$0xff]   ;;  %v12196_v38 = vld [vmem:[#allocation12 + $0x2ac] ss:$16 sps:$4 sm:$0xff]  }
 0x483   : > { %4677 = vmatpush1.bf16.msra.mxu0 %v12131_v22  ;;  %4823 = vmatpush1.bf16.msra.mxu1 %v12134_v42  ;;  %v12191_v22 = vld [vmem:[#allocation12 + $0x2a0] ss:$16 sps:$4 sm:$0xff]   ;;  %v3898_v42 = vshll.u32 %v14593_v6, 16 }
 0x484   : > { %4678 = vmatprep.subr.bf16.mxu0 %v12139_v51  ;;  %4824 = vmatprep.subr.bf16.mxu1 %v12142_v54  ;;  %v12194_v51 = vld [vmem:[#allocation12 + $0x2a8] ss:$16 sps:$4 sm:$0xff]   ;;  %v12199_v54 = vld [vmem:[#allocation12 + $0x2c4] ss:$16 sps:$4 sm:$0xff]  }
 0x487   : > { %4679 = vmatpush1.bf16.msra.mxu0 %v12137_v3  ;;  %4825 = vmatpush1.bf16.msra.mxu1 %v12140_v47  ;;  %v12202_v3 = vld [vmem:[#allocation12 + $0x2cc] ss:$16 sps:$4 sm:$0xff]  }
 0x488   : > { %4680 = vmatprep.subr.bf16.mxu0 %v12145_v57  ;;  %4826 = vmatprep.subr.bf16.mxu1 %v12148_v50  ;;  %v3900_v57 = vor.u32 %v3898_v42, %v14713_v21  ;;  %v12200_v50 = vld [vmem:[#allocation12 + $0x2c8] ss:$16 sps:$4 sm:$0xff]  }
 0x489   : > { %v12206_v21 = vld [vmem:[#allocation12 + $0x2e8] ss:$16 sps:$4 sm:$0xff]  }
 0x48b   : > { %4681 = vmatpush1.bf16.msra.mxu0 %v12143_v43  ;;  %4827 = vmatpush1.bf16.msra.mxu1 %v12146_v14  ;;  %v12205_v43 = vld [vmem:[#allocation12 + $0x2e4] ss:$16 sps:$4 sm:$0xff]   ;;  %v12208_v14 = vld [vmem:[#allocation12 + $0x2ec] ss:$16 sps:$4 sm:$0xff]  }
 0x48c   : > { %4682 = vmatprep.subr.bf16.mxu0 %v12151_v19  ;;  %4828 = vmatprep.subr.bf16.mxu1 %v12154_v60  ;;  %v12211_v19 = vld [vmem:[#allocation12 + $0x304] ss:$16 sps:$4 sm:$0xff]   ;;  %v12214_v60 = vld [vmem:[#allocation12 + $0x30c] ss:$16 sps:$4 sm:$0xff]  }
 0x48f   : > { %4683 = vmatpush1.bf16.msra.mxu0 %v12149_v46  ;;  %4829 = vmatpush1.bf16.msra.mxu1 %v12152_v25  ;;  %v12212_v46 = vld [vmem:[#allocation12 + $0x308] ss:$16 sps:$4 sm:$0xff]   ;;  %v12217_v25 = vld [vmem:[#allocation12 + $0x324] ss:$16 sps:$4 sm:$0xff]  }
 0x490   : > { %4684 = vmatprep.subr.bf16.mxu0 %v12157_v49  ;;  %4830 = vmatprep.subr.bf16.mxu1 %v12160_v40  ;;  %v12215_v49 = vld [vmem:[#allocation12 + $0x320] ss:$16 sps:$4 sm:$0xff]   ;;  %v12218_v40 = vld [vmem:[#allocation12 + $0x328] ss:$16 sps:$4 sm:$0xff]  }
 0x493   : > { %4685 = vmatpush1.bf16.msra.mxu0 %v12155_v4  ;;  %4831 = vmatpush1.bf16.msra.mxu1 %v12158_v61  ;;  %v12221_v4 = vld [vmem:[#allocation12 + $0x340] ss:$16 sps:$4 sm:$0xff]   ;;  %v12224_v61 = vld [vmem:[#allocation12 + $0x348] ss:$16 sps:$4 sm:$0xff]  }
 0x494   : > { %4727 = vmatprep.subr.bf16.mxu0 %v12163_v12  ;;  %4873 = vmatprep.subr.bf16.mxu1 %v12166_v10  ;;  %v12229_v12 = vld [vmem:[#allocation12 + $0x364] ss:$16 sps:$4 sm:$0xff]   ;;  %v12232_v10 = vld [vmem:[#allocation12 + $0x36c] ss:$16 sps:$4 sm:$0xff]  }
 0x496   : > { %4687 = vmatmul.mubr.bf16.vlgmr.msra.gmra.mrb[16].mxu0 %v3865_v35  ;;  %4833 = vmatmul.mubr.bf16.vlgmr.msra.gmra.mrb[16].mxu1 %v3865_v35  ;;  %v12233_v35 = vld [vmem:[#allocation12 + $0x380] ss:$16 sps:$4 sm:$0xff]  }
 0x497   : > { %4696 = vmatprep.mubr.bf16.mxu0 %v14695_v58  ;;  %4728 = vmatpush1.bf16.msra.mxu0 %v12161_v0  ;;  %v12235_v0 = vld [vmem:[#allocation12 + $0x384] ss:$16 sps:$4 sm:$0xff]  }
 0x498   : > { %4842 = vmatprep.mubr.bf16.mxu1 %v14695_v58  ;;  %4874 = vmatpush1.bf16.msra.mxu1 %v12164_v5  ;;  %v12179_v58 = vld [vmem:[#allocation12 + $0x260] ss:$16 sps:$4 sm:$0xff]   ;;  %v12238_v5 = vld [vmem:[#allocation12 + $0x38c] ss:$16 sps:$4 sm:$0xff]  }
 0x499   : > { %4729 = vmatprep.subr.bf16.mxu0 %v12169_v2  ;;  %4875 = vmatprep.subr.bf16.mxu1 %v12172_v55  ;;  %v12236_v2 = vld [vmem:[#allocation12 + $0x388] ss:$16 sps:$4 sm:$0xff]   ;;  %v12241_v55 = vld [vmem:[#allocation12 + $0x3a4] ss:$16 sps:$4 sm:$0xff]  }
 0x49b   : > { %4730 = vmatpush1.bf16.msra.mxu0 %v12167_v28  ;;  %v12244_v28 = vld [vmem:[#allocation12 + $0x3ac] ss:$16 sps:$4 sm:$0xff]  }
 0x49c   : > { %4876 = vmatpush1.bf16.msra.mxu1 %v12170_v56  ;;  %4731 = vmatprep.subr.bf16.mxu0 %v12175_v30  ;;  %v12239_v56 = vld [vmem:[#allocation12 + $0x3a0] ss:$16 sps:$4 sm:$0xff]   ;;  %v12242_v30 = vld [vmem:[#allocation12 + $0x3a8] ss:$16 sps:$4 sm:$0xff]  }
 0x49d   : > { %4877 = vmatprep.subr.bf16.mxu1 %v12178_v59  ;;  %v12247_v59 = vld [vmem:[#allocation12 + $0x3c4] ss:$16 sps:$4 sm:$0xff]  }
 0x49e   : > { %4697 = vmatmul.mubr.bf16.gmra.mrb[20].mxu0 %v14699_v9  ;;  %4843 = vmatmul.mubr.bf16.gmra.mrb[20].mxu1 %v14699_v9  ;;  %v12193_v9 = vld [vmem:[#allocation12 + $0x2a4] ss:$16 sps:$4 sm:$0xff]  }
 0x49f   : > { %4706 = vmatprep.mubr.bf16.mxu0 %v14702_v7  ;;  %4732 = vmatpush1.bf16.msra.mxu0 %v12173_v29  ;;  %v12967_v29 = vld [vmem:[#allocation3 + $0x30] sm:$0xff] }
 0x4a0   : > { %4852 = vmatprep.mubr.bf16.mxu1 %v14702_v7  ;;  %4878 = vmatpush1.bf16.msra.mxu1 %v12176_v8  ;;  %v3891_v7 = vshrl.u32 %v2648_v23, 16  ;;  %v3883_v8 = vshrl.u32 %v12967_v29, 16 }
 0x4a1   : > { %4733 = vmatprep.subr.bf16.mxu0 %v12181_v16  ;;  %4879 = vmatprep.subr.bf16.mxu1 %v12184_v32  ;;  %v12250_v16 = vld [vmem:[#allocation12 + $0x3cc] ss:$16 sps:$4 sm:$0xff]   ;;  %v2647_v32 = vld [vmem:[#allocation3 + $0x10] sm:$0x80] }
 0x4a2   : > { %v3893_v47 = vrot.slane %v3891_v7, 7  ;;  %v3879_v23 = vshrl.u32 %v2647_v32, 16  ;;  %v12259_v7 = vld [vmem:[#allocation12 + $0x804] ss:$16 sps:$4 sm:$0xff]  }
 0x4a3   : > { %4734 = vmatpush1.bf16.msra.mxu0 %v12179_v58  ;;  %v12245_v58 = vld [vmem:[#allocation12 + $0x3c0] ss:$16 sps:$4 sm:$0xff]  }
 0x4a4   : > { %4880 = vmatpush1.bf16.msra.mxu1 %v12182_v17  ;;  %4735 = vmatprep.subr.bf16.mxu0 %v12187_v11  ;;  %v3901_v6 = vsel %vm884_vm8, %v3893_v47, %v3900_v57  ;;  %v12248_v17 = vld [vmem:[#allocation12 + $0x3c8] ss:$16 sps:$4 sm:$0xff]   ;;  %v12253_v11 = vld [vmem:[#allocation12 + $0x3e4] ss:$16 sps:$4 sm:$0xff]   ;;  %v12257_v47 = vld [vmem:[#allocation12 + $0x800] ss:$16 sps:$4 sm:$0xff]  }
 0x4a5   : > { %4881 = vmatprep.subr.bf16.mxu1 %v12190_v1  ;;  %v3885_v1 = vrot.slane %v3883_v8, 7  ;;  %v3986_v8 = vshll.u32 %v14671_v18, 16 }
 0x4a6   : > { %4707 = vmatmul.mubr.bf16.gmra.mrb[24].mxu0 %v14705_v13  ;;  %4853 = vmatmul.mubr.bf16.gmra.mrb[24].mxu1 %v14705_v13  ;;  %v12197_v13 = vld [vmem:[#allocation12 + $0x2c0] ss:$16 sps:$4 sm:$0xff]  }
 0x4a7   : > { %4716 = vmatprep.mubr.bf16.mxu0 %v14709_v33  ;;  %4736 = vmatpush1.bf16.msra.mxu0 %v12185_v34  ;;  %v12256_v34 = vld [vmem:[#allocation12 + $0x3ec] ss:$16 sps:$4 sm:$0xff]  }
 0x4a8   : > { %4862 = vmatprep.mubr.bf16.mxu1 %v14709_v33  ;;  %4882 = vmatpush1.bf16.msra.mxu1 %v12188_v41  ;;  %v12203_v33 = vld [vmem:[#allocation12 + $0x2e0] ss:$16 sps:$4 sm:$0xff]   ;;  %v3886_v41 = vshll.u32 %v12967_v29, 16 }
 0x4a9   : > { %4737 = vmatprep.subr.bf16.mxu0 %v12193_v9  ;;  %4883 = vmatprep.subr.bf16.mxu1 %v12196_v38  ;;  %v12251_v9 = vld [vmem:[#allocation12 + $0x3e0] ss:$16 sps:$4 sm:$0xff]   ;;  %v12254_v38 = vld [vmem:[#allocation12 + $0x3e8] ss:$16 sps:$4 sm:$0xff]  }
 0x4ab   : > { %4738 = vmatpush1.bf16.msra.mxu0 %v12191_v22  ;;  %v12968_v22 = vld [vmem:[#allocation3 + $0x50] sm:$0xff] }
 0x4ac   : > { %4884 = vmatpush1.bf16.msra.mxu1 %v12194_v51  ;;  %4739 = vmatprep.subr.bf16.mxu0 %v12199_v54  ;;  %v3919_v42 = vshrl.u32 %v12968_v22, 16  ;;  %v3881_v51 = vrot.slane %v3879_v23, 7  ;;  %v3888_v54 = vor.u32 %v3886_v41, %v3885_v1 }
 0x4ad   : > { %4885 = vmatprep.subr.bf16.mxu1 %v12202_v3  ;;  %v12262_v3 = vld [vmem:[#allocation12 + $0x80c] ss:$16 sps:$4 sm:$0xff]  }
 0x4ae   : > { %4717 = vmatmul.mubr.bf16.gmra.mrb[28].mxu0 %v14717_v36  ;;  %4863 = vmatmul.mubr.bf16.gmra.mrb[28].mxu1 %v14717_v36  ;;  %v12220_v36 = vld [vmem:[#allocation12 + $0x32c] ss:$16 sps:$4 sm:$0xff]   ;;  %v3921_v57 = vrot.slane %v3919_v42, 7  ;;  %v12299_v42 = vld [vmem:[#allocation12 + $0x8e0] ss:$16 sps:$4 sm:$0xff]  }
 0x4af   : > { %4740 = vmatpush1.bf16.msra.mxu0 %v12197_v13  ;;  %4759 = vmatprep.mubr.bf16.mxu0 %v3901_v6  ;;  %v3889_v13 = vsel %vm884_vm8, %v3881_v51, %v3888_v54  ;;  %v12302_v51 = vld [vmem:[#allocation12 + $0x8e8] ss:$16 sps:$4 sm:$0xff]   ;;  %v12307_v54 = vld [vmem:[#allocation12 + $0x904] ss:$16 sps:$4 sm:$0xff]  }
 0x4b0   : > { %4886 = vmatpush1.bf16.msra.mxu1 %v12200_v50  ;;  %4905 = vmatprep.mubr.bf16.mxu1 %v3901_v6  ;;  %v12260_v50 = vld [vmem:[#allocation12 + $0x808] ss:$16 sps:$4 sm:$0xff]   ;;  %v3922_v6 = vshll.u32 %v12968_v22, 16  ;;  %v12304_v22 = vld [vmem:[#allocation12 + $0x8ec] ss:$16 sps:$4 sm:$0xff]  }
 0x4b1   : > { %4741 = vmatprep.subr.bf16.mxu0 %v12205_v43  ;;  %4887 = vmatprep.subr.bf16.mxu1 %v12208_v14  ;;  %v12265_v43 = vld [vmem:[#allocation12 + $0x824] ss:$16 sps:$4 sm:$0xff]   ;;  %v12268_v14 = vld [vmem:[#allocation12 + $0x82c] ss:$16 sps:$4 sm:$0xff]  }
 0x4b3   : > { %4742 = vmatpush1.bf16.msra.mxu0 %v12203_v33  ;;  %v12263_v33 = vld [vmem:[#allocation12 + $0x820] ss:$16 sps:$4 sm:$0xff]  }
 0x4b4   : > { %4888 = vmatpush1.bf16.msra.mxu1 %v12206_v21  ;;  %4743 = vmatprep.subr.bf16.mxu0 %v12211_v19  ;;  %v12969_v21 = vld [vmem:[#allocation3 + $0x70] sm:$0xff] }
 0x4b5   : > { %4889 = vmatprep.subr.bf16.mxu1 %v12214_v60  ;;  %v3951_v19 = vshrl.u32 %v12969_v21, 16  ;;  %v12266_v60 = vld [vmem:[#allocation12 + $0x828] ss:$16 sps:$4 sm:$0xff]  }
 0x4b7   : > { %4744 = vmatpush1.bf16.msra.mxu0 %v12209_v45  ;;  %v3924_v45 = vor.u32 %v3922_v6, %v3921_v57  ;;  %v12319_v6 = vld [vmem:[#allocation12 + $0x944] ss:$16 sps:$4 sm:$0xff]  }
 0x4b8   : > { %4890 = vmatpush1.bf16.msra.mxu1 %v12212_v46  ;;  %4745 = vmatprep.subr.bf16.mxu0 %v12217_v25  ;;  %v12271_v46 = vld [vmem:[#allocation12 + $0x844] ss:$16 sps:$4 sm:$0xff]   ;;  %v12274_v25 = vld [vmem:[#allocation12 + $0x84c] ss:$16 sps:$4 sm:$0xff]  }
 0x4b9   : > { %4891 = vmatprep.subr.bf16.mxu1 %v12220_v36  ;;  %v12269_v36 = vld [vmem:[#allocation12 + $0x840] ss:$16 sps:$4 sm:$0xff]  }
 0x4bb   : > { %4746 = vmatpush1.bf16.msra.mxu0 %v12215_v49  ;;  %v3953_v49 = vrot.slane %v3951_v19, 7  ;;  %v12320_v19 = vld [vmem:[#allocation12 + $0x948] ss:$16 sps:$4 sm:$0xff]  }
 0x4bc   : > { %4892 = vmatpush1.bf16.msra.mxu1 %v12218_v40  ;;  %4747 = vmatprep.subr.bf16.mxu0 %v12223_v62  ;;  %v3925_v40 = vsel %vm884_vm8, %v3885_v1, %v3924_v45  ;;  %v12272_v62 = vld [vmem:[#allocation12 + $0x848] ss:$16 sps:$4 sm:$0xff]   ;;  %v12298_v1 = vld [vmem:[#allocation12 + $0x8cc] ss:$16 sps:$4 sm:$0xff]  }
 0x4bd   : > { %4893 = vmatprep.subr.bf16.mxu1 %v12226_v63  ;;  %v12280_v63 = vld [vmem:[#allocation12 + $0x86c] ss:$16 sps:$4 sm:$0xff]  }
 0x4be   : > { %v12328_v45 = vld [vmem:[#allocation12 + $0x96c] ss:$16 sps:$4 sm:$0xff]  }
 0x4bf   : > { %4748 = vmatpush1.bf16.msra.mxu0 %v12221_v4  ;;  %v3954_v4 = vshll.u32 %v12969_v21, 16  ;;  %v12317_v21 = vld [vmem:[#allocation12 + $0x940] ss:$16 sps:$4 sm:$0xff]  }
 0x4c0   : > { %4894 = vmatpush1.bf16.msra.mxu1 %v12224_v61  ;;  %4749 = vmatprep.subr.bf16.mxu0 %v12229_v12  ;;  %v12275_v61 = vld [vmem:[#allocation12 + $0x860] ss:$16 sps:$4 sm:$0xff]   ;;  %v3983_v12 = vshrl.u32 %v14671_v18, 16 }
 0x4c1   : > { %4895 = vmatprep.subr.bf16.mxu1 %v12232_v10  ;;  %v12278_v10 = vld [vmem:[#allocation12 + $0x868] ss:$16 sps:$4 sm:$0xff]   ;;  %v12293_v18 = vld [vmem:[#allocation12 + $0x8c0] ss:$16 sps:$4 sm:$0xff]  }
 0x4c3   : > { %4750 = vmatpush1.bf16.msra.mxu0 %v12227_v20  ;;  %v3956_v20 = vor.u32 %v3954_v4, %v3953_v49  ;;  %v12335_v4 = vld [vmem:[#allocation12 + $0x9a0] ss:$16 sps:$4 sm:$0xff]  }
 0x4c4   : > { %4896 = vmatpush1.bf16.msra.mxu1 %v12230_v15  ;;  %4751 = vmatprep.subr.bf16.mxu0 %v12235_v0  ;;  %v12283_v15 = vld [vmem:[#allocation12 + $0x884] ss:$16 sps:$4 sm:$0xff]  }
 0x4c5   : > { %4897 = vmatprep.subr.bf16.mxu1 %v12238_v5  ;;  %v4947_v0 = vld [vmem:[#allocation3 + $0x28] sm:$0xff]  ;;  %v12286_v5 = vld [vmem:[#allocation12 + $0x88c] ss:$16 sps:$4 sm:$0xff]  }
 0x4c7   : > { %4752 = vmatpush1.bf16.msra.mxu0 %v12233_v35  ;;  %v14771_v35 = vld [vmem:[#allocation3 + $0x48] sm:$0xff] }
 0x4c8   : > { %4898 = vmatpush1.bf16.msra.mxu1 %v12236_v2  ;;  %4753 = vmatprep.subr.bf16.mxu0 %v12241_v55  ;;  %v12281_v2 = vld [vmem:[#allocation12 + $0x880] ss:$16 sps:$4 sm:$0xff]   ;;  %v5110_v55 = vshll.u32 %v4947_v0, 16  ;;  %v5115_v29 = vshll.u32 %v14771_v35, 16 }
 0x4c9   : > { %4899 = vmatprep.subr.bf16.mxu1 %v12244_v28  ;;  %v3985_v28 = vrot.slane %v3983_v12, 7  ;;  %v12343_v12 = vld [vmem:[#allocation12 + $0x9c4] ss:$16 sps:$4 sm:$0xff]  }
 0x4ca   : > { %v5112_v32 = vrot.slane %v5110_v55, 1  ;;  %v14778_v23 = vrot.slane %v5115_v29, 1  ;;  %v12344_v55 = vld [vmem:[#allocation12 + $0x9c8] ss:$16 sps:$4 sm:$0xff]  }
 0x4cb   : > { %4754 = vmatpush1.bf16.msra.mxu0 %v12239_v56  ;;  %v12284_v56 = vld [vmem:[#allocation12 + $0x888] ss:$16 sps:$4 sm:$0xff]  }
 0x4cc   : > { %4900 = vmatpush1.bf16.msra.mxu1 %v12242_v30  ;;  %4755 = vmatprep.subr.bf16.mxu0 %v12247_v59  ;;  %v12289_v30 = vld [vmem:[#allocation12 + $0x8a4] ss:$16 sps:$4 sm:$0xff]   ;;  %v12292_v59 = vld [vmem:[#allocation12 + $0x8ac] ss:$16 sps:$4 sm:$0xff]  }
 0x4cd   : > { %4901 = vmatprep.subr.bf16.mxu1 %v12250_v16  ;;  %v12287_v16 = vld [vmem:[#allocation12 + $0x8a0] ss:$16 sps:$4 sm:$0xff]  }
 0x4cf   : > { %4756 = vmatpush1.bf16.msra.mxu0 %v12245_v58  ;;  %v12290_v58 = vld [vmem:[#allocation12 + $0x8a8] ss:$16 sps:$4 sm:$0xff]  }
 0x4d0   : > { %4902 = vmatpush1.bf16.msra.mxu1 %v12248_v17  ;;  %4757 = vmatprep.subr.bf16.mxu0 %v12253_v11  ;;  %v3988_v17 = vor.u32 %v3986_v8, %v3985_v28  ;;  %v12295_v11 = vld [vmem:[#allocation12 + $0x8c4] ss:$16 sps:$4 sm:$0xff]   ;;  %v12350_v8 = vld [vmem:[#allocation12 + $0x9e8] ss:$16 sps:$4 sm:$0xff]  }
 0x4d1   : > { %4903 = vmatprep.subr.bf16.mxu1 %v12256_v34  ;;  %v5108_v34 = vshrl.u32 %v4947_v0, 16  ;;  %v12341_v0 = vld [vmem:[#allocation12 + $0x9c0] ss:$16 sps:$4 sm:$0xff]   ;;  %v12349_v28 = vld [vmem:[#allocation12 + $0x9e4] ss:$16 sps:$4 sm:$0xff]  }
 0x4d3   : > { %4758 = vmatpush1.bf16.msra.mxu0 %v12251_v9  ;;  %v5113_v41 = vor.u32 %v5112_v32, %v5108_v34  ;;  %v3989_v9 = vsel %vm884_vm8, %v3953_v49, %v3988_v17  ;;  %v12334_v49 = vld [vmem:[#allocation12 + $0x98c] ss:$16 sps:$4 sm:$0xff]  }
 0x4d4   : > { %4904 = vmatpush1.bf16.msra.mxu1 %v12254_v38  ;;  %5895 = vmatprep.subr.bf16.mxu0 %v12259_v7  ;;  %v12301_v38 = vld [vmem:[#allocation12 + $0x8e4] ss:$16 sps:$4 sm:$0xff]   ;;  %v12358_v17 = vld [vmem:[#allocation12 + $0xa0c] ss:$16 sps:$4 sm:$0xff]  }
 0x4d5   : > { %6041 = vmatprep.subr.bf16.mxu1 %v12262_v3  ;;  %v5118_v7 = vsel %vm1996_vm12, %v5113_v41, %v14778_v23  ;;  %v12310_v3 = vld [vmem:[#allocation12 + $0x90c] ss:$16 sps:$4 sm:$0xff]   ;;  %v4959_v41 = vld [vmem:[#allocation3 + $0x88] sm:$0xff] }
 0x4d6   : > { %4760 = vmatmul.mubr.bf16.vlgmr.msra.gmra.mrb[16].mxu0 %v3889_v13  ;;  %v14784_v34 = vld [vmem:[#allocation3 + $0x60] sm:$0xff] }
 0x4d7   : > { %4906 = vmatmul.mubr.bf16.vlgmr.msra.gmra.mrb[16].mxu1 %v3889_v13  ;;  %4769 = vmatprep.mubr.bf16.mxu0 %v14721_v44  ;;  %v12313_v13 = vld [vmem:[#allocation12 + $0x924] ss:$16 sps:$4 sm:$0xff]  }
 0x4d8   : > { %4915 = vmatprep.mubr.bf16.mxu1 %v14721_v44  ;;  %5896 = vmatpush1.bf16.msra.mxu0 %v12257_v47  ;;  %v12277_v44 = vld [vmem:[#allocation12 + $0x864] ss:$16 sps:$4 sm:$0xff]   ;;  %v12305_v47 = vld [vmem:[#allocation12 + $0x900] ss:$16 sps:$4 sm:$0xff]  }
 0x4d9   : > { %6042 = vmatpush1.bf16.msra.mxu1 %v12260_v50  ;;  %5897 = vmatprep.subr.bf16.mxu0 %v12265_v43  ;;  %v12316_v50 = vld [vmem:[#allocation12 + $0x92c] ss:$16 sps:$4 sm:$0xff]   ;;  %v12311_v43 = vld [vmem:[#allocation12 + $0x920] ss:$16 sps:$4 sm:$0xff]  }
 0x4da   : > { %6043 = vmatprep.subr.bf16.mxu1 %v12268_v14  ;;  %v12314_v14 = vld [vmem:[#allocation12 + $0x928] ss:$16 sps:$4 sm:$0xff]  }
 0x4dc   : > { %5898 = vmatpush1.bf16.msra.mxu0 %v12263_v33  ;;  %v12322_v33 = vld [vmem:[#allocation12 + $0x94c] ss:$16 sps:$4 sm:$0xff]  }
 0x4dd   : > { %6044 = vmatpush1.bf16.msra.mxu1 %v12266_v60  ;;  %5899 = vmatprep.subr.bf16.mxu0 %v12271_v46  ;;  %v12325_v60 = vld [vmem:[#allocation12 + $0x964] ss:$16 sps:$4 sm:$0xff]   ;;  %v12323_v46 = vld [vmem:[#allocation12 + $0x960] ss:$16 sps:$4 sm:$0xff]  }
 0x4de   : > { %4770 = vmatmul.mubr.bf16.gmra.mrb[20].mxu0 %v3925_v40  ;;  %6045 = vmatprep.subr.bf16.mxu1 %v12274_v25  ;;  %v12326_v25 = vld [vmem:[#allocation12 + $0x968] ss:$16 sps:$4 sm:$0xff]  }
 0x4df   : > { %4916 = vmatmul.mubr.bf16.gmra.mrb[20].mxu1 %v3925_v40  ;;  %4779 = vmatprep.mubr.bf16.mxu0 %v14724_v48  ;;  %v12329_v40 = vld [vmem:[#allocation12 + $0x980] ss:$16 sps:$4 sm:$0xff]  }
 0x4e0   : > { %4925 = vmatprep.mubr.bf16.mxu1 %v14724_v48  ;;  %5900 = vmatpush1.bf16.msra.mxu0 %v12269_v36  ;;  %v3957_v48 = vsel %vm884_vm8, %v3921_v57, %v3956_v20  ;;  %v12308_v57 = vld [vmem:[#allocation12 + $0x908] ss:$16 sps:$4 sm:$0xff]   ;;  %v12331_v36 = vld [vmem:[#allocation12 + $0x984] ss:$16 sps:$4 sm:$0xff]   ;;  %v12346_v20 = vld [vmem:[#allocation12 + $0x9cc] ss:$16 sps:$4 sm:$0xff]  }
 0x4e1   : > { %6046 = vmatpush1.bf16.msra.mxu1 %v12272_v62  ;;  %5901 = vmatprep.subr.bf16.mxu0 %v12277_v44  ;;  %v12332_v62 = vld [vmem:[#allocation12 + $0x988] ss:$16 sps:$4 sm:$0xff]   ;;  %v12337_v44 = vld [vmem:[#allocation12 + $0x9a4] ss:$16 sps:$4 sm:$0xff]  }
 0x4e2   : > { %6047 = vmatprep.subr.bf16.mxu1 %v12280_v63  ;;  %v12340_v63 = vld [vmem:[#allocation12 + $0x9ac] ss:$16 sps:$4 sm:$0xff]  }
 0x4e4   : > { %5902 = vmatpush1.bf16.msra.mxu0 %v12275_v61  ;;  %v12338_v61 = vld [vmem:[#allocation12 + $0x9a8] ss:$16 sps:$4 sm:$0xff]  }
 0x4e5   : > { %6048 = vmatpush1.bf16.msra.mxu1 %v12278_v10  ;;  %5903 = vmatprep.subr.bf16.mxu0 %v12283_v15  ;;  %v4946_v10 = vld [vmem:[#allocation3 + $0x20] sm:$0xff] }
 0x4e6   : > { %4780 = vmatmul.mubr.bf16.gmra.mrb[24].mxu0 %v3957_v48  ;;  %6049 = vmatprep.subr.bf16.mxu1 %v12286_v5  ;;  %v4950_v15 = vld [vmem:[#allocation3 + $0x40] sm:$0xff]  ;;  %v5098_v5 = vshll.u32 %v4946_v10, 16  ;;  %v5096_v32 = vshrl.u32 %v4946_v10, 16 }
 0x4e7   : > { %4926 = vmatmul.mubr.bf16.gmra.mrb[24].mxu1 %v3957_v48  ;;  %4789 = vmatprep.mubr.bf16.mxu0 %v14727_v39  ;;  %v12352_v48 = vld [vmem:[#allocation12 + $0x9ec] ss:$16 sps:$4 sm:$0xff]  }
 0x4e8   : > { %4935 = vmatprep.mubr.bf16.mxu1 %v14727_v39  ;;  %5904 = vmatpush1.bf16.msra.mxu0 %v12281_v2  ;;  %v12296_v39 = vld [vmem:[#allocation12 + $0x8c8] ss:$16 sps:$4 sm:$0xff]   ;;  %v5100_v29 = vrot.slane %v5098_v5, 1 }
 0x4e9   : > { %6050 = vmatpush1.bf16.msra.mxu1 %v12284_v56  ;;  %5905 = vmatprep.subr.bf16.mxu0 %v12289_v30  ;;  %v4955_v2 = vld [vmem:[#allocation3 + $0x68] sm:$0xff]  ;;  %v5103_v56 = vshll.u32 %v4950_v15, 16 }
 0x4ea   : > { %6051 = vmatprep.subr.bf16.mxu1 %v12292_v59  ;;  %v5155_v30 = vshll.u32 %v4955_v2, 16  ;;  %v12347_v59 = vld [vmem:[#allocation12 + $0x9e0] ss:$16 sps:$4 sm:$0xff]  }
 0x4ec   : > { %5906 = vmatpush1.bf16.msra.mxu0 %v12287_v16  ;;  %v12355_v16 = vld [vmem:[#allocation12 + $0xa04] ss:$16 sps:$4 sm:$0xff]  }
 0x4ed   : > { %6052 = vmatpush1.bf16.msra.mxu1 %v12290_v58  ;;  %5907 = vmatprep.subr.bf16.mxu0 %v12295_v11  ;;  %v5105_v58 = vrot.slane %v5103_v56, 1  ;;  %v5151_v11 = vshrl.u32 %v14771_v35, 16 }
 0x4ee   : > { %4790 = vmatmul.mubr.bf16.gmra.mrb[28].mxu0 %v3989_v9  ;;  %6053 = vmatprep.subr.bf16.mxu1 %v12298_v1  ;;  %v5157_v1 = vrot.slane %v5155_v30, 1 }
 0x4ef   : > { %4936 = vmatmul.mubr.bf16.gmra.mrb[28].mxu1 %v3989_v9  ;;  %5927 = vmatprep.mubr.bf16.mxu0 %v5118_v7  ;;  %v12353_v9 = vld [vmem:[#allocation12 + $0xa00] ss:$16 sps:$4 sm:$0xff]  }
 0x4f0   : > { %5908 = vmatpush1.bf16.msra.mxu0 %v12293_v18  ;;  %6073 = vmatprep.mubr.bf16.mxu1 %v5118_v7  ;;  %v5101_v18 = vor.u32 %v5100_v29, %v5096_v32  ;;  %v12356_v7 = vld [vmem:[#allocation12 + $0xa08] ss:$16 sps:$4 sm:$0xff]   ;;  %v12385_v29 = vld [vmem:[#allocation12 + $0xaa4] ss:$16 sps:$4 sm:$0xff]   ;;  %v12388_v32 = vld [vmem:[#allocation12 + $0xaac] ss:$16 sps:$4 sm:$0xff]  }
 0x4f1   : > { %6054 = vmatpush1.bf16.msra.mxu1 %v12296_v39  ;;  %5909 = vmatprep.subr.bf16.mxu0 %v12301_v38  ;;  %v5153_v39 = vor.u32 %v5151_v11, %v14778_v23  ;;  %v12362_v23 = vld [vmem:[#allocation12 + $0xa28] ss:$16 sps:$4 sm:$0xff]   ;;  %v12383_v11 = vld [vmem:[#allocation12 + $0xaa0] ss:$16 sps:$4 sm:$0xff]  }
 0x4f2   : > { %6055 = vmatprep.subr.bf16.mxu1 %v12304_v22  ;;  %v5106_v38 = vsel %vm1996_vm12, %v5101_v18, %v5105_v58  ;;  %v12361_v22 = vld [vmem:[#allocation12 + $0xa24] ss:$16 sps:$4 sm:$0xff]  }
 0x4f3   : > { %v5158_v35 = vsel %vm1996_vm12, %v5153_v39, %v5157_v1  ;;  %v12394_v39 = vld [vmem:[#allocation12 + $0xacc] ss:$16 sps:$4 sm:$0xff]  }
 0x4f4   : > { %5910 = vmatpush1.bf16.msra.mxu0 %v12299_v42  ;;  %v5147_v42 = vshll.u32 %v14784_v34, 16 }
 0x4f5   : > { %6056 = vmatpush1.bf16.msra.mxu1 %v12302_v51  ;;  %5911 = vmatprep.subr.bf16.mxu0 %v12307_v54  ;;  %v12364_v51 = vld [vmem:[#allocation12 + $0xa2c] ss:$16 sps:$4 sm:$0xff]   ;;  %v5187_v54 = vshll.u32 %v4959_v41, 16 }
 0x4f6   : > { %6057 = vmatprep.subr.bf16.mxu1 %v12310_v3  ;;  %v12359_v3 = vld [vmem:[#allocation12 + $0xa20] ss:$16 sps:$4 sm:$0xff]  }
 0x4f8   : > { %5912 = vmatpush1.bf16.msra.mxu0 %v12305_v47  ;;  %v5143_v47 = vshrl.u32 %v4950_v15, 16  ;;  %v12382_v15 = vld [vmem:[#allocation12 + $0xa8c] ss:$16 sps:$4 sm:$0xff]  }
 0x4f9   : > { %6058 = vmatpush1.bf16.msra.mxu1 %v12308_v57  ;;  %5913 = vmatprep.subr.bf16.mxu0 %v12313_v13  ;;  %v5149_v57 = vrot.slane %v5147_v42, 1  ;;  %v12367_v13 = vld [vmem:[#allocation12 + $0xa44] ss:$16 sps:$4 sm:$0xff]  }
 0x4fa   : > { %6059 = vmatprep.subr.bf16.mxu1 %v12316_v50  ;;  %v12370_v50 = vld [vmem:[#allocation12 + $0xa4c] ss:$16 sps:$4 sm:$0xff]  }
 0x4fc   : > { %5914 = vmatpush1.bf16.msra.mxu0 %v12311_v43  ;;  %v5183_v43 = vshrl.u32 %v4955_v2, 16  ;;  %v4962_v2 = vld [vmem:[#allocation3 + $0xa0] sm:$0x1] }
 0x4fd   : > { %6060 = vmatpush1.bf16.msra.mxu1 %v12314_v14  ;;  %5915 = vmatprep.subr.bf16.mxu0 %v12319_v6  ;;  %v5189_v14 = vrot.slane %v5187_v54, 1  ;;  %v4958_v6 = vld [vmem:[#allocation3 + $0x80] sm:$0xff]  ;;  %v12397_v54 = vld [vmem:[#allocation12 + $0xae4] ss:$16 sps:$4 sm:$0xff]  }
 0x4fe   : > { %6061 = vmatprep.subr.bf16.mxu1 %v12322_v33  ;;  %v5145_v33 = vor.u32 %v5143_v47, %v5105_v58  ;;  %v12395_v47 = vld [vmem:[#allocation12 + $0xae0] ss:$16 sps:$4 sm:$0xff]  }
 0x500   : > { %5916 = vmatpush1.bf16.msra.mxu0 %v12317_v21  ;;  %v4963_v21 = vld [vmem:[#allocation3 + $0xa8] sm:$0x1] }
 0x501   : > { %6062 = vmatpush1.bf16.msra.mxu1 %v12320_v19  ;;  %5917 = vmatprep.subr.bf16.mxu0 %v12325_v60  ;;  %v12365_v19 = vld [vmem:[#allocation12 + $0xa40] ss:$16 sps:$4 sm:$0xff]   ;;  %v5185_v60 = vor.u32 %v5183_v43, %v5157_v1 }
 0x502   : > { %6063 = vmatprep.subr.bf16.mxu1 %v12328_v45  ;;  %v5150_v45 = vsel %vm1996_vm12, %v5145_v33, %v5149_v57  ;;  %v12401_v43 = vld [vmem:[#allocation12 + $0xb00] ss:$16 sps:$4 sm:$0xff]   ;;  %v12412_v33 = vld [vmem:[#allocation12 + $0xb2c] ss:$16 sps:$4 sm:$0xff]  }
 0x504   : > { %5918 = vmatpush1.bf16.msra.mxu0 %v12323_v46  ;;  %v12368_v46 = vld [vmem:[#allocation12 + $0xa48] ss:$16 sps:$4 sm:$0xff]  }
 0x505   : > { %6064 = vmatpush1.bf16.msra.mxu1 %v12326_v25  ;;  %5919 = vmatprep.subr.bf16.mxu0 %v12331_v36  ;;  %v12373_v25 = vld [vmem:[#allocation12 + $0xa64] ss:$16 sps:$4 sm:$0xff]   ;;  %v5179_v36 = vshll.u32 %v4958_v6, 16 }
 0x506   : > { %6065 = vmatprep.subr.bf16.mxu1 %v12334_v49  ;;  %v5190_v49 = vsel %vm1996_vm12, %v5185_v60, %v5189_v14  ;;  %v12415_v60 = vld [vmem:[#allocation12 + $0xb44] ss:$16 sps:$4 sm:$0xff]  }
 0x507   : > { %v5181_v10 = vrot.slane %v5179_v36, 1  ;;  %v12421_v36 = vld [vmem:[#allocation12 + $0xb64] ss:$16 sps:$4 sm:$0xff]  }
 0x508   : > { %5920 = vmatpush1.bf16.msra.mxu0 %v12329_v40  ;;  %v12376_v40 = vld [vmem:[#allocation12 + $0xa6c] ss:$16 sps:$4 sm:$0xff]  }
 0x509   : > { %6066 = vmatpush1.bf16.msra.mxu1 %v12332_v62  ;;  %5921 = vmatprep.subr.bf16.mxu0 %v12337_v44  ;;  %v5219_v62 = vshll.u32 %v4963_v21, 16  ;;  %v12371_v44 = vld [vmem:[#allocation12 + $0xa60] ss:$16 sps:$4 sm:$0xff]  }
 0x50a   : > { %6067 = vmatprep.subr.bf16.mxu1 %v12340_v63  ;;  %v5215_v63 = vshrl.u32 %v4959_v41, 16  ;;  %v12407_v21 = vld [vmem:[#allocation12 + $0xb20] ss:$16 sps:$4 sm:$0xff]  }
 0x50b   : > { %v5221_v5 = vrot.slane %v5219_v62, 1  ;;  %v12422_v62 = vld [vmem:[#allocation12 + $0xb68] ss:$16 sps:$4 sm:$0xff]  }
 0x50c   : > { %5922 = vmatpush1.bf16.msra.mxu0 %v12335_v4  ;;  %v4949_v4 = vld [vmem:[#allocation3 + $0x38] sm:$0xff] }
 0x50d   : > { %6068 = vmatpush1.bf16.msra.mxu1 %v12338_v61  ;;  %5923 = vmatprep.subr.bf16.mxu0 %v12343_v12  ;;  %v12374_v61 = vld [vmem:[#allocation12 + $0xa68] ss:$16 sps:$4 sm:$0xff]   ;;  %v5175_v12 = vshrl.u32 %v14784_v34, 16  ;;  %v5134_v56 = vshll.u32 %v4949_v4, 16 }
 0x50e   : > { %6069 = vmatprep.subr.bf16.mxu1 %v12346_v20  ;;  %v12379_v20 = vld [vmem:[#allocation12 + $0xa84] ss:$16 sps:$4 sm:$0xff]   ;;  %v12386_v34 = vld [vmem:[#allocation12 + $0xaa8] ss:$16 sps:$4 sm:$0xff]  }
 0x50f   : > { %v5136_v1 = vrot.slane %v5134_v56, 1 }
 0x510   : > { %5924 = vmatpush1.bf16.msra.mxu0 %v12341_v0  ;;  %v5217_v0 = vor.u32 %v5215_v63, %v5189_v14  ;;  %v12404_v14 = vld [vmem:[#allocation12 + $0xb08] ss:$16 sps:$4 sm:$0xff]   ;;  %v12430_v63 = vld [vmem:[#allocation12 + $0xb8c] ss:$16 sps:$4 sm:$0xff]  }
 0x511   : > { %6070 = vmatpush1.bf16.msra.mxu1 %v12344_v55  ;;  %5925 = vmatprep.subr.bf16.mxu0 %v12349_v28  ;;  %v5177_v55 = vor.u32 %v5175_v12, %v5149_v57  ;;  %v14793_v28 = vld [vmem:[#allocation3 + $0x58] sm:$0xff] }
 0x512   : > { %6071 = vmatprep.subr.bf16.mxu1 %v12352_v48  ;;  %v12377_v48 = vld [vmem:[#allocation12 + $0xa80] ss:$16 sps:$4 sm:$0xff]   ;;  %v5139_v58 = vshll.u32 %v14793_v28, 16  ;;  %v12398_v57 = vld [vmem:[#allocation12 + $0xae8] ss:$16 sps:$4 sm:$0xff]  }
 0x513   : > { %v5182_v30 = vsel %vm1996_vm12, %v5177_v55, %v5181_v10  ;;  %v12433_v12 = vld [vmem:[#allocation12 + $0xba4] ss:$16 sps:$4 sm:$0xff]   ;;  %v4952_v55 = vld [vmem:[#allocation3 + $0x50] sm:$0xff] }
 0x514   : > { %5926 = vmatpush1.bf16.msra.mxu0 %v12347_v59  ;;  %v12380_v59 = vld [vmem:[#allocation12 + $0xa88] ss:$16 sps:$4 sm:$0xff]  }
 0x515   : > { %6072 = vmatpush1.bf16.msra.mxu1 %v12350_v8  ;;  %5968 = vmatprep.subr.bf16.mxu0 %v12355_v16  ;;  %v5211_v8 = vshll.u32 %v4962_v2, 16  ;;  %v5222_v16 = vsel %vm1996_vm12, %v5217_v0, %v5221_v5  ;;  %v12439_v0 = vld [vmem:[#allocation12 + $0xbc4] ss:$16 sps:$4 sm:$0xff]   ;;  %v4948_v5 = vld [vmem:[#allocation3 + $0x30] sm:$0xff] }
 0x516   : > { %6114 = vmatprep.subr.bf16.mxu1 %v12358_v17  ;;  %v5207_v17 = vshrl.u32 %v4958_v6, 16  ;;  %v12409_v6 = vld [vmem:[#allocation12 + $0xb24] ss:$16 sps:$4 sm:$0xff]   ;;  %v12442_v2 = vld [vmem:[#allocation12 + $0xbcc] ss:$16 sps:$4 sm:$0xff]   ;;  %v5122_v56 = vshll.u32 %v4948_v5, 16 }
 0x517   : > { %5928 = vmatmul.mubr.bf16.vlgmr.msra.gmra.mrb[16].mxu0 %v5106_v38  ;;  %v5213_v41 = vrot.slane %v5211_v8, 1  ;;  %v12448_v8 = vld [vmem:[#allocation12 + $0xbec] ss:$16 sps:$4 sm:$0xff]  }
 0x518   : > { %6074 = vmatmul.mubr.bf16.vlgmr.msra.gmra.mrb[16].mxu1 %v5106_v38  ;;  %5937 = vmatprep.mubr.bf16.mxu0 %v5158_v35  ;;  %v5209_v18 = vor.u32 %v5207_v17, %v5181_v10  ;;  %v5132_v38 = vshrl.u32 %v4949_v4, 16  ;;  %v12425_v4 = vld [vmem:[#allocation12 + $0xb80] ss:$16 sps:$4 sm:$0xff]   ;;  %v12436_v10 = vld [vmem:[#allocation12 + $0xbac] ss:$16 sps:$4 sm:$0xff]   ;;  %v5124_v17 = vrot.slane %v5122_v56, 1 }
 0x519   : > { %5969 = vmatpush1.bf16.msra.mxu0 %v12353_v9  ;;  %6083 = vmatprep.mubr.bf16.mxu1 %v5158_v35  ;;  %v12391_v9 = vld [vmem:[#allocation12 + $0xac4] ss:$16 sps:$4 sm:$0xff]  }
 0x51a   : > { %6115 = vmatpush1.bf16.msra.mxu1 %v12356_v7  ;;  %5970 = vmatprep.subr.bf16.mxu0 %v12361_v22  ;;  %v14798_v7 = vrot.slane %v5139_v58, 1  ;;  %v12389_v22 = vld [vmem:[#allocation12 + $0xac0] ss:$16 sps:$4 sm:$0xff]   ;;  %v5137_v42 = vor.u32 %v5136_v1, %v5132_v38  ;;  %v5214_v35 = vsel %vm1996_vm12, %v5209_v18, %v5213_v41  ;;  %v5120_v1 = vshrl.u32 %v4948_v5, 16  ;;  %v4961_v38 = vld [vmem:[#allocation3 + $0x98] sm:$0xff] }
 0x51b   : > { %6116 = vmatprep.subr.bf16.mxu1 %v12364_v51  ;;  %v12392_v51 = vld [vmem:[#allocation12 + $0xac8] ss:$16 sps:$4 sm:$0xff]   ;;  %v12443_v58 = vld [vmem:[#allocation12 + $0xbe0] ss:$16 sps:$4 sm:$0xff]   ;;  %v5167_v18 = vshrl.u32 %v14793_v28, 16 }
 0x51d   : > { %5971 = vmatpush1.bf16.msra.mxu0 %v12359_v3  ;;  %v5142_v3 = vsel %vm1996_vm12, %v5137_v42, %v14798_v7 }
 0x51e   : > { %6117 = vmatpush1.bf16.msra.mxu1 %v12362_v23  ;;  %5972 = vmatprep.subr.bf16.mxu0 %v12367_v13  ;;  %v12400_v23 = vld [vmem:[#allocation12 + $0xaec] ss:$16 sps:$4 sm:$0xff]   ;;  %v12403_v13 = vld [vmem:[#allocation12 + $0xb04] ss:$16 sps:$4 sm:$0xff]  }
 0x51f   : > { %5938 = vmatmul.mubr.bf16.gmra.mrb[20].mxu0 %v5150_v45  ;;  %6118 = vmatprep.subr.bf16.mxu1 %v12370_v50  ;;  %v12406_v50 = vld [vmem:[#allocation12 + $0xb0c] ss:$16 sps:$4 sm:$0xff]  }
 0x520   : > { %6084 = vmatmul.mubr.bf16.gmra.mrb[20].mxu1 %v5150_v45  ;;  %5947 = vmatprep.mubr.bf16.mxu0 %v5190_v49  ;;  %v12418_v45 = vld [vmem:[#allocation12 + $0xb4c] ss:$16 sps:$4 sm:$0xff]  }
 0x521   : > { %5973 = vmatpush1.bf16.msra.mxu0 %v12365_v19  ;;  %6093 = vmatprep.mubr.bf16.mxu1 %v5190_v49  ;;  %v12410_v19 = vld [vmem:[#allocation12 + $0xb28] ss:$16 sps:$4 sm:$0xff]   ;;  %v12424_v49 = vld [vmem:[#allocation12 + $0xb6c] ss:$16 sps:$4 sm:$0xff]  }
 0x522   : > { %6119 = vmatpush1.bf16.msra.mxu1 %v12368_v46  ;;  %5974 = vmatprep.subr.bf16.mxu0 %v12373_v25  ;;  %v12413_v46 = vld [vmem:[#allocation12 + $0xb40] ss:$16 sps:$4 sm:$0xff]   ;;  %v12416_v25 = vld [vmem:[#allocation12 + $0xb48] ss:$16 sps:$4 sm:$0xff]  }
 0x523   : > { %6120 = vmatprep.subr.bf16.mxu1 %v12376_v40  ;;  %v12419_v40 = vld [vmem:[#allocation12 + $0xb60] ss:$16 sps:$4 sm:$0xff]  }
 0x525   : > { %5975 = vmatpush1.bf16.msra.mxu0 %v12371_v44  ;;  %v12427_v44 = vld [vmem:[#allocation12 + $0xb84] ss:$16 sps:$4 sm:$0xff]  }
 0x526   : > { %6121 = vmatpush1.bf16.msra.mxu1 %v12374_v61  ;;  %5976 = vmatprep.subr.bf16.mxu0 %v12379_v20  ;;  %v12428_v61 = vld [vmem:[#allocation12 + $0xb88] ss:$16 sps:$4 sm:$0xff]   ;;  %v12431_v20 = vld [vmem:[#allocation12 + $0xba0] ss:$16 sps:$4 sm:$0xff]  }
 0x527   : > { %5948 = vmatmul.mubr.bf16.gmra.mrb[24].mxu0 %v5182_v30  ;;  %6122 = vmatprep.subr.bf16.mxu1 %v12382_v15  ;;  %v12434_v15 = vld [vmem:[#allocation12 + $0xba8] ss:$16 sps:$4 sm:$0xff]  }
 0x528   : > { %6094 = vmatmul.mubr.bf16.gmra.mrb[24].mxu1 %v5182_v30  ;;  %5957 = vmatprep.mubr.bf16.mxu0 %v5222_v16  ;;  %v4957_v30 = vld [vmem:[#allocation3 + $0x78] sm:$0xff] }
 0x529   : > { %5977 = vmatpush1.bf16.msra.mxu0 %v12377_v48  ;;  %6103 = vmatprep.mubr.bf16.mxu1 %v5222_v16  ;;  %v12437_v48 = vld [vmem:[#allocation12 + $0xbc0] ss:$16 sps:$4 sm:$0xff]   ;;  %v5127_v16 = vshll.u32 %v4952_v55, 16 }
 0x52a   : > { %6123 = vmatpush1.bf16.msra.mxu1 %v12380_v59  ;;  %5978 = vmatprep.subr.bf16.mxu0 %v12385_v29  ;;  %v12440_v59 = vld [vmem:[#allocation12 + $0xbc8] ss:$16 sps:$4 sm:$0xff]   ;;  %v12445_v29 = vld [vmem:[#allocation12 + $0xbe4] ss:$16 sps:$4 sm:$0xff]  }
 0x52b   : > { %6124 = vmatprep.subr.bf16.mxu1 %v12388_v32  ;;  %v5171_v32 = vshll.u32 %v4957_v30, 16 }
 0x52d   : > { %5979 = vmatpush1.bf16.msra.mxu0 %v12383_v11  ;;  %v12446_v11 = vld [vmem:[#allocation12 + $0xbe8] ss:$16 sps:$4 sm:$0xff]   ;;  %v5173_v41 = vrot.slane %v5171_v32, 1 }
 0x52e   : > { %6125 = vmatpush1.bf16.msra.mxu1 %v12386_v34  ;;  %5980 = vmatprep.subr.bf16.mxu0 %v12391_v9  ;;  %v5129_v34 = vrot.slane %v5127_v16, 1  ;;  %v4956_v9 = vld [vmem:[#allocation3 + $0x70] sm:$0xff] }
 0x52f   : > { %5958 = vmatmul.mubr.bf16.gmra.mrb[28].mxu0 %v5214_v35  ;;  %6126 = vmatprep.subr.bf16.mxu1 %v12394_v39  ;;  %v5125_v39 = vor.u32 %v5124_v17, %v5120_v1 }
 0x530   : > { %6104 = vmatmul.mubr.bf16.gmra.mrb[28].mxu1 %v5214_v35  ;;  %6000 = vmatprep.mubr.bf16.mxu0 %v5142_v3  ;;  %v5163_v35 = vshll.u32 %v4956_v9, 16 }
 0x531   : > { %5981 = vmatpush1.bf16.msra.mxu0 %v12389_v22  ;;  %6146 = vmatprep.mubr.bf16.mxu1 %v5142_v3  ;;  %v5169_v22 = vor.u32 %v5167_v18, %v14798_v7  ;;  %v5130_v42 = vsel %vm1996_vm12, %v5125_v39, %v5129_v34  ;;  %v5159_v3 = vshrl.u32 %v4952_v55, 16 }
 0x532   : > { %6127 = vmatpush1.bf16.msra.mxu1 %v12392_v51  ;;  %5982 = vmatprep.subr.bf16.mxu0 %v12397_v54  ;;  %v5203_v54 = vshll.u32 %v4961_v38, 16  ;;  %v5165_v28 = vrot.slane %v5163_v35, 1 }
 0x533   : > { %6128 = vmatprep.subr.bf16.mxu1 %v12400_v23  ;;  %v5174_v51 = vsel %vm1996_vm12, %v5169_v22, %v5173_v41  ;;  %v5199_v23 = vshrl.u32 %v4957_v30, 16 }
 0x535   : > { %5983 = vmatpush1.bf16.msra.mxu0 %v12395_v47  ;;  %v5205_v47 = vrot.slane %v5203_v54, 1 }
 0x536   : > { %6129 = vmatpush1.bf16.msra.mxu1 %v12398_v57  ;;  %5984 = vmatprep.subr.bf16.mxu0 %v12403_v13  ;;  %v4960_v57 = vld [vmem:[#allocation3 + $0x90] sm:$0xff]  ;;  %v5161_v13 = vor.u32 %v5159_v3, %v5129_v34 }
 0x537   : > { %6130 = vmatprep.subr.bf16.mxu1 %v12406_v50  ;;  %v4965_v50 = vld [vmem:[#allocation3 + $0xb8] sm:$0x1] }
 0x538   : > { %v5166_v7 = vsel %vm1996_vm12, %v5161_v13, %v5165_v28 }
 0x539   : > { %5985 = vmatpush1.bf16.msra.mxu0 %v12401_v43  ;;  %v5201_v43 = vor.u32 %v5199_v23, %v5173_v41 }
 0x53a   : > { %6131 = vmatpush1.bf16.msra.mxu1 %v12404_v14  ;;  %5986 = vmatprep.subr.bf16.mxu0 %v12409_v6  ;;  %v5195_v14 = vshll.u32 %v4960_v57, 16 }
 0x53b   : > { %6132 = vmatprep.subr.bf16.mxu1 %v12412_v33  ;;  %v5206_v6 = vsel %vm1996_vm12, %v5201_v43, %v5205_v47  ;;  %v5235_v33 = vshll.u32 %v4965_v50, 16 }
 0x53d   : > { %5987 = vmatpush1.bf16.msra.mxu0 %v12407_v21  ;;  %v5231_v21 = vshrl.u32 %v4961_v38, 16 }
 0x53e   : > { %6133 = vmatpush1.bf16.msra.mxu1 %v12410_v19  ;;  %5988 = vmatprep.subr.bf16.mxu0 %v12415_v60  ;;  %v5191_v19 = vshrl.u32 %v4956_v9, 16  ;;  %v5197_v60 = vrot.slane %v5195_v14, 1 }
 0x53f   : > { %6134 = vmatprep.subr.bf16.mxu1 %v12418_v45  ;;  %v5233_v45 = vor.u32 %v5231_v21, %v5205_v47 }
 0x541   : > { %5989 = vmatpush1.bf16.msra.mxu0 %v12413_v46  ;;  %v5237_v46 = vrot.slane %v5235_v33, 1 }
 0x542   : > { %6135 = vmatpush1.bf16.msra.mxu1 %v12416_v25  ;;  %5990 = vmatprep.subr.bf16.mxu0 %v12421_v36  ;;  %v4964_v25 = vld [vmem:[#allocation3 + $0xb0] sm:$0x1]  ;;  %v5193_v36 = vor.u32 %v5191_v19, %v5165_v28 }
 0x543   : > { %6136 = vmatprep.subr.bf16.mxu1 %v12424_v49 }
 0x544   : > { %v5198_v49 = vsel %vm1996_vm12, %v5193_v36, %v5197_v60 }
 0x545   : > { %5991 = vmatpush1.bf16.msra.mxu0 %v12419_v40  ;;  %v5227_v40 = vshll.u32 %v4964_v25, 16 }
 0x546   : > { %6137 = vmatpush1.bf16.msra.mxu1 %v12422_v62  ;;  %5992 = vmatprep.subr.bf16.mxu0 %v12427_v44  ;;  %v5238_v62 = vsel %vm1996_vm12, %v5233_v45, %v5237_v46  ;;  %v5223_v44 = vshrl.u32 %v4960_v57, 16 }
 0x547   : > { %6138 = vmatprep.subr.bf16.mxu1 %v12430_v63 }
 0x548   : > { %v5225_v63 = vor.u32 %v5223_v44, %v5197_v60 }
 0x549   : > { %5993 = vmatpush1.bf16.msra.mxu0 %v12425_v4  ;;  %v5229_v4 = vrot.slane %v5227_v40, 1 }
 0x54a   : > { %6139 = vmatpush1.bf16.msra.mxu1 %v12428_v61  ;;  %5994 = vmatprep.subr.bf16.mxu0 %v12433_v12  ;;  %v13634_v12 = vmov 0  }
 0x54b   : > { %6140 = vmatprep.subr.bf16.mxu1 %v12436_v10  ;;  %v5230_v61 = vsel %vm1996_vm12, %v5225_v63, %v5229_v4  ;;  %v6219_v10 = vld [vmem:[#allocation14] sm:$0xf] }
 0x54c   : > { %v14826_v5 = vrot.slane %v6219_v10, %v2519_v27 }
 0x54d   : > { %5995 = vmatpush1.bf16.msra.mxu0 %v12431_v20  ;;  %v14815_v20 = vrot.slane %v6219_v10, %v14558_v53 }
 0x54e   : > { %6141 = vmatpush1.bf16.msra.mxu1 %v12434_v15  ;;  %5996 = vmatprep.subr.bf16.mxu0 %v12439_v0  ;;  %v14819_v15 = vrot.slane %v6219_v10, %v2515_v24  ;;  %v14822_v0 = vrot.slane %v6219_v10, %v14562_v26 }
 0x54f   : > { %6142 = vmatprep.subr.bf16.mxu1 %v12442_v2 }
 0x551   : > { %5997 = vmatpush1.bf16.msra.mxu0 %v12437_v48 }
 0x552   : > { %6143 = vmatpush1.bf16.msra.mxu1 %v12440_v59  ;;  %5998 = vmatprep.subr.bf16.mxu0 %v12445_v29 }
 0x553   : > { %6144 = vmatprep.subr.bf16.mxu1 %v12448_v8 }
 0x555   : > { %5999 = vmatpush1.bf16.msra.mxu0 %v12443_v58 }
 0x556   : > { %6145 = vmatpush1.bf16.msra.mxu1 %v12446_v11 }
 0x558   : > { %6001 = vmatmul.mubr.bf16.vlgmr.msra.gmra.mrb[16].mxu0 %v5130_v42 }
 0x559   : > { %6147 = vmatmul.mubr.bf16.vlgmr.msra.gmra.mrb[16].mxu1 %v5130_v42  ;;  %6010 = vmatprep.mubr.bf16.mxu0 %v5174_v51 }
 0x55a   : > { %6156 = vmatprep.mubr.bf16.mxu1 %v5174_v51 }
 0x560   : > { %6011 = vmatmul.mubr.bf16.gmra.mrb[20].mxu0 %v5166_v7 }
 0x561   : > { %6157 = vmatmul.mubr.bf16.gmra.mrb[20].mxu1 %v5166_v7  ;;  %6020 = vmatprep.mubr.bf16.mxu0 %v5206_v6 }
 0x562   : > { %6166 = vmatprep.mubr.bf16.mxu1 %v5206_v6 }
 0x568   : > { %6021 = vmatmul.mubr.bf16.gmra.mrb[24].mxu0 %v5198_v49 }
 0x569   : > { %6167 = vmatmul.mubr.bf16.gmra.mrb[24].mxu1 %v5198_v49  ;;  %6030 = vmatprep.mubr.bf16.mxu0 %v5238_v62 }
 0x56a   : > { %6176 = vmatprep.mubr.bf16.mxu1 %v5238_v62 }
 0x570   : > { %6031 = vmatmul.mubr.bf16.gmra.mrb[28].mxu0 %v5230_v61 }
 0x571   : > { %6177 = vmatmul.mubr.bf16.gmra.mrb[28].mxu1 %v5230_v61  ;;  %6373 = vmatprep.mubr.bf16.mxu0 %v13634_v12 }
 0x572   : > { %6426 = vmatprep.mubr.bf16.mxu1 %v13634_v12 }
 0x62b   : > { %v6002_v2 = vpop.f32.mrb[16].mxu0 }
 0x62c   : > { %v6241_v55 = vadd.f32 %v14815_v20, %v6002_v2  ;;  %v6148_v48 = vpop.f32.mrb[16].mxu1  ;;  %v6004_v56 = vpop.f32.mrb[17].mxu0 }
 0x62d   : > { %v6243_v30 = vadd.f32 %v14819_v15, %v6148_v48  ;;  %v6242_v59 = vadd.f32 %v14822_v0, %v6004_v56  ;;  %v6150_v29 = vpop.f32.mrb[17].mxu1  ;;  %v6006_v8 = vpop.f32.mrb[18].mxu0 }
 0x62e   : > { %v6244_v24 = vadd.f32 %v14826_v5, %v6150_v29  ;;  %v6245_v16 = vadd.f32 %v14815_v20, %v6006_v8  ;;  %v6152_v32 = vpop.f32.mrb[18].mxu1  ;;  %v6008_v58 = vpop.f32.mrb[19].mxu0  ;;  %v6273_v11 = vmax.f32 %v6241_v55, 0.0 }
 0x62f   : > { %v6247_v52 = vadd.f32 %v14819_v15, %v6152_v32  ;;  %v6246_v27 = vadd.f32 %v14822_v0, %v6008_v58  ;;  %v6154_v17 = vpop.f32.mrb[19].mxu1  ;;  %v6275_v18 = vmax.f32 %v6243_v30, 0.0  ;;  %v6274_v41 = vmax.f32 %v6242_v59, 0.0 }
 0x630   : > { %v6277_v1 = vmax.f32 %v6245_v16, 0.0  ;;  %v6248_v34 = vadd.f32 %v14826_v5, %v6154_v17  ;;  %v6276_v38 = vmax.f32 %v6244_v24, 0.0 }
 0x631   : > { %v6279_v9 = vmax.f32 %v6247_v52, 0.0  ;;  %v6278_v39 = vmax.f32 %v6246_v27, 0.0 }
 0x632   : > { %v14836_v22 = vpack.c.bf16 %v6277_v1, %v6273_v11  ;;  %v6280_v42 = vmax.f32 %v6248_v34, 0.0 }
 0x633   : > { %v14838_v35 = vpack.c.bf16 %v6279_v9, %v6275_v18  ;;  %v14840_v51 = vpack.c.bf16 %v6278_v39, %v6274_v41  ;;  %v6012_v54 = vpop.f32.mrb[20].mxu0 }
 0x634   : > { %v14842_v3 = vpack.c.bf16 %v6280_v42, %v6276_v38  ;;  %v6249_v28 = vadd.f32 %v14815_v20, %v6012_v54  ;;  %v6158_v23 = vpop.f32.mrb[20].mxu1  ;;  %v6014_v47 = vpop.f32.mrb[21].mxu0 }
 0x635   : > { %v6251_v57 = vadd.f32 %v14819_v15, %v6158_v23  ;;  %v6250_v13 = vadd.f32 %v14822_v0, %v6014_v47  ;;  %v6160_v50 = vpop.f32.mrb[21].mxu1  ;;  %v6016_v43 = vpop.f32.mrb[22].mxu0  ;;  %6341 = vmatprep.subr.bf16.mxu0 %v14840_v51 }
 0x636   : > { %v6252_v7 = vadd.f32 %v14826_v5, %v6160_v50  ;;  %v6253_v14 = vadd.f32 %v14815_v20, %v6016_v43  ;;  %v6162_v6 = vpop.f32.mrb[22].mxu1  ;;  %6394 = vmatprep.subr.bf16.mxu1 %v14842_v3  ;;  %v6018_v33 = vpop.f32.mrb[23].mxu0  ;;  %6342 = vmatpush1.bf16.msra.mxu0 %v14836_v22  ;;  %v6281_v45 = vmax.f32 %v6249_v28, 0.0 }
 0x637   : > { %v6255_v21 = vadd.f32 %v14819_v15, %v6162_v6  ;;  %v6254_v19 = vadd.f32 %v14822_v0, %v6018_v33  ;;  %v6164_v60 = vpop.f32.mrb[23].mxu1  ;;  %6395 = vmatpush1.bf16.msra.mxu1 %v14838_v35  ;;  %v6283_v36 = vmax.f32 %v6251_v57, 0.0  ;;  %v6282_v49 = vmax.f32 %v6250_v13, 0.0 }
 0x638   : > { %v6285_v46 = vmax.f32 %v6253_v14, 0.0  ;;  %v6256_v25 = vadd.f32 %v14826_v5, %v6164_v60  ;;  %v6284_v44 = vmax.f32 %v6252_v7, 0.0 }
 0x639   : > { %v6287_v40 = vmax.f32 %v6255_v21, 0.0  ;;  %v6286_v62 = vmax.f32 %v6254_v19, 0.0 }
 0x63a   : > { %v14856_v63 = vpack.c.bf16 %v6285_v46, %v6281_v45  ;;  %v6288_v4 = vmax.f32 %v6256_v25, 0.0 }
 0x63b   : > { %v14858_v61 = vpack.c.bf16 %v6287_v40, %v6283_v36  ;;  %v14860_v10 = vpack.c.bf16 %v6286_v62, %v6282_v49  ;;  %v6022_v2 = vpop.f32.mrb[24].mxu0 }
 0x63c   : > { %v14862_v55 = vpack.c.bf16 %v6288_v4, %v6284_v44  ;;  %v6257_v48 = vadd.f32 %v14815_v20, %v6022_v2  ;;  %v6168_v56 = vpop.f32.mrb[24].mxu1  ;;  %v6024_v30 = vpop.f32.mrb[25].mxu0 }
 0x63d   : > { %v6259_v59 = vadd.f32 %v14819_v15, %v6168_v56  ;;  %v6258_v29 = vadd.f32 %v14822_v0, %v6024_v30  ;;  %v6170_v8 = vpop.f32.mrb[25].mxu1  ;;  %v6026_v24 = vpop.f32.mrb[26].mxu0  ;;  %6343 = vmatprep.subr.bf16.mxu0 %v14860_v10 }
 0x63e   : > { %v6260_v16 = vadd.f32 %v14826_v5, %v6170_v8  ;;  %v6261_v32 = vadd.f32 %v14815_v20, %v6026_v24  ;;  %v6172_v58 = vpop.f32.mrb[26].mxu1  ;;  %6396 = vmatprep.subr.bf16.mxu1 %v14862_v55  ;;  %v6028_v52 = vpop.f32.mrb[27].mxu0  ;;  %6344 = vmatpush1.bf16.msra.mxu0 %v14856_v63  ;;  %v6289_v1 = vmax.f32 %v6257_v48, 0.0 }
 0x63f   : > { %v6263_v27 = vadd.f32 %v14819_v15, %v6172_v58  ;;  %v6262_v17 = vadd.f32 %v14822_v0, %v6028_v52  ;;  %v6174_v11 = vpop.f32.mrb[27].mxu1  ;;  %6397 = vmatpush1.bf16.msra.mxu1 %v14858_v61  ;;  %v6291_v41 = vmax.f32 %v6259_v59, 0.0  ;;  %v6290_v9 = vmax.f32 %v6258_v29, 0.0  ;;  %v12465_v58 = vld [vmem:[#allocation18 + $0x20] ss:$8 sps:$4 sm:$0xff]  }
 0x640   : > { %v6293_v34 = vmax.f32 %v6261_v32, 0.0  ;;  %v6264_v18 = vadd.f32 %v14826_v5, %v6174_v11  ;;  %v6292_v42 = vmax.f32 %v6260_v16, 0.0  ;;  %v12452_v16 = vld [vmem:[#allocation17 + $0x8] sm:$0xff]   ;;  %v12470_v52 = vld [vmem:[#allocation20 + $0x24] ss:$8 sps:$4 sm:$0xff]  }
 0x641   : > { %v6295_v39 = vmax.f32 %v6263_v27, 0.0  ;;  %v6294_v38 = vmax.f32 %v6262_v17, 0.0  ;;  %v12462_v32 = vld [vmem:[#allocation20 + $0x10] ss:$8 sps:$4 sm:$0xff]   ;;  %v12473_v27 = vld [vmem:[#allocation18 + $0x34] ss:$8 sps:$4 sm:$0xff]  }
 0x642   : > { %v6313_v54 = vpack.c.bf16 %v6293_v34, %v6289_v1  ;;  %v6296_v28 = vmax.f32 %v6264_v18, 0.0  ;;  %v12468_v17 = vld [vmem:[#allocation20 + $0x20] ss:$8 sps:$4 sm:$0xff]   ;;  %v12471_v11 = vld [vmem:[#allocation18 + $0x30] ss:$8 sps:$4 sm:$0xff]  }
 0x643   : > { %v6315_v23 = vpack.c.bf16 %v6295_v39, %v6291_v41  ;;  %v6314_v47 = vpack.c.bf16 %v6294_v38, %v6290_v9  ;;  %v6032_v57 = vpop.f32.mrb[28].mxu0  ;;  %v12476_v1 = vld [vmem:[#allocation20 + $0x34] ss:$8 sps:$4 sm:$0xff]   ;;  %v12479_v34 = vld [vmem:[#allocation18 + $0x44] ss:$8 sps:$4 sm:$0xff]  }
 0x644   : > { %v6316_v13 = vpack.c.bf16 %v6296_v28, %v6292_v42  ;;  %v6265_v50 = vadd.f32 %v14815_v20, %v6032_v57  ;;  %v6178_v43 = vpop.f32.mrb[28].mxu1  ;;  %v6034_v7 = vpop.f32.mrb[29].mxu0  ;;  %v12474_v18 = vld [vmem:[#allocation20 + $0x30] ss:$8 sps:$4 sm:$0xff]   ;;  %v12477_v41 = vld [vmem:[#allocation18 + $0x40] ss:$8 sps:$4 sm:$0xff]  }
 0x645   : > { %v6267_v14 = vadd.f32 %v14819_v15, %v6178_v43  ;;  %v6266_v6 = vadd.f32 %v14822_v0, %v6034_v7  ;;  %v6180_v33 = vpop.f32.mrb[29].mxu1  ;;  %v6036_v21 = vpop.f32.mrb[30].mxu0  ;;  %6345 = vmatprep.subr.bf16.mxu0 %v6314_v47  ;;  %v12482_v9 = vld [vmem:[#allocation20 + $0x44] ss:$8 sps:$4 sm:$0xff]   ;;  %v12485_v39 = vld [vmem:[#allocation18 + $0x54] ss:$8 sps:$4 sm:$0xff]  }
 0x646   : > { %v6268_v19 = vadd.f32 %v14826_v5, %v6180_v33  ;;  %v6269_v60 = vadd.f32 %v14815_v20, %v6036_v21  ;;  %v6182_v45 = vpop.f32.mrb[30].mxu1  ;;  %6398 = vmatprep.subr.bf16.mxu1 %v6316_v13  ;;  %v6038_v46 = vpop.f32.mrb[31].mxu0  ;;  %6346 = vmatpush1.bf16.msra.mxu0 %v6313_v54  ;;  %v6297_v40 = vmax.f32 %v6265_v50, 0.0  ;;  %v12480_v38 = vld [vmem:[#allocation20 + $0x40] ss:$8 sps:$4 sm:$0xff]  }
 0x647   : > { %v6271_v25 = vadd.f32 %v14819_v15, %v6182_v45  ;;  %v6270_v36 = vadd.f32 %v14822_v0, %v6038_v46  ;;  %v6184_v49 = vpop.f32.mrb[31].mxu1  ;;  %6399 = vmatpush1.bf16.msra.mxu1 %v6315_v23  ;;  %v6299_v4 = vmax.f32 %v6267_v14, 0.0  ;;  %v6298_v2 = vmax.f32 %v6266_v6, 0.0  ;;  %v12449_v15 = vld [vmem:[#allocation15] sm:$0xff]   ;;  %v12450_v0 = vld [vmem:[#allocation15 + $0x8] sm:$0xff]  }
 0x648   : > { %v6301_v62 = vmax.f32 %v6269_v60, 0.0  ;;  %v6272_v44 = vadd.f32 %v14826_v5, %v6184_v49  ;;  %v6300_v30 = vmax.f32 %v6268_v19, 0.0  ;;  %v12455_v5 = vld [vmem:[#allocation18 + $0x4] ss:$8 sps:$4 sm:$0xff]   ;;  %v12483_v42 = vld [vmem:[#allocation18 + $0x50] ss:$8 sps:$4 sm:$0xff]  }
 0x649   : > { %v6303_v48 = vmax.f32 %v6271_v25, 0.0  ;;  %v6302_v56 = vmax.f32 %v6270_v36, 0.0  ;;  %v12491_v28 = vld [vmem:[#allocation18 + $0x64] ss:$8 sps:$4 sm:$0xff]   ;;  %v12492_v50 = vld [vmem:[#allocation20 + $0x60] ss:$8 sps:$4 sm:$0xff]  }
 0x64a   : > { %v6317_v20 = vpack.c.bf16 %v6301_v62, %v6297_v40  ;;  %v6304_v59 = vmax.f32 %v6272_v44, 0.0  ;;  %v12494_v57 = vld [vmem:[#allocation20 + $0x64] ss:$8 sps:$4 sm:$0xff]   ;;  %v12495_v43 = vld [vmem:[#allocation18 + $0x70] ss:$8 sps:$4 sm:$0xff]  }
 0x64b   : > { %v6319_v29 = vpack.c.bf16 %v6303_v48, %v6299_v4  ;;  %v6318_v8 = vpack.c.bf16 %v6302_v56, %v6298_v2  ;;  %v12500_v7 = vld [vmem:[#allocation20 + $0x74] ss:$8 sps:$4 sm:$0xff]   ;;  %v12503_v14 = vld [vmem:[#allocation18 + $0x84] ss:$8 sps:$4 sm:$0xff]   ;;  %v12498_v6 = vld [vmem:[#allocation20 + $0x70] ss:$8 sps:$4 sm:$0xff]  }
 0x64c   : > { %v6320_v24 = vpack.c.bf16 %v6304_v59, %v6300_v30  ;;  %v12501_v33 = vld [vmem:[#allocation18 + $0x80] ss:$8 sps:$4 sm:$0xff]   ;;  %v12506_v21 = vld [vmem:[#allocation20 + $0x84] ss:$8 sps:$4 sm:$0xff]   ;;  %v12509_v19 = vld [vmem:[#allocation18 + $0x94] ss:$8 sps:$4 sm:$0xff]  }
 0x64d   : > { %6347 = vmatprep.subr.bf16.mxu0 %v6318_v8  ;;  %v12504_v60 = vld [vmem:[#allocation20 + $0x80] ss:$8 sps:$4 sm:$0xff]   ;;  %v12507_v45 = vld [vmem:[#allocation18 + $0x90] ss:$8 sps:$4 sm:$0xff]   ;;  %v12512_v46 = vld [vmem:[#allocation20 + $0x94] ss:$8 sps:$4 sm:$0xff]  }
 0x64e   : > { %6400 = vmatprep.subr.bf16.mxu1 %v6320_v24  ;;  %6348 = vmatpush1.bf16.msra.mxu0 %v6317_v20  ;;  %v12510_v25 = vld [vmem:[#allocation20 + $0x90] ss:$8 sps:$4 sm:$0xff]   ;;  %v12513_v36 = vld [vmem:[#allocation18 + $0xa0] ss:$8 sps:$4 sm:$0xff]   ;;  %v12515_v49 = vld [vmem:[#allocation18 + $0xa4] ss:$8 sps:$4 sm:$0xff]  }
 0x64f   : > { %6401 = vmatpush1.bf16.msra.mxu1 %v6319_v29  ;;  %6467 = vmatprep.subr.bf16.mxu0 %v14840_v51  ;;  %v12453_v51 = vld [vmem:[#allocation18] ss:$8 sps:$4 sm:$0xff]   ;;  %v12518_v62 = vld [vmem:[#allocation20 + $0xa4] ss:$8 sps:$4 sm:$0xff]   ;;  %v12519_v44 = vld [vmem:[#allocation18 + $0xb0] ss:$8 sps:$4 sm:$0xff]  }
 0x650   : > { %6520 = vmatprep.subr.bf16.mxu1 %v14842_v3  ;;  %v12461_v3 = vld [vmem:[#allocation18 + $0x14] ss:$8 sps:$4 sm:$0xff]   ;;  %v12516_v40 = vld [vmem:[#allocation20 + $0xa0] ss:$8 sps:$4 sm:$0xff]   ;;  %v12522_v2 = vld [vmem:[#allocation20 + $0xb0] ss:$8 sps:$4 sm:$0xff]  }
 0x651   : > { %10738 = vmatmul.mubr.msk.bf16.vlgmr.msra.gmra.mrb[32].mxu0 %vm906_vm0, %v12449_v15  ;;  %v12521_v4 = vld [vmem:[#allocation18 + $0xb4] ss:$8 sps:$4 sm:$0xff]   ;;  %v12525_v56 = vld [vmem:[#allocation18 + $0xc0] ss:$8 sps:$4 sm:$0xff]   ;;  %v12527_v30 = vld [vmem:[#allocation18 + $0xc4] ss:$8 sps:$4 sm:$0xff]  }
 0x652   : > { %10740 = vmatmul.mubr.msk.bf16.vlgmr.msra.gmra.mrb[32].mxu1 %vm906_vm0, %v12449_v15  ;;  %6468 = vmatpush1.bf16.msra.mxu0 %v14836_v22  ;;  %v12458_v22 = vld [vmem:[#allocation20 + $0x4] ss:$8 sps:$4 sm:$0xff]   ;;  %v12524_v48 = vld [vmem:[#allocation20 + $0xb4] ss:$8 sps:$4 sm:$0xff]  }
 0x653   : > { %6521 = vmatpush1.bf16.msra.mxu1 %v14838_v35  ;;  %6469 = vmatprep.subr.bf16.mxu0 %v14860_v10  ;;  %v12451_v35 = vld [vmem:[#allocation17] sm:$0xff]   ;;  %v12530_v59 = vld [vmem:[#allocation20 + $0xc4] ss:$8 sps:$4 sm:$0xff]  }
 0x654   : > { %6522 = vmatprep.subr.bf16.mxu1 %v14862_v55  ;;  %6383 = vmatprep.mubr.bf16.mxu0 %v13634_v12  ;;  %v12464_v10 = vld [vmem:[#allocation20 + $0x14] ss:$8 sps:$4 sm:$0xff]   ;;  %v12467_v55 = vld [vmem:[#allocation18 + $0x24] ss:$8 sps:$4 sm:$0xff]  }
 0x655   : > { %6436 = vmatprep.mubr.bf16.mxu1 %v13634_v12  ;;  %v12536_v15 = vld [vmem:[#allocation20 + $0xd4] ss:$8 sps:$4 sm:$0xff]  }
 0x656   : > { %6470 = vmatpush1.bf16.msra.mxu0 %v14856_v63  ;;  %v12456_v63 = vld [vmem:[#allocation20] ss:$8 sps:$4 sm:$0xff]  }
 0x657   : > { %6523 = vmatpush1.bf16.msra.mxu1 %v14858_v61  ;;  %6471 = vmatprep.subr.bf16.mxu0 %v6314_v47  ;;  %v12459_v61 = vld [vmem:[#allocation18 + $0x10] ss:$8 sps:$4 sm:$0xff]   ;;  %v12489_v47 = vld [vmem:[#allocation18 + $0x60] ss:$8 sps:$4 sm:$0xff]  }
 0x658   : > { %6524 = vmatprep.subr.bf16.mxu1 %v6316_v13  ;;  %v12497_v13 = vld [vmem:[#allocation18 + $0x74] ss:$8 sps:$4 sm:$0xff]  }
 0x659   : > { %10739 = vmatmul.mubr.msk.bf16.gmra.mrb[36].mxu0 %vm906_vm0, %v12450_v0 }
 0x65a   : > { %6472 = vmatpush1.bf16.msra.mxu0 %v6313_v54  ;;  %6499 = vmatprep.mubr.bf16.mxu0 %v13634_v12  ;;  %v12488_v54 = vld [vmem:[#allocation20 + $0x54] ss:$8 sps:$4 sm:$0xff]  }
 0x65b   : > { %6525 = vmatpush1.bf16.msra.mxu1 %v6315_v23  ;;  %6473 = vmatprep.subr.bf16.mxu0 %v6318_v8  ;;  %v12486_v23 = vld [vmem:[#allocation20 + $0x50] ss:$8 sps:$4 sm:$0xff]   ;;  %v12533_v8 = vld [vmem:[#allocation18 + $0xd4] ss:$8 sps:$4 sm:$0xff]  }
 0x65c   : > { %6526 = vmatprep.subr.bf16.mxu1 %v6320_v24  ;;  %10741 = vmatmul.mubr.msk.bf16.gmra.mrb[36].mxu1 %vm906_vm0, %v12450_v0  ;;  %v12534_v24 = vld [vmem:[#allocation20 + $0xd0] ss:$8 sps:$4 sm:$0xff]   ;;  %v12537_v0 = vld [vmem:[#allocation18 + $0xe0] ss:$8 sps:$4 sm:$0xff]  }
 0x65d   : > { %6552 = vmatprep.mubr.bf16.mxu1 %v13634_v12 }
 0x65e   : > { %6474 = vmatpush1.bf16.msra.mxu0 %v6317_v20  ;;  %v12528_v20 = vld [vmem:[#allocation20 + $0xc0] ss:$8 sps:$4 sm:$0xff]  }
 0x65f   : > { %6527 = vmatpush1.bf16.msra.mxu1 %v6319_v29  ;;  %6981 = vmatprep.subr.bf16.mxu0 %v12455_v5  ;;  %v12531_v29 = vld [vmem:[#allocation18 + $0xd0] ss:$8 sps:$4 sm:$0xff]   ;;  %v12539_v5 = vld [vmem:[#allocation18 + $0xe4] ss:$8 sps:$4 sm:$0xff]  }
 0x660   : > { %7471 = vmatprep.subr.bf16.mxu1 %v12458_v22  ;;  %v12540_v22 = vld [vmem:[#allocation20 + $0xe0] ss:$8 sps:$4 sm:$0xff]  }
 0x661   : > { %10744 = vmatmul.mubr.msk.bf16.vlgmr.msra.gmra.mrb[40].mxu0 %vm906_vm0, %v12451_v35 }
 0x662   : > { %6509 = vmatprep.mubr.bf16.mxu0 %v13634_v12  ;;  %6982 = vmatpush1.bf16.msra.mxu0 %v12453_v51  ;;  %v12543_v51 = vld [vmem:[#allocation18 + $0xf0] ss:$8 sps:$4 sm:$0xff]  }
 0x663   : > { %6983 = vmatprep.subr.bf16.mxu0 %v12461_v3  ;;  %v12545_v3 = vld [vmem:[#allocation18 + $0xf4] ss:$8 sps:$4 sm:$0xff]  }
 0x664   : > { %10746 = vmatmul.mubr.msk.bf16.vlgmr.msra.gmra.mrb[40].mxu1 %vm906_vm0, %v12451_v35  ;;  %v12542_v35 = vld [vmem:[#allocation20 + $0xe4] ss:$8 sps:$4 sm:$0xff]  }
 0x665   : > { %6562 = vmatprep.mubr.bf16.mxu1 %v13634_v12  ;;  %7472 = vmatpush1.bf16.msra.mxu1 %v12456_v63  ;;  %v12546_v63 = vld [vmem:[#allocation20 + $0xf0] ss:$8 sps:$4 sm:$0xff]  }
 0x666   : > { %7473 = vmatprep.subr.bf16.mxu1 %v12464_v10  ;;  %6984 = vmatpush1.bf16.msra.mxu0 %v12459_v61  ;;  %v12548_v61 = vld [vmem:[#allocation20 + $0xf4] ss:$8 sps:$4 sm:$0xff]   ;;  %v12551_v10 = vld [vmem:[#allocation18 + $0x104] ss:$8 sps:$4 sm:$0xff]  }
 0x667   : > { %6985 = vmatprep.subr.bf16.mxu0 %v12467_v55  ;;  %v12554_v55 = vld [vmem:[#allocation20 + $0x104] ss:$8 sps:$4 sm:$0xff]  }
 0x669   : > { %10745 = vmatmul.mubr.msk.bf16.gmra.mrb[44].mxu0 %vm906_vm0, %v12452_v16  ;;  %7474 = vmatpush1.bf16.msra.mxu1 %v12462_v32 }
 0x66a   : > { %7475 = vmatprep.subr.bf16.mxu1 %v12470_v52  ;;  %6986 = vmatpush1.bf16.msra.mxu0 %v12465_v58 }
 0x66b   : > { %6987 = vmatprep.subr.bf16.mxu0 %v12473_v27 }
 0x66c   : > { %10747 = vmatmul.mubr.msk.bf16.gmra.mrb[44].mxu1 %vm906_vm0, %v12452_v16  ;;  %vm9875_vm0 = vcmask 16384  }
 0x66d   : > { %7476 = vmatpush1.bf16.msra.mxu1 %v12468_v17 }
 0x66e   : > { %7477 = vmatprep.subr.bf16.mxu1 %v12476_v1  ;;  %6988 = vmatpush1.bf16.msra.mxu0 %v12471_v11 }
 0x66f   : > { %6989 = vmatprep.subr.bf16.mxu0 %v12479_v34 }
 0x671   : > { %7478 = vmatpush1.bf16.msra.mxu1 %v12474_v18 }
 0x672   : > { %7479 = vmatprep.subr.bf16.mxu1 %v12482_v9  ;;  %6990 = vmatpush1.bf16.msra.mxu0 %v12477_v41 }
 0x673   : > { %6991 = vmatprep.subr.bf16.mxu0 %v12485_v39 }
 0x675   : > { %7480 = vmatpush1.bf16.msra.mxu1 %v12480_v38 }
 0x676   : > { %7481 = vmatprep.subr.bf16.mxu1 %v12488_v54  ;;  %6992 = vmatpush1.bf16.msra.mxu0 %v12483_v42 }
 0x677   : > { %6993 = vmatprep.subr.bf16.mxu0 %v12491_v28 }
 0x679   : > { %7482 = vmatpush1.bf16.msra.mxu1 %v12486_v23 }
 0x67a   : > { %7483 = vmatprep.subr.bf16.mxu1 %v12494_v57  ;;  %6994 = vmatpush1.bf16.msra.mxu0 %v12489_v47 }
 0x67b   : > { %6995 = vmatprep.subr.bf16.mxu0 %v12497_v13 }
 0x67d   : > { %7484 = vmatpush1.bf16.msra.mxu1 %v12492_v50 }
 0x67e   : > { %7485 = vmatprep.subr.bf16.mxu1 %v12500_v7  ;;  %6996 = vmatpush1.bf16.msra.mxu0 %v12495_v43 }
 0x67f   : > { %6997 = vmatprep.subr.bf16.mxu0 %v12503_v14 }
 0x681   : > { %7486 = vmatpush1.bf16.msra.mxu1 %v12498_v6 }
 0x682   : > { %7487 = vmatprep.subr.bf16.mxu1 %v12506_v21  ;;  %6998 = vmatpush1.bf16.msra.mxu0 %v12501_v33 }
 0x683   : > { %6999 = vmatprep.subr.bf16.mxu0 %v12509_v19 }
 0x685   : > { %7488 = vmatpush1.bf16.msra.mxu1 %v12504_v60 }
 0x686   : > { %7489 = vmatprep.subr.bf16.mxu1 %v12512_v46  ;;  %7000 = vmatpush1.bf16.msra.mxu0 %v12507_v45  ;;  %v12549_v46 = vld [vmem:[#allocation18 + $0x100] ss:$8 sps:$4 sm:$0xff]  }
 0x687   : > { %7001 = vmatprep.subr.bf16.mxu0 %v12515_v49 }
 0x689   : > { %7490 = vmatpush1.bf16.msra.mxu1 %v12510_v25  ;;  %v12552_v25 = vld [vmem:[#allocation20 + $0x100] ss:$8 sps:$4 sm:$0xff]  }
 0x68a   : > { %7491 = vmatprep.subr.bf16.mxu1 %v12518_v62  ;;  %7002 = vmatpush1.bf16.msra.mxu0 %v12513_v36  ;;  %v12560_v62 = vld [vmem:[#allocation20 + $0x114] ss:$8 sps:$4 sm:$0xff]  }
 0x68b   : > { %7003 = vmatprep.subr.bf16.mxu0 %v12521_v4 }
 0x68d   : > { %7492 = vmatpush1.bf16.msra.mxu1 %v12516_v40  ;;  %v12557_v40 = vld [vmem:[#allocation18 + $0x114] ss:$8 sps:$4 sm:$0xff]  }
 0x68e   : > { %7493 = vmatprep.subr.bf16.mxu1 %v12524_v48  ;;  %7004 = vmatpush1.bf16.msra.mxu0 %v12519_v44 }
 0x68f   : > { %7005 = vmatprep.subr.bf16.mxu0 %v12527_v30 }
 0x691   : > { %7494 = vmatpush1.bf16.msra.mxu1 %v12522_v2 }
 0x692   : > { %7495 = vmatprep.subr.bf16.mxu1 %v12530_v59  ;;  %7006 = vmatpush1.bf16.msra.mxu0 %v12525_v56 }
 0x693   : > { %7007 = vmatprep.subr.bf16.mxu0 %v12533_v8  ;;  %v12558_v8 = vld [vmem:[#allocation20 + $0x110] ss:$8 sps:$4 sm:$0xff]  }
 0x695   : > { %7496 = vmatpush1.bf16.msra.mxu1 %v12528_v20 }
 0x696   : > { %7497 = vmatprep.subr.bf16.mxu1 %v12536_v15  ;;  %7008 = vmatpush1.bf16.msra.mxu0 %v12531_v29  ;;  %v12555_v29 = vld [vmem:[#allocation18 + $0x110] ss:$8 sps:$4 sm:$0xff]  }
 0x697   : > { %7009 = vmatprep.subr.bf16.mxu0 %v12539_v5  ;;  %v12566_v5 = vld [vmem:[#allocation20 + $0x124] ss:$8 sps:$4 sm:$0xff]  }
 0x699   : > { %7498 = vmatpush1.bf16.msra.mxu1 %v12534_v24 }
 0x69a   : > { %7499 = vmatprep.subr.bf16.mxu1 %v12542_v35  ;;  %7010 = vmatpush1.bf16.msra.mxu0 %v12537_v0  ;;  %v12563_v0 = vld [vmem:[#allocation18 + $0x124] ss:$8 sps:$4 sm:$0xff]  }
 0x69b   : > { %7011 = vmatprep.subr.bf16.mxu0 %v12545_v3 }
 0x69d   : > { %7500 = vmatpush1.bf16.msra.mxu1 %v12540_v22 }
 0x69e   : > { %7501 = vmatprep.subr.bf16.mxu1 %v12548_v61  ;;  %7012 = vmatpush1.bf16.msra.mxu0 %v12543_v51 }
 0x69f   : > { %7034 = vmatprep.subr.bf16.mxu0 %v12551_v10 }
 0x6a1   : > { %7502 = vmatpush1.bf16.msra.mxu1 %v12546_v63 }
 0x6a2   : > { %7524 = vmatprep.subr.bf16.mxu1 %v12554_v55 }
 0x724   : > { %v6375_v16 = vpop.f32.mrb[32].mxu0 }
 0x725   : > { %v6377_v32 = vpop.f32.mrb[33].mxu0  ;;  %v6428_v58 = vpop.f32.mrb[32].mxu1 }
 0x726   : > { %v6379_v52 = vpop.f32.mrb[34].mxu0  ;;  %v6430_v27 = vpop.f32.mrb[33].mxu1 }
 0x727   : > { %v6381_v17 = vpop.f32.mrb[35].mxu0  ;;  %v6432_v11 = vpop.f32.mrb[34].mxu1 }
 0x728   : > { %v6434_v1 = vpop.f32.mrb[35].mxu1 }
 0x72c   : > { %v6385_v34 = vpop.f32.mrb[36].mxu0 }
 0x72d   : > { %v6387_v18 = vpop.f32.mrb[37].mxu0 }
 0x72e   : > { %v6389_v41 = vpop.f32.mrb[38].mxu0 }
 0x72f   : > { %v6391_v9 = vpop.f32.mrb[39].mxu0  ;;  %v14906_v39 = vpop.f32.mrb[36].mxu1 }
 0x730   : > { %v14908_v38 = vpop.f32.mrb[37].mxu1 }
 0x731   : > { %v14910_v42 = vpop.f32.mrb[38].mxu1 }
 0x732   : > { %v14912_v54 = vpop.f32.mrb[39].mxu1 }
 0x734   : > { %v6501_v28 = vpop.f32.mrb[40].mxu0 }
 0x735   : > { %v6573_v23 = vmax.f32 %v6375_v16, %v6501_v28  ;;  %v6503_v47 = vpop.f32.mrb[41].mxu0  ;;  %v12561_v16 = vld [vmem:[#allocation18 + $0x120] ss:$8 sps:$4 sm:$0xff]   ;;  %v12584_v28 = vld [vmem:[#allocation20 + $0x154] ss:$8 sps:$4 sm:$0xff]  }
 0x736   : > { %v6574_v57 = vmax.f32 %v6377_v32, %v6503_v47  ;;  %v6505_v13 = vpop.f32.mrb[42].mxu0  ;;  %v12564_v32 = vld [vmem:[#allocation20 + $0x120] ss:$8 sps:$4 sm:$0xff]   ;;  %v12582_v47 = vld [vmem:[#allocation20 + $0x150] ss:$8 sps:$4 sm:$0xff]  }
 0x737   : > { %v6577_v50 = vmax.f32 %v6379_v52, %v6505_v13  ;;  %v6507_v43 = vpop.f32.mrb[43].mxu0  ;;  %v6554_v7 = vpop.f32.mrb[40].mxu1  ;;  %v12590_v13 = vld [vmem:[#allocation20 + $0x164] ss:$8 sps:$4 sm:$0xff]  }
 0x738   : > { %v6578_v14 = vmax.f32 %v6381_v17, %v6507_v43  ;;  %v6575_v6 = vmax.f32 %v6428_v58, %v6554_v7  ;;  %v6556_v33 = vpop.f32.mrb[41].mxu1  ;;  %v12572_v17 = vld [vmem:[#allocation20 + $0x134] ss:$8 sps:$4 sm:$0xff]   ;;  %v12588_v43 = vld [vmem:[#allocation20 + $0x160] ss:$8 sps:$4 sm:$0xff]  }
 0x739   : > { %v6589_v21 = vpack.c.bf16 %v6577_v50, %v6573_v23  ;;  %v6576_v19 = vmax.f32 %v6430_v27, %v6556_v33  ;;  %v6558_v60 = vpop.f32.mrb[42].mxu1  ;;  %v12569_v27 = vld [vmem:[#allocation18 + $0x134] ss:$8 sps:$4 sm:$0xff]   ;;  %v12579_v23 = vld [vmem:[#allocation18 + $0x150] ss:$8 sps:$4 sm:$0xff]  }
 0x73a   : > { %v6590_v45 = vpack.c.bf16 %v6578_v14, %v6574_v57  ;;  %v6579_v36 = vmax.f32 %v6432_v11, %v6558_v60  ;;  %v6560_v49 = vpop.f32.mrb[43].mxu1  ;;  %v12587_v57 = vld [vmem:[#allocation18 + $0x164] ss:$8 sps:$4 sm:$0xff]   ;;  %v12585_v50 = vld [vmem:[#allocation18 + $0x160] ss:$8 sps:$4 sm:$0xff]  }
 0x73b   : > { %v6580_v44 = vmax.f32 %v6434_v1, %v6560_v49  ;;  %v12593_v7 = vld [vmem:[#allocation18 + $0x174] ss:$8 sps:$4 sm:$0xff]   ;;  %v12594_v33 = vld [vmem:[#allocation20 + $0x170] ss:$8 sps:$4 sm:$0xff]   ;;  %v12597_v60 = vld [vmem:[#allocation18 + $0x180] ss:$8 sps:$4 sm:$0xff]  }
 0x73c   : > { %v6511_v4 = vpop.f32.mrb[44].mxu0  ;;  %7013 = vmatprep.mubr.bf16.mxu0 %v6590_v45  ;;  %7503 = vmatprep.mubr.bf16.mxu1 %v6590_v45  ;;  %v14914_v2 = vpack.c.bf16 %v6579_v36, %v6575_v6  ;;  %v12596_v14 = vld [vmem:[#allocation20 + $0x174] ss:$8 sps:$4 sm:$0xff]   ;;  %v12591_v6 = vld [vmem:[#allocation18 + $0x170] ss:$8 sps:$4 sm:$0xff]  }
 0x73d   : > { %v6581_v48 = vmax.f32 %v6385_v34, %v6511_v4  ;;  %v6513_v56 = vpop.f32.mrb[45].mxu0  ;;  %7014 = vmatmul.mubr.bf16.vlgmr.msra.gmra.mrb[48].mxu0 %v6589_v21  ;;  %7504 = vmatmul.mubr.bf16.vlgmr.msra.gmra.mrb[48].mxu1 %v6589_v21  ;;  %v6592_v30 = vpack.c.bf16 %v6580_v44, %v6576_v19  ;;  %v12599_v21 = vld [vmem:[#allocation18 + $0x184] ss:$8 sps:$4 sm:$0xff]   ;;  %v12600_v45 = vld [vmem:[#allocation20 + $0x180] ss:$8 sps:$4 sm:$0xff]  }
 0x73e   : > { %v6582_v20 = vmax.f32 %v6387_v18, %v6513_v56  ;;  %7035 = vmatpush1.bf16.msra.mxu0 %v12549_v46  ;;  %7525 = vmatpush1.bf16.msra.mxu1 %v12552_v25  ;;  %v6515_v59 = vpop.f32.mrb[46].mxu0  ;;  %v12567_v18 = vld [vmem:[#allocation18 + $0x130] ss:$8 sps:$4 sm:$0xff]   ;;  %v12602_v19 = vld [vmem:[#allocation20 + $0x184] ss:$8 sps:$4 sm:$0xff]  }
 0x73f   : > { %v6585_v24 = vmax.f32 %v6389_v41, %v6515_v59  ;;  %v6517_v15 = vpop.f32.mrb[47].mxu0  ;;  %7036 = vmatprep.subr.bf16.mxu0 %v12557_v40  ;;  %7526 = vmatprep.subr.bf16.mxu1 %v12560_v62  ;;  %v6564_v22 = vpop.f32.mrb[44].mxu1  ;;  %v12570_v41 = vld [vmem:[#allocation20 + $0x130] ss:$8 sps:$4 sm:$0xff]   ;;  %v12605_v46 = vld [vmem:[#allocation18 + $0x194] ss:$8 sps:$4 sm:$0xff]  }
 0x740   : > { %v6586_v35 = vmax.f32 %v6391_v9, %v6517_v15  ;;  %v6583_v51 = vmax.f32 %v14906_v39, %v6564_v22  ;;  %v6566_v3 = vpop.f32.mrb[45].mxu1  ;;  %v12575_v9 = vld [vmem:[#allocation18 + $0x144] ss:$8 sps:$4 sm:$0xff]   ;;  %v12608_v25 = vld [vmem:[#allocation20 + $0x194] ss:$8 sps:$4 sm:$0xff]  }
 0x741   : > { %v6593_v63 = vpack.c.bf16 %v6585_v24, %v6581_v48  ;;  %v6584_v61 = vmax.f32 %v14908_v38, %v6566_v3  ;;  %v6568_v10 = vpop.f32.mrb[46].mxu1  ;;  %v12578_v39 = vld [vmem:[#allocation20 + $0x144] ss:$8 sps:$4 sm:$0xff]   ;;  %v12573_v38 = vld [vmem:[#allocation18 + $0x140] ss:$8 sps:$4 sm:$0xff]  }
 0x742   : > { %v6594_v55 = vpack.c.bf16 %v6586_v35, %v6582_v20  ;;  %7037 = vmatpush1.bf16.msra.mxu0 %v12555_v29  ;;  %7527 = vmatpush1.bf16.msra.mxu1 %v12558_v8  ;;  %v6587_v58 = vmax.f32 %v14910_v42, %v6568_v10  ;;  %v6570_v52 = vpop.f32.mrb[47].mxu1  ;;  %v12576_v42 = vld [vmem:[#allocation20 + $0x140] ss:$8 sps:$4 sm:$0xff]   ;;  %v12603_v36 = vld [vmem:[#allocation18 + $0x190] ss:$8 sps:$4 sm:$0xff]  }
 0x743   : > { %7038 = vmatprep.subr.bf16.mxu0 %v12563_v0  ;;  %7528 = vmatprep.subr.bf16.mxu1 %v12566_v5  ;;  %v6588_v11 = vmax.f32 %v14912_v54, %v6570_v52  ;;  %v12581_v54 = vld [vmem:[#allocation18 + $0x154] ss:$8 sps:$4 sm:$0xff]   ;;  %v12606_v49 = vld [vmem:[#allocation20 + $0x190] ss:$8 sps:$4 sm:$0xff]   ;;  %v12611_v40 = vld [vmem:[#allocation18 + $0x1a4] ss:$8 sps:$4 sm:$0xff]  }
 0x744   : > { %7023 = vmatprep.mubr.bf16.mxu0 %v6594_v55  ;;  %7513 = vmatprep.mubr.bf16.mxu1 %v6594_v55  ;;  %v14920_v1 = vpack.c.bf16 %v6587_v58, %v6583_v51  ;;  %v12614_v62 = vld [vmem:[#allocation20 + $0x1a4] ss:$8 sps:$4 sm:$0xff]   ;;  %v12609_v44 = vld [vmem:[#allocation18 + $0x1a0] ss:$8 sps:$4 sm:$0xff]   ;;  %v12617_v48 = vld [vmem:[#allocation18 + $0x1b4] ss:$8 sps:$4 sm:$0xff]  }
 0x745   : > { %7024 = vmatmul.mubr.bf16.gmra.mrb[52].mxu0 %v6593_v63  ;;  %7514 = vmatmul.mubr.bf16.gmra.mrb[52].mxu1 %v6593_v63  ;;  %v14922_v34 = vpack.c.bf16 %v6588_v11, %v6584_v61  ;;  %v12612_v4 = vld [vmem:[#allocation20 + $0x1a0] ss:$8 sps:$4 sm:$0xff]   ;;  %v12620_v56 = vld [vmem:[#allocation20 + $0x1b4] ss:$8 sps:$4 sm:$0xff]   ;;  %v12618_v20 = vld [vmem:[#allocation20 + $0x1b0] ss:$8 sps:$4 sm:$0xff]  }
 0x746   : > { %7039 = vmatpush1.bf16.msra.mxu0 %v12561_v16  ;;  %7529 = vmatpush1.bf16.msra.mxu1 %v12564_v32  ;;  %v12623_v59 = vld [vmem:[#allocation18 + $0x1c4] ss:$8 sps:$4 sm:$0xff]   ;;  %v12621_v8 = vld [vmem:[#allocation18 + $0x1c0] ss:$8 sps:$4 sm:$0xff]   ;;  %v12629_v15 = vld [vmem:[#allocation18 + $0x1d4] ss:$8 sps:$4 sm:$0xff]  }
 0x747   : > { %7040 = vmatprep.subr.bf16.mxu0 %v12569_v27  ;;  %7530 = vmatprep.subr.bf16.mxu1 %v12572_v17  ;;  %v12626_v29 = vld [vmem:[#allocation20 + $0x1c4] ss:$8 sps:$4 sm:$0xff]   ;;  %v12624_v24 = vld [vmem:[#allocation20 + $0x1c0] ss:$8 sps:$4 sm:$0xff]   ;;  %v12632_v0 = vld [vmem:[#allocation20 + $0x1d4] ss:$8 sps:$4 sm:$0xff]  }
 0x748   : > { %7066 = vmatprep.mubr.bf16.mxu0 %v6592_v30  ;;  %7556 = vmatprep.mubr.bf16.mxu1 %v6592_v30  ;;  %v12615_v30 = vld [vmem:[#allocation18 + $0x1b0] ss:$8 sps:$4 sm:$0xff]   ;;  %v12635_v35 = vld [vmem:[#allocation18 + $0x1e4] ss:$8 sps:$4 sm:$0xff]   ;;  %v12633_v3 = vld [vmem:[#allocation18 + $0x1e0] ss:$8 sps:$4 sm:$0xff]  }
 0x749   : > { %v12627_v5 = vld [vmem:[#allocation18 + $0x1d0] ss:$8 sps:$4 sm:$0xff]   ;;  %v12638_v51 = vld [vmem:[#allocation20 + $0x1e4] ss:$8 sps:$4 sm:$0xff]   ;;  %v12636_v63 = vld [vmem:[#allocation20 + $0x1e0] ss:$8 sps:$4 sm:$0xff]  }
 0x74a   : > { %7041 = vmatpush1.bf16.msra.mxu0 %v12567_v18  ;;  %7531 = vmatpush1.bf16.msra.mxu1 %v12570_v41  ;;  %v12630_v22 = vld [vmem:[#allocation20 + $0x1d0] ss:$8 sps:$4 sm:$0xff]   ;;  %v12641_v61 = vld [vmem:[#allocation18 + $0x1f4] ss:$8 sps:$4 sm:$0xff]   ;;  %v12647_v32 = vld [vmem:[#allocation21 + $0x104] ss:$8 sps:$4 sm:$0xff]  }
 0x74b   : > { %7042 = vmatprep.subr.bf16.mxu0 %v12575_v9  ;;  %7532 = vmatprep.subr.bf16.mxu1 %v12578_v39  ;;  %v12644_v10 = vld [vmem:[#allocation20 + $0x1f4] ss:$8 sps:$4 sm:$0xff]   ;;  %v12639_v55 = vld [vmem:[#allocation18 + $0x1f0] ss:$8 sps:$4 sm:$0xff]   ;;  %v12645_v58 = vld [vmem:[#allocation21 + $0x100] ss:$8 sps:$4 sm:$0xff]  }
 0x74c   : > { %v12642_v16 = vld [vmem:[#allocation20 + $0x1f0] ss:$8 sps:$4 sm:$0xff]   ;;  %v12650_v52 = vld [vmem:[#allocation21 + $0x114] ss:$8 sps:$4 sm:$0xff]   ;;  %v12653_v17 = vld [vmem:[#allocation21 + $0x124] ss:$8 sps:$4 sm:$0xff]  }
 0x74d   : > { %v12648_v27 = vld [vmem:[#allocation21 + $0x110] ss:$8 sps:$4 sm:$0xff]   ;;  %v12651_v11 = vld [vmem:[#allocation21 + $0x120] ss:$8 sps:$4 sm:$0xff]   ;;  %v12656_v18 = vld [vmem:[#allocation21 + $0x134] ss:$8 sps:$4 sm:$0xff]  }
 0x74e   : > { %7043 = vmatpush1.bf16.msra.mxu0 %v12573_v38  ;;  %7533 = vmatpush1.bf16.msra.mxu1 %v12576_v42  ;;  %v12654_v41 = vld [vmem:[#allocation21 + $0x130] ss:$8 sps:$4 sm:$0xff]   ;;  %v12657_v9 = vld [vmem:[#allocation21 + $0x140] ss:$8 sps:$4 sm:$0xff]   ;;  %v12665_v38 = vld [vmem:[#allocation21 + $0x164] ss:$8 sps:$4 sm:$0xff]  }
 0x74f   : > { %7044 = vmatprep.subr.bf16.mxu0 %v12581_v54  ;;  %7534 = vmatprep.subr.bf16.mxu1 %v12584_v28  ;;  %v12660_v39 = vld [vmem:[#allocation21 + $0x150] ss:$8 sps:$4 sm:$0xff]   ;;  %v12663_v42 = vld [vmem:[#allocation21 + $0x160] ss:$8 sps:$4 sm:$0xff]   ;;  %v12668_v54 = vld [vmem:[#allocation21 + $0x174] ss:$8 sps:$4 sm:$0xff]  }
 0x750   : > { %v12666_v28 = vld [vmem:[#allocation21 + $0x170] ss:$8 sps:$4 sm:$0xff]  }
 0x752   : > { %7045 = vmatpush1.bf16.msra.mxu0 %v12579_v23  ;;  %7535 = vmatpush1.bf16.msra.mxu1 %v12582_v47  ;;  %v12669_v23 = vld [vmem:[#allocation21 + $0x180] ss:$8 sps:$4 sm:$0xff]   ;;  %v12674_v47 = vld [vmem:[#allocation21 + $0x194] ss:$8 sps:$4 sm:$0xff]  }
 0x753   : > { %7046 = vmatprep.subr.bf16.mxu0 %v12587_v57  ;;  %7536 = vmatprep.subr.bf16.mxu1 %v12590_v13  ;;  %v12672_v57 = vld [vmem:[#allocation21 + $0x190] ss:$8 sps:$4 sm:$0xff]   ;;  %v12677_v13 = vld [vmem:[#allocation21 + $0x1a4] ss:$8 sps:$4 sm:$0xff]  }
 0x756   : > { %7047 = vmatpush1.bf16.msra.mxu0 %v12585_v50  ;;  %7537 = vmatpush1.bf16.msra.mxu1 %v12588_v43  ;;  %v12675_v50 = vld [vmem:[#allocation21 + $0x1a0] ss:$8 sps:$4 sm:$0xff]   ;;  %v12680_v43 = vld [vmem:[#allocation21 + $0x1b4] ss:$8 sps:$4 sm:$0xff]  }
 0x757   : > { %7048 = vmatprep.subr.bf16.mxu0 %v12593_v7  ;;  %7538 = vmatprep.subr.bf16.mxu1 %v12596_v14  ;;  %v12678_v7 = vld [vmem:[#allocation21 + $0x1b0] ss:$8 sps:$4 sm:$0xff]   ;;  %v12681_v14 = vld [vmem:[#allocation21 + $0x1c0] ss:$8 sps:$4 sm:$0xff]  }
 0x75a   : > { %7049 = vmatpush1.bf16.msra.mxu0 %v12591_v6  ;;  %7539 = vmatpush1.bf16.msra.mxu1 %v12594_v33  ;;  %v12683_v6 = vld [vmem:[#allocation21 + $0x1c4] ss:$8 sps:$4 sm:$0xff]   ;;  %v12684_v33 = vld [vmem:[#allocation21 + $0x1d0] ss:$8 sps:$4 sm:$0xff]  }
 0x75b   : > { %7050 = vmatprep.subr.bf16.mxu0 %v12599_v21  ;;  %7540 = vmatprep.subr.bf16.mxu1 %v12602_v19  ;;  %v12686_v21 = vld [vmem:[#allocation21 + $0x1d4] ss:$8 sps:$4 sm:$0xff]   ;;  %v12689_v19 = vld [vmem:[#allocation21 + $0x1e4] ss:$8 sps:$4 sm:$0xff]  }
 0x75e   : > { %7051 = vmatpush1.bf16.msra.mxu0 %v12597_v60  ;;  %7541 = vmatpush1.bf16.msra.mxu1 %v12600_v45  ;;  %v12687_v60 = vld [vmem:[#allocation21 + $0x1e0] ss:$8 sps:$4 sm:$0xff]   ;;  %v12690_v45 = vld [vmem:[#allocation21 + $0x1f0] ss:$8 sps:$4 sm:$0xff]  }
 0x75f   : > { %7052 = vmatprep.subr.bf16.mxu0 %v12605_v46  ;;  %7542 = vmatprep.subr.bf16.mxu1 %v12608_v25  ;;  %v12692_v46 = vld [vmem:[#allocation21 + $0x1f4] ss:$8 sps:$4 sm:$0xff]   ;;  %v12695_v25 = vld [vmem:[#allocation21 + $0x4] ss:$8 sps:$4 sm:$0xff]  }
 0x762   : > { %7053 = vmatpush1.bf16.msra.mxu0 %v12603_v36  ;;  %7543 = vmatpush1.bf16.msra.mxu1 %v12606_v49  ;;  %v7592_v36 = vld [vmem:[#allocation4 + $0x8] sm:$0x80] }
 0x763   : > { %7054 = vmatprep.subr.bf16.mxu0 %v12611_v40  ;;  %7544 = vmatprep.subr.bf16.mxu1 %v12614_v62  ;;  %v7593_v49 = vsel %vm14371_vm4, 0, %v7592_v36  ;;  %v7589_v40 = vld [vmem:[#allocation4] sm:$0x80] }
 0x764   : > { %7594 = vst [vmem:[#allocation4 + $0x8] sm:$0x80] %v7593_v49  ;;  %v7590_v62 = vsel %vm14371_vm4, 0, %v7589_v40 }
 0x765   : > { %7591 = vst [vmem:[#allocation4] sm:$0x80] %v7590_v62  ;;  %v12789_v62 = vld [vmem:[#allocation24 + $0x100] ss:$8 sps:$4 sm:$0xff]  }
 0x766   : > { %7055 = vmatpush1.bf16.msra.mxu0 %v12609_v44  ;;  %7545 = vmatpush1.bf16.msra.mxu1 %v12612_v4  ;;  %v7595_v44 = vld [vmem:[#allocation4 + $0x30] sm:$0x1]  ;;  %v7598_v4 = vld [vmem:[#allocation4 + $0x38] sm:$0x1] }
 0x767   : > { %7056 = vmatprep.subr.bf16.mxu0 %v12617_v48  ;;  %7546 = vmatprep.subr.bf16.mxu1 %v12620_v56  ;;  %v7596_v48 = vsel %vm14379_vm10, 0, %v7595_v44  ;;  %v7599_v56 = vsel %vm14379_vm10, 0, %v7598_v4  ;;  %v12791_v44 = vld [vmem:[#allocation24 + $0x104] ss:$8 sps:$4 sm:$0xff]  }
 0x768   : > { %7597 = vst [vmem:[#allocation4 + $0x30] sm:$0x1] %v7596_v48  ;;  %7600 = vst [vmem:[#allocation4 + $0x38] sm:$0x1] %v7599_v56  ;;  %v12702_v48 = vld [vmem:[#allocation21 + $0x30] ss:$8 sps:$4 sm:$0xff]  }
 0x76a   : > { %7057 = vmatpush1.bf16.msra.mxu0 %v12615_v30  ;;  %7547 = vmatpush1.bf16.msra.mxu1 %v12618_v20 }
 0x76b   : > { %7058 = vmatprep.subr.bf16.mxu0 %v12623_v59  ;;  %7548 = vmatprep.subr.bf16.mxu1 %v12626_v29 }
 0x76e   : > { %7059 = vmatpush1.bf16.msra.mxu0 %v12621_v8  ;;  %7549 = vmatpush1.bf16.msra.mxu1 %v12624_v24 }
 0x76f   : > { %7060 = vmatprep.subr.bf16.mxu0 %v12629_v15  ;;  %7550 = vmatprep.subr.bf16.mxu1 %v12632_v0 }
 0x772   : > { %7061 = vmatpush1.bf16.msra.mxu0 %v12627_v5  ;;  %7551 = vmatpush1.bf16.msra.mxu1 %v12630_v22 }
 0x773   : > { %7062 = vmatprep.subr.bf16.mxu0 %v12635_v35  ;;  %7552 = vmatprep.subr.bf16.mxu1 %v12638_v51 }
 0x776   : > { %7063 = vmatpush1.bf16.msra.mxu0 %v12633_v3  ;;  %7553 = vmatpush1.bf16.msra.mxu1 %v12636_v63 }
 0x777   : > { %7064 = vmatprep.subr.bf16.mxu0 %v12641_v61  ;;  %7554 = vmatprep.subr.bf16.mxu1 %v12644_v10  ;;  %v12693_v61 = vld [vmem:[#allocation21] ss:$8 sps:$4 sm:$0xff]   ;;  %v7606_v10 = vld [vmem:[#allocation4 + $0x8] sm:$0x80] }
 0x77a   : > { %7065 = vmatpush1.bf16.msra.mxu0 %v12639_v55  ;;  %7555 = vmatpush1.bf16.msra.mxu1 %v12642_v16  ;;  %v12698_v16 = vld [vmem:[#allocation21 + $0x14] ss:$8 sps:$4 sm:$0xff]  }
 0x77b   : > { %7836 = vmatprep.subr.bf16.mxu0 %v12647_v32  ;;  %8729 = vmatprep.subr.bf16.mxu1 %v12791_v44  ;;  %v12735_v44 = vld [vmem:[#allocation21 + $0xe0] ss:$8 sps:$4 sm:$0xff]  }
 0x77d   : > { %7067 = vmatmul.mubr.bf16.vlgmr.msra.gmra.mrb[48].mxu0 %v14914_v2  ;;  %7557 = vmatmul.mubr.bf16.vlgmr.msra.gmra.mrb[48].mxu1 %v14914_v2  ;;  %v12659_v2 = vld [vmem:[#allocation21 + $0x144] ss:$8 sps:$4 sm:$0xff]  }
 0x77e   : > { %7076 = vmatprep.mubr.bf16.mxu0 %v14922_v34  ;;  %7566 = vmatprep.mubr.bf16.mxu1 %v14922_v34  ;;  %v12662_v34 = vld [vmem:[#allocation21 + $0x154] ss:$8 sps:$4 sm:$0xff]  }
 0x77f   : > { %7837 = vmatpush1.bf16.msra.mxu0 %v12645_v58  ;;  %8730 = vmatpush1.bf16.msra.mxu1 %v12789_v62  ;;  %v7605_v62 = vld [vmem:[#allocation4] sm:$0x80] }
 0x780   : > { %7838 = vmatprep.subr.bf16.mxu0 %v12650_v52 }
 0x783   : > { %7839 = vmatpush1.bf16.msra.mxu0 %v12648_v27 }
 0x784   : > { %7840 = vmatprep.subr.bf16.mxu0 %v12653_v17 }
 0x785   : > { %7077 = vmatmul.mubr.bf16.gmra.mrb[52].mxu0 %v14920_v1  ;;  %7567 = vmatmul.mubr.bf16.gmra.mrb[52].mxu1 %v14920_v1  ;;  %v12671_v1 = vld [vmem:[#allocation21 + $0x184] ss:$8 sps:$4 sm:$0xff]  }
 0x787   : > { %7841 = vmatpush1.bf16.msra.mxu0 %v12651_v11 }
 0x788   : > { %7842 = vmatprep.subr.bf16.mxu0 %v12656_v18 }
 0x78b   : > { %7843 = vmatpush1.bf16.msra.mxu0 %v12654_v41 }
 0x78c   : > { %7844 = vmatprep.subr.bf16.mxu0 %v12659_v2  ;;  %v7902_v2 = vshrl.u32 %v7606_v10, 16  ;;  %v12710_v10 = vld [vmem:[#allocation21 + $0x54] ss:$8 sps:$4 sm:$0xff]  }
 0x78f   : > { %7845 = vmatpush1.bf16.msra.mxu0 %v12657_v9 }
 0x790   : > { %7846 = vmatprep.subr.bf16.mxu0 %v12662_v34 }
 0x793   : > { %7847 = vmatpush1.bf16.msra.mxu0 %v12660_v39 }
 0x794   : > { %7848 = vmatprep.subr.bf16.mxu0 %v12665_v38 }
 0x797   : > { %7849 = vmatpush1.bf16.msra.mxu0 %v12663_v42 }
 0x798   : > { %7850 = vmatprep.subr.bf16.mxu0 %v12668_v54  ;;  %v12696_v54 = vld [vmem:[#allocation21 + $0x10] ss:$8 sps:$4 sm:$0xff]  }
 0x79b   : > { %7851 = vmatpush1.bf16.msra.mxu0 %v12666_v28 }
 0x79c   : > { %7852 = vmatprep.subr.bf16.mxu0 %v12671_v1 }
 0x79f   : > { %7853 = vmatpush1.bf16.msra.mxu0 %v12669_v23 }
 0x7a0   : > { %7854 = vmatprep.subr.bf16.mxu0 %v12674_v47 }
 0x7a3   : > { %7855 = vmatpush1.bf16.msra.mxu0 %v12672_v57  ;;  %v12701_v57 = vld [vmem:[#allocation21 + $0x24] ss:$8 sps:$4 sm:$0xff]  }
 0x7a4   : > { %7856 = vmatprep.subr.bf16.mxu0 %v12677_v13 }
 0x7a7   : > { %7857 = vmatpush1.bf16.msra.mxu0 %v12675_v50 }
 0x7a8   : > { %7858 = vmatprep.subr.bf16.mxu0 %v12680_v43 }
 0x7ab   : > { %7859 = vmatpush1.bf16.msra.mxu0 %v12678_v7 }
 0x7ac   : > { %7860 = vmatprep.subr.bf16.mxu0 %v12683_v6  ;;  %v7904_v6 = vrot.slane %v7902_v2, 7  ;;  %v12806_v2 = vld [vmem:[#allocation24 + $0x154] ss:$8 sps:$4 sm:$0xff]  }
 0x7af   : > { %7861 = vmatpush1.bf16.msra.mxu0 %v12681_v14 }
 0x7b0   : > { %7862 = vmatprep.subr.bf16.mxu0 %v12686_v21  ;;  %v12699_v21 = vld [vmem:[#allocation21 + $0x20] ss:$8 sps:$4 sm:$0xff]  }
 0x7b3   : > { %7863 = vmatpush1.bf16.msra.mxu0 %v12684_v33 }
 0x7b4   : > { %7864 = vmatprep.subr.bf16.mxu0 %v12689_v19 }
 0x7b7   : > { %7865 = vmatpush1.bf16.msra.mxu0 %v12687_v60 }
 0x7b8   : > { %7866 = vmatprep.subr.bf16.mxu0 %v12692_v46 }
 0x7bb   : > { %7867 = vmatpush1.bf16.msra.mxu0 %v12690_v45  ;;  %v12704_v45 = vld [vmem:[#allocation21 + $0x34] ss:$8 sps:$4 sm:$0xff]  }
 0x7bc   : > { %8093 = vmatprep.subr.bf16.mxu0 %v12695_v25 }
 0x850   : > { %v7068_v30 = vpop.f32.mrb[48].mxu0  ;;  %v7558_v20 = vpop.f32.mrb[48].mxu1 }
 0x851   : > { %v7577_v59 = vmax.f32 %v7068_v30, %v7558_v20  ;;  %v7070_v29 = vpop.f32.mrb[49].mxu0  ;;  %v7560_v8 = vpop.f32.mrb[49].mxu1  ;;  %v12794_v30 = vld [vmem:[#allocation24 + $0x114] ss:$8 sps:$4 sm:$0xff]  }
 0x852   : > { %v7578_v24 = vmax.f32 %v7070_v29, %v7560_v8  ;;  %v7072_v15 = vpop.f32.mrb[50].mxu0  ;;  %v7562_v0 = vpop.f32.mrb[50].mxu1  ;;  %v12707_v29 = vld [vmem:[#allocation21 + $0x44] ss:$8 sps:$4 sm:$0xff]   ;;  %8731 = vmatprep.subr.bf16.mxu1 %v12794_v30 }
 0x853   : > { %v7579_v5 = vmax.f32 %v7072_v15, %v7562_v0  ;;  %v7074_v22 = vpop.f32.mrb[51].mxu0  ;;  %v7564_v35 = vpop.f32.mrb[51].mxu1  ;;  %v12743_v30 = vld [vmem:[#allocation21 + $0x204] ss:$8 sps:$4 sm:$0xff]  }
 0x854   : > { %v7580_v51 = vmax.f32 %v7074_v22, %v7564_v35  ;;  %v12792_v22 = vld [vmem:[#allocation24 + $0x110] ss:$8 sps:$4 sm:$0xff]  }
 0x855   : > { %v14938_v3 = vpack.c.bf16 %v7579_v5, %v7577_v59  ;;  %8732 = vmatpush1.bf16.msra.mxu1 %v12792_v22  ;;  %v12746_v22 = vld [vmem:[#allocation21 + $0x214] ss:$8 sps:$4 sm:$0xff]  }
 0x856   : > { %v7586_v63 = vpack.c.bf16 %v7580_v51, %v7578_v24  ;;  %v12797_v51 = vld [vmem:[#allocation24 + $0x124] ss:$8 sps:$4 sm:$0xff]  }
 0x857   : > { %v7897_v55 = vshll.u32 %v14938_v3, 16  ;;  %v7894_v41 = vshrl.u32 %v14938_v3, 16  ;;  %8733 = vmatprep.subr.bf16.mxu1 %v12797_v51 }
 0x858   : > { %v7078_v32 = vpop.f32.mrb[52].mxu0  ;;  %v7568_v58 = vpop.f32.mrb[52].mxu1  ;;  %7868 = vmatprep.mubr.bf16.mxu0 %v7586_v63  ;;  %v7906_v52 = vshrl.u32 %v7586_v63, 16  ;;  %v7909_v27 = vshll.u32 %v7586_v63, 16  ;;  %v12705_v63 = vld [vmem:[#allocation21 + $0x40] ss:$8 sps:$4 sm:$0xff]  }
 0x859   : > { %v7581_v17 = vmax.f32 %v7078_v32, %v7568_v58  ;;  %v7080_v11 = vpop.f32.mrb[53].mxu0  ;;  %v7570_v18 = vpop.f32.mrb[53].mxu1  ;;  %7869 = vmatmul.mubr.bf16.vlgmr.msra.gmra.mrb[56].mxu0 %v14938_v3  ;;  %v8190_v9 = vrot.slane %v7897_v55, 1  ;;  %v14946_v20 = vrot.slane %v7894_v41, 7  ;;  %v12800_v32 = vld [vmem:[#allocation24 + $0x134] ss:$8 sps:$4 sm:$0xff]  }
 0x85a   : > { %v7582_v34 = vmax.f32 %v7080_v11, %v7570_v18  ;;  %v7082_v39 = vpop.f32.mrb[54].mxu0  ;;  %v7572_v38 = vpop.f32.mrb[54].mxu1  ;;  %v7908_v42 = vrot.slane %v7906_v52, 7  ;;  %8094 = vmatpush1.bf16.msra.mxu0 %v12693_v61  ;;  %v8202_v28 = vrot.slane %v7909_v27, 1  ;;  %v12708_v58 = vld [vmem:[#allocation21 + $0x50] ss:$8 sps:$4 sm:$0xff]  }
 0x85b   : > { %v7583_v1 = vmax.f32 %v7082_v39, %v7572_v38  ;;  %v7084_v23 = vpop.f32.mrb[55].mxu0  ;;  %v7574_v47 = vpop.f32.mrb[55].mxu1  ;;  %8095 = vmatprep.subr.bf16.mxu0 %v12698_v16  ;;  %v8191_v13 = vor.u32 %v8190_v9, %v7894_v41  ;;  %v12795_v16 = vld [vmem:[#allocation24 + $0x120] ss:$8 sps:$4 sm:$0xff]   ;;  %v12716_v18 = vld [vmem:[#allocation21 + $0x74] ss:$8 sps:$4 sm:$0xff]  }
 0x85c   : > { %v7584_v50 = vmax.f32 %v7084_v23, %v7574_v47  ;;  %v8203_v43 = vor.u32 %v8202_v28, %v7906_v52  ;;  %v7911_v14 = vor.u32 %v7909_v27, %v7908_v42  ;;  %v12713_v52 = vld [vmem:[#allocation21 + $0x64] ss:$8 sps:$4 sm:$0xff]   ;;  %8734 = vmatpush1.bf16.msra.mxu1 %v12795_v16  ;;  %v12798_v27 = vld [vmem:[#allocation24 + $0x130] ss:$8 sps:$4 sm:$0xff]   ;;  %v12711_v11 = vld [vmem:[#allocation21 + $0x60] ss:$8 sps:$4 sm:$0xff]  }
 0x85d   : > { %v7587_v7 = vpack.c.bf16 %v7583_v1, %v7581_v17  ;;  %8735 = vmatprep.subr.bf16.mxu1 %v12800_v32  ;;  %v12803_v17 = vld [vmem:[#allocation24 + $0x144] ss:$8 sps:$4 sm:$0xff]   ;;  %v12801_v41 = vld [vmem:[#allocation24 + $0x140] ss:$8 sps:$4 sm:$0xff]   ;;  %v12804_v39 = vld [vmem:[#allocation24 + $0x150] ss:$8 sps:$4 sm:$0xff]  }
 0x85e   : > { %v7588_v33 = vpack.c.bf16 %v7584_v50, %v7582_v34  ;;  %8096 = vmatpush1.bf16.msra.mxu0 %v12696_v54  ;;  %v7912_v49 = vsel %vm884_vm8, %v7904_v6, %v7911_v14  ;;  %v12714_v9 = vld [vmem:[#allocation21 + $0x70] ss:$8 sps:$4 sm:$0xff]   ;;  %v12719_v34 = vld [vmem:[#allocation21 + $0x84] ss:$8 sps:$4 sm:$0xff]   ;;  %v12722_v54 = vld [vmem:[#allocation21 + $0x94] ss:$8 sps:$4 sm:$0xff]  }
 0x85f   : > { %8097 = vmatprep.subr.bf16.mxu0 %v12701_v57  ;;  %v7914_v19 = vshrl.u32 %v7587_v7, 16  ;;  %v7917_v60 = vshll.u32 %v7587_v7, 16  ;;  %v12809_v38 = vld [vmem:[#allocation24 + $0x164] ss:$8 sps:$4 sm:$0xff]   ;;  %v12807_v28 = vld [vmem:[#allocation24 + $0x160] ss:$8 sps:$4 sm:$0xff]  }
 0x860   : > { %7878 = vmatprep.mubr.bf16.mxu0 %v7588_v33  ;;  %v7922_v46 = vshrl.u32 %v7588_v33, 16  ;;  %v7925_v25 = vshll.u32 %v7588_v33, 16  ;;  %8736 = vmatpush1.bf16.msra.mxu1 %v12798_v27  ;;  %v12812_v1 = vld [vmem:[#allocation24 + $0x174] ss:$8 sps:$4 sm:$0xff]   ;;  %v12725_v47 = vld [vmem:[#allocation21 + $0xa4] ss:$8 sps:$4 sm:$0xff]  }
 0x861   : > { %7879 = vmatmul.mubr.bf16.gmra.mrb[60].mxu0 %v7587_v7  ;;  %v7916_v36 = vrot.slane %v7914_v19, 7  ;;  %v8195_v40 = vrot.slane %v7917_v60, 1  ;;  %8737 = vmatprep.subr.bf16.mxu1 %v12803_v17  ;;  %v12720_v23 = vld [vmem:[#allocation21 + $0x90] ss:$8 sps:$4 sm:$0xff]   ;;  %v12723_v50 = vld [vmem:[#allocation21 + $0xa0] ss:$8 sps:$4 sm:$0xff]  }
 0x862   : > { %v7924_v4 = vrot.slane %v7922_v46, 7  ;;  %8098 = vmatpush1.bf16.msra.mxu0 %v12699_v21  ;;  %8125 = vmatprep.mubr.bf16.mxu0 %v7912_v49  ;;  %v8207_v56 = vrot.slane %v7925_v25, 1  ;;  %v12810_v57 = vld [vmem:[#allocation24 + $0x170] ss:$8 sps:$4 sm:$0xff]   ;;  %v12813_v7 = vld [vmem:[#allocation24 + $0x180] ss:$8 sps:$4 sm:$0xff]  }
 0x863   : > { %v7919_v59 = vor.u32 %v7917_v60, %v7916_v36  ;;  %8099 = vmatprep.subr.bf16.mxu0 %v12704_v45  ;;  %v14949_v8 = vsel %vm1996_vm12, %v8191_v13, %v8195_v40  ;;  %v14951_v24 = vor.u32 %v8195_v40, %v7914_v19  ;;  %v12815_v13 = vld [vmem:[#allocation24 + $0x184] ss:$8 sps:$4 sm:$0xff]   ;;  %v12818_v14 = vld [vmem:[#allocation24 + $0x194] ss:$8 sps:$4 sm:$0xff]   ;;  %v12816_v21 = vld [vmem:[#allocation24 + $0x190] ss:$8 sps:$4 sm:$0xff]  }
 0x864   : > { %v7927_v15 = vor.u32 %v7925_v25, %v7924_v4  ;;  %v14954_v0 = vsel %vm1996_vm12, %v8203_v43, %v8207_v56  ;;  %v14956_v5 = vor.u32 %v8207_v56, %v7922_v46  ;;  %8738 = vmatpush1.bf16.msra.mxu1 %v12801_v41  ;;  %v12728_v43 = vld [vmem:[#allocation21 + $0xb4] ss:$8 sps:$4 sm:$0xff]   ;;  %v12726_v6 = vld [vmem:[#allocation21 + $0xb0] ss:$8 sps:$4 sm:$0xff]   ;;  %v12731_v33 = vld [vmem:[#allocation21 + $0xc4] ss:$8 sps:$4 sm:$0xff]  }
 0x865   : > { %v14960_v35 = vsel %vm884_vm8, %v14946_v20, %v7919_v59  ;;  %8739 = vmatprep.subr.bf16.mxu1 %v12806_v2  ;;  %v12821_v19 = vld [vmem:[#allocation24 + $0x1a4] ss:$8 sps:$4 sm:$0xff]   ;;  %v12734_v45 = vld [vmem:[#allocation21 + $0xd4] ss:$8 sps:$4 sm:$0xff]   ;;  %v12819_v46 = vld [vmem:[#allocation24 + $0x1a0] ss:$8 sps:$4 sm:$0xff]   ;;  %v7899_v59 = vor.u32 %v7897_v55, %v14946_v20 }
 0x866   : > { %8100 = vmatpush1.bf16.msra.mxu0 %v12702_v48  ;;  %v14963_v61 = vsel %vm884_vm8, %v7908_v42, %v7927_v15  ;;  %v12717_v42 = vld [vmem:[#allocation21 + $0x80] ss:$8 sps:$4 sm:$0xff]   ;;  %v12732_v36 = vld [vmem:[#allocation21 + $0xd0] ss:$8 sps:$4 sm:$0xff]   ;;  %v12737_v49 = vld [vmem:[#allocation21 + $0xe4] ss:$8 sps:$4 sm:$0xff]  }
 0x867   : > { %8101 = vmatprep.subr.bf16.mxu0 %v12707_v29  ;;  %v12729_v60 = vld [vmem:[#allocation21 + $0xc0] ss:$8 sps:$4 sm:$0xff]   ;;  %v12822_v40 = vld [vmem:[#allocation24 + $0x1b0] ss:$8 sps:$4 sm:$0xff]   ;;  %v7890_v48 = vshrl.u32 %v7605_v62, 16 }
 0x868   : > { %8740 = vmatpush1.bf16.msra.mxu1 %v12804_v39  ;;  %v12824_v25 = vld [vmem:[#allocation24 + $0x1b4] ss:$8 sps:$4 sm:$0xff]   ;;  %v12755_v55 = vld [vmem:[#allocation21 + $0x244] ss:$8 sps:$4 sm:$0xff]  }
 0x869   : > { %8741 = vmatprep.subr.bf16.mxu1 %v12809_v38  ;;  %v12740_v4 = vld [vmem:[#allocation21 + $0xf4] ss:$8 sps:$4 sm:$0xff]   ;;  %v12738_v56 = vld [vmem:[#allocation21 + $0xf0] ss:$8 sps:$4 sm:$0xff]   ;;  %v7892_v29 = vrot.slane %v7890_v48, 7 }
 0x86a   : > { %8102 = vmatpush1.bf16.msra.mxu0 %v12705_v63  ;;  %v12741_v15 = vld [vmem:[#allocation21 + $0x200] ss:$8 sps:$4 sm:$0xff]   ;;  %v12744_v63 = vld [vmem:[#allocation21 + $0x210] ss:$8 sps:$4 sm:$0xff]   ;;  %v12752_v32 = vld [vmem:[#allocation21 + $0x234] ss:$8 sps:$4 sm:$0xff]  }
 0x86b   : > { %8103 = vmatprep.subr.bf16.mxu0 %v12710_v10  ;;  %v7900_v51 = vsel %vm884_vm8, %v7892_v29, %v7899_v59  ;;  %v12749_v10 = vld [vmem:[#allocation21 + $0x224] ss:$8 sps:$4 sm:$0xff]   ;;  %v12747_v16 = vld [vmem:[#allocation21 + $0x220] ss:$8 sps:$4 sm:$0xff]   ;;  %v12750_v3 = vld [vmem:[#allocation21 + $0x230] ss:$8 sps:$4 sm:$0xff]  }
 0x86c   : > { %8742 = vmatpush1.bf16.msra.mxu1 %v12807_v28  ;;  %v12753_v20 = vld [vmem:[#allocation21 + $0x240] ss:$8 sps:$4 sm:$0xff]   ;;  %v12764_v17 = vld [vmem:[#allocation21 + $0x274] ss:$8 sps:$4 sm:$0xff]   ;;  %v12768_v41 = vld [vmem:[#allocation21 + $0x290] ss:$8 sps:$4 sm:$0xff]  }
 0x86d   : > { %8743 = vmatprep.subr.bf16.mxu1 %v12812_v1  ;;  %v12759_v27 = vld [vmem:[#allocation21 + $0x260] ss:$8 sps:$4 sm:$0xff]   ;;  %v12773_v2 = vld [vmem:[#allocation21 + $0x2a4] ss:$8 sps:$4 sm:$0xff]   ;;  %v12774_v39 = vld [vmem:[#allocation21 + $0x2b0] ss:$8 sps:$4 sm:$0xff]  }
 0x86e   : > { %8104 = vmatpush1.bf16.msra.mxu0 %v12708_v58  ;;  %v12756_v58 = vld [vmem:[#allocation21 + $0x250] ss:$8 sps:$4 sm:$0xff]   ;;  %v12779_v38 = vld [vmem:[#allocation21 + $0x2c4] ss:$8 sps:$4 sm:$0xff]   ;;  %v8482_v62 = vld [vmem:[#allocation5] sm:$0x80] }
 0x86f   : > { %8105 = vmatprep.subr.bf16.mxu0 %v12713_v52  ;;  %v12761_v52 = vld [vmem:[#allocation21 + $0x264] ss:$8 sps:$4 sm:$0xff]   ;;  %v12780_v28 = vld [vmem:[#allocation21 + $0x2d0] ss:$8 sps:$4 sm:$0xff]   ;;  %v8450_v59 = vld [vmem:[#allocation23] sm:$0x3] }
 0x870   : > { %8744 = vmatpush1.bf16.msra.mxu1 %v12810_v57  ;;  %v12785_v1 = vld [vmem:[#allocation21 + $0x2e4] ss:$8 sps:$4 sm:$0xff]   ;;  %v12788_v57 = vld [vmem:[#allocation21 + $0x2f4] ss:$8 sps:$4 sm:$0xff]   ;;  %v8491_v48 = vld [vmem:[#allocation5 + $0x38] sm:$0x1]  ;;  %v8455_v29 = vrot.slane %v8450_v59, %v14558_v53 }
 0x871   : > { %8745 = vmatprep.subr.bf16.mxu1 %v12815_v13 }
 0x872   : > { %8106 = vmatpush1.bf16.msra.mxu0 %v12711_v11  ;;  %v12767_v11 = vld [vmem:[#allocation21 + $0x284] ss:$8 sps:$4 sm:$0xff]  }
 0x873   : > { %8107 = vmatprep.subr.bf16.mxu0 %v12716_v18  ;;  %v12770_v18 = vld [vmem:[#allocation21 + $0x294] ss:$8 sps:$4 sm:$0xff]  }
 0x874   : > { %8746 = vmatpush1.bf16.msra.mxu1 %v12813_v7  ;;  %v8150_v7 = vld [vmem:[#allocation4 + $0x30] sm:$0x1] }
 0x875   : > { %8747 = vmatprep.subr.bf16.mxu1 %v12818_v14  ;;  %v8213_v14 = vshll.u32 %v8150_v7, 16  ;;  %v12845_v7 = vld [vmem:[#allocation24 + $0x24] ss:$8 sps:$4 sm:$0xff]  }
 0x876   : > { %8108 = vmatpush1.bf16.msra.mxu0 %v12714_v9  ;;  %v12771_v9 = vld [vmem:[#allocation21 + $0x2a0] ss:$8 sps:$4 sm:$0xff]  }
 0x877   : > { %8109 = vmatprep.subr.bf16.mxu0 %v12719_v34  ;;  %v12776_v34 = vld [vmem:[#allocation21 + $0x2b4] ss:$8 sps:$4 sm:$0xff]  }
 0x878   : > { %8748 = vmatpush1.bf16.msra.mxu1 %v12816_v21 }
 0x879   : > { %8749 = vmatprep.subr.bf16.mxu1 %v12821_v19  ;;  %v12825_v19 = vld [vmem:[#allocation24 + $0x1c0] ss:$8 sps:$4 sm:$0xff]  }
 0x87a   : > { %8110 = vmatpush1.bf16.msra.mxu0 %v12717_v42  ;;  %v12777_v42 = vld [vmem:[#allocation21 + $0x2c0] ss:$8 sps:$4 sm:$0xff]  }
 0x87b   : > { %8111 = vmatprep.subr.bf16.mxu0 %v12722_v54  ;;  %v12782_v54 = vld [vmem:[#allocation21 + $0x2d4] ss:$8 sps:$4 sm:$0xff]  }
 0x87c   : > { %8750 = vmatpush1.bf16.msra.mxu1 %v12819_v46  ;;  %v12828_v46 = vld [vmem:[#allocation24 + $0x1d0] ss:$8 sps:$4 sm:$0xff]  }
 0x87d   : > { %8751 = vmatprep.subr.bf16.mxu1 %v12824_v25  ;;  %v12833_v25 = vld [vmem:[#allocation24 + $0x1e4] ss:$8 sps:$4 sm:$0xff]  }
 0x87e   : > { %8112 = vmatpush1.bf16.msra.mxu0 %v12720_v23  ;;  %v12783_v23 = vld [vmem:[#allocation21 + $0x2e0] ss:$8 sps:$4 sm:$0xff]  }
 0x87f   : > { %8113 = vmatprep.subr.bf16.mxu0 %v12725_v47  ;;  %v8151_v47 = vld [vmem:[#allocation4 + $0x38] sm:$0x1] }
 0x880   : > { %8752 = vmatpush1.bf16.msra.mxu1 %v12822_v40  ;;  %v8221_v13 = vshll.u32 %v8151_v47, 16 }
 0x882   : > { %8114 = vmatpush1.bf16.msra.mxu0 %v12723_v50  ;;  %v12786_v50 = vld [vmem:[#allocation21 + $0x2f0] ss:$8 sps:$4 sm:$0xff]  }
 0x883   : > { %8115 = vmatprep.subr.bf16.mxu0 %v12728_v43  ;;  %v8223_v43 = vrot.slane %v8221_v13, 1 }
 0x886   : > { %8116 = vmatpush1.bf16.msra.mxu0 %v12726_v6  ;;  %v8224_v6 = vsel %vm1996_vm12, %v14956_v5, %v8223_v43  ;;  %v12834_v5 = vld [vmem:[#allocation24 + $0x1f0] ss:$8 sps:$4 sm:$0xff]  }
 0x887   : > { %8117 = vmatprep.subr.bf16.mxu0 %v12731_v33  ;;  %v8215_v33 = vrot.slane %v8213_v14, 1 }
 0x889   : > { %v8216_v21 = vsel %vm1996_vm12, %v14951_v24, %v8215_v33  ;;  %v8485_v24 = vld [vmem:[#allocation5 + $0x8] sm:$0x80] }
 0x88a   : > { %8118 = vmatpush1.bf16.msra.mxu0 %v12729_v60  ;;  %v12827_v60 = vld [vmem:[#allocation24 + $0x1c4] ss:$8 sps:$4 sm:$0xff]   ;;  %v8486_v40 = vsel %vm14371_vm4, 0, %v8485_v24 }
 0x88b   : > { %8119 = vmatprep.subr.bf16.mxu0 %v12734_v45  ;;  %v12830_v45 = vld [vmem:[#allocation24 + $0x1d4] ss:$8 sps:$4 sm:$0xff]   ;;  %8753 = vmatprep.subr.bf16.mxu1 %v12827_v60  ;;  %8487 = vst [vmem:[#allocation5 + $0x8] sm:$0x80] %v8486_v40 }
 0x88c   : > { %8754 = vmatpush1.bf16.msra.mxu1 %v12825_v19 }
 0x88d   : > { %8755 = vmatprep.subr.bf16.mxu1 %v12830_v45 }
 0x88e   : > { %8120 = vmatpush1.bf16.msra.mxu0 %v12732_v36  ;;  %v12836_v36 = vld [vmem:[#allocation24 + $0x1f4] ss:$8 sps:$4 sm:$0xff]  }
 0x88f   : > { %8121 = vmatprep.subr.bf16.mxu0 %v12737_v49  ;;  %v12839_v49 = vld [vmem:[#allocation24 + $0x4] ss:$8 sps:$4 sm:$0xff]  }
 0x890   : > { %8756 = vmatpush1.bf16.msra.mxu1 %v12828_v46 }
 0x891   : > { %8757 = vmatprep.subr.bf16.mxu1 %v12833_v25 }
 0x892   : > { %8122 = vmatpush1.bf16.msra.mxu0 %v12735_v44  ;;  %v8483_v44 = vsel %vm14371_vm4, 0, %v8482_v62 }
 0x893   : > { %8123 = vmatprep.subr.bf16.mxu0 %v12740_v4  ;;  %8484 = vst [vmem:[#allocation5] sm:$0x80] %v8483_v44  ;;  %v8488_v4 = vld [vmem:[#allocation5 + $0x30] sm:$0x1] }
 0x896   : > { %8124 = vmatpush1.bf16.msra.mxu0 %v12738_v56  ;;  %v8489_v56 = vsel %vm14379_vm10, 0, %v8488_v4 }
 0x897   : > { %8389 = vmatprep.subr.bf16.mxu0 %v12743_v30  ;;  %v8492_v30 = vsel %vm14379_vm10, 0, %v8491_v48  ;;  %8490 = vst [vmem:[#allocation5 + $0x30] sm:$0x1] %v8489_v56  ;;  %v12846_v48 = vld [vmem:[#allocation24 + $0x30] ss:$8 sps:$4 sm:$0xff]  }
 0x898   : > { %8493 = vst [vmem:[#allocation5 + $0x38] sm:$0x1] %v8492_v30 }
 0x899   : > { %8126 = vmatmul.mubr.bf16.vlgmr.msra.gmra.mrb[56].mxu0 %v7900_v51 }
 0x89a   : > { %8135 = vmatprep.mubr.bf16.mxu0 %v14963_v61  ;;  %8390 = vmatpush1.bf16.msra.mxu0 %v12741_v15  ;;  %v12758_v61 = vld [vmem:[#allocation21 + $0x254] ss:$8 sps:$4 sm:$0xff]   ;;  %v8459_v15 = vrot.slane %v8450_v59, %v14562_v26 }
 0x89b   : > { %8391 = vmatprep.subr.bf16.mxu0 %v12746_v22 }
 0x89e   : > { %8392 = vmatpush1.bf16.msra.mxu0 %v12744_v63 }
 0x89f   : > { %8393 = vmatprep.subr.bf16.mxu0 %v12749_v10 }
 0x8a1   : > { %8136 = vmatmul.mubr.bf16.gmra.mrb[60].mxu0 %v14960_v35  ;;  %v12762_v35 = vld [vmem:[#allocation21 + $0x270] ss:$8 sps:$4 sm:$0xff]  }
 0x8a2   : > { %8394 = vmatpush1.bf16.msra.mxu0 %v12747_v16  ;;  %8421 = vmatprep.mubr.bf16.mxu0 %v14954_v0  ;;  %v12765_v0 = vld [vmem:[#allocation21 + $0x280] ss:$8 sps:$4 sm:$0xff]  }
 0x8a3   : > { %8395 = vmatprep.subr.bf16.mxu0 %v12752_v32 }
 0x8a6   : > { %8396 = vmatpush1.bf16.msra.mxu0 %v12750_v3 }
 0x8a7   : > { %8397 = vmatprep.subr.bf16.mxu0 %v12755_v55 }
 0x8aa   : > { %8398 = vmatpush1.bf16.msra.mxu0 %v12753_v20 }
 0x8ab   : > { %8399 = vmatprep.subr.bf16.mxu0 %v12758_v61 }
 0x8ae   : > { %8400 = vmatpush1.bf16.msra.mxu0 %v12756_v58 }
 0x8af   : > { %8401 = vmatprep.subr.bf16.mxu0 %v12761_v52 }
 0x8b2   : > { %8402 = vmatpush1.bf16.msra.mxu0 %v12759_v27 }
 0x8b3   : > { %8403 = vmatprep.subr.bf16.mxu0 %v12764_v17  ;;  %v12837_v17 = vld [vmem:[#allocation24] ss:$8 sps:$4 sm:$0xff]  }
 0x8b6   : > { %8404 = vmatpush1.bf16.msra.mxu0 %v12762_v35  ;;  %v8499_v35 = vld [vmem:[#allocation5 + $0x8] sm:$0x80] }
 0x8b7   : > { %8405 = vmatprep.subr.bf16.mxu0 %v12767_v11 }
 0x8ba   : > { %8406 = vmatpush1.bf16.msra.mxu0 %v12765_v0 }
 0x8bb   : > { %8407 = vmatprep.subr.bf16.mxu0 %v12770_v18 }
 0x8be   : > { %8408 = vmatpush1.bf16.msra.mxu0 %v12768_v41  ;;  %v12842_v41 = vld [vmem:[#allocation24 + $0x14] ss:$8 sps:$4 sm:$0xff]  }
 0x8bf   : > { %8409 = vmatprep.subr.bf16.mxu0 %v12773_v2 }
 0x8c2   : > { %8410 = vmatpush1.bf16.msra.mxu0 %v12771_v9 }
 0x8c3   : > { %8411 = vmatprep.subr.bf16.mxu0 %v12776_v34 }
 0x8c6   : > { %8412 = vmatpush1.bf16.msra.mxu0 %v12774_v39 }
 0x8c7   : > { %8413 = vmatprep.subr.bf16.mxu0 %v12779_v38 }
 0x8ca   : > { %8414 = vmatpush1.bf16.msra.mxu0 %v12777_v42 }
 0x8cb   : > { %8415 = vmatprep.subr.bf16.mxu0 %v12782_v54 }
 0x8ce   : > { %8416 = vmatpush1.bf16.msra.mxu0 %v12780_v28  ;;  %v8795_v28 = vshrl.u32 %v8499_v35, 16  ;;  %v12866_v35 = vld [vmem:[#allocation24 + $0x94] ss:$8 sps:$4 sm:$0xff]  }
 0x8cf   : > { %8417 = vmatprep.subr.bf16.mxu0 %v12785_v1 }
 0x8d0   : > { %v8797_v45 = vrot.slane %v8795_v28, 7  ;;  %v8498_v28 = vld [vmem:[#allocation5] sm:$0x80] }
 0x8d2   : > { %8418 = vmatpush1.bf16.msra.mxu0 %v12783_v23 }
 0x8d3   : > { %8419 = vmatprep.subr.bf16.mxu0 %v12788_v57  ;;  %v12840_v57 = vld [vmem:[#allocation24 + $0x10] ss:$8 sps:$4 sm:$0xff]  }
 0x8d6   : > { %8420 = vmatpush1.bf16.msra.mxu0 %v12786_v50 }
 0x8d9   : > { %8422 = vmatmul.mubr.bf16.vlgmr.msra.gmra.mrb[56].mxu0 %v14949_v8  ;;  %v12831_v8 = vld [vmem:[#allocation24 + $0x1e0] ss:$8 sps:$4 sm:$0xff]  }
 0x8da   : > { %8431 = vmatprep.mubr.bf16.mxu0 %v8224_v6  ;;  %8758 = vmatpush1.bf16.msra.mxu1 %v12831_v8  ;;  %v12843_v8 = vld [vmem:[#allocation24 + $0x20] ss:$8 sps:$4 sm:$0xff]  }
 0x8db   : > { %8759 = vmatprep.subr.bf16.mxu1 %v12836_v36 }
 0x8de   : > { %8760 = vmatpush1.bf16.msra.mxu1 %v12834_v5  ;;  %v12848_v5 = vld [vmem:[#allocation24 + $0x34] ss:$8 sps:$4 sm:$0xff]  }
 0x8df   : > { %8986 = vmatprep.subr.bf16.mxu1 %v12839_v49 }
 0x8e1   : > { %8432 = vmatmul.mubr.bf16.gmra.mrb[60].mxu0 %v8216_v21 }
 0x8e2   : > { %9418 = vmatprep.mubr.bf16.mxu0 %v13634_v12 }
 0x9ac   : > { %v8423_v22 = vpop.f32.mrb[56].mxu0 }
 0x9ad   : > { %v8462_v51 = vadd.f32 %v8455_v29, %v8423_v22  ;;  %v8425_v31 = vpop.f32.mrb[57].mxu0 }
 0x9ae   : > { %v8463_v63 = vadd.f32 %v8459_v15, %v8425_v31  ;;  %v8427_v10 = vpop.f32.mrb[58].mxu0 }
 0x9af   : > { %v8464_v16 = vadd.f32 %v8455_v29, %v8427_v10  ;;  %v8429_v32 = vpop.f32.mrb[59].mxu0  ;;  %v8470_v55 = vmax.f32 %v8462_v51, 0.0 }
 0x9b0   : > { %v8465_v3 = vadd.f32 %v8459_v15, %v8429_v32  ;;  %v8471_v61 = vmax.f32 %v8463_v63, 0.0 }
 0x9b1   : > { %v8472_v20 = vmax.f32 %v8464_v16, 0.0  ;;  %v12849_v16 = vld [vmem:[#allocation24 + $0x40] ss:$8 sps:$4 sm:$0xff]  }
 0x9b2   : > { %v8473_v37 = vmax.f32 %v8465_v3, 0.0  ;;  %v12854_v3 = vld [vmem:[#allocation24 + $0x54] ss:$8 sps:$4 sm:$0xff]  }
 0x9b3   : > { %v14988_v58 = vpack.c.bf16 %v8472_v20, %v8470_v55  ;;  %v12852_v55 = vld [vmem:[#allocation24 + $0x50] ss:$8 sps:$4 sm:$0xff]   ;;  %v12857_v20 = vld [vmem:[#allocation24 + $0x64] ss:$8 sps:$4 sm:$0xff]  }
 0x9b4   : > { %v8479_v52 = vpack.c.bf16 %v8473_v37, %v8471_v61  ;;  %v8433_v27 = vpop.f32.mrb[60].mxu0  ;;  %v12855_v61 = vld [vmem:[#allocation24 + $0x60] ss:$8 sps:$4 sm:$0xff]   ;;  %v12860_v37 = vld [vmem:[#allocation24 + $0x74] ss:$8 sps:$4 sm:$0xff]  }
 0x9b5   : > { %v8466_v11 = vadd.f32 %v8455_v29, %v8433_v27  ;;  %v8435_v0 = vpop.f32.mrb[61].mxu0  ;;  %v8790_v18 = vshll.u32 %v14988_v58, 16  ;;  %v8787_v54 = vshrl.u32 %v14988_v58, 16  ;;  %v12863_v27 = vld [vmem:[#allocation24 + $0x84] ss:$8 sps:$4 sm:$0xff]  }
 0x9b6   : > { %v8467_v2 = vadd.f32 %v8459_v15, %v8435_v0  ;;  %v8437_v9 = vpop.f32.mrb[62].mxu0  ;;  %8761 = vmatprep.mubr.bf16.mxu1 %v8479_v52  ;;  %v8799_v34 = vshrl.u32 %v8479_v52, 16  ;;  %v8802_v39 = vshll.u32 %v8479_v52, 16  ;;  %v12858_v52 = vld [vmem:[#allocation24 + $0x70] ss:$8 sps:$4 sm:$0xff]  }
 0x9b7   : > { %v8468_v38 = vadd.f32 %v8455_v29, %v8437_v9  ;;  %v8439_v42 = vpop.f32.mrb[63].mxu0  ;;  %8762 = vmatmul.mubr.bf16.vlgmr.msra.gmra.mrb[56].mxu1 %v14988_v58  ;;  %v9083_v1 = vrot.slane %v8790_v18, 1  ;;  %v8474_v50 = vmax.f32 %v8466_v11, 0.0  ;;  %v8789_v30 = vrot.slane %v8787_v54, 7  ;;  %v12851_v29 = vld [vmem:[#allocation24 + $0x44] ss:$8 sps:$4 sm:$0xff]  }
 0x9b8   : > { %v8469_v23 = vadd.f32 %v8459_v15, %v8439_v42  ;;  %v8801_v47 = vrot.slane %v8799_v34, 7  ;;  %8987 = vmatpush1.bf16.msra.mxu1 %v12837_v17  ;;  %v9095_v13 = vrot.slane %v8802_v39, 1  ;;  %v8475_v6 = vmax.f32 %v8467_v2, 0.0  ;;  %v12861_v17 = vld [vmem:[#allocation24 + $0x80] ss:$8 sps:$4 sm:$0xff]  }
 0x9b9   : > { %v8476_v43 = vmax.f32 %v8468_v38, 0.0  ;;  %8988 = vmatprep.subr.bf16.mxu1 %v12842_v41  ;;  %v9084_v14 = vor.u32 %v9083_v1, %v8787_v54  ;;  %v12864_v11 = vld [vmem:[#allocation24 + $0x90] ss:$8 sps:$4 sm:$0xff]   ;;  %v12869_v0 = vld [vmem:[#allocation24 + $0xa4] ss:$8 sps:$4 sm:$0xff]  }
 0x9ba   : > { %v8477_v33 = vmax.f32 %v8469_v23, 0.0  ;;  %v9096_v21 = vor.u32 %v9095_v13, %v8799_v34  ;;  %v8804_v60 = vor.u32 %v8802_v39, %v8801_v47  ;;  %v12867_v41 = vld [vmem:[#allocation24 + $0xa0] ss:$8 sps:$4 sm:$0xff]   ;;  %v12872_v2 = vld [vmem:[#allocation24 + $0xb4] ss:$8 sps:$4 sm:$0xff]  }
 0x9bb   : > { %v8480_v19 = vpack.c.bf16 %v8476_v43, %v8474_v50  ;;  %v12870_v9 = vld [vmem:[#allocation24 + $0xb0] ss:$8 sps:$4 sm:$0xff]   ;;  %v12875_v34 = vld [vmem:[#allocation24 + $0xc4] ss:$8 sps:$4 sm:$0xff]   ;;  %v12873_v39 = vld [vmem:[#allocation24 + $0xc0] ss:$8 sps:$4 sm:$0xff]   ;;  %v8792_v50 = vor.u32 %v8790_v18, %v8789_v30 }
 0x9bc   : > { %v8481_v46 = vpack.c.bf16 %v8477_v33, %v8475_v6  ;;  %8989 = vmatpush1.bf16.msra.mxu1 %v12840_v57  ;;  %v8805_v62 = vsel %vm884_vm8, %v8797_v45, %v8804_v60  ;;  %v12878_v38 = vld [vmem:[#allocation24 + $0xd4] ss:$8 sps:$4 sm:$0xff]   ;;  %v12876_v42 = vld [vmem:[#allocation24 + $0xd0] ss:$8 sps:$4 sm:$0xff]   ;;  %v12881_v54 = vld [vmem:[#allocation24 + $0xe4] ss:$8 sps:$4 sm:$0xff]  }
 0x9bd   : > { %8990 = vmatprep.subr.bf16.mxu1 %v12845_v7  ;;  %v8807_v25 = vshrl.u32 %v8480_v19, 16  ;;  %v8810_v36 = vshll.u32 %v8480_v19, 16  ;;  %v12879_v1 = vld [vmem:[#allocation24 + $0xe0] ss:$8 sps:$4 sm:$0xff]   ;;  %v12884_v23 = vld [vmem:[#allocation24 + $0xf4] ss:$8 sps:$4 sm:$0xff]  }
 0x9be   : > { %8771 = vmatprep.mubr.bf16.mxu1 %v8481_v46  ;;  %v8815_v49 = vshrl.u32 %v8481_v46, 16  ;;  %v8818_v24 = vshll.u32 %v8481_v46, 16  ;;  %v12882_v57 = vld [vmem:[#allocation24 + $0xf0] ss:$8 sps:$4 sm:$0xff]   ;;  %v12887_v13 = vld [vmem:[#allocation24 + $0x204] ss:$8 sps:$4 sm:$0xff]  }
 0x9bf   : > { %8772 = vmatmul.mubr.bf16.gmra.mrb[60].mxu1 %v8480_v19  ;;  %v8809_v40 = vrot.slane %v8807_v25, 7  ;;  %v9088_v44 = vrot.slane %v8810_v36, 1  ;;  %v12885_v7 = vld [vmem:[#allocation24 + $0x200] ss:$8 sps:$4 sm:$0xff]   ;;  %v12888_v33 = vld [vmem:[#allocation24 + $0x210] ss:$8 sps:$4 sm:$0xff]  }
 0x9c0   : > { %v8817_v4 = vrot.slane %v8815_v49, 7  ;;  %8991 = vmatpush1.bf16.msra.mxu1 %v12843_v8  ;;  %9018 = vmatprep.mubr.bf16.mxu1 %v8805_v62  ;;  %v9100_v56 = vrot.slane %v8818_v24, 1  ;;  %v12891_v19 = vld [vmem:[#allocation24 + $0x220] ss:$8 sps:$4 sm:$0xff]   ;;  %v12896_v60 = vld [vmem:[#allocation24 + $0x234] ss:$8 sps:$4 sm:$0xff]  }
 0x9c1   : > { %v8812_v59 = vor.u32 %v8810_v36, %v8809_v40  ;;  %8992 = vmatprep.subr.bf16.mxu1 %v12848_v5  ;;  %v14997_v15 = vsel %vm1996_vm12, %v9084_v14, %v9088_v44  ;;  %v14999_v22 = vor.u32 %v9088_v44, %v8807_v25  ;;  %v12890_v14 = vld [vmem:[#allocation24 + $0x214] ss:$8 sps:$4 sm:$0xff]   ;;  %v12894_v58 = vld [vmem:[#allocation24 + $0x230] ss:$8 sps:$4 sm:$0xff]   ;;  %v12899_v18 = vld [vmem:[#allocation24 + $0x244] ss:$8 sps:$4 sm:$0xff]  }
 0x9c2   : > { %v8820_v51 = vor.u32 %v8818_v24, %v8817_v4  ;;  %v15002_v31 = vsel %vm1996_vm12, %v9096_v21, %v9100_v56  ;;  %v15004_v63 = vor.u32 %v9100_v56, %v8815_v49  ;;  %v12893_v21 = vld [vmem:[#allocation24 + $0x224] ss:$8 sps:$4 sm:$0xff]   ;;  %v12897_v45 = vld [vmem:[#allocation24 + $0x240] ss:$8 sps:$4 sm:$0xff]   ;;  %v12902_v46 = vld [vmem:[#allocation24 + $0x254] ss:$8 sps:$4 sm:$0xff]  }
 0x9c3   : > { %v15007_v10 = vsel %vm884_vm8, %v8789_v30, %v8812_v59  ;;  %v12900_v8 = vld [vmem:[#allocation24 + $0x250] ss:$8 sps:$4 sm:$0xff]   ;;  %v12905_v25 = vld [vmem:[#allocation24 + $0x264] ss:$8 sps:$4 sm:$0xff]   ;;  %v12903_v36 = vld [vmem:[#allocation24 + $0x260] ss:$8 sps:$4 sm:$0xff]  }
 0x9c4   : > { %8993 = vmatpush1.bf16.msra.mxu1 %v12846_v48  ;;  %v8821_v32 = vsel %vm884_vm8, %v8801_v47, %v8820_v51  ;;  %v8783_v47 = vshrl.u32 %v8498_v28, 16  ;;  %v12908_v5 = vld [vmem:[#allocation24 + $0x274] ss:$8 sps:$4 sm:$0xff]   ;;  %v12906_v49 = vld [vmem:[#allocation24 + $0x270] ss:$8 sps:$4 sm:$0xff]  }
 0x9c5   : > { %8994 = vmatprep.subr.bf16.mxu1 %v12851_v29  ;;  %v12911_v24 = vld [vmem:[#allocation24 + $0x284] ss:$8 sps:$4 sm:$0xff]   ;;  %v12909_v40 = vld [vmem:[#allocation24 + $0x280] ss:$8 sps:$4 sm:$0xff]   ;;  %v12914_v62 = vld [vmem:[#allocation24 + $0x294] ss:$8 sps:$4 sm:$0xff]  }
 0x9c6   : > { %v8785_v43 = vrot.slane %v8783_v47, 7  ;;  %v12912_v44 = vld [vmem:[#allocation24 + $0x290] ss:$8 sps:$4 sm:$0xff]   ;;  %v12917_v4 = vld [vmem:[#allocation24 + $0x2a4] ss:$8 sps:$4 sm:$0xff]  }
 0x9c7   : > { %v12915_v48 = vld [vmem:[#allocation24 + $0x2a0] ss:$8 sps:$4 sm:$0xff]   ;;  %v12920_v56 = vld [vmem:[#allocation24 + $0x2b4] ss:$8 sps:$4 sm:$0xff]   ;;  %v12918_v30 = vld [vmem:[#allocation24 + $0x2b0] ss:$8 sps:$4 sm:$0xff]  }
 0x9c8   : > { %8995 = vmatpush1.bf16.msra.mxu1 %v12849_v16  ;;  %v8793_v6 = vsel %vm884_vm8, %v8785_v43, %v8792_v50  ;;  %v12923_v59 = vld [vmem:[#allocation24 + $0x2c4] ss:$8 sps:$4 sm:$0xff]   ;;  %v12921_v29 = vld [vmem:[#allocation24 + $0x2c0] ss:$8 sps:$4 sm:$0xff]   ;;  %v12926_v51 = vld [vmem:[#allocation24 + $0x2d4] ss:$8 sps:$4 sm:$0xff]  }
 0x9c9   : > { %8996 = vmatprep.subr.bf16.mxu1 %v12854_v3  ;;  %v12927_v16 = vld [vmem:[#allocation24 + $0x2e0] ss:$8 sps:$4 sm:$0xff]   ;;  %v12932_v3 = vld [vmem:[#allocation24 + $0x2f4] ss:$8 sps:$4 sm:$0xff]  }
 0x9cc   : > { %8997 = vmatpush1.bf16.msra.mxu1 %v12852_v55 }
 0x9cd   : > { %8998 = vmatprep.subr.bf16.mxu1 %v12857_v20  ;;  %v12930_v20 = vld [vmem:[#allocation24 + $0x2f0] ss:$8 sps:$4 sm:$0xff]  }
 0x9d0   : > { %8999 = vmatpush1.bf16.msra.mxu1 %v12855_v61 }
 0x9d1   : > { %9000 = vmatprep.subr.bf16.mxu1 %v12860_v37  ;;  %v9043_v37 = vld [vmem:[#allocation5 + $0x30] sm:$0x1] }
 0x9d4   : > { %9001 = vmatpush1.bf16.msra.mxu1 %v12858_v52  ;;  %v9106_v52 = vshll.u32 %v9043_v37, 16  ;;  %v12961_v37 = vld [vmem:[#allocation30 + $0x30] sm:$0xff]  }
 0x9d5   : > { %9002 = vmatprep.subr.bf16.mxu1 %v12863_v27 }
 0x9d8   : > { %9003 = vmatpush1.bf16.msra.mxu1 %v12861_v17  ;;  %v9108_v17 = vrot.slane %v9106_v52, 1  ;;  %v12962_v52 = vld [vmem:[#allocation32 + $0x30] sm:$0xff]  }
 0x9d9   : > { %9004 = vmatprep.subr.bf16.mxu1 %v12866_v35 }
 0x9da   : > { %v9109_v35 = vsel %vm1996_vm12, %v14999_v22, %v9108_v17  ;;  %v12964_v17 = vld [vmem:[#allocation32 + $0x78] sm:$0xff]  }
 0x9dc   : > { %9005 = vmatpush1.bf16.msra.mxu1 %v12864_v11  ;;  %v9343_v11 = vld [vmem:[#allocation26] sm:$0x3] }
 0x9dd   : > { %9006 = vmatprep.subr.bf16.mxu1 %v12869_v0  ;;  %v9348_v0 = vrot.slane %v9343_v11, %v14558_v53 }
 0x9e0   : > { %9007 = vmatpush1.bf16.msra.mxu1 %v12867_v41  ;;  %v9352_v41 = vrot.slane %v9343_v11, %v14562_v26  ;;  %v12966_v11 = vld [vmem:[#allocation32 + $0x38] sm:$0xff]  }
 0x9e1   : > { %9008 = vmatprep.subr.bf16.mxu1 %v12872_v2 }
 0x9e4   : > { %9009 = vmatpush1.bf16.msra.mxu1 %v12870_v9 }
 0x9e5   : > { %9010 = vmatprep.subr.bf16.mxu1 %v12875_v34 }
 0x9e8   : > { %9011 = vmatpush1.bf16.msra.mxu1 %v12873_v39 }
 0x9e9   : > { %9012 = vmatprep.subr.bf16.mxu1 %v12878_v38 }
 0x9ec   : > { %9013 = vmatpush1.bf16.msra.mxu1 %v12876_v42 }
 0x9ed   : > { %9014 = vmatprep.subr.bf16.mxu1 %v12881_v54 }
 0x9f0   : > { %9015 = vmatpush1.bf16.msra.mxu1 %v12879_v1 }
 0x9f1   : > { %9016 = vmatprep.subr.bf16.mxu1 %v12884_v23 }
 0x9f4   : > { %9017 = vmatpush1.bf16.msra.mxu1 %v12882_v57 }
 0x9f5   : > { %9282 = vmatprep.subr.bf16.mxu1 %v12887_v13 }
 0x9f7   : > { %9019 = vmatmul.mubr.bf16.vlgmr.msra.gmra.mrb[56].mxu1 %v8793_v6 }
 0x9f8   : > { %9028 = vmatprep.mubr.bf16.mxu1 %v8821_v32  ;;  %9283 = vmatpush1.bf16.msra.mxu1 %v12885_v7  ;;  %v9044_v32 = vld [vmem:[#allocation5 + $0x38] sm:$0x1] }
 0x9f9   : > { %9284 = vmatprep.subr.bf16.mxu1 %v12890_v14  ;;  %v9114_v55 = vshll.u32 %v9044_v32, 16  ;;  %v12956_v32 = vld [vmem:[#allocation32 + $0x68] sm:$0xff]  }
 0x9fb   : > { %v9116_v61 = vrot.slane %v9114_v55, 1  ;;  %v12958_v55 = vld [vmem:[#allocation32 + $0x28] sm:$0xff]  }
 0x9fc   : > { %9285 = vmatpush1.bf16.msra.mxu1 %v12888_v33 }
 0x9fd   : > { %9286 = vmatprep.subr.bf16.mxu1 %v12893_v21  ;;  %v9117_v27 = vsel %vm1996_vm12, %v15004_v63, %v9116_v61  ;;  %v12960_v61 = vld [vmem:[#allocation32 + $0x70] sm:$0xff]  }
 0x9ff   : > { %9029 = vmatmul.mubr.bf16.gmra.mrb[60].mxu1 %v15007_v10  ;;  %v12929_v10 = vld [vmem:[#allocation24 + $0x2e4] ss:$8 sps:$4 sm:$0xff]  }
 0xa00   : > { %9287 = vmatpush1.bf16.msra.mxu1 %v12891_v19  ;;  %9314 = vmatprep.mubr.bf16.mxu1 %v15002_v31  ;;  %v12924_v31 = vld [vmem:[#allocation24 + $0x2d0] ss:$8 sps:$4 sm:$0xff]  }
 0xa01   : > { %9288 = vmatprep.subr.bf16.mxu1 %v12896_v60 }
 0xa04   : > { %9289 = vmatpush1.bf16.msra.mxu1 %v12894_v58  ;;  %v12935_v58 = vld [vmem:[#allocation30 + $0x40] sm:$0xff]  }
 0xa05   : > { %9290 = vmatprep.subr.bf16.mxu1 %v12899_v18  ;;  %v12936_v18 = vld [vmem:[#allocation32 + $0x40] sm:$0xff]  }
 0xa08   : > { %9291 = vmatpush1.bf16.msra.mxu1 %v12897_v45  ;;  %v12933_v45 = vld [vmem:[#allocation27] sm:$0xff]  }
 0xa09   : > { %9292 = vmatprep.subr.bf16.mxu1 %v12902_v46  ;;  %v12934_v46 = vld [vmem:[#allocation29] sm:$0xff]  }
 0xa0c   : > { %9293 = vmatpush1.bf16.msra.mxu1 %v12900_v8  ;;  %v12937_v8 = vld [vmem:[#allocation30] sm:$0xff]  }
 0xa0d   : > { %9294 = vmatprep.subr.bf16.mxu1 %v12905_v25  ;;  %v12938_v25 = vld [vmem:[#allocation32] sm:$0xff]  }
 0xa10   : > { %9295 = vmatpush1.bf16.msra.mxu1 %v12903_v36  ;;  %v12939_v36 = vld [vmem:[#allocation30 + $0x48] sm:$0xff]  }
 0xa11   : > { %9296 = vmatprep.subr.bf16.mxu1 %v12908_v5  ;;  %v12940_v5 = vld [vmem:[#allocation32 + $0x48] sm:$0xff]  }
 0xa14   : > { %9297 = vmatpush1.bf16.msra.mxu1 %v12906_v49  ;;  %v12941_v49 = vld [vmem:[#allocation30 + $0x8] sm:$0xff]  }
 0xa15   : > { %9298 = vmatprep.subr.bf16.mxu1 %v12911_v24  ;;  %v12942_v24 = vld [vmem:[#allocation32 + $0x8] sm:$0xff]  }
 0xa18   : > { %9299 = vmatpush1.bf16.msra.mxu1 %v12909_v40  ;;  %v12943_v40 = vld [vmem:[#allocation30 + $0x50] sm:$0xff]  }
 0xa19   : > { %9300 = vmatprep.subr.bf16.mxu1 %v12914_v62  ;;  %v12944_v62 = vld [vmem:[#allocation32 + $0x50] sm:$0xff]  }
 0xa1c   : > { %9301 = vmatpush1.bf16.msra.mxu1 %v12912_v44  ;;  %v12945_v44 = vld [vmem:[#allocation30 + $0x10] sm:$0xff]  }
 0xa1d   : > { %9302 = vmatprep.subr.bf16.mxu1 %v12917_v4  ;;  %v12946_v4 = vld [vmem:[#allocation32 + $0x10] sm:$0xff]  }
 0xa20   : > { %9303 = vmatpush1.bf16.msra.mxu1 %v12915_v48  ;;  %v12947_v48 = vld [vmem:[#allocation30 + $0x58] sm:$0xff]  }
 0xa21   : > { %9304 = vmatprep.subr.bf16.mxu1 %v12920_v56  ;;  %v12948_v56 = vld [vmem:[#allocation32 + $0x58] sm:$0xff]  }
 0xa24   : > { %9305 = vmatpush1.bf16.msra.mxu1 %v12918_v30  ;;  %v12949_v30 = vld [vmem:[#allocation30 + $0x18] sm:$0xff]  }
 0xa25   : > { %9306 = vmatprep.subr.bf16.mxu1 %v12923_v59  ;;  %v12950_v59 = vld [vmem:[#allocation32 + $0x18] sm:$0xff]  }
 0xa28   : > { %9307 = vmatpush1.bf16.msra.mxu1 %v12921_v29  ;;  %v12951_v29 = vld [vmem:[#allocation30 + $0x60] sm:$0xff]  }
 0xa29   : > { %9308 = vmatprep.subr.bf16.mxu1 %v12926_v51  ;;  %v12952_v51 = vld [vmem:[#allocation32 + $0x60] sm:$0xff]  }
 0xa2c   : > { %9309 = vmatpush1.bf16.msra.mxu1 %v12924_v31  ;;  %v12953_v31 = vld [vmem:[#allocation30 + $0x20] sm:$0xff]  }
 0xa2d   : > { %9310 = vmatprep.subr.bf16.mxu1 %v12929_v10  ;;  %v12954_v10 = vld [vmem:[#allocation32 + $0x20] sm:$0xff]  }
 0xa30   : > { %9311 = vmatpush1.bf16.msra.mxu1 %v12927_v16  ;;  %v12955_v16 = vld [vmem:[#allocation30 + $0x68] sm:$0xff]  }
 0xa31   : > { %9312 = vmatprep.subr.bf16.mxu1 %v12932_v3  ;;  %v12957_v3 = vld [vmem:[#allocation30 + $0x28] sm:$0xff]  }
 0xa34   : > { %9313 = vmatpush1.bf16.msra.mxu1 %v12930_v20  ;;  %v12959_v20 = vld [vmem:[#allocation30 + $0x70] sm:$0xff]  }
 0xa37   : > { %9315 = vmatmul.mubr.bf16.vlgmr.msra.gmra.mrb[56].mxu1 %v14997_v15 }
 0xa38   : > { %9324 = vmatprep.mubr.bf16.mxu1 %v9117_v27  ;;  %v12963_v27 = vld [vmem:[#allocation30 + $0x78] sm:$0xff]  }
 0xa3f   : > { %9325 = vmatmul.mubr.bf16.gmra.mrb[60].mxu1 %v9109_v35  ;;  %v12965_v35 = vld [vmem:[#allocation30 + $0x38] sm:$0xff]  }
 0xa40   : > { %9471 = vmatprep.mubr.bf16.mxu1 %v13634_v12 }
 0xb0a   : > { %v9316_v2 = vpop.f32.mrb[56].mxu1 }
 0xb0b   : > { %v9355_v9 = vadd.f32 %v9348_v0, %v9316_v2  ;;  %v9318_v34 = vpop.f32.mrb[57].mxu1 }
 0xb0c   : > { %v9356_v15 = vadd.f32 %v9352_v41, %v9318_v34  ;;  %v9320_v39 = vpop.f32.mrb[58].mxu1 }
 0xb0d   : > { %v9357_v38 = vadd.f32 %v9348_v0, %v9320_v39  ;;  %v9322_v63 = vpop.f32.mrb[59].mxu1  ;;  %v9363_v54 = vmax.f32 %v9355_v9, 0.0 }
 0xb0e   : > { %v9358_v42 = vadd.f32 %v9352_v41, %v9322_v63  ;;  %v9364_v1 = vmax.f32 %v9356_v15, 0.0 }
 0xb0f   : > { %v9365_v28 = vmax.f32 %v9357_v38, 0.0 }
 0xb10   : > { %v9366_v22 = vmax.f32 %v9358_v42, 0.0 }
 0xb11   : > { %v9371_v23 = vpack.c.bf16 %v9365_v28, %v9363_v54 }
 0xb12   : > { %v9372_v47 = vpack.c.bf16 %v9366_v22, %v9364_v1  ;;  %v9326_v12 = vpop.f32.mrb[60].mxu1 }
 0xb13   : > { %v9359_v57 = vadd.f32 %v9348_v0, %v9326_v12  ;;  %v9328_v13 = vpop.f32.mrb[61].mxu1 }
 0xb14   : > { %v9360_v53 = vadd.f32 %v9352_v41, %v9328_v13  ;;  %v9330_v50 = vpop.f32.mrb[62].mxu1  ;;  %9386 = vmatprep.subr.bf16.mxu0 %v9372_v47  ;;  %9439 = vmatprep.subr.bf16.mxu1 %v9372_v47 }
 0xb15   : > { %v9361_v26 = vadd.f32 %v9348_v0, %v9330_v50  ;;  %v9332_v43 = vpop.f32.mrb[63].mxu1  ;;  %9387 = vmatpush1.bf16.msra.mxu0 %v9371_v23  ;;  %9440 = vmatpush1.bf16.msra.mxu1 %v9371_v23  ;;  %v9367_v14 = vmax.f32 %v9359_v57, 0.0 }
 0xb16   : > { %v9362_v7 = vadd.f32 %v9352_v41, %v9332_v43  ;;  %v9368_v33 = vmax.f32 %v9360_v53, 0.0 }
 0xb17   : > { %v9369_v6 = vmax.f32 %v9361_v26, 0.0 }
 0xb18   : > { %v9370_v21 = vmax.f32 %v9362_v7, 0.0 }
 0xb19   : > { %v9373_v19 = vpack.c.bf16 %v9369_v6, %v9367_v14  ;;  %v9828_v6 = vld [vmem:[#allocation33] sm:$0xff] }
 0xb1a   : > { %v9374_v60 = vpack.c.bf16 %v9370_v21, %v9368_v33  ;;  %v9842_v33 = vld [vmem:[#allocation33 + $0x10] sm:$0xff]  ;;  %v9856_v21 = vld [vmem:[#allocation33 + $0x20] sm:$0xff] }
 0xb1c   : > { %9388 = vmatprep.subr.bf16.mxu0 %v9374_v60  ;;  %9441 = vmatprep.subr.bf16.mxu1 %v9374_v60 }
 0xb1d   : > { %9389 = vmatpush1.bf16.msra.mxu0 %v9373_v19  ;;  %9442 = vmatpush1.bf16.msra.mxu1 %v9373_v19 }
 0xb1e   : > { %11107 = vmatprep.subr.bf16.mxu0 %v12935_v58  ;;  %11129 = vmatprep.subr.bf16.mxu1 %v12936_v18  ;;  %v9829_v58 = vld [vmem:[#allocation33 + $0x8] sm:$0xff]  ;;  %v9843_v18 = vld [vmem:[#allocation33 + $0x18] sm:$0xff] }
 0xb20   : > { %11069 = vmatmul.mubr.msk.bf16.vlgmr.msra.gmra.mrb[64].mxu0 %vm9382_vm13, %v12933_v45  ;;  %11071 = vmatmul.mubr.msk.bf16.vlgmr.msra.gmra.mrb[64].mxu1 %vm9382_vm13, %v12934_v46  ;;  %v9857_v45 = vld [vmem:[#allocation33 + $0x28] sm:$0xff] }
 0xb21   : > { %11108 = vmatpush3.bf16.msra.mxu0 %v12937_v8  ;;  %11130 = vmatpush3.bf16.msra.mxu1 %v12938_v25 }
 0xb22   : > { %11109 = vmatprep.subr.bf16.mxu0 %v12939_v36  ;;  %11131 = vmatprep.subr.bf16.mxu1 %v12940_v5 }
 0xb25   : > { %11110 = vmatpush3.bf16.msra.mxu0 %v12941_v49  ;;  %11132 = vmatpush3.bf16.msra.mxu1 %v12942_v24 }
 0xb26   : > { %11111 = vmatprep.subr.bf16.mxu0 %v12943_v40  ;;  %11133 = vmatprep.subr.bf16.mxu1 %v12944_v62 }
 0xb29   : > { %11112 = vmatpush3.bf16.msra.mxu0 %v12945_v44  ;;  %11134 = vmatpush3.bf16.msra.mxu1 %v12946_v4 }
 0xb2a   : > { %11113 = vmatprep.subr.bf16.mxu0 %v12947_v48  ;;  %11135 = vmatprep.subr.bf16.mxu1 %v12948_v56 }
 0xb2d   : > { %11114 = vmatpush3.bf16.msra.mxu0 %v12949_v30  ;;  %11136 = vmatpush3.bf16.msra.mxu1 %v12950_v59 }
 0xb2e   : > { %11115 = vmatprep.subr.bf16.mxu0 %v12951_v29  ;;  %11137 = vmatprep.subr.bf16.mxu1 %v12952_v51 }
 0xb31   : > { %11116 = vmatpush3.bf16.msra.mxu0 %v12953_v31  ;;  %11138 = vmatpush3.bf16.msra.mxu1 %v12954_v10 }
 0xb32   : > { %11117 = vmatprep.subr.bf16.mxu0 %v12955_v16  ;;  %11139 = vmatprep.subr.bf16.mxu1 %v12956_v32 }
 0xb35   : > { %11118 = vmatpush3.bf16.msra.mxu0 %v12957_v3  ;;  %11140 = vmatpush3.bf16.msra.mxu1 %v12958_v55 }
 0xb36   : > { %11119 = vmatprep.subr.bf16.mxu0 %v12959_v20  ;;  %11141 = vmatprep.subr.bf16.mxu1 %v12960_v61 }
 0xb39   : > { %11120 = vmatpush3.bf16.msra.mxu0 %v12961_v37  ;;  %11142 = vmatpush3.bf16.msra.mxu1 %v12962_v52 }
 0xb3a   : > { %11121 = vmatprep.subr.bf16.mxu0 %v12963_v27  ;;  %11143 = vmatprep.subr.bf16.mxu1 %v12964_v17 }
 0xb3d   : > { %11122 = vmatpush3.bf16.msra.mxu0 %v12965_v35  ;;  %11144 = vmatpush3.bf16.msra.mxu1 %v12966_v11  ;;  %v9873_v11 = vld [vmem:[#allocation35] sm:$0x1] }
 0xbf3   : > { %v9420_v0 = vpop.f32.mrb[64].mxu0  ;;  %v9473_v41 = vpop.f32.mrb[64].mxu1 }
 0xbf4   : > { %v9482_v2 = vmax.f32 %v9420_v0, %v9473_v41  ;;  %v9422_v9 = vpop.f32.mrb[65].mxu0  ;;  %v9475_v34 = vpop.f32.mrb[65].mxu1 }
 0xbf5   : > { %v9483_v15 = vmax.f32 %v9422_v9, %v9475_v34  ;;  %v9424_v39 = vpop.f32.mrb[66].mxu0  ;;  %v9477_v38 = vpop.f32.mrb[66].mxu1 }
 0xbf6   : > { %v9484_v63 = vmax.f32 %v9424_v39, %v9477_v38  ;;  %v9426_v42 = vpop.f32.mrb[67].mxu0  ;;  %v9479_v54 = vpop.f32.mrb[67].mxu1 }
 0xbf7   : > { %v9485_v28 = vmax.f32 %v9426_v42, %v9479_v54 }
 0xbf8   : > { %v9486_v1 = vpack.c.bf16 %v9484_v63, %v9482_v2 }
 0xbf9   : > { %v9487_v22 = vpack.c.bf16 %v9485_v28, %v9483_v15 }
 0xbfb   : > { %9648 = vmatprep.mubr.bf16.mxu0 %v9487_v22  ;;  %9817 = vmatprep.mubr.bf16.mxu1 %v9487_v22 }
 0xbfc   : > { %9649 = vmatmul.mubr.bf16.vlgmr.msra.gmra.mrb[68].mxu0 %v9486_v1  ;;  %9818 = vmatmul.mubr.bf16.vlgmr.msra.gmra.mrb[68].mxu1 %v9486_v1 }
 0xccf   : > { %v11123_v23 = vpop.f32.mrb[68].mxu0  ;;  %v11145_v47 = vpop.f32.mrb[68].mxu1 }
 0xcd0   : > { %v11124_v12 = vpop.f32.mrb[69].mxu0  ;;  %v11146_v57 = vpop.f32.mrb[69].mxu1 }
 0xcd1   : > { %v11125_v13 = vadd.f32 %v11124_v12, %v11123_v23  ;;  %v11147_v53 = vadd.f32 %v11146_v57, %v11145_v47  ;;  %v11126_v50 = vpop.f32.mrb[70].mxu0  ;;  %v11148_v26 = vpop.f32.mrb[70].mxu1 }
 0xcd2   : > { %v11127_v43 = vpop.f32.mrb[71].mxu0  ;;  %v11149_v7 = vpop.f32.mrb[71].mxu1 }
 0xcd3   : > { %v9826_v14 = vmax.f32 %v11125_v13, %v11147_v53  ;;  %v11128_v19 = vadd.f32 %v11127_v43, %v11126_v50  ;;  %v11150_v60 = vadd.f32 %v11149_v7, %v11148_v26 }
 0xcd5   : > { %v9827_v46 = vmax.f32 %v11128_v19, %v11150_v60  ;;  %v9830_v8 = vmul.f32 %v9828_v6, %v9826_v14  ;;  %v9844_v25 = vmul.f32 %v9842_v33, %v9826_v14  ;;  %v9858_v36 = vmul.f32 %v9856_v21, %v9826_v14 }
 0xcd7   : > { %v9831_v5 = vmul.f32 %v9829_v58, %v9827_v46  ;;  %v9845_v49 = vmul.f32 %v9843_v18, %v9827_v46  ;;  %v9859_v24 = vmul.f32 %v9857_v45, %v9827_v46 }
 0xcd9   : > { %v9846_v40 = vadd.f32 %v9845_v49, %v9844_v25  ;;  %v9832_v62 = vadd.f32 %v9831_v5, %v9830_v8  ;;  %v9860_v44 = vadd.f32 %v9859_v24, %v9858_v36 }
 0xcdb   : > { %v9847_v4 = vrot.slane %v9846_v40, 4  ;;  %v9833_v48 = vrot.slane %v9832_v62, 4  ;;  %v9861_v56 = vrot.slane %v9860_v44, 4 }
 0xcdd   : > { %v9848_v30 = vadd.f32 %v9847_v4, %v9846_v40  ;;  %v9834_v59 = vadd.f32 %v9833_v48, %v9832_v62  ;;  %v9862_v29 = vadd.f32 %v9861_v56, %v9860_v44 }
 0xcdf   : > { %v9849_v51 = vrot.slane %v9848_v30, 2  ;;  %v9835_v31 = vrot.slane %v9834_v59, 2  ;;  %v9863_v10 = vrot.slane %v9862_v29, 2 }
 0xce1   : > { %v9850_v16 = vadd.f32 %v9849_v51, %v9848_v30  ;;  %v9836_v32 = vadd.f32 %v9835_v31, %v9834_v59  ;;  %v9864_v3 = vadd.f32 %v9863_v10, %v9862_v29 }
 0xce3   : > { %v9851_v55 = vrot.slane %v9850_v16, 1  ;;  %v9837_v20 = vrot.slane %v9836_v32, 1  ;;  %v9865_v52 = vrot.slane %v9864_v3, 1 }
 0xce5   : > { %v9852_v61 = vadd.f32 %v9851_v55, %v9850_v16  ;;  %v9838_v37 = vadd.f32 %v9837_v20, %v9836_v32  ;;  %v9866_v27 = vadd.f32 %v9865_v52, %v9864_v3 }
 0xce7   : > { %9853 = vadd.xlane.f32.xlu1 %v9852_v61  ;;  %9839 = vadd.xlane.f32.xlu0 %v9838_v37 }
 0xceb   : > { %9867 = vadd.xlane.f32.xlu0 %v9866_v27 }
 0xd74   : > { %v9840_v17 = vpop.xlane.xlu0 %9839  ;;  %v9854_v35 = vpop.xlane.xlu1 %9853 }
 0xd75   : > { %v9870_v0 = vsel %vm9869_vm14, %v9840_v17, %v9854_v35 }
 0xd78   : > { %v9868_v41 = vpop.xlane.xlu0 %9867 }
 0xd79   : > { %v9872_v2 = vsel %vm9871_vm15, %v9870_v0, %v9868_v41 }
 0xd7a   : > { %v9874_v9 = vadd.f32 %v9873_v11, %v9872_v2 }
 0xd7c   : > { %9876 = vst.msk [vmem:[%s870_s2] sm:$0x1] %vm9875_vm0, %v9874_v9 }
 0xd7d   : > { %13517 = shalt.err (!%p13514_p0)
}
 0xd7e   : > { %s13518_s24 = scalar_lea.hbm %s15028_s3, 16  ;;  %s13522_s25 = scalar_lea.hbm %s15199_s6, 32 }
 0xd7f   : > { %p13519_p2 = scmp.ne.s32.totalorder %s15028_s3, %s13518_s24  ;;  %p13523_p10 = scmp.lt.u32.totalorder %s15028_s3, %s15199_s6 }
 0xd80   : > { %p13524_p11 = scmp.lt.u32.totalorder %s13522_s25, %s13518_s24  ;;  %p13526_p6 = scmp.lt.u32.totalorder %s13518_s24, %s15028_s3 }
 0xd81   : > { %p13520_p8 = pnand %p13519_p2, %p15200_p7 }
 0xd82   : > { %p13525_p3 = por %p13524_p11, %p13523_p10 }
 0xd83   : > { %p13521_p4 = pneg %p13520_p8 }
 0xd84   : > { %p13527_p5 = por %p13526_p6, %p13525_p3 }
 0xd86   : > { %p13528_p9 = pnand %p13527_p5, %p13521_p4 }
 0xd88   : > { %13531 = shalt.err (!%p13528_p9)
}
 0xd89   : > { %11500 = dma.vmem_to_hbm [thread:$0]  (%p15200_p7), %s15030_s4, 16, %s15028_s3, %s9878_s8  }
 0xd8a PF: > { %s15201_s0 = sld [smem:[#allocation48_spill]]  ;;  %s15202_s22 = sld [smem:[#allocation51_spill]] }
 0xd8b   : > { %p15203_p12 = scmp.ne.s32.totalorder %s15170_s20, 0 }
 0xd90   : > { %s9902_s7 = sand.u32 1, %s15201_s0   ;;  %p15204_p1 = scmp.ge.s32.totalorder %s15202_s22, 2 }
 0xd91   : > { %s9903_s9 = scalar_lea.sflag [#allocation8], %s9902_s7 }
 0xd92   : > { %p11562_p13 = pnand %p15204_p1, %p15203_p12 }
 0xd94   : > { %13589 = dma.done.wait (!%p11562_p13), %s9903_s9, 16  }
 0xd95   : > { %13591 = vsyncadd (!%p11562_p13), %s9903_s9, 4294967280  ;;  %s15205_s0 = sld [smem:[#allocation49_spill]]  ;;  %s15206_s30 = sld [smem:[#allocation50_spill]] }
 0xd96   : > { %p41_p0 = scmp.ge.s32.totalorder %s14211_s21, 4   ;;  %s15207_s20 = smov %s14222_s14 }
 0xd98   :  { %43 = sbr.rel (!%p41_p0) target bundleno = 29 (0x1d), region = 225 }
 0xd9f   :  { %9907 = vsyncpa [#allocation7], 1 }
 0xda0   :  { %9909 = vsyncpa [#allocation7 + $0x1], 1 }
 0xda1   :  { %9910 = vsyncpa [#allocation10], 1 }
 0xda2   :  { %9911 = vsyncpa [#allocation13], 1 }
 0xda3   :  { %9912 = vsyncpa [#allocation16], 1 }
 0xda4   :  { %9913 = vsyncpa [#allocation19], 1 }
 0xda5   :  { %9914 = vsyncpa [#allocation22], 1 }
 0xda6   :  { %9915 = vsyncpa [#allocation25], 1 }
 0xda7   :  { %9916 = vsyncpa [#allocation28], 1 }
 0xda8   :  { %9917 = vsyncpa [#allocation31], 1 }
 0xda9   :  { %9918 = vsyncpa [#allocation34], 1 }
 0xdaa   :  { %9919 = vsyncpa [#allocation8], 1 }
 0xdab   :  { %9921 = vsyncpa [#allocation8 + $0x1], 1 }

</bundles_post_ra>
